<compile_context>
chip_gen: v6e
topology: v6e:2x2x1
jax: 0.10.0
libtpu: 0.0.40
codegen_flags: <defaults>
</compile_context>

<pallas_src>
import functools

import jax
import jax.numpy as jnp
from jax.experimental import pallas as pl
from jax.experimental.pallas import tpu as pltpu

EPS = 1e-5


# ---------------------------------------------------------------------------
# Fused decoder kernel: all five SAGE stages with A resident in VMEM.
# ---------------------------------------------------------------------------
def _fused_decoder_kernel(a_ref, invdeg_ref, x_ref,
                          w0_ref, b0_ref,
                          w1a_ref, g1a_ref, be1a_ref,
                          w1b_ref, g1b_ref, be1b_ref,
                          w2ac_ref, g2ac_ref, be2ac_ref,
                          w2b_ref, g2b_ref, be2b_ref,
                          out_ref, *, cout):
    a = a_ref[...]               # (N, N) bf16, exact 0/1 entries
    inv_deg = invdeg_ref[...]    # (N, 1) f32, 1 / max(in_degree, 1)

    def sage(feat_bf16, w_ref):
        """mean-aggr SAGEConv: (1/deg) * (A @ feat) @ Wl + feat @ Wr  (f32 acc)."""
        cx = feat_bf16.shape[1]
        aggr = jnp.dot(a, feat_bf16, preferred_element_type=jnp.float32) * inv_deg
        h = jnp.dot(aggr.astype(jnp.bfloat16), w_ref[pl.ds(0, cx), :],
                    preferred_element_type=jnp.float32)
        h = h + jnp.dot(feat_bf16, w_ref[pl.ds(cx, cx), :],
                        preferred_element_type=jnp.float32)
        return h

    def bn(h, g_ref, be_ref):
        # Training-mode BatchNorm over the node axis (biased variance).
        m = jnp.mean(h, axis=0, keepdims=True)
        v = jnp.mean(jnp.square(h - m), axis=0, keepdims=True)
        return g_ref[...] * (h - m) * jax.lax.rsqrt(v + EPS) + be_ref[...]

    relu = lambda t: jnp.maximum(t, 0.0)

    # decoder.conv (in -> hidden) + bias; decoder.drop = identity (eval).
    x0 = sage(x_ref[...], w0_ref) + b0_ref[...]

    # layer1 (hidden -> hidden): identity residual.
    h1 = relu(bn(sage(x0.astype(jnp.bfloat16), w1a_ref), g1a_ref, be1a_ref))
    x1 = relu(bn(sage(h1.astype(jnp.bfloat16), w1b_ref), g1b_ref, be1b_ref) + x0)

    # layer2 (hidden -> out): conv1 and conv3 share aggr(x1) and are fused into
    # one lane-dense (N, 2*cout) slab; BN is per-column so the fused BN is exact.
    slab = bn(sage(x1.astype(jnp.bfloat16), w2ac_ref), g2ac_ref, be2ac_ref)
    h3 = relu(slab[:, :cout])        # relu(BN(conv1(x1)))
    res = slab[:, cout:]             # BN(conv3(x1))   (projection residual)

    h4 = bn(sage(h3.astype(jnp.bfloat16), w2b_ref), g2b_ref, be2b_ref)
    h4 = relu(h4 + res)
    out_ref[...] = (1.0 / (1.0 + jnp.exp(-h4))).astype(out_ref.dtype)


# ---------------------------------------------------------------------------
# Wrapper: generation-aware VMEM budget + single pallas_call.
# ---------------------------------------------------------------------------
def _vmem_budget_bytes():
    cap = 64 * 1024 * 1024  # conservative fallback (v7x per-TC physical VMEM)
    try:
        info = pltpu.get_tpu_info()
        cap = int(getattr(info, "vmem_capacity_bytes", cap))
    except Exception:
        pass
    # Leave headroom for the compiler; never ask for more than ~100 MiB.
    return min(int(cap * 3 // 4), 100 * 1024 * 1024)


def _fused_vmem_estimate_bytes(n, cin, hid, cout):
    a_bytes = n * n * 2                                   # resident bf16 A
    io_bytes = n * cin * 2 + n * cout * 4                 # x (bf16) + out (f32)
    live_f32 = 8 * n * max(hid, 2 * cout) * 4             # upper bound on temps
    w_bytes = 2 * (2 * cin * hid + 4 * hid * hid
                   + 2 * hid * 2 * cout + 2 * cout * cout)
    return a_bytes + io_bytes + live_f32 + w_bytes


def graphsage_decoder(x_bf16, a_bf16, inv_deg, q, *, cout):
    n, cin = x_bf16.shape
    hid = q["w1a"].shape[1]

    budget = _vmem_budget_bytes()
    need = _fused_vmem_estimate_bytes(n, cin, hid, cout)
    if need > budget:
        # TODO(synk): streamed (K-blocked) multi-call fallback for large graphs.
        raise NotImplementedError(
            f"fused decoder needs ~{need} B of VMEM; budget is {budget} B")

    kernel = functools.partial(_fused_decoder_kernel, cout=cout)
    operands = [a_bf16, inv_deg, x_bf16,
                q["w0"], q["b0"],
                q["w1a"], q["g1a"], q["be1a"],
                q["w1b"], q["g1b"], q["be1b"],
                q["w2ac"], q["g2ac"], q["be2ac"],
                q["w2b"], q["g2b"], q["be2b"]]

    vmem_spec = pl.BlockSpec(memory_space=pltpu.MemorySpace.VMEM)
    return pl.pallas_call(
        kernel,
        out_shape=jax.ShapeDtypeStruct((n, cout), jnp.float32),
        in_specs=[vmem_spec] * len(operands),
        out_specs=vmem_spec,
        compiler_params=pltpu.CompilerParams(vmem_limit_bytes=int(budget)),
    )(*operands)


# ---------------------------------------------------------------------------
# Graph / parameter helpers
# ---------------------------------------------------------------------------
def make_adjacency(edge_index, num_nodes):
    """Returns (exact 0/1 bf16 adjacency A[dst,src], f32 1/deg, f32 mean-A)."""
    src, dst = edge_index[0], edge_index[1]
    a = jnp.zeros((num_nodes, num_nodes), jnp.float32).at[dst, src].add(1.0)
    deg = jnp.sum(a, axis=1, keepdims=True)
    inv_deg = 1.0 / jnp.maximum(deg, 1.0)
    return a.astype(jnp.bfloat16), inv_deg, a * inv_deg


def init_params(key, cin, hid, cout):
    ks = iter(jax.random.split(key, 23))

    def glorot(fi, fo):
        lim = (6.0 / (fi + fo)) ** 0.5
        return jax.random.uniform(next(ks), (fi, fo), jnp.float32, -lim, lim)

    def bn(c):
        g = jax.random.uniform(next(ks), (1, c), jnp.float32, 0.5, 1.5)
        b = 0.1 * jax.random.normal(next(ks), (1, c), jnp.float32)
        return g, b

    p = {}
    # decoder.conv: SAGEConv(cin -> hid); bias kept (no BN follows).
    p["wl0"], p["wr0"] = glorot(cin, hid), glorot(cin, hid)
    p["b0"] = 0.1 * jax.random.normal(next(ks), (1, hid), jnp.float32)
    # layer1.conv1 / norm1      (conv biases dropped: cancel under training BN)
    p["wl1a"], p["wr1a"] = glorot(hid, hid), glorot(hid, hid)
    p["g1a"], p["be1a"] = bn(hid)
    # layer1.conv2 / norm2
    p["wl1b"], p["wr1b"] = glorot(hid, hid), glorot(hid, hid)
    p["g1b"], p["be1b"] = bn(hid)
    # layer2.conv1 / norm1
    p["wl2a"], p["wr2a"] = glorot(hid, cout), glorot(hid, cout)
    p["g2a"], p["be2a"] = bn(cout)
    # layer2.conv2 / norm2
    p["wl2b"], p["wr2b"] = glorot(cout, cout), glorot(cout, cout)
    p["g2b"], p["be2b"] = bn(cout)
    # layer2.conv3 / norm3 (projection residual, since hid != cout)
    p["wl2c"], p["wr2c"] = glorot(hid, cout), glorot(hid, cout)
    p["g2c"], p["be2c"] = bn(cout)
    return p


def pack_params(p):
    """Pre-concatenate [Wl; Wr] (and layer2 conv1|conv3) as bf16 for the kernel."""
    cat_k = lambda wl, wr: jnp.concatenate([wl, wr], axis=0).astype(jnp.bfloat16)
    return {
        "w0": cat_k(p["wl0"], p["wr0"]), "b0": p["b0"],
        "w1a": cat_k(p["wl1a"], p["wr1a"]), "g1a": p["g1a"], "be1a": p["be1a"],
        "w1b": cat_k(p["wl1b"], p["wr1b"]), "g1b": p["g1b"], "be1b": p["be1b"],
        "w2ac": jnp.concatenate(
            [jnp.concatenate([p["wl2a"], p["wl2c"]], axis=1),
             jnp.concatenate([p["wr2a"], p["wr2c"]], axis=1)],
            axis=0).astype(jnp.bfloat16),
        "g2ac": jnp.concatenate([p["g2a"], p["g2c"]], axis=1),
        "be2ac": jnp.concatenate([p["be2a"], p["be2c"]], axis=1),
        "w2b": cat_k(p["wl2b"], p["wr2b"]), "g2b": p["g2b"], "be2b": p["be2b"],
    }


def decoder_reference(x, a_mean, p):
    """Pure-JAX f32 reference of the decoder forward."""
    def sage(feat, wl, wr, b=None):
        h = (a_mean @ feat) @ wl + feat @ wr
        return h if b is None else h + b

    def bn(h, g, be):
        m = jnp.mean(h, axis=0, keepdims=True)
        v = jnp.mean((h - m) ** 2, axis=0, keepdims=True)
        return g * (h - m) / jnp.sqrt(v + EPS) + be

    relu = lambda t: jnp.maximum(t, 0.0)

    x0 = sage(x, p["wl0"], p["wr0"], p["b0"])
    h1 = relu(bn(sage(x0, p["wl1a"], p["wr1a"]), p["g1a"], p["be1a"]))
    x1 = relu(bn(sage(h1, p["wl1b"], p["wr1b"]), p["g1b"], p["be1b"]) + x0)
    h3 = relu(bn(sage(x1, p["wl2a"], p["wr2a"]), p["g2a"], p["be2a"]))
    r = bn(sage(x1, p["wl2c"], p["wr2c"]), p["g2c"], p["be2c"])
    x2 = relu(bn(sage(h3, p["wl2b"], p["wr2b"]), p["g2b"], p["be2b"]) + r)
    return 1.0 / (1.0 + jnp.exp(-x2))


if __name__ == "__main__":
    key = jax.random.PRNGKey(0)
    k_x, k_p = jax.random.split(key)

    N, CIN, HID, COUT = 256, 32, 64, 32   # hid != out -> layer2 uses conv3/norm3

    x = jax.random.normal(k_x, (N, CIN), jnp.float32)

    # deterministic graph: node i receives from i-1, i+1 and i+7
    idx = jnp.arange(N, dtype=jnp.int32)
    src = jnp.concatenate([(idx - 1) % N, (idx + 1) % N, (idx + 7) % N])
    dst = jnp.concatenate([idx, idx, idx])
    edge_index = jnp.stack([src, dst], axis=0)  # [2, 3N]

    a_bf16, inv_deg, a_mean_f32 = make_adjacency(edge_index, N)

    raw = init_params(k_p, CIN, HID, COUT)
    packed = pack_params(raw)

    out = graphsage_decoder(x.astype(jnp.bfloat16), a_bf16, inv_deg, packed,
                            cout=COUT)
    out = jax.block_until_ready(out)

    ref = decoder_reference(x, a_mean_f32, raw)
    max_err = float(jnp.max(jnp.abs(out - ref)))

    assert out.shape == (N, COUT)
    assert bool(jnp.all((out >= 0.0) & (out <= 1.0)))  # final sigmoid range
    assert max_err < 0.06, f"mismatch vs f32 reference: max abs err = {max_err}"
    print("KERNEL_OK")
</pallas_src>

<mosaic_0001>
module attributes {stable_mosaic.version = 11 : i64} {
  func.func @_fused_decoder_kernel(%arg0: memref<256x256xbf16, #tpu.memory_space<vmem>>, %arg1: memref<256x1xf32, #tpu.memory_space<vmem>>, %arg2: memref<256x32xbf16, #tpu.memory_space<vmem>>, %arg3: memref<64x64xbf16, #tpu.memory_space<vmem>>, %arg4: memref<1x64xf32, #tpu.memory_space<vmem>>, %arg5: memref<128x64xbf16, #tpu.memory_space<vmem>>, %arg6: memref<1x64xf32, #tpu.memory_space<vmem>>, %arg7: memref<1x64xf32, #tpu.memory_space<vmem>>, %arg8: memref<128x64xbf16, #tpu.memory_space<vmem>>, %arg9: memref<1x64xf32, #tpu.memory_space<vmem>>, %arg10: memref<1x64xf32, #tpu.memory_space<vmem>>, %arg11: memref<128x64xbf16, #tpu.memory_space<vmem>>, %arg12: memref<1x64xf32, #tpu.memory_space<vmem>>, %arg13: memref<1x64xf32, #tpu.memory_space<vmem>>, %arg14: memref<64x32xbf16, #tpu.memory_space<vmem>>, %arg15: memref<1x32xf32, #tpu.memory_space<vmem>>, %arg16: memref<1x32xf32, #tpu.memory_space<vmem>>, %arg17: memref<256x32xf32, #tpu.memory_space<vmem>>) attributes {dimension_semantics = [], scalar_prefetch = 0 : i64, scratch_operands = 0 : i64, tpu.core_type = #tpu.core_type<tc>} {
    %c0 = arith.constant 0 : index
    %c0_0 = arith.constant 0 : index
    %0 = vector.load %arg0[%c0, %c0_0] : memref<256x256xbf16, #tpu.memory_space<vmem>>, vector<256x256xbf16>
    %c0_1 = arith.constant 0 : index
    %c0_2 = arith.constant 0 : index
    %1 = vector.load %arg1[%c0_1, %c0_2] : memref<256x1xf32, #tpu.memory_space<vmem>>, vector<256x1xf32>
    %c0_3 = arith.constant 0 : index
    %c0_4 = arith.constant 0 : index
    %2 = vector.load %arg2[%c0_3, %c0_4] : memref<256x32xbf16, #tpu.memory_space<vmem>>, vector<256x32xbf16>
    %cst = arith.constant dense<0.000000e+00> : vector<256x32xf32>
    %3 = tpu.matmul %0, %2, %cst {dimension_numbers = #tpu.dot_dimension_numbers<[1], [0], [0], [1], [0, 0, 1, 1], [], []>} : vector<256x256xbf16>, vector<256x32xbf16>, vector<256x32xf32> -> vector<256x32xf32>
    %4 = vector.broadcast %1 : vector<256x1xf32> to vector<256x32xf32>
    %5 = arith.mulf %3, %4 : vector<256x32xf32>
    %6 = arith.truncf %5 : vector<256x32xf32> to vector<256x32xbf16>
    %c0_5 = arith.constant 0 : index
    %c0_6 = arith.constant 0 : index
    %7 = vector.load %arg3[%c0_5, %c0_6] : memref<64x64xbf16, #tpu.memory_space<vmem>>, vector<32x64xbf16>
    %cst_7 = arith.constant dense<0.000000e+00> : vector<256x64xf32>
    %8 = tpu.matmul %6, %7, %cst_7 {dimension_numbers = #tpu.dot_dimension_numbers<[1], [0], [0], [1], [0, 0, 1, 1], [], []>} : vector<256x32xbf16>, vector<32x64xbf16>, vector<256x64xf32> -> vector<256x64xf32>
    %c32 = arith.constant 32 : index
    %c0_8 = arith.constant 0 : index
    %9 = vector.load %arg3[%c32, %c0_8] : memref<64x64xbf16, #tpu.memory_space<vmem>>, vector<32x64xbf16>
    %cst_9 = arith.constant dense<0.000000e+00> : vector<256x64xf32>
    %10 = tpu.matmul %2, %9, %cst_9 {dimension_numbers = #tpu.dot_dimension_numbers<[1], [0], [0], [1], [0, 0, 1, 1], [], []>} : vector<256x32xbf16>, vector<32x64xbf16>, vector<256x64xf32> -> vector<256x64xf32>
    %11 = arith.addf %8, %10 : vector<256x64xf32>
    %c0_10 = arith.constant 0 : index
    %c0_11 = arith.constant 0 : index
    %12 = vector.load %arg4[%c0_10, %c0_11] : memref<1x64xf32, #tpu.memory_space<vmem>>, vector<1x64xf32>
    %13 = vector.broadcast %12 : vector<1x64xf32> to vector<256x64xf32>
    %14 = arith.addf %11, %13 : vector<256x64xf32>
    %15 = arith.truncf %14 : vector<256x64xf32> to vector<256x64xbf16>
    %cst_12 = arith.constant dense<0.000000e+00> : vector<256x64xf32>
    %16 = tpu.matmul %0, %15, %cst_12 {dimension_numbers = #tpu.dot_dimension_numbers<[1], [0], [0], [1], [0, 0, 1, 1], [], []>} : vector<256x256xbf16>, vector<256x64xbf16>, vector<256x64xf32> -> vector<256x64xf32>
    %17 = vector.broadcast %1 : vector<256x1xf32> to vector<256x64xf32>
    %18 = arith.mulf %16, %17 : vector<256x64xf32>
    %19 = arith.truncf %18 : vector<256x64xf32> to vector<256x64xbf16>
    %c0_13 = arith.constant 0 : index
    %c0_14 = arith.constant 0 : index
    %20 = vector.load %arg5[%c0_13, %c0_14] : memref<128x64xbf16, #tpu.memory_space<vmem>>, vector<64x64xbf16>
    %cst_15 = arith.constant dense<0.000000e+00> : vector<256x64xf32>
    %21 = tpu.matmul %19, %20, %cst_15 {dimension_numbers = #tpu.dot_dimension_numbers<[1], [0], [0], [1], [0, 0, 1, 1], [], []>} : vector<256x64xbf16>, vector<64x64xbf16>, vector<256x64xf32> -> vector<256x64xf32>
    %c64 = arith.constant 64 : index
    %c0_16 = arith.constant 0 : index
    %22 = vector.load %arg5[%c64, %c0_16] : memref<128x64xbf16, #tpu.memory_space<vmem>>, vector<64x64xbf16>
    %cst_17 = arith.constant dense<0.000000e+00> : vector<256x64xf32>
    %23 = tpu.matmul %15, %22, %cst_17 {dimension_numbers = #tpu.dot_dimension_numbers<[1], [0], [0], [1], [0, 0, 1, 1], [], []>} : vector<256x64xbf16>, vector<64x64xbf16>, vector<256x64xf32> -> vector<256x64xf32>
    %24 = arith.addf %21, %23 : vector<256x64xf32>
    %cst_18 = arith.constant dense<0.000000e+00> : vector<64xf32>
    %25 = vector.multi_reduction <add>, %24, %cst_18 [0] : vector<256x64xf32> to vector<64xf32>
    %26 = vector.shape_cast %25 : vector<64xf32> to vector<1x64xf32>
    %cst_19 = arith.constant 2.560000e+02 : f32
    %27 = vector.broadcast %cst_19 : f32 to vector<1x64xf32>
    %28 = arith.divf %26, %27 : vector<1x64xf32>
    %29 = vector.broadcast %28 : vector<1x64xf32> to vector<256x64xf32>
    %30 = arith.subf %24, %29 : vector<256x64xf32>
    %31 = arith.mulf %30, %30 : vector<256x64xf32>
    %cst_20 = arith.constant dense<0.000000e+00> : vector<64xf32>
    %32 = vector.multi_reduction <add>, %31, %cst_20 [0] : vector<256x64xf32> to vector<64xf32>
    %33 = vector.shape_cast %32 : vector<64xf32> to vector<1x64xf32>
    %cst_21 = arith.constant 2.560000e+02 : f32
    %34 = vector.broadcast %cst_21 : f32 to vector<1x64xf32>
    %35 = arith.divf %33, %34 : vector<1x64xf32>
    %c0_22 = arith.constant 0 : index
    %c0_23 = arith.constant 0 : index
    %36 = vector.load %arg6[%c0_22, %c0_23] : memref<1x64xf32, #tpu.memory_space<vmem>>, vector<1x64xf32>
    %37 = vector.broadcast %28 : vector<1x64xf32> to vector<256x64xf32>
    %38 = arith.subf %24, %37 : vector<256x64xf32>
    %39 = vector.broadcast %36 : vector<1x64xf32> to vector<256x64xf32>
    %40 = arith.mulf %39, %38 : vector<256x64xf32>
    %cst_24 = arith.constant 9.99999974E-6 : f32
    %41 = vector.broadcast %cst_24 : f32 to vector<1x64xf32>
    %42 = arith.addf %35, %41 : vector<1x64xf32>
    %43 = math.rsqrt %42 : vector<1x64xf32>
    %44 = vector.broadcast %43 : vector<1x64xf32> to vector<256x64xf32>
    %45 = arith.mulf %40, %44 : vector<256x64xf32>
    %c0_25 = arith.constant 0 : index
    %c0_26 = arith.constant 0 : index
    %46 = vector.load %arg7[%c0_25, %c0_26] : memref<1x64xf32, #tpu.memory_space<vmem>>, vector<1x64xf32>
    %47 = vector.broadcast %46 : vector<1x64xf32> to vector<256x64xf32>
    %48 = arith.addf %45, %47 : vector<256x64xf32>
    %cst_27 = arith.constant 0.000000e+00 : f32
    %49 = vector.broadcast %cst_27 : f32 to vector<256x64xf32>
    %50 = arith.maximumf %48, %49 : vector<256x64xf32>
    %51 = arith.truncf %50 : vector<256x64xf32> to vector<256x64xbf16>
    %cst_28 = arith.constant dense<0.000000e+00> : vector<256x64xf32>
    %52 = tpu.matmul %0, %51, %cst_28 {dimension_numbers = #tpu.dot_dimension_numbers<[1], [0], [0], [1], [0, 0, 1, 1], [], []>} : vector<256x256xbf16>, vector<256x64xbf16>, vector<256x64xf32> -> vector<256x64xf32>
    %53 = vector.broadcast %1 : vector<256x1xf32> to vector<256x64xf32>
    %54 = arith.mulf %52, %53 : vector<256x64xf32>
    %55 = arith.truncf %54 : vector<256x64xf32> to vector<256x64xbf16>
    %c0_29 = arith.constant 0 : index
    %c0_30 = arith.constant 0 : index
    %56 = vector.load %arg8[%c0_29, %c0_30] : memref<128x64xbf16, #tpu.memory_space<vmem>>, vector<64x64xbf16>
    %cst_31 = arith.constant dense<0.000000e+00> : vector<256x64xf32>
    %57 = tpu.matmul %55, %56, %cst_31 {dimension_numbers = #tpu.dot_dimension_numbers<[1], [0], [0], [1], [0, 0, 1, 1], [], []>} : vector<256x64xbf16>, vector<64x64xbf16>, vector<256x64xf32> -> vector<256x64xf32>
    %c64_32 = arith.constant 64 : index
    %c0_33 = arith.constant 0 : index
    %58 = vector.load %arg8[%c64_32, %c0_33] : memref<128x64xbf16, #tpu.memory_space<vmem>>, vector<64x64xbf16>
    %cst_34 = arith.constant dense<0.000000e+00> : vector<256x64xf32>
    %59 = tpu.matmul %51, %58, %cst_34 {dimension_numbers = #tpu.dot_dimension_numbers<[1], [0], [0], [1], [0, 0, 1, 1], [], []>} : vector<256x64xbf16>, vector<64x64xbf16>, vector<256x64xf32> -> vector<256x64xf32>
    %60 = arith.addf %57, %59 : vector<256x64xf32>
    %cst_35 = arith.constant dense<0.000000e+00> : vector<64xf32>
    %61 = vector.multi_reduction <add>, %60, %cst_35 [0] : vector<256x64xf32> to vector<64xf32>
    %62 = vector.shape_cast %61 : vector<64xf32> to vector<1x64xf32>
    %cst_36 = arith.constant 2.560000e+02 : f32
    %63 = vector.broadcast %cst_36 : f32 to vector<1x64xf32>
    %64 = arith.divf %62, %63 : vector<1x64xf32>
    %65 = vector.broadcast %64 : vector<1x64xf32> to vector<256x64xf32>
    %66 = arith.subf %60, %65 : vector<256x64xf32>
    %67 = arith.mulf %66, %66 : vector<256x64xf32>
    %cst_37 = arith.constant dense<0.000000e+00> : vector<64xf32>
    %68 = vector.multi_reduction <add>, %67, %cst_37 [0] : vector<256x64xf32> to vector<64xf32>
    %69 = vector.shape_cast %68 : vector<64xf32> to vector<1x64xf32>
    %cst_38 = arith.constant 2.560000e+02 : f32
    %70 = vector.broadcast %cst_38 : f32 to vector<1x64xf32>
    %71 = arith.divf %69, %70 : vector<1x64xf32>
    %c0_39 = arith.constant 0 : index
    %c0_40 = arith.constant 0 : index
    %72 = vector.load %arg9[%c0_39, %c0_40] : memref<1x64xf32, #tpu.memory_space<vmem>>, vector<1x64xf32>
    %73 = vector.broadcast %64 : vector<1x64xf32> to vector<256x64xf32>
    %74 = arith.subf %60, %73 : vector<256x64xf32>
    %75 = vector.broadcast %72 : vector<1x64xf32> to vector<256x64xf32>
    %76 = arith.mulf %75, %74 : vector<256x64xf32>
    %cst_41 = arith.constant 9.99999974E-6 : f32
    %77 = vector.broadcast %cst_41 : f32 to vector<1x64xf32>
    %78 = arith.addf %71, %77 : vector<1x64xf32>
    %79 = math.rsqrt %78 : vector<1x64xf32>
    %80 = vector.broadcast %79 : vector<1x64xf32> to vector<256x64xf32>
    %81 = arith.mulf %76, %80 : vector<256x64xf32>
    %c0_42 = arith.constant 0 : index
    %c0_43 = arith.constant 0 : index
    %82 = vector.load %arg10[%c0_42, %c0_43] : memref<1x64xf32, #tpu.memory_space<vmem>>, vector<1x64xf32>
    %83 = vector.broadcast %82 : vector<1x64xf32> to vector<256x64xf32>
    %84 = arith.addf %81, %83 : vector<256x64xf32>
    %85 = arith.addf %84, %14 : vector<256x64xf32>
    %cst_44 = arith.constant 0.000000e+00 : f32
    %86 = vector.broadcast %cst_44 : f32 to vector<256x64xf32>
    %87 = arith.maximumf %85, %86 : vector<256x64xf32>
    %88 = arith.truncf %87 : vector<256x64xf32> to vector<256x64xbf16>
    %cst_45 = arith.constant dense<0.000000e+00> : vector<256x64xf32>
    %89 = tpu.matmul %0, %88, %cst_45 {dimension_numbers = #tpu.dot_dimension_numbers<[1], [0], [0], [1], [0, 0, 1, 1], [], []>} : vector<256x256xbf16>, vector<256x64xbf16>, vector<256x64xf32> -> vector<256x64xf32>
    %90 = vector.broadcast %1 : vector<256x1xf32> to vector<256x64xf32>
    %91 = arith.mulf %89, %90 : vector<256x64xf32>
    %92 = arith.truncf %91 : vector<256x64xf32> to vector<256x64xbf16>
    %c0_46 = arith.constant 0 : index
    %c0_47 = arith.constant 0 : index
    %93 = vector.load %arg11[%c0_46, %c0_47] : memref<128x64xbf16, #tpu.memory_space<vmem>>, vector<64x64xbf16>
    %cst_48 = arith.constant dense<0.000000e+00> : vector<256x64xf32>
    %94 = tpu.matmul %92, %93, %cst_48 {dimension_numbers = #tpu.dot_dimension_numbers<[1], [0], [0], [1], [0, 0, 1, 1], [], []>} : vector<256x64xbf16>, vector<64x64xbf16>, vector<256x64xf32> -> vector<256x64xf32>
    %c64_49 = arith.constant 64 : index
    %c0_50 = arith.constant 0 : index
    %95 = vector.load %arg11[%c64_49, %c0_50] : memref<128x64xbf16, #tpu.memory_space<vmem>>, vector<64x64xbf16>
    %cst_51 = arith.constant dense<0.000000e+00> : vector<256x64xf32>
    %96 = tpu.matmul %88, %95, %cst_51 {dimension_numbers = #tpu.dot_dimension_numbers<[1], [0], [0], [1], [0, 0, 1, 1], [], []>} : vector<256x64xbf16>, vector<64x64xbf16>, vector<256x64xf32> -> vector<256x64xf32>
    %97 = arith.addf %94, %96 : vector<256x64xf32>
    %cst_52 = arith.constant dense<0.000000e+00> : vector<64xf32>
    %98 = vector.multi_reduction <add>, %97, %cst_52 [0] : vector<256x64xf32> to vector<64xf32>
    %99 = vector.shape_cast %98 : vector<64xf32> to vector<1x64xf32>
    %cst_53 = arith.constant 2.560000e+02 : f32
    %100 = vector.broadcast %cst_53 : f32 to vector<1x64xf32>
    %101 = arith.divf %99, %100 : vector<1x64xf32>
    %102 = vector.broadcast %101 : vector<1x64xf32> to vector<256x64xf32>
    %103 = arith.subf %97, %102 : vector<256x64xf32>
    %104 = arith.mulf %103, %103 : vector<256x64xf32>
    %cst_54 = arith.constant dense<0.000000e+00> : vector<64xf32>
    %105 = vector.multi_reduction <add>, %104, %cst_54 [0] : vector<256x64xf32> to vector<64xf32>
    %106 = vector.shape_cast %105 : vector<64xf32> to vector<1x64xf32>
    %cst_55 = arith.constant 2.560000e+02 : f32
    %107 = vector.broadcast %cst_55 : f32 to vector<1x64xf32>
    %108 = arith.divf %106, %107 : vector<1x64xf32>
    %c0_56 = arith.constant 0 : index
    %c0_57 = arith.constant 0 : index
    %109 = vector.load %arg12[%c0_56, %c0_57] : memref<1x64xf32, #tpu.memory_space<vmem>>, vector<1x64xf32>
    %110 = vector.broadcast %101 : vector<1x64xf32> to vector<256x64xf32>
    %111 = arith.subf %97, %110 : vector<256x64xf32>
    %112 = vector.broadcast %109 : vector<1x64xf32> to vector<256x64xf32>
    %113 = arith.mulf %112, %111 : vector<256x64xf32>
    %cst_58 = arith.constant 9.99999974E-6 : f32
    %114 = vector.broadcast %cst_58 : f32 to vector<1x64xf32>
    %115 = arith.addf %108, %114 : vector<1x64xf32>
    %116 = math.rsqrt %115 : vector<1x64xf32>
    %117 = vector.broadcast %116 : vector<1x64xf32> to vector<256x64xf32>
    %118 = arith.mulf %113, %117 : vector<256x64xf32>
    %c0_59 = arith.constant 0 : index
    %c0_60 = arith.constant 0 : index
    %119 = vector.load %arg13[%c0_59, %c0_60] : memref<1x64xf32, #tpu.memory_space<vmem>>, vector<1x64xf32>
    %120 = vector.broadcast %119 : vector<1x64xf32> to vector<256x64xf32>
    %121 = arith.addf %118, %120 : vector<256x64xf32>
    %122 = vector.extract_strided_slice %121 {offsets = [0, 0], sizes = [256, 32], strides = [1, 1]} : vector<256x64xf32> to vector<256x32xf32>
    %cst_61 = arith.constant 0.000000e+00 : f32
    %123 = vector.broadcast %cst_61 : f32 to vector<256x32xf32>
    %124 = arith.maximumf %122, %123 : vector<256x32xf32>
    %125 = vector.extract_strided_slice %121 {offsets = [0, 32], sizes = [256, 32], strides = [1, 1]} : vector<256x64xf32> to vector<256x32xf32>
    %126 = arith.truncf %124 : vector<256x32xf32> to vector<256x32xbf16>
    %cst_62 = arith.constant dense<0.000000e+00> : vector<256x32xf32>
    %127 = tpu.matmul %0, %126, %cst_62 {dimension_numbers = #tpu.dot_dimension_numbers<[1], [0], [0], [1], [0, 0, 1, 1], [], []>} : vector<256x256xbf16>, vector<256x32xbf16>, vector<256x32xf32> -> vector<256x32xf32>
    %128 = vector.broadcast %1 : vector<256x1xf32> to vector<256x32xf32>
    %129 = arith.mulf %127, %128 : vector<256x32xf32>
    %130 = arith.truncf %129 : vector<256x32xf32> to vector<256x32xbf16>
    %c0_63 = arith.constant 0 : index
    %c0_64 = arith.constant 0 : index
    %131 = vector.load %arg14[%c0_63, %c0_64] : memref<64x32xbf16, #tpu.memory_space<vmem>>, vector<32x32xbf16>
    %cst_65 = arith.constant dense<0.000000e+00> : vector<256x32xf32>
    %132 = tpu.matmul %130, %131, %cst_65 {dimension_numbers = #tpu.dot_dimension_numbers<[1], [0], [0], [1], [0, 0, 1, 1], [], []>} : vector<256x32xbf16>, vector<32x32xbf16>, vector<256x32xf32> -> vector<256x32xf32>
    %c32_66 = arith.constant 32 : index
    %c0_67 = arith.constant 0 : index
    %133 = vector.load %arg14[%c32_66, %c0_67] : memref<64x32xbf16, #tpu.memory_space<vmem>>, vector<32x32xbf16>
    %cst_68 = arith.constant dense<0.000000e+00> : vector<256x32xf32>
    %134 = tpu.matmul %126, %133, %cst_68 {dimension_numbers = #tpu.dot_dimension_numbers<[1], [0], [0], [1], [0, 0, 1, 1], [], []>} : vector<256x32xbf16>, vector<32x32xbf16>, vector<256x32xf32> -> vector<256x32xf32>
    %135 = arith.addf %132, %134 : vector<256x32xf32>
    %cst_69 = arith.constant dense<0.000000e+00> : vector<32xf32>
    %136 = vector.multi_reduction <add>, %135, %cst_69 [0] : vector<256x32xf32> to vector<32xf32>
    %137 = vector.shape_cast %136 : vector<32xf32> to vector<1x32xf32>
    %cst_70 = arith.constant 2.560000e+02 : f32
    %138 = vector.broadcast %cst_70 : f32 to vector<1x32xf32>
    %139 = arith.divf %137, %138 : vector<1x32xf32>
    %140 = vector.broadcast %139 : vector<1x32xf32> to vector<256x32xf32>
    %141 = arith.subf %135, %140 : vector<256x32xf32>
    %142 = arith.mulf %141, %141 : vector<256x32xf32>
    %cst_71 = arith.constant dense<0.000000e+00> : vector<32xf32>
    %143 = vector.multi_reduction <add>, %142, %cst_71 [0] : vector<256x32xf32> to vector<32xf32>
    %144 = vector.shape_cast %143 : vector<32xf32> to vector<1x32xf32>
    %cst_72 = arith.constant 2.560000e+02 : f32
    %145 = vector.broadcast %cst_72 : f32 to vector<1x32xf32>
    %146 = arith.divf %144, %145 : vector<1x32xf32>
    %c0_73 = arith.constant 0 : index
    %c0_74 = arith.constant 0 : index
    %147 = vector.load %arg15[%c0_73, %c0_74] : memref<1x32xf32, #tpu.memory_space<vmem>>, vector<1x32xf32>
    %148 = vector.broadcast %139 : vector<1x32xf32> to vector<256x32xf32>
    %149 = arith.subf %135, %148 : vector<256x32xf32>
    %150 = vector.broadcast %147 : vector<1x32xf32> to vector<256x32xf32>
    %151 = arith.mulf %150, %149 : vector<256x32xf32>
    %cst_75 = arith.constant 9.99999974E-6 : f32
    %152 = vector.broadcast %cst_75 : f32 to vector<1x32xf32>
    %153 = arith.addf %146, %152 : vector<1x32xf32>
    %154 = math.rsqrt %153 : vector<1x32xf32>
    %155 = vector.broadcast %154 : vector<1x32xf32> to vector<256x32xf32>
    %156 = arith.mulf %151, %155 : vector<256x32xf32>
    %c0_76 = arith.constant 0 : index
    %c0_77 = arith.constant 0 : index
    %157 = vector.load %arg16[%c0_76, %c0_77] : memref<1x32xf32, #tpu.memory_space<vmem>>, vector<1x32xf32>
    %158 = vector.broadcast %157 : vector<1x32xf32> to vector<256x32xf32>
    %159 = arith.addf %156, %158 : vector<256x32xf32>
    %160 = arith.addf %159, %125 : vector<256x32xf32>
    %cst_78 = arith.constant 0.000000e+00 : f32
    %161 = vector.broadcast %cst_78 : f32 to vector<256x32xf32>
    %162 = arith.maximumf %160, %161 : vector<256x32xf32>
    %cst_79 = arith.constant 0.000000e+00 : f32
    %163 = vector.broadcast %cst_79 : f32 to vector<256x32xf32>
    %164 = arith.subf %163, %162 : vector<256x32xf32>
    %165 = math.exp %164 : vector<256x32xf32>
    %cst_80 = arith.constant 1.000000e+00 : f32
    %166 = vector.broadcast %cst_80 : f32 to vector<256x32xf32>
    %167 = arith.addf %166, %165 : vector<256x32xf32>
    %cst_81 = arith.constant 1.000000e+00 : f32
    %168 = vector.broadcast %cst_81 : f32 to vector<256x32xf32>
    %169 = arith.divf %168, %167 : vector<256x32xf32>
    %c0_82 = arith.constant 0 : index
    %c0_83 = arith.constant 0 : index
    %170 = vector.load %arg17[%c0_82, %c0_83] : memref<256x32xf32, #tpu.memory_space<vmem>>, vector<256x32xf32>
    tpu.vector_store %arg17[%c0_82, %c0_83], %169 {strides = array<i32>} : memref<256x32xf32, #tpu.memory_space<vmem>>, vector<256x32xf32>,
    return
  }
}

</mosaic_0001>

<bundles_post_ra>
// kernel: tpu_custom_call.1
= control target key start
LH: loop header
LB: loop body
LE: loop exit
PB: predicated region body
PF: predicated region fallthrough
CT: control target
= control target key end

     0   :  { %v7607_v1 = vmov 0   ;;  %vm798_vm0 = vcmask 261120   ;;  %vm1533_vm1 = vcmask 523264   ;;  %s11658_s2 = inlined_call_operand.vmem [shape: bf16[256,32], index: 2, kind: input, shape index: {}]   ;;  %s11659_s0 = inlined_call_operand.vmem [shape: bf16[256,256], index: 0, kind: input, shape index: {}]   ;;  %s11660_s1 = inlined_call_operand.vmem [shape: f32[256,1], index: 1, kind: input, shape index: {}]   ;;  %s11661_s3 = inlined_call_operand.vmem [shape: bf16[64,64], index: 3, kind: input, shape index: {}]   ;;  %s11662_s5 = inlined_call_operand.vmem [shape: bf16[128,64], index: 5, kind: input, shape index: {}]   ;;  %s11663_s4 = inlined_call_operand.vmem [shape: f32[1,64], index: 4, kind: input, shape index: {}]   ;;  %s11664_s8 = inlined_call_operand.vmem [shape: bf16[128,64], index: 8, kind: input, shape index: {}]   ;;  %s11665_s6 = inlined_call_operand.vmem [shape: f32[1,64], index: 6, kind: input, shape index: {}]   ;;  %s11666_s7 = inlined_call_operand.vmem [shape: f32[1,64], index: 7, kind: input, shape index: {}]   ;;  %s11667_s11 = inlined_call_operand.vmem [shape: bf16[128,64], index: 11, kind: input, shape index: {}]   ;;  %s11668_s9 = inlined_call_operand.vmem [shape: f32[1,64], index: 9, kind: input, shape index: {}]   ;;  %s11669_s10 = inlined_call_operand.vmem [shape: f32[1,64], index: 10, kind: input, shape index: {}]   ;;  %s11670_s14 = inlined_call_operand.vmem [shape: bf16[64,32], index: 14, kind: input, shape index: {}]   ;;  %s11671_s12 = inlined_call_operand.vmem [shape: f32[1,64], index: 12, kind: input, shape index: {}]   ;;  %s11672_s13 = inlined_call_operand.vmem [shape: f32[1,64], index: 13, kind: input, shape index: {}]   ;;  %s11673_s15 = inlined_call_operand.vmem [shape: f32[1,32], index: 15, kind: input, shape index: {}]   ;;  %s11674_s16 = inlined_call_operand.vmem [shape: f32[1,32], index: 16, kind: input, shape index: {}]   ;;  %s11675_s17 = inlined_call_operand.vmem [shape: f32[256,32], index: 17, kind: output, shape index: {}]  }
   0x1   :  { %11776 = sst [smem:[#allocation68_spill]] %s11658_s2  ;;  %7269 = vset.pattern.permute.xlu0 %v7607_v1  ;;  %7270 = vset.pattern.permute.xlu1 %v7607_v1  ;;  %v89_v18 = vld [vmem:[%s11660_s1] sm:$0xff]  ;;  %v91_v19 = vld [vmem:[%s11660_s1 + $0x10] sm:$0xff]  ;;  %v90_v22 = vld [vmem:[%s11660_s1 + $0x8] sm:$0xff] }
   0x2   :  { %11777 = sst [smem:[#allocation69_spill]] %s11659_s0  ;;  %572 = vperm.xlu0 %7269, %v89_v18   ;;  %582 = vperm.xlu1 %7270, %v91_v19   ;;  %v92_v23 = vld [vmem:[%s11660_s1 + $0x18] sm:$0xff]  ;;  %v93_v24 = vld [vmem:[%s11660_s1 + $0x20] sm:$0xff]  ;;  %v94_v25 = vld [vmem:[%s11660_s1 + $0x28] sm:$0xff] }
   0x3   :  { %s11778_s26 = sld [smem:[#allocation68_spill]]  ;;  %v95_v28 = vld [vmem:[%s11660_s1 + $0x30] sm:$0xff]  ;;  %v96_v29 = vld [vmem:[%s11660_s1 + $0x38] sm:$0xff]  ;;  %v97_v30 = vld [vmem:[%s11660_s1 + $0x40] sm:$0xff] }
   0x4   :  { %s11779_s20 = sld [smem:[#allocation69_spill]]  ;;  %v98_v31 = vld [vmem:[%s11660_s1 + $0x48] sm:$0xff]  ;;  %v99_v34 = vld [vmem:[%s11660_s1 + $0x50] sm:$0xff]  ;;  %v100_v35 = vld [vmem:[%s11660_s1 + $0x58] sm:$0xff] }
   0x5   :  { %v7335_v36 = vld [vmem:[%s11661_s3 + $0x18] sm:$0xff]   ;;  %v7336_v37 = vld [vmem:[%s11661_s3 + $0x10] sm:$0xff]   ;;  %v101_v38 = vld [vmem:[%s11660_s1 + $0x60] sm:$0xff] }
   0x6   :  { %577 = vperm.xlu0 %7269, %v90_v22   ;;  %587 = vperm.xlu1 %7270, %v92_v23   ;;  %v102_v39 = vld [vmem:[%s11660_s1 + $0x68] sm:$0xff]  ;;  %v103_v42 = vld [vmem:[%s11660_s1 + $0x70] sm:$0xff]  ;;  %v104_v43 = vld [vmem:[%s11660_s1 + $0x78] sm:$0xff] }
   0x7   :  { %6879 = vmatprep.subr.bf16.mxu1 %v7335_v36  ;;  %v105_v44 = vld [vmem:[%s11660_s1 + $0x80] sm:$0xff]  ;;  %v106_v45 = vld [vmem:[%s11660_s1 + $0x88] sm:$0xff]  ;;  %v107_v48 = vld [vmem:[%s11660_s1 + $0x90] sm:$0xff] }
   0x8   :  { %6880 = vmatpush3.bf16.msra.mxu1 %v7335_v36  ;;  %v108_v49 = vld [vmem:[%s11660_s1 + $0x98] sm:$0xff]  ;;  %v109_v50 = vld [vmem:[%s11660_s1 + $0xa0] sm:$0xff]  ;;  %v110_v51 = vld [vmem:[%s11660_s1 + $0xa8] sm:$0xff] }
   0x9   :  { %v7702_v0 = vld [vmem:[%s11778_s26 + $0x78] sm:$0xff]   ;;  %v7713_v3 = vld [vmem:[%s11778_s26 + $0x70] sm:$0xff]   ;;  %v7725_v5 = vld [vmem:[%s11778_s26 + $0x68] sm:$0xff]   ;;  %6881 = vmatprep.subr.bf16.mxu1 %v7336_v37 }
   0xa   :  { %v7707_v2 = vld [vmem:[%s11778_s26 + $0x38] sm:$0xff]   ;;  %6127 = vmatprep.subr.bf16.mxu0 %v7702_v0  ;;  %v7719_v4 = vld [vmem:[%s11778_s26 + $0x30] sm:$0xff]   ;;  %v7731_v6 = vld [vmem:[%s11778_s26 + $0x28] sm:$0xff]   ;;  %592 = vperm.xlu0 %7269, %v93_v24  }
   0xb   :  { %6128 = vmatpush3.bf16.msra.mxu0 %v7707_v2  ;;  %v7737_v7 = vld [vmem:[%s11778_s26 + $0x60] sm:$0xff]   ;;  %v7749_v9 = vld [vmem:[%s11778_s26 + $0x58] sm:$0xff]   ;;  %v7760_v11 = vld [vmem:[%s11778_s26 + $0x50] sm:$0xff]   ;;  %597 = vperm.xlu1 %7270, %v94_v25  }
   0xc   :  { %6129 = vmatprep.subr.bf16.mxu0 %v7713_v3  ;;  %v7743_v8 = vld [vmem:[%s11778_s26 + $0x20] sm:$0xff]   ;;  %v7754_v10 = vld [vmem:[%s11778_s26 + $0x18] sm:$0xff]   ;;  %v7773_v13 = vld [vmem:[%s11778_s26 + $0x10] sm:$0xff]   ;;  %6882 = vmatpush3.bf16.msra.mxu1 %v7336_v37 }
   0xd   :  { %v7766_v12 = vld [vmem:[%s11779_s20 + $0x4] ss:$8 sps:$4 sm:$0xff]   ;;  %v7289_v20 = vld [vmem:[%s11779_s20] ss:$8 sps:$4 sm:$0xff]   ;;  %v7290_v21 = vld [vmem:[%s11779_s20 + $0x14] ss:$8 sps:$4 sm:$0xff]  }
   0xe   :  { %441 = vmatprep.mubr.bf16.mxu0 %v7766_v12  ;;  %v7779_v14 = vld [vmem:[%s11778_s26 + $0x48] sm:$0xff]   ;;  %v7791_v16 = vld [vmem:[%s11778_s26 + $0x40] sm:$0xff]   ;;  %v7292_v26 = vld [vmem:[%s11779_s20 + $0x10] ss:$8 sps:$4 sm:$0xff]   ;;  %602 = vperm.xlu0 %7269, %v95_v28  }
   0xf   :  { %6130 = vmatpush3.bf16.msra.mxu0 %v7719_v4  ;;  %v7785_v15 = vld [vmem:[%s11778_s26 + $0x8] sm:$0xff]   ;;  %v7286_v17 = vld [vmem:[%s11778_s26] sm:$0xff]   ;;  %607 = vperm.xlu1 %7270, %v96_v29   ;;  %v7296_v33 = vld [vmem:[%s11779_s20 + $0x34] ss:$8 sps:$4 sm:$0xff]  }
  0x10   :  { %6131 = vmatprep.subr.bf16.mxu0 %v7725_v5  ;;  %6883 = vmatprep.mubr.msk.bf16.mxu1 %vm798_vm0, %v7286_v17  ;;  %v7293_v27 = vld [vmem:[%s11779_s20 + $0x24] ss:$8 sps:$4 sm:$0xff]   ;;  %v7295_v32 = vld [vmem:[%s11779_s20 + $0x20] ss:$8 sps:$4 sm:$0xff]   ;;  %v7298_v40 = vld [vmem:[%s11779_s20 + $0x30] ss:$8 sps:$4 sm:$0xff]  }
  0x11   :  { %v7299_v41 = vld [vmem:[%s11779_s20 + $0x44] ss:$8 sps:$4 sm:$0xff]   ;;  %6884 = vmatmul.mubr.msk.bf16.vlgmr.msra.gmra.mxu1 %vm798_vm0, %v7785_v15  ;;  %v7890_v46 = vld [vmem:[%s11779_s20 + $0x40] ss:$8 sps:$4 sm:$0xff]   ;;  %v7895_v47 = vld [vmem:[%s11779_s20 + $0x54] ss:$8 sps:$4 sm:$0xff]  }
  0x12   :  { %612 = vperm.xlu0 %7269, %v97_v30   ;;  %6887 = vmatprep.mubr.msk.bf16.mxu1 %vm798_vm0, %v7773_v13  ;;  %v7918_v52 = vld [vmem:[%s11779_s20 + $0x50] ss:$8 sps:$4 sm:$0xff]   ;;  %v7923_v53 = vld [vmem:[%s11779_s20 + $0x64] ss:$8 sps:$4 sm:$0xff]   ;;  %v7946_v58 = vld [vmem:[%s11779_s20 + $0x60] ss:$8 sps:$4 sm:$0xff]  }
  0x13   :  { %6132 = vmatpush3.bf16.msra.mxu0 %v7731_v6  ;;  %617 = vperm.xlu1 %7270, %v98_v31   ;;  %v111_v54 = vld [vmem:[%s11660_s1 + $0xb0] sm:$0xff]  ;;  %v112_v55 = vld [vmem:[%s11660_s1 + $0xb8] sm:$0xff]  ;;  %v113_v56 = vld [vmem:[%s11660_s1 + $0xc0] sm:$0xff] }
  0x14   :  { %6133 = vmatprep.subr.bf16.mxu0 %v7737_v7  ;;  %v114_v57 = vld [vmem:[%s11660_s1 + $0xc8] sm:$0xff]  ;;  %v7951_v59 = vld [vmem:[%s11779_s20 + $0x74] ss:$8 sps:$4 sm:$0xff]   ;;  %v117_v62 = vld [vmem:[%s11660_s1 + $0xe0] sm:$0xff] }
  0x15   :  { %v115_v60 = vld [vmem:[%s11660_s1 + $0xd0] sm:$0xff]  ;;  %v116_v61 = vld [vmem:[%s11660_s1 + $0xd8] sm:$0xff]  ;;  %v118_v63 = vld [vmem:[%s11660_s1 + $0xe8] sm:$0xff] }
  0x16   :  { %622 = vperm.xlu0 %7269, %v99_v34   ;;  %v7974_v1 = vld [vmem:[%s11779_s20 + $0x70] ss:$8 sps:$4 sm:$0xff]   ;;  %v8077_v18 = vld [vmem:[%s11779_s20 + $0xe4] ss:$8 sps:$4 sm:$0xff]   ;;  %v8084_v19 = vld [vmem:[%s11779_s20 + $0xe0] ss:$8 sps:$4 sm:$0xff]  }
  0x17   :  { %6134 = vmatpush3.bf16.msra.mxu0 %v7743_v8  ;;  %627 = vperm.xlu1 %7270, %v100_v35   ;;  %v7339_v29 = vld [vmem:[%s11662_s5 + $0x38] sm:$0xff]  }
  0x18   :  { %6135 = vmatprep.subr.bf16.mxu0 %v7749_v9 }
  0x19   :  { %6888 = vmatmul.mubr.msk.bf16.gmra.mxu1 %vm798_vm0, %v7754_v10 }
  0x1a   :  { %632 = vperm.xlu0 %7269, %v101_v38   ;;  %6891 = vmatprep.mubr.msk.bf16.mxu1 %vm798_vm0, %v7743_v8  ;;  %v7996_v8 = vld [vmem:[%s11779_s20 + $0x80] ss:$8 sps:$4 sm:$0xff]  }
  0x1b   :  { %6136 = vmatpush3.bf16.msra.mxu0 %v7754_v10  ;;  %637 = vperm.xlu1 %7270, %v102_v39   ;;  %v8001_v10 = vld [vmem:[%s11779_s20 + $0x94] ss:$8 sps:$4 sm:$0xff]  }
  0x1c   :  { %6137 = vmatprep.subr.bf16.mxu0 %v7760_v11 }
  0x1e   :  { %642 = vperm.xlu0 %7269, %v103_v42  }
  0x1f   :  { %6138 = vmatpush3.bf16.msra.mxu0 %v7773_v13  ;;  %647 = vperm.xlu1 %7270, %v104_v43   ;;  %v8017_v13 = vld [vmem:[%s11779_s20 + $0xa4] ss:$8 sps:$4 sm:$0xff]  }
  0x20   :  { %6139 = vmatprep.subr.bf16.mxu0 %v7779_v14 }
  0x21   :  { %6892 = vmatmul.mubr.msk.bf16.gmra.mxu1 %vm798_vm0, %v7731_v6  ;;  %v119_v6 = vld [vmem:[%s11660_s1 + $0xf0] sm:$0xff] }
  0x22   :  { %652 = vperm.xlu0 %7269, %v105_v44   ;;  %6895 = vmatprep.mubr.msk.bf16.mxu1 %vm798_vm0, %v7719_v4  ;;  %v7979_v4 = vld [vmem:[%s11779_s20 + $0x84] ss:$8 sps:$4 sm:$0xff]  }
  0x23   :  { %6140 = vmatpush3.bf16.msra.mxu0 %v7785_v15  ;;  %657 = vperm.xlu1 %7270, %v106_v45   ;;  %v8053_v15 = vld [vmem:[%s11779_s20 + $0xc4] ss:$8 sps:$4 sm:$0xff]  }
  0x24   :  { %6141 = vmatprep.subr.bf16.mxu0 %v7791_v16 }
  0x26   :  { %662 = vperm.xlu0 %7269, %v107_v48  }
  0x27   :  { %6142 = vmatpush3.bf16.msra.mxu0 %v7286_v17  ;;  %667 = vperm.xlu1 %7270, %v108_v49   ;;  %v8072_v17 = vld [vmem:[%s11779_s20 + $0xd0] ss:$8 sps:$4 sm:$0xff]  }
  0x28   :  { %6951 = vmatprep.subr.bf16.mxu0 %v7339_v29 }
  0x29   :  { %6896 = vmatmul.mubr.msk.bf16.gmra.mxu1 %vm798_vm0, %v7707_v2  ;;  %v120_v2 = vld [vmem:[%s11660_s1 + $0xf8] sm:$0xff] }
  0x2a   :  { %442 = vmatmul.mubr.bf16.vlgmr.msra.gmra.mxu0 %v7289_v20  ;;  %672 = vperm.xlu0 %7269, %v109_v50   ;;  %v8089_v20 = vld [vmem:[%s11779_s20 + $0xf4] ss:$8 sps:$4 sm:$0xff]  }
  0x2b   :  { %449 = vmatprep.mubr.bf16.mxu0 %v7290_v21  ;;  %677 = vperm.xlu1 %7270, %v110_v51   ;;  %11780 = vst [vmem:[#allocation2_spill] sm:$0xff] %v8089_v20  ;;  %v8096_v21 = vld [vmem:[%s11779_s20 + $0xf0] ss:$8 sps:$4 sm:$0xff]  }
  0x2c   :  { %6899 = vmatprep.mubr.msk.bf16.mxu1 %vm798_vm0, %v7791_v16  ;;  %v8060_v16 = vld [vmem:[%s11779_s20 + $0xc0] ss:$8 sps:$4 sm:$0xff]   ;;  %11781 = vst [vmem:[#allocation3_spill] sm:$0xff] %v8096_v21  ;;  %6952 = vmatpush3.bf16.msra.mxu0 %v7339_v29 }
  0x2e   :  { %682 = vperm.xlu0 %7269, %v111_v54  }
  0x2f   :  { %687 = vperm.xlu1 %7270, %v112_v55  }
  0x31   :  { %6900 = vmatmul.mubr.msk.bf16.gmra.mxu1 %vm798_vm0, %v7779_v14  ;;  %v8036_v14 = vld [vmem:[%s11779_s20 + $0xb4] ss:$8 sps:$4 sm:$0xff]  }
  0x32   :  { %450 = vmatmul.mubr.bf16.gmra.mxu0 %v7292_v26  ;;  %692 = vperm.xlu0 %7269, %v113_v56  }
  0x33   :  { %457 = vmatprep.mubr.bf16.mxu0 %v7293_v27  ;;  %697 = vperm.xlu1 %7270, %v114_v57  }
  0x34   :  { %6903 = vmatprep.mubr.msk.bf16.mxu1 %vm798_vm0, %v7760_v11  ;;  %v8012_v11 = vld [vmem:[%s11779_s20 + $0x90] ss:$8 sps:$4 sm:$0xff]  }
  0x36   :  { %702 = vperm.xlu0 %7269, %v115_v60  }
  0x37   :  { %707 = vperm.xlu1 %7270, %v116_v61  }
  0x39   :  { %6904 = vmatmul.mubr.msk.bf16.gmra.mxu1 %vm798_vm0, %v7749_v9  ;;  %v8031_v9 = vld [vmem:[%s11779_s20 + $0xa0] ss:$8 sps:$4 sm:$0xff]  }
  0x3a   :  { %458 = vmatmul.mubr.bf16.gmra.mxu0 %v7295_v32  ;;  %712 = vperm.xlu0 %7269, %v117_v62  }
  0x3b   :  { %465 = vmatprep.mubr.bf16.mxu0 %v7296_v33  ;;  %717 = vperm.xlu1 %7270, %v118_v63  }
  0x3c   :  { %6907 = vmatprep.mubr.msk.bf16.mxu1 %vm798_vm0, %v7737_v7  ;;  %v7337_v7 = vld [vmem:[%s11661_s3 + $0x8] sm:$0xff]  }
  0x3d   :  { %6915 = vmatprep.subr.bf16.mxu1 %v7337_v7 }
  0x3e   :  { %722 = vperm.xlu0 %7269, %v119_v6   ;;  %6916 = vmatpush3.bf16.msra.mxu1 %v7337_v7 }
  0x3f   :  { %727 = vperm.xlu1 %7270, %v120_v2  }
  0x41   :  { %6908 = vmatmul.mubr.msk.bf16.gmra.mxu1 %vm798_vm0, %v7725_v5  ;;  %v8048_v5 = vld [vmem:[%s11779_s20 + $0xb0] ss:$8 sps:$4 sm:$0xff]  }
  0x42   :  { %466 = vmatmul.mubr.bf16.gmra.mxu0 %v7298_v40  ;;  %6911 = vmatprep.mubr.msk.bf16.mxu1 %vm798_vm0, %v7713_v3  ;;  %v7338_v3 = vld [vmem:[%s11661_s3] sm:$0xff]  }
  0x43   :  { %473 = vmatprep.mubr.bf16.mxu0 %v7299_v41  ;;  %6917 = vmatprep.subr.bf16.mxu1 %v7338_v3 }
  0x44   :  { %6918 = vmatpush3.bf16.msra.mxu1 %v7338_v3 }
  0x49   :  { %6912 = vmatmul.mubr.msk.bf16.gmra.mxu1 %vm798_vm0, %v7702_v0  ;;  %v8065_v0 = vld [vmem:[%s11779_s20 + $0xd4] ss:$8 sps:$4 sm:$0xff]  }
  0x4a   :  { %474 = vmatmul.mubr.bf16.gmra.mxu0 %v7890_v46 }
  0x4b   :  { %481 = vmatprep.mubr.bf16.mxu0 %v7895_v47 }
  0x52   :  { %482 = vmatmul.mubr.bf16.gmra.mxu0 %v7918_v52 }
  0x53   :  { %489 = vmatprep.mubr.bf16.mxu0 %v7923_v53 }
  0x5a   :  { %490 = vmatmul.mubr.bf16.gmra.mxu0 %v7946_v58 }
  0x5b   :  { %497 = vmatprep.mubr.bf16.mxu0 %v7951_v59 }
  0x62   :  { %498 = vmatmul.mubr.bf16.gmra.mxu0 %v7974_v1 }
  0x63   :  { %505 = vmatprep.mubr.bf16.mxu0 %v7979_v4 }
  0x6a   :  { %506 = vmatmul.mubr.bf16.gmra.mxu0 %v7996_v8 }
  0x6b   :  { %513 = vmatprep.mubr.bf16.mxu0 %v8001_v10 }
  0x72   :  { %514 = vmatmul.mubr.bf16.gmra.mxu0 %v8012_v11 }
  0x73   :  { %521 = vmatprep.mubr.bf16.mxu0 %v8017_v13 }
  0x7a   :  { %522 = vmatmul.mubr.bf16.gmra.mxu0 %v8031_v9 }
  0x7b   :  { %529 = vmatprep.mubr.bf16.mxu0 %v8036_v14 }
  0x7d   :  { %v8099_v23 = vpop.permute.xlu0 %572  ;;  %v8108_v34 = vpop.permute.xlu1 %582 }
  0x7e   :  { %11782 = vst [vmem:[#allocation4_spill] sm:$0xff] %v8099_v23  ;;  %11784 = vst [vmem:[#allocation6_spill] sm:$0xff] %v8108_v34 }
  0x81   :  { %v8101_v28 = vpop.permute.xlu0 %577  ;;  %v8111_v41 = vpop.permute.xlu1 %587 }
  0x82   :  { %530 = vmatmul.mubr.bf16.gmra.mxu0 %v8048_v5  ;;  %11783 = vst [vmem:[#allocation5_spill] sm:$0xff] %v8101_v28  ;;  %11785 = vst [vmem:[#allocation7_spill] sm:$0xff] %v8111_v41 }
  0x83   :  { %537 = vmatprep.mubr.bf16.mxu0 %v8053_v15 }
  0x85   :  { %v8116_v54 = vpop.permute.xlu0 %592 }
  0x86   :  { %11786 = vst [vmem:[#allocation8_spill] sm:$0xff] %v8116_v54  ;;  %v8118_v56 = vpop.permute.xlu1 %597 }
  0x87   :  { %11787 = vst [vmem:[#allocation9_spill] sm:$0xff] %v8118_v56 }
  0x89   :  { %v8123_v3 = vpop.permute.xlu0 %602 }
  0x8a   :  { %538 = vmatmul.mubr.bf16.gmra.mxu0 %v8060_v16  ;;  %11788 = vst [vmem:[#allocation10_spill] sm:$0xff] %v8123_v3 }
  0x8b   :  { %545 = vmatprep.mubr.bf16.mxu0 %v8065_v0 }
  0x92   :  { %546 = vmatmul.mubr.bf16.gmra.mxu0 %v8072_v17 }
  0x93   :  { %553 = vmatprep.mubr.bf16.mxu0 %v8077_v18 }
  0x9a   :  { %554 = vmatmul.mubr.bf16.gmra.mxu0 %v8084_v19 }
  0x9b   :  { %561 = vmatprep.mubr.bf16.mxu0 %v8089_v20 }
  0xa2   :  { %562 = vmatmul.mubr.bf16.gmra.mxu0 %v8096_v21 }
  0xea   :  { %v6143_v22 = vpop.f32.mrf.mxu0 }
  0xec   :  { %v6144_v24 = vpop.f32.mrf.mxu0 }
  0xed   :  { %v6145_v26 = vadd.f32 %v6144_v24, %v6143_v22  ;;  %v8125_v24 = vpop.permute.xlu1 %607 }
  0xee   :  { %v6146_v25 = vpop.f32.mrf.mxu0  ;;  %11789 = vst [vmem:[#allocation11_spill] sm:$0xff] %v8125_v24 }
  0xef   :  { %v730_v32 = vmul.f32 %v6145_v26, %v8099_v23 }
  0xf0   :  { %v6147_v27 = vpop.f32.mrf.mxu0 }
  0xf1   :  { %v6148_v30 = vadd.f32 %v6147_v27, %v6146_v25 }
  0xf2   :  { %v6149_v31 = vpop.f32.mrf.mxu0 }
  0xf3   :  { %v731_v33 = vmul.f32 %v6148_v30, %v8101_v28  ;;  %v8294_v28 = vld [vmem:[%s11663_s4] ss:$0 sm:$0xff] }
  0xf4   :  { %v6150_v35 = vpop.f32.mrf.mxu0 }
  0xf5   :  { %v762_v36 = vpack.c.bf16 %v731_v33, %v730_v32  ;;  %v6151_v38 = vadd.f32 %v6150_v35, %v6149_v31  ;;  %v8130_v35 = vpop.permute.xlu0 %612 }
  0xf6   :  { %v6152_v37 = vpop.f32.mrf.mxu0  ;;  %11790 = vst [vmem:[#allocation12_spill] sm:$0xff] %v8130_v35 }
  0xf7   :  { %6919 = vmatprep.mubr.msk.bf16.mxu1 %vm798_vm0, %v762_v36  ;;  %v732_v43 = vmul.f32 %v6151_v38, %v8108_v34 }
  0xf8   :  { %v6153_v39 = vpop.f32.mrf.mxu0 }
  0xf9   :  { %v6154_v40 = vadd.f32 %v6153_v39, %v6152_v37  ;;  %v8132_v37 = vpop.permute.xlu1 %617 }
  0xfa   :  { %v6155_v42 = vpop.f32.mrf.mxu0  ;;  %11791 = vst [vmem:[#allocation13_spill] sm:$0xff] %v8132_v37 }
  0xfb   :  { %v733_v44 = vmul.f32 %v6154_v40, %v8111_v41 }
  0xfc   :  { %v6156_v45 = vpop.f32.mrf.mxu0 }
  0xfd   :  { %v763_v48 = vpack.c.bf16 %v733_v44, %v732_v43  ;;  %v6157_v50 = vadd.f32 %v6156_v45, %v6155_v42 }
  0xfe   :  { %v6158_v49 = vpop.f32.mrf.mxu0 }
  0xff   :  { %6920 = vmatmul.mubr.msk.bf16.vlgmr.msra.gmra.mxu1 %vm798_vm0, %v763_v48  ;;  %v734_v60 = vmul.f32 %v6157_v50, %v8116_v54 }
 0x100   :  { %v6159_v51 = vpop.f32.mrf.mxu0 }
 0x101   :  { %v6160_v55 = vadd.f32 %v6159_v51, %v6158_v49  ;;  %v8137_v49 = vpop.permute.xlu0 %622  ;;  %v8139_v51 = vpop.permute.xlu1 %627 }
 0x102   :  { %v6161_v57 = vpop.f32.mrf.mxu0  ;;  %11792 = vst [vmem:[#allocation14_spill] sm:$0xff] %v8137_v49  ;;  %11793 = vst [vmem:[#allocation15_spill] sm:$0xff] %v8139_v51 }
 0x103   :  { %v735_v61 = vmul.f32 %v6160_v55, %v8118_v56 }
 0x104   :  { %v6162_v62 = vpop.f32.mrf.mxu0 }
 0x105   :  { %v764_v63 = vpack.c.bf16 %v735_v61, %v734_v60  ;;  %v6163_v2 = vadd.f32 %v6162_v62, %v6161_v57 }
 0x106   :  { %v6164_v6 = vpop.f32.mrf.mxu0 }
 0x107   :  { %6923 = vmatprep.mubr.msk.bf16.mxu1 %vm798_vm0, %v764_v63  ;;  %v736_v26 = vmul.f32 %v6163_v2, %v8123_v3 }
 0x108   :  { %v6165_v7 = vpop.f32.mrf.mxu0 }
 0x109   :  { %v6166_v22 = vadd.f32 %v6165_v7, %v6164_v6  ;;  %v8144_v7 = vpop.permute.xlu0 %632 }
 0x10a   :  { %v6167_v25 = vpop.f32.mrf.mxu0  ;;  %11794 = vst [vmem:[#allocation16_spill] sm:$0xff] %v8144_v7 }
 0x10b   :  { %v737_v27 = vmul.f32 %v6166_v22, %v8125_v24 }
 0x10c   :  { %v6168_v29 = vpop.f32.mrf.mxu0 }
 0x10d   :  { %v765_v30 = vpack.c.bf16 %v737_v27, %v736_v26  ;;  %v6169_v32 = vadd.f32 %v6168_v29, %v6167_v25  ;;  %v8146_v25 = vpop.permute.xlu1 %637 }
 0x10e   :  { %v6170_v31 = vpop.f32.mrf.mxu0  ;;  %11795 = vst [vmem:[#allocation17_spill] sm:$0xff] %v8146_v25 }
 0x10f   :  { %6924 = vmatmul.mubr.msk.bf16.gmra.mxu1 %vm798_vm0, %v765_v30  ;;  %v738_v39 = vmul.f32 %v6169_v32, %v8130_v35 }
 0x110   :  { %v6171_v33 = vpop.f32.mrf.mxu0 }
 0x111   :  { %v6172_v36 = vadd.f32 %v6171_v33, %v6170_v31 }
 0x112   :  { %v6173_v38 = vpop.f32.mrf.mxu0 }
 0x113   :  { %v739_v40 = vmul.f32 %v6172_v36, %v8132_v37 }
 0x114   :  { %v6174_v42 = vpop.f32.mrf.mxu0 }
 0x115   :  { %v766_v43 = vpack.c.bf16 %v739_v40, %v738_v39  ;;  %v6175_v45 = vadd.f32 %v6174_v42, %v6173_v38  ;;  %v8151_v38 = vpop.permute.xlu0 %642  ;;  %v8153_v40 = vpop.permute.xlu1 %647 }
 0x116   :  { %v6176_v44 = vpop.f32.mrf.mxu0  ;;  %11796 = vst [vmem:[#allocation18_spill] sm:$0xff] %v8151_v38  ;;  %11797 = vst [vmem:[#allocation19_spill] sm:$0xff] %v8153_v40 }
 0x117   :  { %6927 = vmatprep.mubr.msk.bf16.mxu1 %vm798_vm0, %v766_v43  ;;  %v740_v57 = vmul.f32 %v6175_v45, %v8137_v49 }
 0x118   :  { %v6177_v48 = vpop.f32.mrf.mxu0 }
 0x119   :  { %v6178_v50 = vadd.f32 %v6177_v48, %v6176_v44 }
 0x11a   :  { %v6179_v55 = vpop.f32.mrf.mxu0 }
 0x11b   :  { %v741_v60 = vmul.f32 %v6178_v50, %v8139_v51 }
 0x11c   :  { %v6180_v61 = vpop.f32.mrf.mxu0 }
 0x11d   :  { %v767_v62 = vpack.c.bf16 %v741_v60, %v740_v57  ;;  %v6181_v6 = vadd.f32 %v6180_v61, %v6179_v55  ;;  %v8158_v60 = vpop.permute.xlu0 %652 }
 0x11e   :  { %v6182_v63 = vpop.f32.mrf.mxu0  ;;  %11798 = vst [vmem:[#allocation20_spill] sm:$0xff] %v8158_v60 }
 0x11f   :  { %6928 = vmatmul.mubr.msk.bf16.gmra.mxu1 %vm798_vm0, %v767_v62  ;;  %v742_v27 = vmul.f32 %v6181_v6, %v8144_v7  ;;  %v8160_v62 = vpop.permute.xlu1 %657 }
 0x120   :  { %v6183_v2 = vpop.f32.mrf.mxu0  ;;  %11799 = vst [vmem:[#allocation21_spill] sm:$0xff] %v8160_v62 }
 0x121   :  { %v6184_v22 = vadd.f32 %v6183_v2, %v6182_v63 }
 0x122   :  { %v6185_v26 = vpop.f32.mrf.mxu0 }
 0x123   :  { %v743_v29 = vmul.f32 %v6184_v22, %v8146_v25 }
 0x124   :  { %v6186_v30 = vpop.f32.mrf.mxu0 }
 0x125   :  { %v768_v31 = vpack.c.bf16 %v743_v29, %v742_v27  ;;  %v6187_v33 = vadd.f32 %v6186_v30, %v6185_v26 }
 0x126   :  { %v6188_v32 = vpop.f32.mrf.mxu0 }
 0x127   :  { %6931 = vmatprep.mubr.msk.bf16.mxu1 %vm798_vm0, %v768_v31  ;;  %v744_v43 = vmul.f32 %v6187_v33, %v8151_v38  ;;  %v8165_v31 = vpop.permute.xlu0 %662  ;;  %v8167_v33 = vpop.permute.xlu1 %667 }
 0x128   :  { %v6189_v36 = vpop.f32.mrf.mxu0  ;;  %11800 = vst [vmem:[#allocation22_spill] sm:$0xff] %v8165_v31  ;;  %11801 = vst [vmem:[#allocation23_spill] sm:$0xff] %v8167_v33 }
 0x129   :  { %v6190_v39 = vadd.f32 %v6189_v36, %v6188_v32 }
 0x12a   :  { %v6191_v42 = vpop.f32.mrf.mxu0 }
 0x12b   :  { %v745_v44 = vmul.f32 %v6190_v39, %v8153_v40 }
 0x12c   :  { %v6192_v45 = vpop.f32.mrf.mxu0 }
 0x12d   :  { %v769_v48 = vpack.c.bf16 %v745_v44, %v744_v43  ;;  %v6193_v55 = vadd.f32 %v6192_v45, %v6191_v42 }
 0x12e   :  { %v6194_v50 = vpop.f32.mrf.mxu0 }
 0x12f   :  { %6932 = vmatmul.mubr.msk.bf16.gmra.mxu1 %vm798_vm0, %v769_v48  ;;  %v746_v6 = vmul.f32 %v6193_v55, %v8158_v60  ;;  %v7340_v55 = vld [vmem:[%s11662_s5 + $0x30] sm:$0xff]  }
 0x130   :  { %v6195_v57 = vpop.f32.mrf.mxu0  ;;  %6953 = vmatprep.subr.bf16.mxu0 %v7340_v55 }
 0x131   :  { %v6196_v61 = vadd.f32 %v6195_v57, %v6194_v50  ;;  %v8172_v50 = vpop.f32.mrf.mxu1  ;;  %6954 = vmatpush3.bf16.msra.mxu0 %v7340_v55 }
 0x132   :  { %v6197_v63 = vpop.f32.mrf.mxu0 }
 0x133   :  { %v747_v2 = vmul.f32 %v6196_v61, %v8160_v62  ;;  %v8177_v61 = vpop.permute.xlu0 %672 }
 0x134   :  { %v6198_v22 = vpop.f32.mrf.mxu0  ;;  %11802 = vst [vmem:[#allocation24_spill] sm:$0xff] %v8177_v61 }
 0x135   :  { %v770_v26 = vpack.c.bf16 %v747_v2, %v746_v6  ;;  %v6199_v29 = vadd.f32 %v6198_v22, %v6197_v63  ;;  %v8179_v6 = vpop.permute.xlu1 %677 }
 0x136   :  { %v6200_v27 = vpop.f32.mrf.mxu0  ;;  %11803 = vst [vmem:[#allocation25_spill] sm:$0xff] %v8179_v6 }
 0x137   :  { %6935 = vmatprep.mubr.msk.bf16.mxu1 %vm798_vm0, %v770_v26  ;;  %v748_v39 = vmul.f32 %v6199_v29, %v8165_v31  ;;  %v7341_v29 = vld [vmem:[%s11662_s5 + $0x28] sm:$0xff]  }
 0x138   :  { %v6201_v30 = vpop.f32.mrf.mxu0  ;;  %6955 = vmatprep.subr.bf16.mxu0 %v7341_v29 }
 0x139   :  { %v6202_v32 = vadd.f32 %v6201_v30, %v6200_v27  ;;  %v8183_v27 = vpop.f32.mrf.mxu1  ;;  %6956 = vmatpush3.bf16.msra.mxu0 %v7341_v29  ;;  %v8196_v55 = vpop.permute.xlu1 %687 }
 0x13a   :  { %v6203_v36 = vpop.f32.mrf.mxu0  ;;  %11805 = vst [vmem:[#allocation27_spill] sm:$0xff] %v8196_v55 }
 0x13b   :  { %v749_v42 = vmul.f32 %v6202_v32, %v8167_v33 }
 0x13c   :  { %v6204_v43 = vpop.f32.mrf.mxu0 }
 0x13d   :  { %v771_v44 = vpack.c.bf16 %v749_v42, %v748_v39  ;;  %v6205_v48 = vadd.f32 %v6204_v43, %v6203_v36  ;;  %v8189_v42 = vpop.f32.mrf.mxu1  ;;  %v7342_v43 = vld [vmem:[%s11662_s5 + $0x20] sm:$0xff]   ;;  %v8207_v33 = vpop.permute.xlu1 %697 }
 0x13e   :  { %v6206_v45 = vpop.f32.mrf.mxu0  ;;  %6957 = vmatprep.subr.bf16.mxu0 %v7342_v43  ;;  %11807 = vst [vmem:[#allocation29_spill] sm:$0xff] %v8207_v33 }
 0x13f   :  { %6936 = vmatmul.mubr.msk.bf16.gmra.mxu1 %vm798_vm0, %v771_v44  ;;  %v750_v22 = vmul.f32 %v6205_v48, %v8177_v61  ;;  %6958 = vmatpush3.bf16.msra.mxu0 %v7342_v43 }
 0x140   :  { %v6207_v57 = vpop.f32.mrf.mxu0 }
 0x141   :  { %v6208_v63 = vadd.f32 %v6207_v57, %v6206_v45  ;;  %v8194_v45 = vpop.permute.xlu0 %682 }
 0x142   :  { %v6209_v2 = vpop.f32.mrf.mxu0  ;;  %11804 = vst [vmem:[#allocation26_spill] sm:$0xff] %v8194_v45 }
 0x143   :  { %v751_v26 = vmul.f32 %v6208_v63, %v8179_v6 }
 0x144   :  { %v6210_v30 = vpop.f32.mrf.mxu0 }
 0x145   :  { %v772_v32 = vpack.c.bf16 %v751_v26, %v750_v22  ;;  %v6211_v39 = vadd.f32 %v6210_v30, %v6209_v2  ;;  %v8200_v22 = vpop.f32.mrf.mxu1 }
 0x146   :  { %v6212_v36 = vpop.f32.mrf.mxu0 }
 0x147   :  { %6939 = vmatprep.mubr.msk.bf16.mxu1 %vm798_vm0, %v772_v32  ;;  %v752_v63 = vmul.f32 %v6211_v39, %v8194_v45  ;;  %v8203_v6 = vpop.f32.mrf.mxu1 }
 0x148   :  { %v6213_v44 = vpop.f32.mrf.mxu0 }
 0x149   :  { %v6214_v48 = vadd.f32 %v6213_v44, %v6212_v36  ;;  %v8205_v44 = vpop.permute.xlu0 %692 }
 0x14a   :  { %v6215_v57 = vpop.f32.mrf.mxu0  ;;  %11806 = vst [vmem:[#allocation28_spill] sm:$0xff] %v8205_v44 }
 0x14b   :  { %v753_v2 = vmul.f32 %v6214_v48, %v8196_v55  ;;  %v8211_v55 = vpop.f32.mrf.mxu1 }
 0x14c   :  { %v6216_v26 = vpop.f32.mrf.mxu0 }
 0x14d   :  { %v773_v29 = vpack.c.bf16 %v753_v2, %v752_v63  ;;  %v6217_v32 = vadd.f32 %v6216_v26, %v6215_v57  ;;  %v8216_v31 = vpop.permute.xlu0 %702 }
 0x14e   :  { %v6218_v30 = vpop.f32.mrf.mxu0  ;;  %11808 = vst [vmem:[#allocation30_spill] sm:$0xff] %v8216_v31 }
 0x14f   :  { %6940 = vmatmul.mubr.msk.bf16.gmra.mxu1 %vm798_vm0, %v773_v29  ;;  %v754_v39 = vmul.f32 %v6217_v32, %v8205_v44  ;;  %v8214_v29 = vpop.f32.mrf.mxu1 }
 0x150   :  { %v6219_v36 = vpop.f32.mrf.mxu0 }
 0x151   :  { %v6220_v61 = vadd.f32 %v6219_v36, %v6218_v30  ;;  %v8218_v36 = vpop.permute.xlu1 %707  ;;  %v8227_v60 = vpop.permute.xlu0 %712 }
 0x152   :  { %v6221_v43 = vpop.f32.mrf.mxu0  ;;  %11809 = vst [vmem:[#allocation31_spill] sm:$0xff] %v8218_v36  ;;  %11810 = vst [vmem:[#allocation32_spill] sm:$0xff] %v8227_v60 }
 0x153   :  { %v755_v48 = vmul.f32 %v6220_v61, %v8207_v33  ;;  %v8222_v33 = vpop.f32.mrf.mxu1 }
 0x154   :  { %v6222_v63 = vpop.f32.mrf.mxu0 }
 0x155   :  { %v774_v2 = vpack.c.bf16 %v755_v48, %v754_v39  ;;  %v6223_v26 = vadd.f32 %v6222_v63, %v6221_v43 }
 0x156   :  { %v6224_v57 = vpop.f32.mrf.mxu0 }
 0x157   :  { %6943 = vmatprep.mubr.msk.bf16.mxu1 %vm798_vm0, %v774_v2  ;;  %v756_v32 = vmul.f32 %v6223_v26, %v8216_v31  ;;  %v8225_v2 = vpop.f32.mrf.mxu1 }
 0x158   :  { %v6225_v45 = vpop.f32.mrf.mxu0 }
 0x159   :  { %v6226_v30 = vadd.f32 %v6225_v45, %v6224_v57  ;;  %v8229_v57 = vpop.permute.xlu1 %717 }
 0x15a   :  { %v6227_v62 = vpop.f32.mrf.mxu0  ;;  %11811 = vst [vmem:[#allocation33_spill] sm:$0xff] %v8229_v57 }
 0x15b   :  { %v757_v61 = vmul.f32 %v6226_v30, %v8218_v36  ;;  %v8233_v36 = vpop.f32.mrf.mxu1 }
 0x15c   :  { %v6228_v39 = vpop.f32.mrf.mxu0 }
 0x15d   :  { %v775_v48 = vpack.c.bf16 %v757_v61, %v756_v32  ;;  %v6229_v63 = vadd.f32 %v6228_v39, %v6227_v62 }
 0x15e   :  { %v6230_v43 = vpop.f32.mrf.mxu0 }
 0x15f   :  { %6944 = vmatmul.mubr.msk.bf16.gmra.mxu1 %vm798_vm0, %v775_v48  ;;  %v758_v26 = vmul.f32 %v6229_v63, %v8227_v60  ;;  %v8236_v48 = vpop.f32.mrf.mxu1 }
 0x160   :  { %v6231_v44 = vpop.f32.mrf.mxu0 }
 0x161   :  { %v6232_v45 = vadd.f32 %v6231_v44, %v6230_v43  ;;  %v8238_v44 = vpop.permute.xlu0 %722  ;;  %v8240_v43 = vpop.permute.xlu1 %727 }
 0x162   :  { %v6233_v40 = vpop.f32.mrf.mxu0  ;;  %11812 = vst [vmem:[#allocation34_spill] sm:$0xff] %v8238_v44  ;;  %11813 = vst [vmem:[#allocation35_spill] sm:$0xff] %v8240_v43 }
 0x163   :  { %v759_v30 = vmul.f32 %v6232_v45, %v8229_v57  ;;  %v8244_v57 = vpop.f32.mrf.mxu1 }
 0x164   :  { %v6234_v32 = vpop.f32.mrf.mxu0 }
 0x165   :  { %v776_v61 = vpack.c.bf16 %v759_v30, %v758_v26  ;;  %v6235_v39 = vadd.f32 %v6234_v32, %v6233_v40  ;;  %v8247_v40 = vpop.f32.mrf.mxu1 }
 0x166   :  { %v6236_v62 = vpop.f32.mrf.mxu0 }
 0x167   :  { %6947 = vmatprep.mubr.msk.bf16.mxu1 %vm798_vm0, %v776_v61  ;;  %v760_v63 = vmul.f32 %v6235_v39, %v8238_v44  ;;  %v8250_v26 = vpop.f32.mrf.mxu1 }
 0x168   :  { %v6237_v31 = vpop.f32.mrf.mxu0 }
 0x169   :  { %v6238_v38 = vadd.f32 %v6237_v31, %v6236_v62  ;;  %v8252_v31 = vpop.f32.mrf.mxu1 }
 0x16b   :  { %v761_v45 = vmul.f32 %v6238_v38, %v8240_v43  ;;  %v8254_v30 = vpop.f32.mrf.mxu1 }
 0x16d   :  { %v777_v60 = vpack.c.bf16 %v761_v45, %v760_v63  ;;  %v8256_v32 = vpop.f32.mrf.mxu1 }
 0x16f   :  { %6948 = vmatmul.mubr.msk.bf16.gmra.mxu1 %vm798_vm0, %v777_v60  ;;  %v8258_v61 = vpop.f32.mrf.mxu1 }
 0x170   :  { %1316 = vmatprep.mubr.bf16.mxu1 %v7766_v12 }
 0x171   :  { %v8260_v38 = vpop.f32.mrf.mxu1 }
 0x173   :  { %v8262_v62 = vpop.f32.mrf.mxu1 }
 0x175   :  { %v8264_v39 = vpop.f32.mrf.mxu1 }
 0x177   :  { %v8266_v60 = vpop.f32.mrf.mxu1 }
 0x179   :  { %v8268_v63 = vpop.f32.mrf.mxu1 }
 0x17b   :  { %v8270_v12 = vpop.f32.mrf.mxu1 }
 0x17d   :  { %v8272_v45 = vpop.f32.mrf.mxu1 }
 0x17f   :  { %v8274_v43 = vpop.f32.mrf.mxu1 }
 0x181   :  { %v8276_v44 = vpop.f32.mrf.mxu1 }
 0x183   :  { %v8278_v25 = vpop.f32.mrf.mxu1 }
 0x185   :  { %v8280_v7 = vpop.f32.mrf.mxu1 }
 0x187   :  { %v8282_v51 = vpop.f32.mrf.mxu1 }
 0x189   :  { %v8284_v49 = vpop.f32.mrf.mxu1 }
 0x18b   :  { %v8286_v37 = vpop.f32.mrf.mxu1 }
 0x1bf   :  { %v6921_v35 = vpop.f32.mrf.mxu1 }
 0x1c0   :  { %v1111_v41 = vadd.f32 %v6921_v35, %v8172_v50 }
 0x1c1   :  { %v1102_v24 = vpop.f32.mrf.mxu1 }
 0x1c2   :  { %v1103_v56 = vadd.f32 %v1102_v24, %v8183_v27 }
 0x1c3   :  { %v6922_v3 = vpop.f32.mrf.mxu1 }
 0x1c4   :  { %v1114_v54 = vadd.f32 %v6922_v3, %v8189_v42  ;;  %v8301_v20 = vadd.f32 %v8294_v28, %v1103_v56  ;;  %v8307_v3 = vadd.f32 %v8294_v28, %v1111_v41 }
 0x1c5   :  { %v1105_v34 = vpop.f32.mrf.mxu1 }
 0x1c6   :  { %v1106_v23 = vadd.f32 %v1105_v34, %v8200_v22  ;;  %v8298_v21 = vadd.f32 %v8294_v28, %v1114_v54  ;;  %11815 = vst [vmem:[#allocation37_spill] sm:$0xff] %v8301_v20  ;;  %11817 = vst [vmem:[#allocation39_spill] sm:$0xff] %v8307_v3 }
 0x1c8   :  { %11814 = vst [vmem:[#allocation36_spill] sm:$0xff] %v8298_v21  ;;  %v8304_v24 = vadd.f32 %v8294_v28, %v1106_v23  ;;  %v8315_v34 = vpack.c.bf16 %v8298_v21, %v8307_v3 }
 0x1ca   :  { %11816 = vst [vmem:[#allocation38_spill] sm:$0xff] %v8304_v24  ;;  %v8311_v35 = vpack.c.bf16 %v8304_v24, %v8301_v20 }
 0x1cc   :  { %6959 = vmatprep.mubr.msk.bf16.mxu0 %vm1533_vm1, %v8311_v35 }
 0x1cd   :  { %6960 = vmatmul.mubr.msk.bf16.vlgmr.msra.gmra.mxu0 %vm1533_vm1, %v8315_v34 }
 0x1cf   :  { %v6925_v23 = vpop.f32.mrf.mxu1 }
 0x1d0   :  { %v1127_v27 = vadd.f32 %v6925_v23, %v8203_v6 }
 0x1d1   :  { %v1118_v54 = vpop.f32.mrf.mxu1 }
 0x1d2   :  { %v1119_v41 = vadd.f32 %v1118_v54, %v8211_v55  ;;  %v8335_v3 = vadd.f32 %v8294_v28, %v1127_v27 }
 0x1d3   :  { %v6926_v56 = vpop.f32.mrf.mxu1 }
 0x1d4   :  { %v1130_v50 = vadd.f32 %v6926_v56, %v8214_v29  ;;  %v8329_v20 = vadd.f32 %v8294_v28, %v1119_v41  ;;  %11821 = vst [vmem:[#allocation43_spill] sm:$0xff] %v8335_v3 }
 0x1d5   :  { %v1121_v42 = vpop.f32.mrf.mxu1 }
 0x1d6   :  { %v1122_v22 = vadd.f32 %v1121_v42, %v8222_v33  ;;  %v8326_v24 = vadd.f32 %v8294_v28, %v1130_v50  ;;  %11819 = vst [vmem:[#allocation41_spill] sm:$0xff] %v8329_v20 }
 0x1d8   :  { %11818 = vst [vmem:[#allocation40_spill] sm:$0xff] %v8326_v24  ;;  %v8332_v21 = vadd.f32 %v8294_v28, %v1122_v22  ;;  %v8343_v6 = vpack.c.bf16 %v8326_v24, %v8335_v3 }
 0x1da   :  { %11820 = vst [vmem:[#allocation42_spill] sm:$0xff] %v8332_v21  ;;  %v8339_v55 = vpack.c.bf16 %v8332_v21, %v8329_v20 }
 0x1dc   :  { %6963 = vmatprep.mubr.msk.bf16.mxu0 %vm1533_vm1, %v8339_v55 }
 0x1dd   :  { %6964 = vmatmul.mubr.msk.bf16.gmra.mxu0 %vm1533_vm1, %v8343_v6 }
 0x1df   :  { %v6929_v33 = vpop.f32.mrf.mxu1 }
 0x1e0   :  { %v1143_v41 = vadd.f32 %v6929_v33, %v8225_v2 }
 0x1e1   :  { %v1134_v29 = vpop.f32.mrf.mxu1 }
 0x1e2   :  { %v1135_v54 = vadd.f32 %v1134_v29, %v8233_v36  ;;  %v8363_v20 = vadd.f32 %v8294_v28, %v1143_v41 }
 0x1e3   :  { %v6930_v23 = vpop.f32.mrf.mxu1 }
 0x1e4   :  { %v1146_v56 = vadd.f32 %v6930_v23, %v8236_v48  ;;  %v8357_v22 = vadd.f32 %v8294_v28, %v1135_v54  ;;  %11825 = vst [vmem:[#allocation47_spill] sm:$0xff] %v8363_v20 }
 0x1e5   :  { %v1137_v50 = vpop.f32.mrf.mxu1 }
 0x1e6   :  { %v1138_v27 = vadd.f32 %v1137_v50, %v8244_v57  ;;  %v8354_v42 = vadd.f32 %v8294_v28, %v1146_v56  ;;  %11823 = vst [vmem:[#allocation45_spill] sm:$0xff] %v8357_v22 }
 0x1e8   :  { %11822 = vst [vmem:[#allocation44_spill] sm:$0xff] %v8354_v42  ;;  %v8360_v21 = vadd.f32 %v8294_v28, %v1138_v27  ;;  %v8371_v2 = vpack.c.bf16 %v8354_v42, %v8363_v20 }
 0x1ea   :  { %11824 = vst [vmem:[#allocation46_spill] sm:$0xff] %v8360_v21  ;;  %v8367_v36 = vpack.c.bf16 %v8360_v21, %v8357_v22 }
 0x1ec   :  { %6967 = vmatprep.mubr.msk.bf16.mxu0 %vm1533_vm1, %v8367_v36 }
 0x1ed   :  { %6968 = vmatmul.mubr.msk.bf16.gmra.mxu0 %vm1533_vm1, %v8371_v2 }
 0x1ef   :  { %v6933_v57 = vpop.f32.mrf.mxu1 }
 0x1f0   :  { %v1159_v54 = vadd.f32 %v6933_v57, %v8247_v40 }
 0x1f1   :  { %v1150_v48 = vpop.f32.mrf.mxu1 }
 0x1f2   :  { %v1151_v29 = vadd.f32 %v1150_v48, %v8250_v26  ;;  %v8391_v22 = vadd.f32 %v8294_v28, %v1159_v54 }
 0x1f3   :  { %v6934_v33 = vpop.f32.mrf.mxu1 }
 0x1f4   :  { %v1162_v23 = vadd.f32 %v6934_v33, %v8252_v31  ;;  %v8385_v27 = vadd.f32 %v8294_v28, %v1151_v29  ;;  %11829 = vst [vmem:[#allocation51_spill] sm:$0xff] %v8391_v22 }
 0x1f5   :  { %v1153_v56 = vpop.f32.mrf.mxu1 }
 0x1f6   :  { %v1154_v41 = vadd.f32 %v1153_v56, %v8254_v30  ;;  %v8382_v50 = vadd.f32 %v8294_v28, %v1162_v23  ;;  %11827 = vst [vmem:[#allocation49_spill] sm:$0xff] %v8385_v27 }
 0x1f8   :  { %11826 = vst [vmem:[#allocation48_spill] sm:$0xff] %v8382_v50  ;;  %v8388_v21 = vadd.f32 %v8294_v28, %v1154_v41  ;;  %v8399_v40 = vpack.c.bf16 %v8382_v50, %v8391_v22 }
 0x1fa   :  { %11828 = vst [vmem:[#allocation50_spill] sm:$0xff] %v8388_v21  ;;  %v8395_v26 = vpack.c.bf16 %v8388_v21, %v8385_v27 }
 0x1fc   :  { %6971 = vmatprep.mubr.msk.bf16.mxu0 %vm1533_vm1, %v8395_v26 }
 0x1fd   :  { %6972 = vmatmul.mubr.msk.bf16.gmra.mxu0 %vm1533_vm1, %v8399_v40 }
 0x1ff   :  { %v6937_v31 = vpop.f32.mrf.mxu1 }
 0x200   :  { %v1175_v29 = vadd.f32 %v6937_v31, %v8256_v32 }
 0x201   :  { %v1166_v30 = vpop.f32.mrf.mxu1 }
 0x202   :  { %v1167_v48 = vadd.f32 %v1166_v30, %v8258_v61  ;;  %v8419_v20 = vadd.f32 %v8294_v28, %v1175_v29 }
 0x203   :  { %v6938_v57 = vpop.f32.mrf.mxu1 }
 0x204   :  { %v1178_v33 = vadd.f32 %v6938_v57, %v8260_v38  ;;  %v8413_v41 = vadd.f32 %v8294_v28, %v1167_v48  ;;  %11833 = vst [vmem:[#allocation55_spill] sm:$0xff] %v8419_v20 }
 0x205   :  { %v1169_v23 = vpop.f32.mrf.mxu1 }
 0x206   :  { %v1170_v54 = vadd.f32 %v1169_v23, %v8262_v62  ;;  %v8410_v56 = vadd.f32 %v8294_v28, %v1178_v33  ;;  %11831 = vst [vmem:[#allocation53_spill] sm:$0xff] %v8413_v41 }
 0x208   :  { %11830 = vst [vmem:[#allocation52_spill] sm:$0xff] %v8410_v56  ;;  %v8416_v42 = vadd.f32 %v8294_v28, %v1170_v54  ;;  %v1277_v32 = vpack.c.bf16 %v8410_v56, %v8419_v20 }
 0x20a   :  { %11832 = vst [vmem:[#allocation54_spill] sm:$0xff] %v8416_v42  ;;  %v8423_v61 = vpack.c.bf16 %v8416_v42, %v8413_v41 }
 0x20c   :  { %6975 = vmatprep.mubr.msk.bf16.mxu0 %vm1533_vm1, %v8423_v61 }
 0x20d   :  { %6976 = vmatmul.mubr.msk.bf16.gmra.mxu0 %vm1533_vm1, %v1277_v32 }
 0x20f   :  { %v6941_v38 = vpop.f32.mrf.mxu1 }
 0x210   :  { %v1191_v48 = vadd.f32 %v6941_v38, %v8264_v39 }
 0x211   :  { %v1182_v62 = vpop.f32.mrf.mxu1 }
 0x212   :  { %v1183_v30 = vadd.f32 %v1182_v62, %v8266_v60  ;;  %v8444_v41 = vadd.f32 %v8294_v28, %v1191_v48 }
 0x213   :  { %v6942_v31 = vpop.f32.mrf.mxu1 }
 0x214   :  { %v1194_v57 = vadd.f32 %v6942_v31, %v8268_v63  ;;  %v8438_v54 = vadd.f32 %v8294_v28, %v1183_v30  ;;  %11837 = vst [vmem:[#allocation59_spill] sm:$0xff] %v8444_v41 }
 0x215   :  { %v1185_v33 = vpop.f32.mrf.mxu1 }
 0x216   :  { %v1186_v29 = vadd.f32 %v1185_v33, %v8270_v12  ;;  %v8435_v23 = vadd.f32 %v8294_v28, %v1194_v57  ;;  %11835 = vst [vmem:[#allocation57_spill] sm:$0xff] %v8438_v54 }
 0x218   :  { %11834 = vst [vmem:[#allocation56_spill] sm:$0xff] %v8435_v23  ;;  %v8441_v42 = vadd.f32 %v8294_v28, %v1186_v29  ;;  %v1279_v39 = vpack.c.bf16 %v8435_v23, %v8444_v41 }
 0x21a   :  { %11836 = vst [vmem:[#allocation58_spill] sm:$0xff] %v8441_v42  ;;  %v1278_v60 = vpack.c.bf16 %v8441_v42, %v8438_v54 }
 0x21c   :  { %6979 = vmatprep.mubr.msk.bf16.mxu0 %vm1533_vm1, %v1278_v60 }
 0x21d   :  { %6980 = vmatmul.mubr.msk.bf16.gmra.mxu0 %vm1533_vm1, %v1279_v39 }
 0x21f   :  { %v6945_v63 = vpop.f32.mrf.mxu1 }
 0x220   :  { %v1207_v30 = vadd.f32 %v6945_v63, %v8272_v45 }
 0x221   :  { %v1198_v12 = vpop.f32.mrf.mxu1 }
 0x222   :  { %v1199_v62 = vadd.f32 %v1198_v12, %v8274_v43  ;;  %v8466_v20 = vadd.f32 %v8294_v28, %v1207_v30 }
 0x223   :  { %v6946_v38 = vpop.f32.mrf.mxu1 }
 0x224   :  { %v1210_v31 = vadd.f32 %v6946_v38, %v8276_v44  ;;  %v8460_v29 = vadd.f32 %v8294_v28, %v1199_v62  ;;  %11841 = vst [vmem:[#allocation63_spill] sm:$0xff] %v8466_v20 }
 0x225   :  { %v1201_v57 = vpop.f32.mrf.mxu1 }
 0x226   :  { %v1202_v48 = vadd.f32 %v1201_v57, %v8278_v25  ;;  %v8457_v33 = vadd.f32 %v8294_v28, %v1210_v31  ;;  %11839 = vst [vmem:[#allocation61_spill] sm:$0xff] %v8460_v29 }
 0x228   :  { %11838 = vst [vmem:[#allocation60_spill] sm:$0xff] %v8457_v33  ;;  %v8463_v56 = vadd.f32 %v8294_v28, %v1202_v48  ;;  %v1281_v43 = vpack.c.bf16 %v8457_v33, %v8466_v20 }
 0x22a   :  { %11840 = vst [vmem:[#allocation62_spill] sm:$0xff] %v8463_v56  ;;  %v1280_v44 = vpack.c.bf16 %v8463_v56, %v8460_v29 }
 0x22c   :  { %6983 = vmatprep.mubr.msk.bf16.mxu0 %vm1533_vm1, %v1280_v44 }
 0x22d   :  { %6984 = vmatmul.mubr.msk.bf16.gmra.mxu0 %vm1533_vm1, %v1281_v43 }
 0x22f   :  { %v6949_v25 = vpop.f32.mrf.mxu1 }
 0x230   :  { %v1223_v63 = vadd.f32 %v6949_v25, %v8280_v7  ;;  %v7505_v7 = vld [vmem:[%s11779_s20 + $0x10] ss:$8 sps:$4 sm:$0xff]  }
 0x231   :  { %v1214_v45 = vpop.f32.mrf.mxu1 }
 0x232   :  { %v1215_v38 = vadd.f32 %v1214_v45, %v8282_v51  ;;  %v8478_v30 = vadd.f32 %v8294_v28, %v1223_v63 }
 0x233   :  { %v6950_v12 = vpop.f32.mrf.mxu1 }
 0x234   :  { %v1226_v62 = vadd.f32 %v6950_v12, %v8284_v49  ;;  %11842 = vst [vmem:[#allocation64_spill] sm:$0xff] %v8478_v30  ;;  %v8485_v42 = vadd.f32 %v8294_v28, %v1215_v38 }
 0x235   :  { %v1217_v31 = vpop.f32.mrf.mxu1 }
 0x236   :  { %v8481_v57 = vadd.f32 %v8294_v28, %v1226_v62  ;;  %v1218_v48 = vadd.f32 %v1217_v31, %v8286_v37  ;;  %11844 = vst [vmem:[#allocation66_spill] sm:$0xff] %v8485_v42  ;;  %v7504_v37 = vld [vmem:[%s11779_s20 + $0x14] ss:$8 sps:$4 sm:$0xff]  }
 0x237   :  { %v11852_v31 = vld [vmem:[#allocation8_spill] sm:$0xff] }
 0x238   :  { %11843 = vst [vmem:[#allocation65_spill] sm:$0xff] %v8481_v57  ;;  %v8488_v54 = vadd.f32 %v8294_v28, %v1218_v48  ;;  %v1283_v51 = vpack.c.bf16 %v8481_v57, %v8478_v30  ;;  %v7503_v28 = vld [vmem:[%s11779_s20] ss:$8 sps:$4 sm:$0xff]  }
 0x23a   :  { %11845 = vst [vmem:[#allocation67_spill] sm:$0xff] %v8488_v54  ;;  %6275 = vmatprep.subr.bf16.mxu1 %v1283_v51  ;;  %v1282_v49 = vpack.c.bf16 %v8488_v54, %v8485_v42 }
 0x23b   :  { %6276 = vmatpush3.bf16.msra.mxu1 %v8399_v40 }
 0x23c   :  { %6277 = vmatprep.subr.bf16.mxu1 %v1282_v49  ;;  %6987 = vmatprep.mubr.msk.bf16.mxu0 %vm1533_vm1, %v1282_v49 }
 0x23d   :  { %6988 = vmatmul.mubr.msk.bf16.gmra.mxu0 %vm1533_vm1, %v1283_v51  ;;  %v11853_v51 = vld [vmem:[#allocation9_spill] sm:$0xff] }
 0x23f   :  { %6278 = vmatpush3.bf16.msra.mxu1 %v8395_v26 }
 0x240   :  { %6279 = vmatprep.subr.bf16.mxu1 %v1281_v43 }
 0x243   :  { %6280 = vmatpush3.bf16.msra.mxu1 %v8371_v2 }
 0x244   :  { %6281 = vmatprep.subr.bf16.mxu1 %v1280_v44 }
 0x247   :  { %6282 = vmatpush3.bf16.msra.mxu1 %v8367_v36  ;;  %v7510_v36 = vld [vmem:[%s11779_s20 + $0x44] ss:$8 sps:$4 sm:$0xff]  }
 0x248   :  { %6283 = vmatprep.subr.bf16.mxu1 %v1279_v39  ;;  %v11851_v39 = vld [vmem:[#allocation7_spill] sm:$0xff] }
 0x24b   :  { %6284 = vmatpush3.bf16.msra.mxu1 %v8343_v6  ;;  %v7509_v6 = vld [vmem:[%s11779_s20 + $0x30] ss:$8 sps:$4 sm:$0xff]  }
 0x24c   :  { %6285 = vmatprep.subr.bf16.mxu1 %v1278_v60 }
 0x24f   :  { %6286 = vmatpush3.bf16.msra.mxu1 %v8339_v55  ;;  %v7508_v55 = vld [vmem:[%s11779_s20 + $0x34] ss:$8 sps:$4 sm:$0xff]  }
 0x250   :  { %6287 = vmatprep.subr.bf16.mxu1 %v1277_v32  ;;  %v11850_v32 = vld [vmem:[#allocation6_spill] sm:$0xff] }
 0x253   :  { %6288 = vmatpush3.bf16.msra.mxu1 %v8315_v34  ;;  %v7506_v34 = vld [vmem:[%s11779_s20 + $0x24] ss:$8 sps:$4 sm:$0xff]  }
 0x254   :  { %6289 = vmatprep.subr.bf16.mxu1 %v8423_v61 }
 0x257   :  { %6290 = vmatpush3.bf16.msra.mxu1 %v8311_v35  ;;  %v7507_v35 = vld [vmem:[%s11779_s20 + $0x20] ss:$8 sps:$4 sm:$0xff]  }
 0x25a   :  { %1317 = vmatmul.mubr.bf16.vlgmr.msra.gmra.mxu1 %v7503_v28 }
 0x25b   :  { %1324 = vmatprep.mubr.bf16.mxu1 %v7504_v37 }
 0x262   :  { %1325 = vmatmul.mubr.bf16.gmra.mxu1 %v7505_v7 }
 0x263   :  { %1332 = vmatprep.mubr.bf16.mxu1 %v7506_v34 }
 0x26a   :  { %1333 = vmatmul.mubr.bf16.gmra.mxu1 %v7507_v35 }
 0x26b   :  { %1340 = vmatprep.mubr.bf16.mxu1 %v7508_v55 }
 0x272   :  { %1341 = vmatmul.mubr.bf16.gmra.mxu1 %v7509_v6 }
 0x273   :  { %1348 = vmatprep.mubr.bf16.mxu1 %v7510_v36  ;;  %v11854_v36 = vld [vmem:[#allocation10_spill] sm:$0xff] }
 0x27a   :  { %1349 = vmatmul.mubr.bf16.gmra.mxu1 %v7890_v46  ;;  %v7343_v46 = vld [vmem:[%s11662_s5 + $0x18] sm:$0xff]  }
 0x27b   :  { %1356 = vmatprep.mubr.bf16.mxu1 %v7895_v47  ;;  %6991 = vmatprep.subr.bf16.mxu0 %v7343_v46  ;;  %v7344_v47 = vld [vmem:[%s11662_s5 + $0x10] sm:$0xff]  }
 0x27c   :  { %6992 = vmatpush3.bf16.msra.mxu0 %v7343_v46 }
 0x27d   :  { %6993 = vmatprep.subr.bf16.mxu0 %v7344_v47 }
 0x280   :  { %6994 = vmatpush3.bf16.msra.mxu0 %v7344_v47  ;;  %v11855_v47 = vld [vmem:[#allocation11_spill] sm:$0xff] }
 0x282   :  { %1357 = vmatmul.mubr.bf16.gmra.mxu1 %v7918_v52  ;;  %v7345_v52 = vld [vmem:[%s11662_s5 + $0x8] sm:$0xff]  }
 0x283   :  { %1364 = vmatprep.mubr.bf16.mxu1 %v7923_v53  ;;  %6995 = vmatprep.subr.bf16.mxu0 %v7345_v52  ;;  %v7346_v53 = vld [vmem:[%s11662_s5] sm:$0xff]  }
 0x284   :  { %6996 = vmatpush3.bf16.msra.mxu0 %v7345_v52 }
 0x285   :  { %6997 = vmatprep.subr.bf16.mxu0 %v7346_v53 }
 0x288   :  { %6998 = vmatpush3.bf16.msra.mxu0 %v7346_v53 }
 0x28a   :  { %1365 = vmatmul.mubr.bf16.gmra.mxu1 %v7946_v58  ;;  %v11846_v58 = vld [vmem:[#allocation2_spill] sm:$0xff] }
 0x28b   :  { %1372 = vmatprep.mubr.bf16.mxu1 %v7951_v59  ;;  %v11847_v59 = vld [vmem:[#allocation3_spill] sm:$0xff] }
 0x292   :  { %1373 = vmatmul.mubr.bf16.gmra.mxu1 %v7974_v1  ;;  %v7511_v1 = vld [vmem:[%s11779_s20 + $0x4] ss:$8 sps:$4 sm:$0xff]  }
 0x293   :  { %1380 = vmatprep.mubr.bf16.mxu1 %v7979_v4 }
 0x29a   :  { %1381 = vmatmul.mubr.bf16.gmra.mxu1 %v7996_v8 }
 0x29b   :  { %1388 = vmatprep.mubr.bf16.mxu1 %v8001_v10 }
 0x2a2   :  { %1389 = vmatmul.mubr.bf16.gmra.mxu1 %v8012_v11 }
 0x2a3   :  { %1396 = vmatprep.mubr.bf16.mxu1 %v8017_v13 }
 0x2aa   :  { %1397 = vmatmul.mubr.bf16.gmra.mxu1 %v8031_v9 }
 0x2ab   :  { %1404 = vmatprep.mubr.bf16.mxu1 %v8036_v14 }
 0x2b2   :  { %1405 = vmatmul.mubr.bf16.gmra.mxu1 %v8048_v5  ;;  %v11848_v5 = vld [vmem:[#allocation4_spill] sm:$0xff] }
 0x2b3   :  { %1412 = vmatprep.mubr.bf16.mxu1 %v8053_v15 }
 0x2ba   :  { %1413 = vmatmul.mubr.bf16.gmra.mxu1 %v8060_v16  ;;  %v11849_v16 = vld [vmem:[#allocation5_spill] sm:$0xff] }
 0x2bb   :  { %1420 = vmatprep.mubr.bf16.mxu1 %v8065_v0 }
 0x2c2   :  { %1421 = vmatmul.mubr.bf16.gmra.mxu1 %v8072_v17 }
 0x2c3   :  { %1428 = vmatprep.mubr.bf16.mxu1 %v8077_v18 }
 0x2ca   :  { %1429 = vmatmul.mubr.bf16.gmra.mxu1 %v8084_v19 }
 0x2cb   :  { %1436 = vmatprep.mubr.bf16.mxu1 %v11846_v58 }
 0x2d2   :  { %1437 = vmatmul.mubr.bf16.gmra.mxu1 %v11847_v59 }
 0x2d3   :  { %2373 = vmatprep.mubr.bf16.mxu1 %v7511_v1 }
 0x31a   :  { %v6291_v4 = vpop.f32.mrf.mxu1 }
 0x31c   :  { %v6292_v8 = vpop.f32.mrf.mxu1 }
 0x31d   :  { %v6293_v11 = vadd.f32 %v6292_v8, %v6291_v4 }
 0x31e   :  { %v6294_v10 = vpop.f32.mrf.mxu1 }
 0x31f   :  { %v1445_v15 = vmul.f32 %v6293_v11, %v11848_v5  ;;  %v11856_v11 = vld [vmem:[#allocation12_spill] sm:$0xff] }
 0x320   :  { %v6295_v13 = vpop.f32.mrf.mxu1 }
 0x321   :  { %v6296_v9 = vadd.f32 %v6295_v13, %v6294_v10 }
 0x322   :  { %v6297_v14 = vpop.f32.mrf.mxu1 }
 0x323   :  { %v1446_v0 = vmul.f32 %v6296_v9, %v11849_v16  ;;  %v11857_v9 = vld [vmem:[#allocation13_spill] sm:$0xff] }
 0x324   :  { %v6298_v17 = vpop.f32.mrf.mxu1 }
 0x325   :  { %v1477_v18 = vpack.c.bf16 %v1446_v0, %v1445_v15  ;;  %v6299_v2 = vadd.f32 %v6298_v17, %v6297_v14 }
 0x326   :  { %v6300_v19 = vpop.f32.mrf.mxu1 }
 0x327   :  { %6999 = vmatprep.mubr.msk.bf16.mxu0 %vm1533_vm1, %v1477_v18  ;;  %v1447_v60 = vmul.f32 %v6299_v2, %v11850_v32 }
 0x328   :  { %v6301_v26 = vpop.f32.mrf.mxu1 }
 0x329   :  { %v6302_v40 = vadd.f32 %v6301_v26, %v6300_v19 }
 0x32a   :  { %v6303_v61 = vpop.f32.mrf.mxu1 }
 0x32b   :  { %v1448_v44 = vmul.f32 %v6302_v40, %v11851_v39  ;;  %v11858_v40 = vld [vmem:[#allocation14_spill] sm:$0xff] }
 0x32c   :  { %v6304_v43 = vpop.f32.mrf.mxu1 }
 0x32d   :  { %v1478_v25 = vpack.c.bf16 %v1448_v44, %v1447_v60  ;;  %v6305_v63 = vadd.f32 %v6304_v43, %v6303_v61  ;;  %v11859_v60 = vld [vmem:[#allocation15_spill] sm:$0xff] }
 0x32e   :  { %v6306_v45 = vpop.f32.mrf.mxu1 }
 0x32f   :  { %7000 = vmatmul.mubr.msk.bf16.vlgmr.msra.gmra.mxu0 %vm1533_vm1, %v1478_v25  ;;  %v1449_v48 = vmul.f32 %v6305_v63, %v11852_v31 }
 0x330   :  { %v6307_v12 = vpop.f32.mrf.mxu1 }
 0x331   :  { %v6308_v38 = vadd.f32 %v6307_v12, %v6306_v45 }
 0x332   :  { %v6309_v62 = vpop.f32.mrf.mxu1 }
 0x333   :  { %v1450_v49 = vmul.f32 %v6308_v38, %v11853_v51 }
 0x334   :  { %v6310_v28 = vpop.f32.mrf.mxu1 }
 0x335   :  { %v1479_v37 = vpack.c.bf16 %v1450_v49, %v1449_v48  ;;  %v6311_v34 = vadd.f32 %v6310_v28, %v6309_v62  ;;  %v11860_v48 = vld [vmem:[#allocation16_spill] sm:$0xff]  ;;  %v11861_v28 = vld [vmem:[#allocation17_spill] sm:$0xff] }
 0x336   :  { %v6312_v7 = vpop.f32.mrf.mxu1 }
 0x337   :  { %7003 = vmatprep.mubr.msk.bf16.mxu0 %vm1533_vm1, %v1479_v37  ;;  %v1451_v46 = vmul.f32 %v6311_v34, %v11854_v36 }
 0x338   :  { %v6313_v35 = vpop.f32.mrf.mxu1 }
 0x339   :  { %v6314_v55 = vadd.f32 %v6313_v35, %v6312_v7 }
 0x33a   :  { %v6315_v6 = vpop.f32.mrf.mxu1 }
 0x33b   :  { %v1452_v52 = vmul.f32 %v6314_v55, %v11855_v47 }
 0x33c   :  { %v6316_v53 = vpop.f32.mrf.mxu1 }
 0x33d   :  { %v1480_v58 = vpack.c.bf16 %v1452_v52, %v1451_v46  ;;  %v6317_v1 = vadd.f32 %v6316_v53, %v6315_v6  ;;  %v11862_v53 = vld [vmem:[#allocation18_spill] sm:$0xff] }
 0x33e   :  { %v6318_v59 = vpop.f32.mrf.mxu1 }
 0x33f   :  { %7004 = vmatmul.mubr.msk.bf16.gmra.mxu0 %vm1533_vm1, %v1480_v58  ;;  %v1453_v13 = vmul.f32 %v6317_v1, %v11856_v11 }
 0x340   :  { %v6319_v4 = vpop.f32.mrf.mxu1 }
 0x341   :  { %v6320_v8 = vadd.f32 %v6319_v4, %v6318_v59  ;;  %v11863_v59 = vld [vmem:[#allocation19_spill] sm:$0xff] }
 0x342   :  { %v6321_v10 = vpop.f32.mrf.mxu1 }
 0x343   :  { %v1454_v14 = vmul.f32 %v6320_v8, %v11857_v9 }
 0x344   :  { %v6322_v15 = vpop.f32.mrf.mxu1 }
 0x345   :  { %v1481_v0 = vpack.c.bf16 %v1454_v14, %v1453_v13  ;;  %v6323_v18 = vadd.f32 %v6322_v15, %v6321_v10 }
 0x346   :  { %v6324_v17 = vpop.f32.mrf.mxu1 }
 0x347   :  { %7007 = vmatprep.mubr.msk.bf16.mxu0 %vm1533_vm1, %v1481_v0  ;;  %v1455_v61 = vmul.f32 %v6323_v18, %v11858_v40 }
 0x348   :  { %v6325_v19 = vpop.f32.mrf.mxu1 }
 0x349   :  { %v6326_v2 = vadd.f32 %v6325_v19, %v6324_v17  ;;  %v11864_v17 = vld [vmem:[#allocation20_spill] sm:$0xff]  ;;  %v11865_v19 = vld [vmem:[#allocation21_spill] sm:$0xff] }
 0x34a   :  { %v6327_v26 = vpop.f32.mrf.mxu1 }
 0x34b   :  { %v1456_v44 = vmul.f32 %v6326_v2, %v11859_v60 }
 0x34c   :  { %v6328_v43 = vpop.f32.mrf.mxu1 }
 0x34d   :  { %v1482_v25 = vpack.c.bf16 %v1456_v44, %v1455_v61  ;;  %v6329_v63 = vadd.f32 %v6328_v43, %v6327_v26 }
 0x34e   :  { %v6330_v45 = vpop.f32.mrf.mxu1 }
 0x34f   :  { %7008 = vmatmul.mubr.msk.bf16.gmra.mxu0 %vm1533_vm1, %v1482_v25  ;;  %v1457_v49 = vmul.f32 %v6329_v63, %v11860_v48 }
 0x350   :  { %v6331_v12 = vpop.f32.mrf.mxu1 }
 0x351   :  { %v6332_v38 = vadd.f32 %v6331_v12, %v6330_v45  ;;  %v11866_v12 = vld [vmem:[#allocation22_spill] sm:$0xff] }
 0x352   :  { %v6333_v62 = vpop.f32.mrf.mxu1 }
 0x353   :  { %v1458_v37 = vmul.f32 %v6332_v38, %v11861_v28 }
 0x354   :  { %v6334_v7 = vpop.f32.mrf.mxu1 }
 0x355   :  { %v1483_v34 = vpack.c.bf16 %v1458_v37, %v1457_v49  ;;  %v6335_v55 = vadd.f32 %v6334_v7, %v6333_v62  ;;  %v11867_v62 = vld [vmem:[#allocation23_spill] sm:$0xff] }
 0x356   :  { %v6336_v35 = vpop.f32.mrf.mxu1 }
 0x357   :  { %7011 = vmatprep.mubr.msk.bf16.mxu0 %vm1533_vm1, %v1483_v34  ;;  %v1459_v58 = vmul.f32 %v6335_v55, %v11862_v53 }
 0x358   :  { %v6337_v6 = vpop.f32.mrf.mxu1 }
 0x359   :  { %v6338_v46 = vadd.f32 %v6337_v6, %v6336_v35 }
 0x35a   :  { %v6339_v52 = vpop.f32.mrf.mxu1 }
 0x35b   :  { %v1460_v1 = vmul.f32 %v6338_v46, %v11863_v59 }
 0x35c   :  { %v6340_v4 = vpop.f32.mrf.mxu1 }
 0x35d   :  { %v1484_v8 = vpack.c.bf16 %v1460_v1, %v1459_v58  ;;  %v6341_v13 = vadd.f32 %v6340_v4, %v6339_v52  ;;  %v11868_v52 = vld [vmem:[#allocation24_spill] sm:$0xff]  ;;  %v11869_v1 = vld [vmem:[#allocation25_spill] sm:$0xff] }
 0x35e   :  { %v6342_v10 = vpop.f32.mrf.mxu1 }
 0x35f   :  { %7012 = vmatmul.mubr.msk.bf16.gmra.mxu0 %vm1533_vm1, %v1484_v8  ;;  %v1461_v18 = vmul.f32 %v6341_v13, %v11864_v17 }
 0x360   :  { %v6343_v14 = vpop.f32.mrf.mxu1 }
 0x361   :  { %v6344_v15 = vadd.f32 %v6343_v14, %v6342_v10 }
 0x362   :  { %v6345_v0 = vpop.f32.mrf.mxu1 }
 0x363   :  { %v1462_v2 = vmul.f32 %v6344_v15, %v11865_v19 }
 0x364   :  { %v6346_v26 = vpop.f32.mrf.mxu1 }
 0x365   :  { %v1485_v61 = vpack.c.bf16 %v1462_v2, %v1461_v18  ;;  %v6347_v43 = vadd.f32 %v6346_v26, %v6345_v0  ;;  %v11870_v2 = vld [vmem:[#allocation26_spill] sm:$0xff] }
 0x366   :  { %v6348_v44 = vpop.f32.mrf.mxu1 }
 0x367   :  { %7015 = vmatprep.mubr.msk.bf16.mxu0 %vm1533_vm1, %v1485_v61  ;;  %v1463_v38 = vmul.f32 %v6347_v43, %v11866_v12  ;;  %v11871_v61 = vld [vmem:[#allocation27_spill] sm:$0xff] }
 0x368   :  { %v6349_v25 = vpop.f32.mrf.mxu1 }
 0x369   :  { %v6350_v45 = vadd.f32 %v6349_v25, %v6348_v44 }
 0x36a   :  { %v6351_v63 = vpop.f32.mrf.mxu1 }
 0x36b   :  { %v1464_v49 = vmul.f32 %v6350_v45, %v11867_v62 }
 0x36c   :  { %v6352_v37 = vpop.f32.mrf.mxu1 }
 0x36d   :  { %v1486_v7 = vpack.c.bf16 %v1464_v49, %v1463_v38  ;;  %v6353_v35 = vadd.f32 %v6352_v37, %v6351_v63 }
 0x36e   :  { %v6354_v34 = vpop.f32.mrf.mxu1 }
 0x36f   :  { %7016 = vmatmul.mubr.msk.bf16.gmra.mxu0 %vm1533_vm1, %v1486_v7  ;;  %v1465_v58 = vmul.f32 %v6353_v35, %v11868_v52  ;;  %v11872_v7 = vld [vmem:[#allocation28_spill] sm:$0xff]  ;;  %v11873_v35 = vld [vmem:[#allocation29_spill] sm:$0xff] }
 0x370   :  { %v6355_v55 = vpop.f32.mrf.mxu1 }
 0x371   :  { %v6356_v6 = vadd.f32 %v6355_v55, %v6354_v34 }
 0x372   :  { %v6357_v46 = vpop.f32.mrf.mxu1 }
 0x373   :  { %v1466_v4 = vmul.f32 %v6356_v6, %v11869_v1 }
 0x374   :  { %v6358_v8 = vpop.f32.mrf.mxu1 }
 0x375   :  { %v1487_v10 = vpack.c.bf16 %v1466_v4, %v1465_v58  ;;  %v6359_v14 = vadd.f32 %v6358_v8, %v6357_v46  ;;  %v8605_v4 = vpop.f32.mrf.mxu0 }
 0x376   :  { %v6360_v13 = vpop.f32.mrf.mxu1 }
 0x377   :  { %7019 = vmatprep.mubr.msk.bf16.mxu0 %vm1533_vm1, %v1487_v10  ;;  %v1467_v26 = vmul.f32 %v6359_v14, %v11870_v2 }
 0x378   :  { %v6361_v15 = vpop.f32.mrf.mxu1 }
 0x379   :  { %v6362_v0 = vadd.f32 %v6361_v15, %v6360_v13  ;;  %v1616_v15 = vpop.f32.mrf.mxu0 }
 0x37a   :  { %v6363_v18 = vpop.f32.mrf.mxu1 }
 0x37b   :  { %v1468_v44 = vmul.f32 %v6362_v0, %v11871_v61  ;;  %v11874_v0 = vld [vmem:[#allocation30_spill] sm:$0xff] }
 0x37c   :  { %v6364_v43 = vpop.f32.mrf.mxu1 }
 0x37d   :  { %v1488_v25 = vpack.c.bf16 %v1468_v44, %v1467_v26  ;;  %v6365_v63 = vadd.f32 %v6364_v43, %v6363_v18  ;;  %v11875_v26 = vld [vmem:[#allocation31_spill] sm:$0xff] }
 0x37e   :  { %v6366_v45 = vpop.f32.mrf.mxu1 }
 0x37f   :  { %7020 = vmatmul.mubr.msk.bf16.gmra.mxu0 %vm1533_vm1, %v1488_v25  ;;  %v1469_v34 = vmul.f32 %v6365_v63, %v11872_v7  ;;  %v8610_v63 = vpop.f32.mrf.mxu0 }
 0x380   :  { %v6367_v38 = vpop.f32.mrf.mxu1 }
 0x381   :  { %v6368_v49 = vadd.f32 %v6367_v38, %v6366_v45 }
 0x382   :  { %v6369_v37 = vpop.f32.mrf.mxu1 }
 0x383   :  { %v1470_v55 = vmul.f32 %v6368_v49, %v11873_v35 }
 0x384   :  { %v6370_v6 = vpop.f32.mrf.mxu1 }
 0x385   :  { %v1489_v46 = vpack.c.bf16 %v1470_v55, %v1469_v34  ;;  %v6371_v8 = vadd.f32 %v6370_v6, %v6369_v37  ;;  %v1619_v55 = vpop.f32.mrf.mxu0  ;;  %v11876_v6 = vld [vmem:[#allocation32_spill] sm:$0xff] }
 0x386   :  { %v6372_v58 = vpop.f32.mrf.mxu1 }
 0x387   :  { %7023 = vmatprep.mubr.msk.bf16.mxu0 %vm1533_vm1, %v1489_v46  ;;  %v1471_v18 = vmul.f32 %v6371_v8, %v11874_v0  ;;  %v8615_v8 = vpop.f32.mrf.mxu0 }
 0x388   :  { %v6373_v10 = vpop.f32.mrf.mxu1 }
 0x389   :  { %v6374_v13 = vadd.f32 %v6373_v10, %v6372_v58  ;;  %v11877_v58 = vld [vmem:[#allocation33_spill] sm:$0xff] }
 0x38a   :  { %v6375_v14 = vpop.f32.mrf.mxu1 }
 0x38b   :  { %v1472_v44 = vmul.f32 %v6374_v13, %v11875_v26 }
 0x38c   :  { %v6376_v43 = vpop.f32.mrf.mxu1 }
 0x38d   :  { %v1490_v25 = vpack.c.bf16 %v1472_v44, %v1471_v18  ;;  %v6377_v38 = vadd.f32 %v6376_v43, %v6375_v14  ;;  %v1632_v14 = vpop.f32.mrf.mxu0 }
 0x38e   :  { %v6378_v45 = vpop.f32.mrf.mxu1 }
 0x38f   :  { %7024 = vmatmul.mubr.msk.bf16.gmra.mxu0 %vm1533_vm1, %v1490_v25  ;;  %v1473_v46 = vmul.f32 %v6377_v38, %v11876_v6  ;;  %v11878_v25 = vld [vmem:[#allocation34_spill] sm:$0xff]  ;;  %v6966_v29 = vpop.f32.mrf.mxu0 }
 0x390   :  { %v6379_v49 = vpop.f32.mrf.mxu1 }
 0x391   :  { %v6380_v37 = vadd.f32 %v6379_v49, %v6378_v45  ;;  %v11879_v45 = vld [vmem:[#allocation35_spill] sm:$0xff]  ;;  %v1635_v38 = vpop.f32.mrf.mxu0 }
 0x392   :  { %v6381_v34 = vpop.f32.mrf.mxu1 }
 0x393   :  { %v1474_v10 = vmul.f32 %v6380_v37, %v11877_v58  ;;  %v8621_v37 = vpop.f32.mrf.mxu0 }
 0x394   :  { %v6382_v23 = vpop.f32.mrf.mxu1 }
 0x395   :  { %v1491_v13 = vpack.c.bf16 %v1474_v10, %v1473_v46  ;;  %v6383_v18 = vadd.f32 %v6382_v23, %v6381_v34  ;;  %v1648_v20 = vpop.f32.mrf.mxu0 }
 0x396   :  { %v6384_v41 = vpop.f32.mrf.mxu1 }
 0x397   :  { %7027 = vmatprep.mubr.msk.bf16.mxu0 %vm1533_vm1, %v1491_v13  ;;  %v1475_v56 = vmul.f32 %v6383_v18, %v11878_v25  ;;  %v8623_v46 = vpop.f32.mrf.mxu0 }
 0x398   :  { %v6385_v44 = vpop.f32.mrf.mxu1 }
 0x399   :  { %v6386_v43 = vadd.f32 %v6385_v44, %v6384_v41  ;;  %v1651_v23 = vpop.f32.mrf.mxu0 }
 0x39b   :  { %v1476_v49 = vmul.f32 %v6386_v43, %v11879_v45  ;;  %v8625_v34 = vpop.f32.mrf.mxu0 }
 0x39d   :  { %v1492_v33 = vpack.c.bf16 %v1476_v49, %v1475_v56  ;;  %v8627_v10 = vpop.f32.mrf.mxu0 }
 0x39f   :  { %7028 = vmatmul.mubr.msk.bf16.gmra.mxu0 %vm1533_vm1, %v1492_v33  ;;  %v8629_v41 = vpop.f32.mrf.mxu0 }
 0x3a1   :  { %v8631_v13 = vpop.f32.mrf.mxu0 }
 0x3a3   :  { %v8633_v18 = vpop.f32.mrf.mxu0 }
 0x3a5   :  { %v8635_v56 = vpop.f32.mrf.mxu0 }
 0x3a7   :  { %v8637_v33 = vpop.f32.mrf.mxu0 }
 0x3a9   :  { %v8639_v44 = vpop.f32.mrf.mxu0 }
 0x3ab   :  { %v8641_v43 = vpop.f32.mrf.mxu0 }
 0x3ad   :  { %v8643_v49 = vpop.f32.mrf.mxu0 }
 0x3af   :  { %v8645_v21 = vpop.f32.mrf.mxu0 }
 0x3b1   :  { %v8647_v27 = vpop.f32.mrf.mxu0 }
 0x3b3   :  { %v8649_v54 = vpop.f32.mrf.mxu0 }
 0x3b5   :  { %v8651_v42 = vpop.f32.mrf.mxu0 }
 0x3b7   :  { %v8653_v50 = vpop.f32.mrf.mxu0 }
 0x3b9   :  { %v8655_v22 = vpop.f32.mrf.mxu0 }
 0x3bb   :  { %v8657_v57 = vpop.f32.mrf.mxu0 }
 0x3bd   :  { %v8659_v30 = vpop.f32.mrf.mxu0 }
 0x3bf   :  { %v8661_v24 = vpop.f32.mrf.mxu0 }
 0x3c1   :  { %v8663_v3 = vpop.f32.mrf.mxu0 }
 0x3ef   :  { %v7001_v45 = vpop.f32.mrf.mxu0 }
 0x3f0   :  { %v8672_v62 = vadd.f32 %v7001_v45, %v8605_v4 }
 0x3f1   :  { %v1849_v25 = vpop.f32.mrf.mxu0 }
 0x3f2   :  { %v8667_v61 = vadd.f32 %v1849_v25, %v1616_v15  ;;  %v1979_v59 = vsel %vm1533_vm1, %v8672_v62, 0.0 }
 0x3f3   :  { %v7002_v58 = vpop.f32.mrf.mxu0 }
 0x3f4   :  { %v1976_v12 = vsel %vm1533_vm1, %v8667_v61, 0.0 }
 0x3f5   :  { %v1852_v6 = vpop.f32.mrf.mxu0 }
 0x3f6   :  { %v8665_v7 = vadd.f32 %v1852_v6, %v1619_v55  ;;  %v8679_v55 = vadd.f32 %v7002_v58, %v8610_v63 }
 0x3f8   :  { %v1977_v1 = vsel %vm1533_vm1, %v8665_v7, 0.0  ;;  %v1981_v4 = vsel %vm1533_vm1, %v8679_v55, 0.0 }
 0x3f9   :  { %v1978_v19 = vadd.f32 %v1977_v1, %v1976_v12 }
 0x3fb   :  { %v1980_v6 = vadd.f32 %v1979_v59, %v1978_v19 }
 0x3fd   :  { %v1982_v12 = vadd.f32 %v1981_v4, %v1980_v6 }
 0x3ff   :  { %v7005_v26 = vpop.f32.mrf.mxu0 }
 0x400   :  { %v8692_v63 = vadd.f32 %v7005_v26, %v8615_v8 }
 0x401   :  { %v1865_v0 = vpop.f32.mrf.mxu0 }
 0x402   :  { %v8681_v15 = vadd.f32 %v1865_v0, %v1632_v14  ;;  %v1987_v19 = vsel %vm1533_vm1, %v8692_v63, 0.0 }
 0x403   :  { %v7006_v35 = vpop.f32.mrf.mxu0 }
 0x404   :  { %v1983_v45 = vsel %vm1533_vm1, %v8681_v15, 0.0 }
 0x405   :  { %v1868_v2 = vpop.f32.mrf.mxu0  ;;  %v1984_v28 = vadd.f32 %v1983_v45, %v1982_v12 }
 0x406   :  { %v8683_v25 = vadd.f32 %v1868_v2, %v1635_v38  ;;  %v8696_v2 = vadd.f32 %v7006_v35, %v6966_v29 }
 0x408   :  { %v1985_v1 = vsel %vm1533_vm1, %v8683_v25, 0.0  ;;  %v1989_v4 = vsel %vm1533_vm1, %v8696_v2, 0.0 }
 0x409   :  { %v1986_v0 = vadd.f32 %v1985_v1, %v1984_v28 }
 0x40b   :  { %v1988_v14 = vadd.f32 %v1987_v19, %v1986_v0 }
 0x40d   :  { %v1990_v8 = vadd.f32 %v1989_v4, %v1988_v14 }
 0x40f   :  { %v7009_v52 = vpop.f32.mrf.mxu0 }
 0x410   :  { %v8709_v29 = vadd.f32 %v7009_v52, %v8621_v37 }
 0x411   :  { %v1881_v17 = vpop.f32.mrf.mxu0 }
 0x412   :  { %v8698_v58 = vadd.f32 %v1881_v17, %v1648_v20 }
 0x413   :  { %v7010_v53 = vpop.f32.mrf.mxu0 }
 0x414   :  { %v1991_v26 = vsel %vm1533_vm1, %v8698_v58, 0.0 }
 0x415   :  { %v1884_v48 = vpop.f32.mrf.mxu0  ;;  %v1992_v12 = vadd.f32 %v1991_v26, %v1990_v8 }
 0x416   :  { %v8700_v6 = vadd.f32 %v1884_v48, %v1651_v23  ;;  %v1995_v48 = vsel %vm1533_vm1, %v8709_v29, 0.0  ;;  %v8714_v23 = vadd.f32 %v7010_v53, %v8623_v46 }
 0x418   :  { %v1993_v45 = vsel %vm1533_vm1, %v8700_v6, 0.0  ;;  %v1997_v52 = vsel %vm1533_vm1, %v8714_v23, 0.0 }
 0x419   :  { %v1994_v20 = vadd.f32 %v1993_v45, %v1992_v12 }
 0x41b   :  { %v1996_v0 = vadd.f32 %v1995_v48, %v1994_v20 }
 0x41d   :  { %v1998_v4 = vadd.f32 %v1997_v52, %v1996_v0 }
 0x41f   :  { %v7013_v59 = vpop.f32.mrf.mxu0 }
 0x421   :  { %v1897_v38 = vpop.f32.mrf.mxu0 }
 0x422   :  { %v8717_v1 = vadd.f32 %v1897_v38, %v8627_v10  ;;  %v8729_v10 = vadd.f32 %v7013_v59, %v8625_v34 }
 0x423   :  { %v7014_v28 = vpop.f32.mrf.mxu0 }
 0x424   :  { %v1999_v37 = vsel %vm1533_vm1, %v8717_v1, 0.0  ;;  %v8734_v45 = vadd.f32 %v7014_v28, %v8629_v41 }
 0x425   :  { %v1900_v17 = vpop.f32.mrf.mxu0  ;;  %v2000_v53 = vadd.f32 %v1999_v37, %v1998_v4 }
 0x426   :  { %v8720_v19 = vadd.f32 %v1900_v17, %v8631_v13  ;;  %v2003_v13 = vsel %vm1533_vm1, %v8729_v10, 0.0  ;;  %v2005_v34 = vsel %vm1533_vm1, %v8734_v45, 0.0 }
 0x428   :  { %v2001_v26 = vsel %vm1533_vm1, %v8720_v19, 0.0 }
 0x429   :  { %v2002_v38 = vadd.f32 %v2001_v26, %v2000_v53 }
 0x42b   :  { %v2004_v20 = vadd.f32 %v2003_v13, %v2002_v38 }
 0x42d   :  { %v2006_v0 = vadd.f32 %v2005_v34, %v2004_v20 }
 0x42f   :  { %v7017_v35 = vpop.f32.mrf.mxu0 }
 0x431   :  { %v1913_v14 = vpop.f32.mrf.mxu0 }
 0x432   :  { %v8737_v12 = vadd.f32 %v1913_v14, %v8635_v56  ;;  %v8749_v56 = vadd.f32 %v7017_v35, %v8633_v18 }
 0x433   :  { %v7018_v46 = vpop.f32.mrf.mxu0 }
 0x434   :  { %v2007_v59 = vsel %vm1533_vm1, %v8737_v12, 0.0  ;;  %v2011_v4 = vsel %vm1533_vm1, %v8749_v56, 0.0  ;;  %v8754_v26 = vadd.f32 %v7018_v46, %v8637_v33 }
 0x435   :  { %v1916_v8 = vpop.f32.mrf.mxu0  ;;  %v2008_v28 = vadd.f32 %v2007_v59, %v2006_v0 }
 0x436   :  { %v8740_v17 = vadd.f32 %v1916_v8, %v8639_v44  ;;  %v2013_v13 = vsel %vm1533_vm1, %v8754_v26, 0.0 }
 0x438   :  { %v2009_v41 = vsel %vm1533_vm1, %v8740_v17, 0.0 }
 0x439   :  { %v2010_v14 = vadd.f32 %v2009_v41, %v2008_v28 }
 0x43b   :  { %v2012_v38 = vadd.f32 %v2011_v4, %v2010_v14 }
 0x43d   :  { %v2014_v35 = vadd.f32 %v2013_v13, %v2012_v38 }
 0x43f   :  { %v7021_v48 = vpop.f32.mrf.mxu0 }
 0x440   :  { %v8769_v46 = vadd.f32 %v7021_v48, %v8641_v43 }
 0x441   :  { %v1929_v52 = vpop.f32.mrf.mxu0 }
 0x442   :  { %v8757_v53 = vadd.f32 %v1929_v52, %v8643_v49 }
 0x443   :  { %v7022_v37 = vpop.f32.mrf.mxu0 }
 0x444   :  { %v2015_v18 = vsel %vm1533_vm1, %v8757_v53, 0.0  ;;  %v8774_v52 = vadd.f32 %v7022_v37, %v8645_v21 }
 0x445   :  { %v1932_v44 = vpop.f32.mrf.mxu0  ;;  %v2016_v34 = vadd.f32 %v2015_v18, %v2014_v35 }
 0x446   :  { %v8760_v8 = vadd.f32 %v1932_v44, %v8647_v27  ;;  %v2019_v27 = vsel %vm1533_vm1, %v8769_v46, 0.0  ;;  %v2021_v43 = vsel %vm1533_vm1, %v8774_v52, 0.0 }
 0x448   :  { %v2017_v20 = vsel %vm1533_vm1, %v8760_v8, 0.0 }
 0x449   :  { %v2018_v49 = vadd.f32 %v2017_v20, %v2016_v34 }
 0x44b   :  { %v2020_v28 = vadd.f32 %v2019_v27, %v2018_v49 }
 0x44d   :  { %v2022_v4 = vadd.f32 %v2021_v43, %v2020_v28 }
 0x44f   :  { %v7025_v33 = vpop.f32.mrf.mxu0 }
 0x450   :  { %v8789_v37 = vadd.f32 %v7025_v33, %v8649_v54 }
 0x451   :  { %v1945_v59 = vpop.f32.mrf.mxu0 }
 0x452   :  { %v8777_v41 = vadd.f32 %v1945_v59, %v8651_v42 }
 0x453   :  { %v7026_v0 = vpop.f32.mrf.mxu0 }
 0x454   :  { %v2023_v48 = vsel %vm1533_vm1, %v8777_v41, 0.0  ;;  %v8794_v18 = vadd.f32 %v7026_v0, %v8653_v50 }
 0x455   :  { %v1948_v14 = vpop.f32.mrf.mxu0  ;;  %v2024_v21 = vadd.f32 %v2023_v48, %v2022_v4 }
 0x456   :  { %v8780_v44 = vadd.f32 %v1948_v14, %v8655_v22  ;;  %v2027_v22 = vsel %vm1533_vm1, %v8789_v37, 0.0  ;;  %v2029_v59 = vsel %vm1533_vm1, %v8794_v18, 0.0 }
 0x458   :  { %v2025_v38 = vsel %vm1533_vm1, %v8780_v44, 0.0 }
 0x459   :  { %v2026_v42 = vadd.f32 %v2025_v38, %v2024_v21 }
 0x45b   :  { %v2028_v35 = vadd.f32 %v2027_v22, %v2026_v42  ;;  %v7348_v22 = vld [vmem:[%s11664_s8 + $0x30] sm:$0xff]  }
 0x45d   :  { %v2030_v33 = vadd.f32 %v2029_v59, %v2028_v35 }
 0x45f   :  { %v7029_v13 = vpop.f32.mrf.mxu0 }
 0x460   :  { %v8804_v28 = vadd.f32 %v7029_v13, %v8657_v57 }
 0x461   :  { %v1961_v20 = vpop.f32.mrf.mxu0 }
 0x462   :  { %v8797_v34 = vadd.f32 %v1961_v20, %v8659_v30  ;;  %v2035_v48 = vsel %vm1533_vm1, %v8804_v28, 0.0  ;;  %v7349_v20 = vld [vmem:[%s11664_s8 + $0x28] sm:$0xff]  }
 0x463   :  { %v7030_v49 = vpop.f32.mrf.mxu0 }
 0x464   :  { %v2031_v54 = vsel %vm1533_vm1, %v8797_v34, 0.0  ;;  %v8810_v14 = vadd.f32 %v7030_v49, %v8661_v24  ;;  %v7350_v49 = vld [vmem:[%s11664_s8 + $0x20] sm:$0xff]  }
 0x465   :  { %v1964_v27 = vpop.f32.mrf.mxu0  ;;  %v2032_v0 = vadd.f32 %v2031_v54, %v2030_v33 }
 0x466   :  { %v8807_v50 = vadd.f32 %v1964_v27, %v8663_v3  ;;  %v2037_v4 = vsel %vm1533_vm1, %v8810_v14, 0.0  ;;  %v7347_v3 = vld [vmem:[%s11664_s8 + $0x38] sm:$0xff]  }
 0x467   :  { %7031 = vmatprep.subr.bf16.mxu0 %v7347_v3 }
 0x468   :  { %v2033_v30 = vsel %vm1533_vm1, %v8807_v50, 0.0  ;;  %7032 = vmatpush3.bf16.msra.mxu0 %v7347_v3 }
 0x469   :  { %v2034_v43 = vadd.f32 %v2033_v30, %v2032_v0  ;;  %7033 = vmatprep.subr.bf16.mxu0 %v7348_v22 }
 0x46b   :  { %v2036_v38 = vadd.f32 %v2035_v48, %v2034_v43 }
 0x46c   :  { %7034 = vmatpush3.bf16.msra.mxu0 %v7348_v22 }
 0x46d   :  { %v2038_v57 = vadd.f32 %v2037_v4, %v2036_v38  ;;  %7035 = vmatprep.subr.bf16.mxu0 %v7349_v20 }
 0x46f   :  { %v2039_v24 = vrot.slane %v2038_v57, 4 }
 0x470   :  { %7036 = vmatpush3.bf16.msra.mxu0 %v7349_v20 }
 0x471   :  { %v2040_v21 = vadd.f32 %v2039_v24, %v2038_v57  ;;  %7037 = vmatprep.subr.bf16.mxu0 %v7350_v49 }
 0x473   :  { %v2041_v42 = vrot.slane %v2040_v21, 2 }
 0x474   :  { %7038 = vmatpush3.bf16.msra.mxu0 %v7350_v49 }
 0x475   :  { %v2042_v13 = vadd.f32 %v2041_v42, %v2040_v21 }
 0x477   :  { %v2043_v35 = vrot.slane %v2042_v13, 1 }
 0x479   :  { %v2044_v59 = vadd.f32 %v2043_v35, %v2042_v13 }
 0x47b   :  { %v8830_v54 = vmul.f32 0.00390625, %v2044_v59 }
 0x47d   :  { %v8834_v33 = vsub.f32 %v8667_v61, %v8830_v54  ;;  %v8838_v27 = vsub.f32 %v8665_v7, %v8830_v54  ;;  %v8842_v0 = vsub.f32 %v8672_v62, %v8830_v54  ;;  %v8846_v30 = vsub.f32 %v8679_v55, %v8830_v54 }
 0x47e   :  { %v8854_v61 = vsub.f32 %v8681_v15, %v8830_v54  ;;  %v8860_v62 = vsub.f32 %v8683_v25, %v8830_v54  ;;  %v8868_v57 = vsub.f32 %v8692_v63, %v8830_v54  ;;  %v8875_v25 = vsub.f32 %v8696_v2, %v8830_v54 }
 0x47f   :  { %v2079_v43 = vmul.f32 %v8834_v33, %v8834_v33  ;;  %v2080_v48 = vmul.f32 %v8838_v27, %v8838_v27  ;;  %v2081_v7 = vmul.f32 %v8842_v0, %v8842_v0  ;;  %v2082_v55 = vmul.f32 %v8846_v30, %v8846_v30 }
 0x480   :  { %v2083_v15 = vmul.f32 %v8854_v61, %v8854_v61  ;;  %v2084_v42 = vmul.f32 %v8860_v62, %v8860_v62  ;;  %v8882_v63 = vsub.f32 %v8698_v58, %v8830_v54  ;;  %v2085_v35 = vmul.f32 %v8868_v57, %v8868_v57 }
 0x481   :  { %v2111_v4 = vsel %vm1533_vm1, %v2079_v43, 0.0  ;;  %v2112_v38 = vsel %vm1533_vm1, %v2080_v48, 0.0  ;;  %v2114_v24 = vsel %vm1533_vm1, %v2081_v7, 0.0  ;;  %v2116_v13 = vsel %vm1533_vm1, %v2082_v55, 0.0 }
 0x482   :  { %v2113_v3 = vadd.f32 %v2112_v38, %v2111_v4  ;;  %v2118_v20 = vsel %vm1533_vm1, %v2083_v15, 0.0  ;;  %v8889_v2 = vsub.f32 %v8700_v6, %v8830_v54  ;;  %v2086_v59 = vmul.f32 %v8875_v25, %v8875_v25 }
 0x483   :  { %v2120_v43 = vsel %vm1533_vm1, %v2084_v42, 0.0  ;;  %v8896_v58 = vsub.f32 %v8709_v29, %v8830_v54  ;;  %v2087_v7 = vmul.f32 %v8882_v63, %v8882_v63  ;;  %v2122_v55 = vsel %vm1533_vm1, %v2085_v35, 0.0 }
 0x484   :  { %v2115_v21 = vadd.f32 %v2114_v24, %v2113_v3  ;;  %v8903_v6 = vsub.f32 %v8714_v23, %v8830_v54  ;;  %v2088_v38 = vmul.f32 %v8889_v2, %v8889_v2  ;;  %v2124_v3 = vsel %vm1533_vm1, %v2086_v59, 0.0 }
 0x485   :  { %v8910_v29 = vsub.f32 %v8717_v1, %v8830_v54  ;;  %v2089_v24 = vmul.f32 %v8896_v58, %v8896_v58  ;;  %v8917_v23 = vsub.f32 %v8720_v19, %v8830_v54  ;;  %v8924_v1 = vsub.f32 %v8729_v10, %v8830_v54 }
 0x486   :  { %v2117_v22 = vadd.f32 %v2116_v13, %v2115_v21  ;;  %v2126_v21 = vsel %vm1533_vm1, %v2087_v7, 0.0  ;;  %v2090_v13 = vmul.f32 %v8903_v6, %v8903_v6  ;;  %v8931_v19 = vsub.f32 %v8734_v45, %v8830_v54 }
 0x487   :  { %v8938_v10 = vsub.f32 %v8737_v12, %v8830_v54  ;;  %v8945_v45 = vsub.f32 %v8740_v17, %v8830_v54  ;;  %v8952_v12 = vsub.f32 %v8749_v56, %v8830_v54  ;;  %v8959_v17 = vsub.f32 %v8754_v26, %v8830_v54 }
 0x488   :  { %v2119_v49 = vadd.f32 %v2118_v20, %v2117_v22  ;;  %v2128_v22 = vsel %vm1533_vm1, %v2088_v38, 0.0  ;;  %v2091_v20 = vmul.f32 %v8910_v29, %v8910_v29  ;;  %v8966_v56 = vsub.f32 %v8757_v53, %v8830_v54 }
 0x489   :  { %v8973_v26 = vsub.f32 %v8760_v8, %v8830_v54  ;;  %v8980_v53 = vsub.f32 %v8769_v46, %v8830_v54  ;;  %v8987_v8 = vsub.f32 %v8774_v52, %v8830_v54  ;;  %v8994_v46 = vsub.f32 %v8777_v41, %v8830_v54 }
 0x48a   :  { %v2121_v48 = vadd.f32 %v2120_v43, %v2119_v49  ;;  %v2130_v49 = vsel %vm1533_vm1, %v2089_v24, 0.0  ;;  %v2092_v43 = vmul.f32 %v8917_v23, %v8917_v23  ;;  %v9001_v52 = vsub.f32 %v8780_v44, %v8830_v54 }
 0x48b   :  { %v9008_v41 = vsub.f32 %v8789_v37, %v8830_v54  ;;  %v9015_v44 = vsub.f32 %v8794_v18, %v8830_v54  ;;  %v9022_v37 = vsub.f32 %v8797_v34, %v8830_v54  ;;  %v2076_v18 = vsub.f32 %v8807_v50, %v8830_v54 }
 0x48c   :  { %v2123_v4 = vadd.f32 %v2122_v55, %v2121_v48  ;;  %v2132_v48 = vsel %vm1533_vm1, %v2090_v13, 0.0  ;;  %v2093_v55 = vmul.f32 %v8924_v1, %v8924_v1 }
 0x48d   :  { %v2107_v34 = vmul.f32 %v9022_v37, %v9022_v37 }
 0x48e   :  { %v2125_v15 = vadd.f32 %v2124_v3, %v2123_v4  ;;  %v2134_v4 = vsel %vm1533_vm1, %v2091_v20, 0.0  ;;  %v2094_v3 = vmul.f32 %v8931_v19, %v8931_v19 }
 0x490   :  { %v2127_v42 = vadd.f32 %v2126_v21, %v2125_v15  ;;  %v2136_v15 = vsel %vm1533_vm1, %v2092_v43, 0.0  ;;  %v2095_v21 = vmul.f32 %v8938_v10, %v8938_v10 }
 0x492   :  { %v2129_v35 = vadd.f32 %v2128_v22, %v2127_v42  ;;  %v2138_v42 = vsel %vm1533_vm1, %v2093_v55, 0.0  ;;  %v2096_v22 = vmul.f32 %v8945_v45, %v8945_v45 }
 0x494   :  { %v2131_v59 = vadd.f32 %v2130_v49, %v2129_v35  ;;  %v2140_v35 = vsel %vm1533_vm1, %v2094_v3, 0.0  ;;  %v2097_v49 = vmul.f32 %v8952_v12, %v8952_v12 }
 0x496   :  { %v2133_v7 = vadd.f32 %v2132_v48, %v2131_v59  ;;  %v2142_v59 = vsel %vm1533_vm1, %v2095_v21, 0.0  ;;  %v2098_v48 = vmul.f32 %v8959_v17, %v8959_v17 }
 0x498   :  { %v2135_v38 = vadd.f32 %v2134_v4, %v2133_v7  ;;  %v2144_v7 = vsel %vm1533_vm1, %v2096_v22, 0.0  ;;  %v2099_v4 = vmul.f32 %v8966_v56, %v8966_v56 }
 0x49a   :  { %v2137_v24 = vadd.f32 %v2136_v15, %v2135_v38  ;;  %v2146_v38 = vsel %vm1533_vm1, %v2097_v49, 0.0  ;;  %v2100_v15 = vmul.f32 %v8973_v26, %v8973_v26 }
 0x49c   :  { %v2139_v13 = vadd.f32 %v2138_v42, %v2137_v24  ;;  %v2148_v24 = vsel %vm1533_vm1, %v2098_v48, 0.0  ;;  %v2101_v42 = vmul.f32 %v8980_v53, %v8980_v53 }
 0x49e   :  { %v2141_v20 = vadd.f32 %v2140_v35, %v2139_v13  ;;  %v2150_v13 = vsel %vm1533_vm1, %v2099_v4, 0.0  ;;  %v2102_v35 = vmul.f32 %v8987_v8, %v8987_v8 }
 0x4a0   :  { %v2143_v43 = vadd.f32 %v2142_v59, %v2141_v20  ;;  %v2152_v20 = vsel %vm1533_vm1, %v2100_v15, 0.0  ;;  %v2103_v59 = vmul.f32 %v8994_v46, %v8994_v46 }
 0x4a2   :  { %v2145_v55 = vadd.f32 %v2144_v7, %v2143_v43  ;;  %v2154_v43 = vsel %vm1533_vm1, %v2101_v42, 0.0  ;;  %v2104_v7 = vmul.f32 %v9001_v52, %v9001_v52 }
 0x4a4   :  { %v2147_v3 = vadd.f32 %v2146_v38, %v2145_v55  ;;  %v2156_v55 = vsel %vm1533_vm1, %v2102_v35, 0.0  ;;  %v2105_v38 = vmul.f32 %v9008_v41, %v9008_v41 }
 0x4a6   :  { %v2149_v21 = vadd.f32 %v2148_v24, %v2147_v3  ;;  %v2158_v3 = vsel %vm1533_vm1, %v2103_v59, 0.0  ;;  %v2106_v24 = vmul.f32 %v9015_v44, %v9015_v44 }
 0x4a8   :  { %v2151_v22 = vadd.f32 %v2150_v13, %v2149_v21  ;;  %v2160_v21 = vsel %vm1533_vm1, %v2104_v7, 0.0  ;;  %v2077_v13 = vsub.f32 %v8804_v28, %v8830_v54  ;;  %v2164_v50 = vsel %vm1533_vm1, %v2106_v24, 0.0 }
 0x4aa   :  { %v2153_v49 = vadd.f32 %v2152_v20, %v2151_v22  ;;  %v2162_v22 = vsel %vm1533_vm1, %v2105_v38, 0.0  ;;  %v2078_v20 = vsub.f32 %v8810_v14, %v8830_v54 }
 0x4ac   :  { %v2155_v48 = vadd.f32 %v2154_v43, %v2153_v49  ;;  %v2108_v49 = vmul.f32 %v2076_v18, %v2076_v18  ;;  %v2109_v43 = vmul.f32 %v2077_v13, %v2077_v13 }
 0x4ae   :  { %v2157_v4 = vadd.f32 %v2156_v55, %v2155_v48  ;;  %v2166_v48 = vsel %vm1533_vm1, %v2107_v34, 0.0  ;;  %v2110_v55 = vmul.f32 %v2078_v20, %v2078_v20  ;;  %v2168_v28 = vsel %vm1533_vm1, %v2108_v49, 0.0  ;;  %v6003_v34 = vld [vmem:[%s11665_s6] ss:$0 sm:$0xff] }
 0x4af   :  { %v2217_v49 = vmul.f32 %v6003_v34, %v2076_v18  ;;  %v2197_v18 = vmul.f32 %v6003_v34, %v8889_v2  ;;  %v2207_v2 = vmul.f32 %v6003_v34, %v8959_v17  ;;  %v2218_v17 = vmul.f32 %v6003_v34, %v2077_v13 }
 0x4b0   :  { %v2159_v15 = vadd.f32 %v2158_v3, %v2157_v4  ;;  %v2170_v3 = vsel %vm1533_vm1, %v2109_v43, 0.0  ;;  %v2172_v38 = vsel %vm1533_vm1, %v2110_v55, 0.0  ;;  %v2189_v43 = vmul.f32 %v6003_v34, %v8838_v27 }
 0x4b1   :  { %v2192_v55 = vmul.f32 %v6003_v34, %v8854_v61  ;;  %v2199_v27 = vmul.f32 %v6003_v34, %v8903_v6  ;;  %v2202_v61 = vmul.f32 %v6003_v34, %v8924_v1  ;;  %v2209_v6 = vmul.f32 %v6003_v34, %v8973_v26 }
 0x4b2   :  { %v2161_v42 = vadd.f32 %v2160_v21, %v2159_v15  ;;  %v2212_v1 = vmul.f32 %v6003_v34, %v8994_v46 }
 0x4b4   :  { %v2163_v35 = vadd.f32 %v2162_v22, %v2161_v42 }
 0x4b6   :  { %v2165_v59 = vadd.f32 %v2164_v50, %v2163_v35 }
 0x4b8   :  { %v2167_v7 = vadd.f32 %v2166_v48, %v2165_v59  ;;  %v2188_v59 = vmul.f32 %v6003_v34, %v8834_v33  ;;  %v2190_v48 = vmul.f32 %v6003_v34, %v8842_v0  ;;  %v2198_v33 = vmul.f32 %v6003_v34, %v8896_v58 }
 0x4b9   :  { %v2200_v0 = vmul.f32 %v6003_v34, %v8910_v29  ;;  %v2208_v58 = vmul.f32 %v6003_v34, %v8966_v56  ;;  %v2210_v29 = vmul.f32 %v6003_v34, %v8980_v53 }
 0x4ba   :  { %v2169_v4 = vadd.f32 %v2168_v28, %v2167_v7  ;;  %v2191_v7 = vmul.f32 %v6003_v34, %v8846_v30  ;;  %v2193_v28 = vmul.f32 %v6003_v34, %v8860_v62  ;;  %v2201_v30 = vmul.f32 %v6003_v34, %v8917_v23 }
 0x4bb   :  { %v2203_v62 = vmul.f32 %v6003_v34, %v8931_v19  ;;  %v2211_v23 = vmul.f32 %v6003_v34, %v8987_v8  ;;  %v2213_v19 = vmul.f32 %v6003_v34, %v9001_v52 }
 0x4bc   :  { %v2171_v15 = vadd.f32 %v2170_v3, %v2169_v4  ;;  %v2194_v4 = vmul.f32 %v6003_v34, %v8868_v57  ;;  %v2196_v3 = vmul.f32 %v6003_v34, %v8882_v63  ;;  %v2204_v57 = vmul.f32 %v6003_v34, %v8938_v10 }
 0x4bd   :  { %v2206_v63 = vmul.f32 %v6003_v34, %v8952_v12  ;;  %v2214_v10 = vmul.f32 %v6003_v34, %v9008_v41  ;;  %v2216_v12 = vmul.f32 %v6003_v34, %v9022_v37 }
 0x4be   :  { %v2173_v21 = vadd.f32 %v2172_v38, %v2171_v15  ;;  %v2219_v38 = vmul.f32 %v6003_v34, %v2078_v20 }
 0x4c0   :  { %v2174_v42 = vrot.slane %v2173_v21, 4 }
 0x4c2   :  { %v2175_v14 = vadd.f32 %v2174_v42, %v2173_v21 }
 0x4c4   :  { %v2176_v54 = vrot.slane %v2175_v14, 2 }
 0x4c6   :  { %v2177_v22 = vadd.f32 %v2176_v54, %v2175_v14 }
 0x4c8   :  { %v2178_v24 = vrot.slane %v2177_v22, 1 }
 0x4ca   :  { %v2179_v35 = vadd.f32 %v2178_v24, %v2177_v22 }
 0x4cc   :  { %v2180_v50 = vmul.f32 0.00390625, %v2179_v35 }
 0x4ce   :  { %v2220_v60 = vadd.f32 1e-05, %v2180_v50 }
 0x4d0   :  { %7367 = vrsqrt.f32 %v2220_v60  ;;  %v2195_v60 = vmul.f32 %v6003_v34, %v8875_v25  ;;  %v2205_v25 = vmul.f32 %v6003_v34, %v8945_v45  ;;  %v2215_v45 = vmul.f32 %v6003_v34, %v9015_v44 }
 0x4dd   :  { %v7368_v15 = vpop.eup %7367 }
 0x4de   :  { %v9076_v56 = vmul.f32 %v7368_v15, %v2217_v49  ;;  %v2222_v26 = vmul.f32 %v7368_v15, %v2188_v59  ;;  %v2223_v21 = vmul.f32 %v7368_v15, %v2189_v43  ;;  %v2224_v53 = vmul.f32 %v7368_v15, %v2190_v48  ;;  %v9087_v49 = vld [vmem:[%s11666_s7] ss:$0 sm:$0xff] }
 0x4df   :  { %v2225_v42 = vmul.f32 %v7368_v15, %v2191_v7  ;;  %v2226_v8 = vmul.f32 %v7368_v15, %v2192_v55  ;;  %v2227_v14 = vmul.f32 %v7368_v15, %v2193_v28  ;;  %v2228_v46 = vmul.f32 %v7368_v15, %v2194_v4 }
 0x4e0   :  { %v2229_v54 = vmul.f32 %v7368_v15, %v2195_v60  ;;  %v2230_v52 = vmul.f32 %v7368_v15, %v2196_v3  ;;  %v2231_v22 = vmul.f32 %v7368_v15, %v2197_v18  ;;  %v2232_v41 = vmul.f32 %v7368_v15, %v2198_v33 }
 0x4e1   :  { %v2233_v24 = vmul.f32 %v7368_v15, %v2199_v27  ;;  %v2234_v35 = vmul.f32 %v7368_v15, %v2200_v0  ;;  %v2235_v44 = vmul.f32 %v7368_v15, %v2201_v30  ;;  %v2236_v50 = vmul.f32 %v7368_v15, %v2202_v61 }
 0x4e2   :  { %v2237_v37 = vmul.f32 %v7368_v15, %v2203_v62  ;;  %v9078_v13 = vmul.f32 %v7368_v15, %v2204_v57  ;;  %v9080_v20 = vmul.f32 %v7368_v15, %v2205_v25  ;;  %v9082_v34 = vmul.f32 %v7368_v15, %v2206_v63 }
 0x4e3   :  { %v9089_v59 = vmul.f32 %v7368_v15, %v2207_v2  ;;  %v9091_v43 = vmul.f32 %v7368_v15, %v2208_v58  ;;  %v9093_v48 = vmul.f32 %v7368_v15, %v2209_v6  ;;  %v9095_v7 = vmul.f32 %v7368_v15, %v2210_v29 }
 0x4e4   :  { %v9097_v55 = vmul.f32 %v7368_v15, %v2211_v23  ;;  %v2246_v28 = vmul.f32 %v7368_v15, %v2212_v1  ;;  %v2247_v4 = vmul.f32 %v7368_v15, %v2213_v19  ;;  %v2248_v60 = vmul.f32 %v7368_v15, %v2214_v10 }
 0x4e5   :  { %v2249_v3 = vmul.f32 %v7368_v15, %v2215_v45  ;;  %v2250_v18 = vmul.f32 %v7368_v15, %v2216_v12  ;;  %v2252_v33 = vmul.f32 %v7368_v15, %v2218_v17  ;;  %v2253_v27 = vmul.f32 %v7368_v15, %v2219_v38 }
 0x4e6   :  { %v2261_v0 = vadd.f32 %v9087_v49, %v2222_v26  ;;  %v2262_v30 = vadd.f32 %v9087_v49, %v2223_v21  ;;  %v2263_v61 = vadd.f32 %v9087_v49, %v2224_v53  ;;  %v2264_v62 = vadd.f32 %v9087_v49, %v2225_v42 }
 0x4e7   :  { %v2265_v57 = vadd.f32 %v9087_v49, %v2226_v8  ;;  %v2266_v25 = vadd.f32 %v9087_v49, %v2227_v14  ;;  %v2267_v63 = vadd.f32 %v9087_v49, %v2228_v46  ;;  %v2268_v2 = vadd.f32 %v9087_v49, %v2229_v54 }
 0x4e8   :  { %v2269_v58 = vadd.f32 %v9087_v49, %v2230_v52  ;;  %v2270_v6 = vadd.f32 %v9087_v49, %v2231_v22  ;;  %v2271_v29 = vadd.f32 %v9087_v49, %v2232_v41  ;;  %v2272_v23 = vadd.f32 %v9087_v49, %v2233_v24 }
 0x4e9   :  { %v2273_v1 = vadd.f32 %v9087_v49, %v2234_v35  ;;  %v2274_v19 = vadd.f32 %v9087_v49, %v2235_v44  ;;  %v2275_v10 = vadd.f32 %v9087_v49, %v2236_v50  ;;  %v2276_v15 = vadd.f32 %v9087_v49, %v2237_v37 }
 0x4ea   :  { %v2293_v45 = vmax.f32 %v2261_v0, 0.0  ;;  %v2295_v12 = vmax.f32 %v2263_v61, 0.0  ;;  %v2296_v17 = vmax.f32 %v2264_v62, 0.0  ;;  %v2297_v38 = vmax.f32 %v2265_v57, 0.0 }
 0x4eb   :  { %v2299_v26 = vmax.f32 %v2267_v63, 0.0  ;;  %v2300_v21 = vmax.f32 %v2268_v2, 0.0  ;;  %v2301_v53 = vmax.f32 %v2269_v58, 0.0  ;;  %v2303_v42 = vmax.f32 %v2271_v29, 0.0 }
 0x4ec   :  { %v2304_v8 = vmax.f32 %v2272_v23, 0.0  ;;  %v2305_v14 = vmax.f32 %v2273_v1, 0.0  ;;  %v2307_v46 = vmax.f32 %v2275_v10, 0.0  ;;  %v2308_v54 = vmax.f32 %v2276_v15, 0.0 }
 0x4ed   :  { %v9115_v52 = vpack.c.bf16 %v2296_v17, %v2295_v12  ;;  %v9117_v22 = vpack.c.bf16 %v2300_v21, %v2299_v26  ;;  %v2291_v41 = vadd.f32 %v9087_v49, %v2252_v33  ;;  %v2292_v24 = vadd.f32 %v9087_v49, %v2253_v27 }
 0x4ee   :  { %v2294_v35 = vmax.f32 %v2262_v30, 0.0  ;;  %v9121_v44 = vpack.c.bf16 %v2308_v54, %v2307_v46  ;;  %v2289_v50 = vadd.f32 %v9087_v49, %v2250_v18  ;;  %v2290_v37 = vadd.f32 %v9087_v49, %v9076_v56 }
 0x4ef   :  { %v2323_v0 = vmax.f32 %v2291_v41, 0.0  ;;  %v2324_v61 = vmax.f32 %v2292_v24, 0.0  ;;  %v2298_v62 = vmax.f32 %v2266_v25, 0.0  ;;  %v2306_v57 = vmax.f32 %v2274_v19, 0.0 }
 0x4f0   :  { %v9126_v63 = vpack.c.bf16 %v2294_v35, %v2293_v45  ;;  %v2321_v2 = vmax.f32 %v2289_v50, 0.0  ;;  %v2322_v58 = vmax.f32 %v2290_v37, 0.0  ;;  %v2287_v33 = vadd.f32 %v9087_v49, %v2248_v60  ;;  %v7519_v50 = vld [vmem:[%s11779_s20 + $0x44] ss:$8 sps:$4 sm:$0xff]   ;;  %v7520_v37 = vld [vmem:[%s11779_s20 + $0x40] ss:$8 sps:$4 sm:$0xff]  }
 0x4f1   :  { %v9129_v29 = vpack.c.bf16 %v2324_v61, %v2323_v0  ;;  %v2327_v27 = vpack.c.bf16 %v2298_v62, %v2297_v38  ;;  %v2331_v30 = vpack.c.bf16 %v2306_v57, %v2305_v14  ;;  %v2288_v23 = vadd.f32 %v9087_v49, %v2249_v3  ;;  %v7521_v0 = vld [vmem:[%s11779_s20 + $0x54] ss:$8 sps:$4 sm:$0xff]   ;;  %v7522_v61 = vld [vmem:[%s11779_s20 + $0x50] ss:$8 sps:$4 sm:$0xff]   ;;  %v7523_v62 = vld [vmem:[%s11779_s20 + $0x64] ss:$8 sps:$4 sm:$0xff]  }
 0x4f2   :  { %7039 = vmatprep.mubr.msk.bf16.mxu0 %vm1533_vm1, %v9126_v63  ;;  %v9134_v56 = vpack.c.bf16 %v2322_v58, %v2321_v2  ;;  %v2319_v18 = vmax.f32 %v2287_v33, 0.0  ;;  %v2330_v25 = vpack.c.bf16 %v2304_v8, %v2303_v42  ;;  %v2285_v1 = vadd.f32 %v9087_v49, %v2246_v28  ;;  %v7524_v57 = vld [vmem:[%s11779_s20 + $0x60] ss:$8 sps:$4 sm:$0xff]   ;;  %v7526_v2 = vld [vmem:[%s11779_s20 + $0x70] ss:$8 sps:$4 sm:$0xff]  }
 0x4f3   :  { %6427 = vmatprep.subr.bf16.mxu1 %v9129_v29  ;;  %7040 = vmatmul.mubr.msk.bf16.vlgmr.msra.gmra.mxu0 %vm1533_vm1, %v9115_v52  ;;  %v2320_v60 = vmax.f32 %v2288_v23, 0.0  ;;  %v2286_v19 = vadd.f32 %v9087_v49, %v2247_v4  ;;  %v2302_v10 = vmax.f32 %v2270_v6, 0.0  ;;  %v2283_v3 = vadd.f32 %v9087_v49, %v9095_v7  ;;  %v7527_v58 = vld [vmem:[%s11779_s20 + $0x84] ss:$8 sps:$4 sm:$0xff]   ;;  %v7528_v33 = vld [vmem:[%s11779_s20 + $0x80] ss:$8 sps:$4 sm:$0xff]  }
 0x4f4   :  { %6428 = vmatpush3.bf16.msra.mxu1 %v9121_v44  ;;  %7043 = vmatprep.mubr.msk.bf16.mxu0 %vm1533_vm1, %v2327_v27  ;;  %v2317_v15 = vmax.f32 %v2285_v1, 0.0  ;;  %v2284_v28 = vadd.f32 %v9087_v49, %v9097_v55  ;;  %v2281_v45 = vadd.f32 %v9087_v49, %v9091_v43  ;;  %v2282_v12 = vadd.f32 %v9087_v49, %v9093_v48  ;;  %v7531_v23 = vld [vmem:[%s11779_s20 + $0xa4] ss:$8 sps:$4 sm:$0xff]   ;;  %v7533_v1 = vld [vmem:[%s11779_s20 + $0xb4] ss:$8 sps:$4 sm:$0xff]  }
 0x4f5   :  { %6429 = vmatprep.subr.bf16.mxu1 %v9134_v56  ;;  %v2338_v4 = vpack.c.bf16 %v2320_v60, %v2319_v18  ;;  %v2318_v6 = vmax.f32 %v2286_v19, 0.0  ;;  %v2329_v17 = vpack.c.bf16 %v2302_v10, %v2301_v53  ;;  %v2315_v7 = vmax.f32 %v2283_v3, 0.0  ;;  %v7353_v18 = vld [vmem:[%s11664_s8 + $0x8] sm:$0xff]   ;;  %v7354_v60 = vld [vmem:[%s11664_s8] sm:$0xff]   ;;  %v7534_v19 = vld [vmem:[%s11779_s20 + $0xb0] ss:$8 sps:$4 sm:$0xff]  }
 0x4f6   :  { %v2316_v38 = vmax.f32 %v2284_v28, 0.0  ;;  %v2313_v26 = vmax.f32 %v2281_v45, 0.0  ;;  %v2314_v21 = vmax.f32 %v2282_v12, 0.0  ;;  %v2279_v42 = vadd.f32 %v9087_v49, %v9082_v34  ;;  %v7535_v10 = vld [vmem:[%s11779_s20 + $0xc4] ss:$8 sps:$4 sm:$0xff]  }
 0x4f7   :  { %v2337_v8 = vpack.c.bf16 %v2318_v6, %v2317_v15  ;;  %v2280_v55 = vadd.f32 %v9087_v49, %v9089_v59  ;;  %v2277_v43 = vadd.f32 %v9087_v49, %v9078_v13  ;;  %v2278_v48 = vadd.f32 %v9087_v49, %v9080_v20  ;;  %v7512_v13 = vld [vmem:[%s11779_s20] ss:$8 sps:$4 sm:$0xff]   ;;  %v7513_v20 = vld [vmem:[%s11779_s20 + $0x14] ss:$8 sps:$4 sm:$0xff]   ;;  %v7514_v49 = vld [vmem:[%s11779_s20 + $0x10] ss:$8 sps:$4 sm:$0xff]  }
 0x4f8   :  { %6430 = vmatpush3.bf16.msra.mxu1 %v2331_v30  ;;  %v2336_v14 = vpack.c.bf16 %v2316_v38, %v2315_v7  ;;  %v2335_v53 = vpack.c.bf16 %v2314_v21, %v2313_v26  ;;  %v2311_v46 = vmax.f32 %v2279_v42, 0.0  ;;  %v7515_v59 = vld [vmem:[%s11779_s20 + $0x24] ss:$8 sps:$4 sm:$0xff]   ;;  %v7536_v3 = vld [vmem:[%s11779_s20 + $0xc0] ss:$8 sps:$4 sm:$0xff]  }
 0x4f9   :  { %6431 = vmatprep.subr.bf16.mxu1 %v2338_v4  ;;  %v2312_v54 = vmax.f32 %v2280_v55, 0.0  ;;  %v2309_v41 = vmax.f32 %v2277_v43, 0.0  ;;  %v2310_v24 = vmax.f32 %v2278_v48, 0.0  ;;  %v7537_v15 = vld [vmem:[%s11779_s20 + $0xd4] ss:$8 sps:$4 sm:$0xff]  }
 0x4fa   :  { %v7538_v28 = vld [vmem:[%s11779_s20 + $0xd0] ss:$8 sps:$4 sm:$0xff]   ;;  %v7539_v45 = vld [vmem:[%s11779_s20 + $0xe4] ss:$8 sps:$4 sm:$0xff]   ;;  %v7540_v12 = vld [vmem:[%s11779_s20 + $0xe0] ss:$8 sps:$4 sm:$0xff]  }
 0x4fb   :  { %7044 = vmatmul.mubr.msk.bf16.gmra.mxu0 %vm1533_vm1, %v9117_v22  ;;  %v2334_v34 = vpack.c.bf16 %v2312_v54, %v2311_v46  ;;  %v2333_v35 = vpack.c.bf16 %v2310_v24, %v2309_v41  ;;  %v7542_v6 = vld [vmem:[%s11779_s20 + $0xf0] ss:$8 sps:$4 sm:$0xff]  }
 0x4fc   :  { %6432 = vmatpush3.bf16.msra.mxu1 %v2330_v25  ;;  %7047 = vmatprep.mubr.msk.bf16.mxu0 %vm1533_vm1, %v2329_v17 }
 0x4fd   :  { %6433 = vmatprep.subr.bf16.mxu1 %v2337_v8 }
 0x500   :  { %6434 = vmatpush3.bf16.msra.mxu1 %v2329_v17  ;;  %v7543_v17 = vld [vmem:[%s11779_s20 + $0x4] ss:$8 sps:$4 sm:$0xff]  }
 0x501   :  { %6435 = vmatprep.subr.bf16.mxu1 %v2336_v14 }
 0x503   :  { %7048 = vmatmul.mubr.msk.bf16.gmra.mxu0 %vm1533_vm1, %v2330_v25  ;;  %v7532_v25 = vld [vmem:[%s11779_s20 + $0xa0] ss:$8 sps:$4 sm:$0xff]  }
 0x504   :  { %6436 = vmatpush3.bf16.msra.mxu1 %v9117_v22  ;;  %7051 = vmatprep.mubr.msk.bf16.mxu0 %vm1533_vm1, %v2331_v30  ;;  %v7517_v22 = vld [vmem:[%s11779_s20 + $0x34] ss:$8 sps:$4 sm:$0xff]   ;;  %v7530_v30 = vld [vmem:[%s11779_s20 + $0x90] ss:$8 sps:$4 sm:$0xff]  }
 0x505   :  { %6437 = vmatprep.subr.bf16.mxu1 %v2335_v53 }
 0x508   :  { %6438 = vmatpush3.bf16.msra.mxu1 %v2327_v27  ;;  %v7351_v27 = vld [vmem:[%s11664_s8 + $0x18] sm:$0xff]  }
 0x509   :  { %6439 = vmatprep.subr.bf16.mxu1 %v2334_v34  ;;  %7071 = vmatprep.subr.bf16.mxu0 %v7351_v27 }
 0x50a   :  { %7072 = vmatpush3.bf16.msra.mxu0 %v7351_v27 }
 0x50b   :  { %7052 = vmatmul.mubr.msk.bf16.gmra.mxu0 %vm1533_vm1, %v9121_v44  ;;  %v7518_v44 = vld [vmem:[%s11779_s20 + $0x30] ss:$8 sps:$4 sm:$0xff]  }
 0x50c   :  { %6440 = vmatpush3.bf16.msra.mxu1 %v9115_v52  ;;  %7055 = vmatprep.mubr.msk.bf16.mxu0 %vm1533_vm1, %v2333_v35  ;;  %v7516_v52 = vld [vmem:[%s11779_s20 + $0x20] ss:$8 sps:$4 sm:$0xff]  }
 0x50d   :  { %6441 = vmatprep.subr.bf16.mxu1 %v2333_v35 }
 0x510   :  { %6442 = vmatpush3.bf16.msra.mxu1 %v9126_v63  ;;  %v7525_v63 = vld [vmem:[%s11779_s20 + $0x74] ss:$8 sps:$4 sm:$0xff]  }
 0x513   :  { %2374 = vmatmul.mubr.bf16.vlgmr.msra.gmra.mxu1 %v7512_v13  ;;  %7056 = vmatmul.mubr.msk.bf16.gmra.mxu0 %vm1533_vm1, %v2334_v34 }
 0x514   :  { %7059 = vmatprep.mubr.msk.bf16.mxu0 %vm1533_vm1, %v2335_v53  ;;  %2381 = vmatprep.mubr.bf16.mxu1 %v7513_v20 }
 0x51b   :  { %2382 = vmatmul.mubr.bf16.gmra.mxu1 %v7514_v49  ;;  %7060 = vmatmul.mubr.msk.bf16.gmra.mxu0 %vm1533_vm1, %v2336_v14 }
 0x51c   :  { %7063 = vmatprep.mubr.msk.bf16.mxu0 %vm1533_vm1, %v2337_v8  ;;  %2389 = vmatprep.mubr.bf16.mxu1 %v7515_v59 }
 0x523   :  { %2390 = vmatmul.mubr.bf16.gmra.mxu1 %v7516_v52  ;;  %7064 = vmatmul.mubr.msk.bf16.gmra.mxu0 %vm1533_vm1, %v2338_v4  ;;  %v7541_v4 = vld [vmem:[%s11779_s20 + $0xf4] ss:$8 sps:$4 sm:$0xff]  }
 0x524   :  { %7067 = vmatprep.mubr.msk.bf16.mxu0 %vm1533_vm1, %v9134_v56  ;;  %2397 = vmatprep.mubr.bf16.mxu1 %v7517_v22  ;;  %v7352_v56 = vld [vmem:[%s11664_s8 + $0x10] sm:$0xff]  }
 0x525   :  { %7073 = vmatprep.subr.bf16.mxu0 %v7352_v56 }
 0x526   :  { %7074 = vmatpush3.bf16.msra.mxu0 %v7352_v56 }
 0x527   :  { %7075 = vmatprep.subr.bf16.mxu0 %v7353_v18 }
 0x52a   :  { %7076 = vmatpush3.bf16.msra.mxu0 %v7353_v18 }
 0x52b   :  { %2398 = vmatmul.mubr.bf16.gmra.mxu1 %v7518_v44  ;;  %7068 = vmatmul.mubr.msk.bf16.gmra.mxu0 %vm1533_vm1, %v9129_v29  ;;  %v7529_v29 = vld [vmem:[%s11779_s20 + $0x94] ss:$8 sps:$4 sm:$0xff]  }
 0x52c   :  { %2405 = vmatprep.mubr.bf16.mxu1 %v7519_v50  ;;  %7077 = vmatprep.subr.bf16.mxu0 %v7354_v60 }
 0x52e   :  { %7078 = vmatpush3.bf16.msra.mxu0 %v7354_v60 }
 0x533   :  { %2406 = vmatmul.mubr.bf16.gmra.mxu1 %v7520_v37 }
 0x534   :  { %2413 = vmatprep.mubr.bf16.mxu1 %v7521_v0 }
 0x53b   :  { %2414 = vmatmul.mubr.bf16.gmra.mxu1 %v7522_v61 }
 0x53c   :  { %2421 = vmatprep.mubr.bf16.mxu1 %v7523_v62 }
 0x543   :  { %2422 = vmatmul.mubr.bf16.gmra.mxu1 %v7524_v57 }
 0x544   :  { %2429 = vmatprep.mubr.bf16.mxu1 %v7525_v63 }
 0x54b   :  { %2430 = vmatmul.mubr.bf16.gmra.mxu1 %v7526_v2 }
 0x54c   :  { %2437 = vmatprep.mubr.bf16.mxu1 %v7527_v58 }
 0x553   :  { %2438 = vmatmul.mubr.bf16.gmra.mxu1 %v7528_v33 }
 0x554   :  { %2445 = vmatprep.mubr.bf16.mxu1 %v7529_v29 }
 0x55b   :  { %2446 = vmatmul.mubr.bf16.gmra.mxu1 %v7530_v30 }
 0x55c   :  { %2453 = vmatprep.mubr.bf16.mxu1 %v7531_v23 }
 0x563   :  { %2454 = vmatmul.mubr.bf16.gmra.mxu1 %v7532_v25 }
 0x564   :  { %2461 = vmatprep.mubr.bf16.mxu1 %v7533_v1 }
 0x56b   :  { %2462 = vmatmul.mubr.bf16.gmra.mxu1 %v7534_v19 }
 0x56c   :  { %2469 = vmatprep.mubr.bf16.mxu1 %v7535_v10 }
 0x573   :  { %2470 = vmatmul.mubr.bf16.gmra.mxu1 %v7536_v3 }
 0x574   :  { %2477 = vmatprep.mubr.bf16.mxu1 %v7537_v15 }
 0x57b   :  { %2478 = vmatmul.mubr.bf16.gmra.mxu1 %v7538_v28 }
 0x57c   :  { %2485 = vmatprep.mubr.bf16.mxu1 %v7539_v45 }
 0x583   :  { %2486 = vmatmul.mubr.bf16.gmra.mxu1 %v7540_v12 }
 0x584   :  { %2493 = vmatprep.mubr.bf16.mxu1 %v7541_v4 }
 0x58b   :  { %2494 = vmatmul.mubr.bf16.gmra.mxu1 %v7542_v6 }
 0x58c   :  { %3460 = vmatprep.mubr.bf16.mxu1 %v7543_v17 }
 0x5d3   :  { %v6443_v7 = vpop.f32.mrf.mxu1 }
 0x5d5   :  { %v6444_v38 = vpop.f32.mrf.mxu1 }
 0x5d6   :  { %v6445_v21 = vadd.f32 %v6444_v38, %v6443_v7  ;;  %v11880_v7 = vld [vmem:[#allocation15_spill] sm:$0xff] }
 0x5d7   :  { %v6446_v26 = vpop.f32.mrf.mxu1 }
 0x5d8   :  { %v2502_v43 = vmul.f32 %v6445_v21, %v11848_v5 }
 0x5d9   :  { %v6447_v42 = vpop.f32.mrf.mxu1 }
 0x5da   :  { %v6448_v8 = vadd.f32 %v6447_v42, %v6446_v26 }
 0x5db   :  { %v6449_v55 = vpop.f32.mrf.mxu1 }
 0x5dc   :  { %v2503_v48 = vmul.f32 %v6448_v8, %v11849_v16 }
 0x5dd   :  { %v6450_v14 = vpop.f32.mrf.mxu1 }
 0x5de   :  { %v2534_v53 = vpack.c.bf16 %v2503_v48, %v2502_v43  ;;  %v6451_v54 = vadd.f32 %v6450_v14, %v6449_v55  ;;  %v11881_v14 = vld [vmem:[#allocation16_spill] sm:$0xff] }
 0x5df   :  { %v6452_v46 = vpop.f32.mrf.mxu1 }
 0x5e0   :  { %7079 = vmatprep.mubr.msk.bf16.mxu0 %vm1533_vm1, %v2534_v53  ;;  %v2504_v35 = vmul.f32 %v6451_v54, %v11850_v32 }
 0x5e1   :  { %v6453_v41 = vpop.f32.mrf.mxu1 }
 0x5e2   :  { %v6454_v24 = vadd.f32 %v6453_v41, %v6452_v46  ;;  %v11882_v46 = vld [vmem:[#allocation17_spill] sm:$0xff] }
 0x5e3   :  { %v6455_v34 = vpop.f32.mrf.mxu1 }
 0x5e4   :  { %v2505_v13 = vmul.f32 %v6454_v24, %v11851_v39 }
 0x5e5   :  { %v6456_v20 = vpop.f32.mrf.mxu1 }
 0x5e6   :  { %v2535_v49 = vpack.c.bf16 %v2505_v13, %v2504_v35  ;;  %v6457_v52 = vadd.f32 %v6456_v20, %v6455_v34 }
 0x5e7   :  { %v6458_v59 = vpop.f32.mrf.mxu1 }
 0x5e8   :  { %7080 = vmatmul.mubr.msk.bf16.vlgmr.msra.gmra.mxu0 %vm1533_vm1, %v2535_v49  ;;  %v2506_v37 = vmul.f32 %v6457_v52, %v11852_v31 }
 0x5e9   :  { %v6459_v22 = vpop.f32.mrf.mxu1 }
 0x5ea   :  { %v6460_v44 = vadd.f32 %v6459_v22, %v6458_v59  ;;  %v11883_v59 = vld [vmem:[#allocation18_spill] sm:$0xff]  ;;  %v11884_v22 = vld [vmem:[#allocation19_spill] sm:$0xff] }
 0x5eb   :  { %v6461_v50 = vpop.f32.mrf.mxu1 }
 0x5ec   :  { %v2507_v0 = vmul.f32 %v6460_v44, %v11853_v51 }
 0x5ed   :  { %v6462_v61 = vpop.f32.mrf.mxu1 }
 0x5ee   :  { %v2536_v62 = vpack.c.bf16 %v2507_v0, %v2506_v37  ;;  %v6463_v63 = vadd.f32 %v6462_v61, %v6461_v50 }
 0x5ef   :  { %v6464_v57 = vpop.f32.mrf.mxu1 }
 0x5f0   :  { %7083 = vmatprep.mubr.msk.bf16.mxu0 %vm1533_vm1, %v2536_v62  ;;  %v2508_v29 = vmul.f32 %v6463_v63, %v11854_v36 }
 0x5f1   :  { %v6465_v2 = vpop.f32.mrf.mxu1 }
 0x5f2   :  { %v6466_v58 = vadd.f32 %v6465_v2, %v6464_v57  ;;  %v11885_v2 = vld [vmem:[#allocation20_spill] sm:$0xff] }
 0x5f3   :  { %v6467_v33 = vpop.f32.mrf.mxu1 }
 0x5f4   :  { %v2509_v27 = vmul.f32 %v6466_v58, %v11855_v47 }
 0x5f5   :  { %v6468_v30 = vpop.f32.mrf.mxu1 }
 0x5f6   :  { %v2537_v23 = vpack.c.bf16 %v2509_v27, %v2508_v29  ;;  %v6469_v18 = vadd.f32 %v6468_v30, %v6467_v33  ;;  %v11886_v33 = vld [vmem:[#allocation21_spill] sm:$0xff] }
 0x5f7   :  { %v6470_v56 = vpop.f32.mrf.mxu1 }
 0x5f8   :  { %7084 = vmatmul.mubr.msk.bf16.gmra.mxu0 %vm1533_vm1, %v2537_v23  ;;  %v2510_v19 = vmul.f32 %v6469_v18, %v11856_v11 }
 0x5f9   :  { %v6471_v25 = vpop.f32.mrf.mxu1 }
 0x5fa   :  { %v6472_v1 = vadd.f32 %v6471_v25, %v6470_v56 }
 0x5fb   :  { %v6473_v60 = vpop.f32.mrf.mxu1 }
 0x5fc   :  { %v2511_v10 = vmul.f32 %v6472_v1, %v11857_v9 }
 0x5fd   :  { %v6474_v3 = vpop.f32.mrf.mxu1 }
 0x5fe   :  { %v2538_v15 = vpack.c.bf16 %v2511_v10, %v2510_v19  ;;  %v6475_v45 = vadd.f32 %v6474_v3, %v6473_v60  ;;  %v11887_v60 = vld [vmem:[#allocation22_spill] sm:$0xff]  ;;  %v11888_v10 = vld [vmem:[#allocation23_spill] sm:$0xff] }
 0x5ff   :  { %v6476_v28 = vpop.f32.mrf.mxu1 }
 0x600   :  { %7087 = vmatprep.mubr.msk.bf16.mxu0 %vm1533_vm1, %v2538_v15  ;;  %v2512_v17 = vmul.f32 %v6475_v45, %v11858_v40 }
 0x601   :  { %v6477_v12 = vpop.f32.mrf.mxu1 }
 0x602   :  { %v6478_v4 = vadd.f32 %v6477_v12, %v6476_v28 }
 0x603   :  { %v6479_v6 = vpop.f32.mrf.mxu1 }
 0x604   :  { %v2513_v38 = vmul.f32 %v6478_v4, %v11880_v7 }
 0x605   :  { %v6480_v26 = vpop.f32.mrf.mxu1 }
 0x606   :  { %v2539_v21 = vpack.c.bf16 %v2513_v38, %v2512_v17  ;;  %v6481_v8 = vadd.f32 %v6480_v26, %v6479_v6  ;;  %v11889_v38 = vld [vmem:[#allocation24_spill] sm:$0xff] }
 0x607   :  { %v6482_v42 = vpop.f32.mrf.mxu1 }
 0x608   :  { %7088 = vmatmul.mubr.msk.bf16.gmra.mxu0 %vm1533_vm1, %v2539_v21  ;;  %v2514_v53 = vmul.f32 %v6481_v8, %v11881_v14  ;;  %v11890_v21 = vld [vmem:[#allocation25_spill] sm:$0xff] }
 0x609   :  { %v6483_v55 = vpop.f32.mrf.mxu1 }
 0x60a   :  { %v6484_v43 = vadd.f32 %v6483_v55, %v6482_v42 }
 0x60b   :  { %v6485_v48 = vpop.f32.mrf.mxu1 }
 0x60c   :  { %v2515_v54 = vmul.f32 %v6484_v43, %v11882_v46 }
 0x60d   :  { %v6486_v41 = vpop.f32.mrf.mxu1 }
 0x60e   :  { %v2540_v24 = vpack.c.bf16 %v2515_v54, %v2514_v53  ;;  %v6487_v35 = vadd.f32 %v6486_v41, %v6485_v48  ;;  %v9321_v54 = vpop.f32.mrf.mxu0 }
 0x60f   :  { %v6488_v34 = vpop.f32.mrf.mxu1 }
 0x610   :  { %7091 = vmatprep.mubr.msk.bf16.mxu0 %vm1533_vm1, %v2540_v24  ;;  %v2516_v52 = vmul.f32 %v6487_v35, %v11883_v59 }
 0x611   :  { %v6489_v13 = vpop.f32.mrf.mxu1 }
 0x612   :  { %v6490_v20 = vadd.f32 %v6489_v13, %v6488_v34  ;;  %v11891_v34 = vld [vmem:[#allocation26_spill] sm:$0xff]  ;;  %v11892_v13 = vld [vmem:[#allocation27_spill] sm:$0xff] }
 0x613   :  { %v6491_v49 = vpop.f32.mrf.mxu1 }
 0x614   :  { %v2517_v44 = vmul.f32 %v6490_v20, %v11884_v22 }
 0x615   :  { %v6492_v50 = vpop.f32.mrf.mxu1 }
 0x616   :  { %v2541_v37 = vpack.c.bf16 %v2517_v44, %v2516_v52  ;;  %v6493_v61 = vadd.f32 %v6492_v50, %v6491_v49  ;;  %v9325_v52 = vpop.f32.mrf.mxu0 }
 0x617   :  { %v6494_v0 = vpop.f32.mrf.mxu1 }
 0x618   :  { %7092 = vmatmul.mubr.msk.bf16.gmra.mxu0 %vm1533_vm1, %v2541_v37  ;;  %v2518_v58 = vmul.f32 %v6493_v61, %v11885_v2  ;;  %v9328_v61 = vpop.f32.mrf.mxu0 }
 0x619   :  { %v6495_v62 = vpop.f32.mrf.mxu1 }
 0x61a   :  { %v6496_v57 = vadd.f32 %v6495_v62, %v6494_v0 }
 0x61b   :  { %v6497_v63 = vpop.f32.mrf.mxu1 }
 0x61c   :  { %v2519_v29 = vmul.f32 %v6496_v57, %v11886_v33 }
 0x61d   :  { %v6498_v27 = vpop.f32.mrf.mxu1 }
 0x61e   :  { %v2542_v30 = vpack.c.bf16 %v2519_v29, %v2518_v58  ;;  %v6499_v56 = vadd.f32 %v6498_v27, %v6497_v63  ;;  %v11893_v63 = vld [vmem:[#allocation28_spill] sm:$0xff]  ;;  %v11894_v29 = vld [vmem:[#allocation29_spill] sm:$0xff] }
 0x61f   :  { %v6500_v23 = vpop.f32.mrf.mxu1 }
 0x620   :  { %7095 = vmatprep.mubr.msk.bf16.mxu0 %vm1533_vm1, %v2542_v30  ;;  %v2520_v19 = vmul.f32 %v6499_v56, %v11887_v60 }
 0x621   :  { %v6501_v18 = vpop.f32.mrf.mxu1 }
 0x622   :  { %v6502_v25 = vadd.f32 %v6501_v18, %v6500_v23  ;;  %v9332_v23 = vpop.f32.mrf.mxu0 }
 0x623   :  { %v6503_v1 = vpop.f32.mrf.mxu1 }
 0x624   :  { %v2521_v3 = vmul.f32 %v6502_v25, %v11888_v10 }
 0x625   :  { %v6504_v15 = vpop.f32.mrf.mxu1 }
 0x626   :  { %v2543_v28 = vpack.c.bf16 %v2521_v3, %v2520_v19  ;;  %v6505_v12 = vadd.f32 %v6504_v15, %v6503_v1  ;;  %v9335_v19 = vpop.f32.mrf.mxu0 }
 0x627   :  { %v6506_v45 = vpop.f32.mrf.mxu1 }
 0x628   :  { %7096 = vmatmul.mubr.msk.bf16.gmra.mxu0 %vm1533_vm1, %v2543_v28  ;;  %v2522_v26 = vmul.f32 %v6505_v12, %v11889_v38  ;;  %v11895_v28 = vld [vmem:[#allocation30_spill] sm:$0xff]  ;;  %v11896_v12 = vld [vmem:[#allocation31_spill] sm:$0xff] }
 0x629   :  { %v6507_v4 = vpop.f32.mrf.mxu1 }
 0x62a   :  { %v6508_v6 = vadd.f32 %v6507_v4, %v6506_v45 }
 0x62b   :  { %v6509_v17 = vpop.f32.mrf.mxu1 }
 0x62c   :  { %v2523_v42 = vmul.f32 %v6508_v6, %v11890_v21 }
 0x62d   :  { %v6510_v8 = vpop.f32.mrf.mxu1 }
 0x62e   :  { %v2544_v55 = vpack.c.bf16 %v2523_v42, %v2522_v26  ;;  %v6511_v48 = vadd.f32 %v6510_v8, %v6509_v17  ;;  %v9339_v17 = vpop.f32.mrf.mxu0 }
 0x62f   :  { %v6512_v43 = vpop.f32.mrf.mxu1 }
 0x630   :  { %7099 = vmatprep.mubr.msk.bf16.mxu0 %vm1533_vm1, %v2544_v55  ;;  %v2524_v35 = vmul.f32 %v6511_v48, %v11891_v34 }
 0x631   :  { %v6513_v53 = vpop.f32.mrf.mxu1 }
 0x632   :  { %v6514_v41 = vadd.f32 %v6513_v53, %v6512_v43  ;;  %v9342_v43 = vpop.f32.mrf.mxu0 }
 0x633   :  { %v6515_v24 = vpop.f32.mrf.mxu1 }
 0x634   :  { %v2525_v20 = vmul.f32 %v6514_v41, %v11892_v13  ;;  %v11897_v41 = vld [vmem:[#allocation32_spill] sm:$0xff] }
 0x635   :  { %v6516_v49 = vpop.f32.mrf.mxu1 }
 0x636   :  { %v2545_v44 = vpack.c.bf16 %v2525_v20, %v2524_v35  ;;  %v6517_v37 = vadd.f32 %v6516_v49, %v6515_v24  ;;  %v11898_v35 = vld [vmem:[#allocation33_spill] sm:$0xff] }
 0x637   :  { %v6518_v50 = vpop.f32.mrf.mxu1 }
 0x638   :  { %7100 = vmatmul.mubr.msk.bf16.gmra.mxu0 %vm1533_vm1, %v2545_v44  ;;  %v2526_v58 = vmul.f32 %v6517_v37, %v11893_v63  ;;  %v2691_v44 = vpop.f32.mrf.mxu0 }
 0x639   :  { %v6519_v0 = vpop.f32.mrf.mxu1 }
 0x63a   :  { %v6520_v62 = vadd.f32 %v6519_v0, %v6518_v50 }
 0x63b   :  { %v6521_v57 = vpop.f32.mrf.mxu1 }
 0x63c   :  { %v2527_v27 = vmul.f32 %v6520_v62, %v11894_v29 }
 0x63d   :  { %v6522_v30 = vpop.f32.mrf.mxu1 }
 0x63e   :  { %v2546_v56 = vpack.c.bf16 %v2527_v27, %v2526_v58  ;;  %v6523_v25 = vadd.f32 %v6522_v30, %v6521_v57  ;;  %v9347_v57 = vpop.f32.mrf.mxu0  ;;  %v11899_v27 = vld [vmem:[#allocation34_spill] sm:$0xff] }
 0x63f   :  { %v6524_v18 = vpop.f32.mrf.mxu1 }
 0x640   :  { %7103 = vmatprep.mubr.msk.bf16.mxu0 %vm1533_vm1, %v2546_v56  ;;  %v2528_v45 = vmul.f32 %v6523_v25, %v11895_v28  ;;  %v11900_v56 = vld [vmem:[#allocation35_spill] sm:$0xff]  ;;  %v2704_v25 = vpop.f32.mrf.mxu0 }
 0x641   :  { %v6525_v1 = vpop.f32.mrf.mxu1 }
 0x642   :  { %v6526_v3 = vadd.f32 %v6525_v1, %v6524_v18 }
 0x643   :  { %v6527_v15 = vpop.f32.mrf.mxu1 }
 0x644   :  { %v2529_v4 = vmul.f32 %v6526_v3, %v11896_v12  ;;  %v9352_v3 = vpop.f32.mrf.mxu0 }
 0x645   :  { %v6528_v6 = vpop.f32.mrf.mxu1 }
 0x646   :  { %v2547_v26 = vpack.c.bf16 %v2529_v4, %v2528_v45  ;;  %v6529_v8 = vadd.f32 %v6528_v6, %v6527_v15  ;;  %v2707_v15 = vpop.f32.mrf.mxu0 }
 0x647   :  { %v6530_v42 = vpop.f32.mrf.mxu1 }
 0x648   :  { %7104 = vmatmul.mubr.msk.bf16.gmra.mxu0 %vm1533_vm1, %v2547_v26  ;;  %v2530_v24 = vmul.f32 %v6529_v8, %v11897_v41  ;;  %v9354_v45 = vpop.f32.mrf.mxu0 }
 0x649   :  { %v6531_v55 = vpop.f32.mrf.mxu1 }
 0x64a   :  { %v6532_v48 = vadd.f32 %v6531_v55, %v6530_v42  ;;  %v9356_v4 = vpop.f32.mrf.mxu0 }
 0x64b   :  { %v6533_v53 = vpop.f32.mrf.mxu1 }
 0x64c   :  { %v2531_v20 = vmul.f32 %v6532_v48, %v11898_v35  ;;  %v9358_v6 = vpop.f32.mrf.mxu0 }
 0x64d   :  { %v6534_v49 = vpop.f32.mrf.mxu1 }
 0x64e   :  { %v2548_v50 = vpack.c.bf16 %v2531_v20, %v2530_v24  ;;  %v6535_v0 = vadd.f32 %v6534_v49, %v6533_v53  ;;  %v9360_v26 = vpop.f32.mrf.mxu0 }
 0x64f   :  { %v6536_v37 = vpop.f32.mrf.mxu1 }
 0x650   :  { %7107 = vmatprep.mubr.msk.bf16.mxu0 %vm1533_vm1, %v2548_v50  ;;  %v2532_v30 = vmul.f32 %v6535_v0, %v11899_v27  ;;  %v9362_v42 = vpop.f32.mrf.mxu0 }
 0x651   :  { %v6537_v62 = vpop.f32.mrf.mxu1 }
 0x652   :  { %v6538_v58 = vadd.f32 %v6537_v62, %v6536_v37  ;;  %v9364_v8 = vpop.f32.mrf.mxu0 }
 0x654   :  { %v2533_v18 = vmul.f32 %v6538_v58, %v11900_v56  ;;  %v9366_v55 = vpop.f32.mrf.mxu0 }
 0x656   :  { %v2549_v1 = vpack.c.bf16 %v2533_v18, %v2532_v30  ;;  %v9368_v48 = vpop.f32.mrf.mxu0 }
 0x658   :  { %7108 = vmatmul.mubr.msk.bf16.gmra.mxu0 %vm1533_vm1, %v2549_v1  ;;  %v9370_v53 = vpop.f32.mrf.mxu0 }
 0x65a   :  { %v9372_v24 = vpop.f32.mrf.mxu0 }
 0x65c   :  { %v9374_v20 = vpop.f32.mrf.mxu0 }
 0x65e   :  { %v9376_v49 = vpop.f32.mrf.mxu0 }
 0x660   :  { %v9378_v50 = vpop.f32.mrf.mxu0 }
 0x662   :  { %v9380_v37 = vpop.f32.mrf.mxu0 }
 0x664   :  { %v9382_v0 = vpop.f32.mrf.mxu0 }
 0x666   :  { %v9384_v62 = vpop.f32.mrf.mxu0 }
 0x668   :  { %v9386_v58 = vpop.f32.mrf.mxu0 }
 0x66a   :  { %v9388_v30 = vpop.f32.mrf.mxu0 }
 0x66c   :  { %v9390_v18 = vpop.f32.mrf.mxu0 }
 0x66e   :  { %v9392_v1 = vpop.f32.mrf.mxu0 }
 0x6a8   :  { %v7081_v56 = vpop.f32.mrf.mxu0 }
 0x6a9   :  { %v9403_v10 = vadd.f32 %v7081_v56, %v9321_v54 }
 0x6aa   :  { %v2905_v27 = vpop.f32.mrf.mxu0 }
 0x6ab   :  { %v9398_v13 = vadd.f32 %v2905_v27, %v9325_v52 }
 0x6ac   :  { %v7082_v35 = vpop.f32.mrf.mxu0 }
 0x6ad   :  { %v3032_v60 = vsel %vm1533_vm1, %v9398_v13, 0.0 }
 0x6ae   :  { %v2908_v41 = vpop.f32.mrf.mxu0 }
 0x6af   :  { %v9395_v63 = vadd.f32 %v2908_v41, %v9332_v23  ;;  %v3035_v23 = vsel %vm1533_vm1, %v9403_v10, 0.0  ;;  %v9410_v41 = vadd.f32 %v7082_v35, %v9328_v61 }
 0x6b1   :  { %v3033_v21 = vsel %vm1533_vm1, %v9395_v63, 0.0  ;;  %v3037_v54 = vsel %vm1533_vm1, %v9410_v41, 0.0 }
 0x6b2   :  { %v3034_v33 = vadd.f32 %v3033_v21, %v3032_v60 }
 0x6b4   :  { %v3036_v27 = vadd.f32 %v3035_v23, %v3034_v33 }
 0x6b6   :  { %v3038_v21 = vadd.f32 %v3037_v54, %v3036_v27 }
 0x6b8   :  { %v7085_v12 = vpop.f32.mrf.mxu0 }
 0x6b9   :  { %v9424_v35 = vadd.f32 %v7085_v12, %v9335_v19 }
 0x6ba   :  { %v2921_v28 = vpop.f32.mrf.mxu0 }
 0x6bb   :  { %v9413_v52 = vadd.f32 %v2921_v28, %v9339_v17 }
 0x6bc   :  { %v7086_v29 = vpop.f32.mrf.mxu0 }
 0x6bd   :  { %v3039_v60 = vsel %vm1533_vm1, %v9413_v52, 0.0  ;;  %v9429_v17 = vadd.f32 %v7086_v29, %v9342_v43 }
 0x6be   :  { %v2924_v34 = vpop.f32.mrf.mxu0  ;;  %v3040_v46 = vadd.f32 %v3039_v60, %v3038_v21 }
 0x6bf   :  { %v9415_v22 = vadd.f32 %v2924_v34, %v2691_v44  ;;  %v3043_v34 = vsel %vm1533_vm1, %v9424_v35, 0.0  ;;  %v3045_v60 = vsel %vm1533_vm1, %v9429_v17, 0.0 }
 0x6c1   :  { %v3041_v56 = vsel %vm1533_vm1, %v9415_v22, 0.0 }
 0x6c2   :  { %v3042_v28 = vadd.f32 %v3041_v56, %v3040_v46 }
 0x6c4   :  { %v3044_v23 = vadd.f32 %v3043_v34, %v3042_v28 }
 0x6c6   :  { %v3046_v46 = vadd.f32 %v3045_v60, %v3044_v23 }
 0x6c8   :  { %v7089_v38 = vpop.f32.mrf.mxu0 }
 0x6c9   :  { %v9442_v29 = vadd.f32 %v7089_v38, %v9347_v57 }
 0x6ca   :  { %v2937_v2 = vpop.f32.mrf.mxu0 }
 0x6cb   :  { %v9431_v44 = vadd.f32 %v2937_v2, %v2704_v25 }
 0x6cc   :  { %v7090_v59 = vpop.f32.mrf.mxu0 }
 0x6cd   :  { %v3047_v19 = vsel %vm1533_vm1, %v9431_v44, 0.0 }
 0x6ce   :  { %v2940_v61 = vpop.f32.mrf.mxu0  ;;  %v3048_v56 = vadd.f32 %v3047_v19, %v3046_v46 }
 0x6cf   :  { %v9433_v54 = vadd.f32 %v2940_v61, %v2707_v15  ;;  %v3051_v15 = vsel %vm1533_vm1, %v9442_v29, 0.0  ;;  %v9447_v61 = vadd.f32 %v7090_v59, %v9352_v3 }
 0x6d1   :  { %v3049_v21 = vsel %vm1533_vm1, %v9433_v54, 0.0  ;;  %v3053_v38 = vsel %vm1533_vm1, %v9447_v61, 0.0 }
 0x6d2   :  { %v3050_v2 = vadd.f32 %v3049_v21, %v3048_v56 }
 0x6d4   :  { %v3052_v34 = vadd.f32 %v3051_v15, %v3050_v2 }
 0x6d6   :  { %v3054_v19 = vadd.f32 %v3053_v38, %v3052_v34 }
 0x6d8   :  { %v7093_v33 = vpop.f32.mrf.mxu0 }
 0x6da   :  { %v2953_v27 = vpop.f32.mrf.mxu0 }
 0x6db   :  { %v9450_v28 = vadd.f32 %v2953_v27, %v9356_v4  ;;  %v9462_v4 = vadd.f32 %v7093_v33, %v9354_v45 }
 0x6dc   :  { %v7094_v12 = vpop.f32.mrf.mxu0 }
 0x6dd   :  { %v3055_v57 = vsel %vm1533_vm1, %v9450_v28, 0.0  ;;  %v9467_v56 = vadd.f32 %v7094_v12, %v9358_v6 }
 0x6de   :  { %v2956_v43 = vpop.f32.mrf.mxu0  ;;  %v3056_v59 = vadd.f32 %v3055_v57, %v3054_v19 }
 0x6df   :  { %v9453_v23 = vadd.f32 %v2956_v43, %v9360_v26  ;;  %v3059_v26 = vsel %vm1533_vm1, %v9462_v4, 0.0  ;;  %v3061_v45 = vsel %vm1533_vm1, %v9467_v56, 0.0 }
 0x6e1   :  { %v3057_v46 = vsel %vm1533_vm1, %v9453_v23, 0.0 }
 0x6e2   :  { %v3058_v27 = vadd.f32 %v3057_v46, %v3056_v59 }
 0x6e4   :  { %v3060_v43 = vadd.f32 %v3059_v26, %v3058_v27 }
 0x6e6   :  { %v3062_v38 = vadd.f32 %v3061_v45, %v3060_v43 }
 0x6e8   :  { %v7097_v25 = vpop.f32.mrf.mxu0 }
 0x6ea   :  { %v2969_v60 = vpop.f32.mrf.mxu0 }
 0x6eb   :  { %v9470_v2 = vadd.f32 %v2969_v60, %v9364_v8  ;;  %v9482_v8 = vadd.f32 %v7097_v25, %v9362_v42 }
 0x6ec   :  { %v7098_v3 = vpop.f32.mrf.mxu0 }
 0x6ed   :  { %v3063_v33 = vsel %vm1533_vm1, %v9470_v2, 0.0  ;;  %v3067_v46 = vsel %vm1533_vm1, %v9482_v8, 0.0  ;;  %v9487_v59 = vadd.f32 %v7098_v3, %v9366_v55 }
 0x6ee   :  { %v2972_v21 = vpop.f32.mrf.mxu0  ;;  %v3064_v12 = vadd.f32 %v3063_v33, %v3062_v38 }
 0x6ef   :  { %v9473_v15 = vadd.f32 %v2972_v21, %v9368_v48  ;;  %v3069_v43 = vsel %vm1533_vm1, %v9487_v59, 0.0 }
 0x6f1   :  { %v3065_v6 = vsel %vm1533_vm1, %v9473_v15, 0.0 }
 0x6f2   :  { %v3066_v60 = vadd.f32 %v3065_v6, %v3064_v12 }
 0x6f4   :  { %v3068_v21 = vadd.f32 %v3067_v46, %v3066_v60 }
 0x6f6   :  { %v3070_v25 = vadd.f32 %v3069_v43, %v3068_v21 }
 0x6f8   :  { %v7101_v34 = vpop.f32.mrf.mxu0 }
 0x6f9   :  { %v9502_v3 = vadd.f32 %v7101_v34, %v9370_v53 }
 0x6fa   :  { %v2985_v57 = vpop.f32.mrf.mxu0 }
 0x6fb   :  { %v9490_v27 = vadd.f32 %v2985_v57, %v9372_v24 }
 0x6fc   :  { %v7102_v19 = vpop.f32.mrf.mxu0 }
 0x6fd   :  { %v3071_v42 = vsel %vm1533_vm1, %v9490_v27, 0.0  ;;  %v9507_v6 = vadd.f32 %v7102_v19, %v9374_v20 }
 0x6fe   :  { %v2988_v48 = vpop.f32.mrf.mxu0  ;;  %v3072_v33 = vadd.f32 %v3071_v42, %v3070_v25 }
 0x6ff   :  { %v9493_v26 = vadd.f32 %v2988_v48, %v9376_v49  ;;  %v3075_v49 = vsel %vm1533_vm1, %v9502_v3, 0.0  ;;  %v3077_v53 = vsel %vm1533_vm1, %v9507_v6, 0.0 }
 0x701   :  { %v3073_v45 = vsel %vm1533_vm1, %v9493_v26, 0.0 }
 0x702   :  { %v3074_v24 = vadd.f32 %v3073_v45, %v3072_v33 }
 0x704   :  { %v3076_v60 = vadd.f32 %v3075_v49, %v3074_v24 }
 0x706   :  { %v3078_v21 = vadd.f32 %v3077_v53, %v3076_v60 }
 0x708   :  { %v7105_v55 = vpop.f32.mrf.mxu0 }
 0x709   :  { %v9522_v19 = vadd.f32 %v7105_v55, %v9378_v50 }
 0x70a   :  { %v3001_v38 = vpop.f32.mrf.mxu0 }
 0x70b   :  { %v9510_v12 = vadd.f32 %v3001_v38, %v9380_v37 }
 0x70c   :  { %v7106_v57 = vpop.f32.mrf.mxu0 }
 0x70d   :  { %v3079_v34 = vsel %vm1533_vm1, %v9510_v12, 0.0  ;;  %v9527_v25 = vadd.f32 %v7106_v57, %v9382_v0 }
 0x70e   :  { %v3004_v48 = vpop.f32.mrf.mxu0  ;;  %v3080_v20 = vadd.f32 %v3079_v34, %v3078_v21 }
 0x70f   :  { %v9513_v46 = vadd.f32 %v3004_v48, %v9384_v62  ;;  %v3083_v62 = vsel %vm1533_vm1, %v9522_v19, 0.0  ;;  %v3085_v49 = vsel %vm1533_vm1, %v9527_v25, 0.0 }
 0x711   :  { %v3081_v43 = vsel %vm1533_vm1, %v9513_v46, 0.0 }
 0x712   :  { %v3082_v37 = vadd.f32 %v3081_v43, %v3080_v20 }
 0x714   :  { %v3084_v45 = vadd.f32 %v3083_v62, %v3082_v37 }
 0x716   :  { %v3086_v55 = vadd.f32 %v3085_v49, %v3084_v45  ;;  %v7356_v45 = vld [vmem:[%s11667_s11 + $0x30] sm:$0xff]   ;;  %v7358_v49 = vld [vmem:[%s11667_s11 + $0x20] sm:$0xff]  }
 0x718   :  { %v7109_v42 = vpop.f32.mrf.mxu0 }
 0x719   :  { %v9537_v48 = vadd.f32 %v7109_v42, %v9386_v58  ;;  %v7355_v58 = vld [vmem:[%s11667_s11 + $0x38] sm:$0xff]  }
 0x71a   :  { %v3017_v33 = vpop.f32.mrf.mxu0  ;;  %7111 = vmatprep.subr.bf16.mxu0 %v7355_v58 }
 0x71b   :  { %v9530_v24 = vadd.f32 %v3017_v33, %v9388_v30  ;;  %v3091_v21 = vsel %vm1533_vm1, %v9537_v48, 0.0  ;;  %7112 = vmatpush3.bf16.msra.mxu0 %v7355_v58  ;;  %v7357_v33 = vld [vmem:[%s11667_s11 + $0x28] sm:$0xff]  }
 0x71c   :  { %v7110_v38 = vpop.f32.mrf.mxu0  ;;  %7113 = vmatprep.subr.bf16.mxu0 %v7356_v45 }
 0x71d   :  { %v3087_v50 = vsel %vm1533_vm1, %v9530_v24, 0.0  ;;  %v9543_v53 = vadd.f32 %v7110_v38, %v9390_v18 }
 0x71e   :  { %v3020_v60 = vpop.f32.mrf.mxu0  ;;  %v3088_v57 = vadd.f32 %v3087_v50, %v3086_v55 }
 0x71f   :  { %v9540_v0 = vadd.f32 %v3020_v60, %v9392_v1  ;;  %v3093_v43 = vsel %vm1533_vm1, %v9543_v53, 0.0  ;;  %7114 = vmatpush3.bf16.msra.mxu0 %v7356_v45 }
 0x720   :  { %7115 = vmatprep.subr.bf16.mxu0 %v7357_v33 }
 0x721   :  { %v3089_v30 = vsel %vm1533_vm1, %v9540_v0, 0.0 }
 0x722   :  { %v3090_v34 = vadd.f32 %v3089_v30, %v3088_v57 }
 0x723   :  { %7116 = vmatpush3.bf16.msra.mxu0 %v7357_v33 }
 0x724   :  { %v3092_v20 = vadd.f32 %v3091_v21, %v3090_v34  ;;  %7117 = vmatprep.subr.bf16.mxu0 %v7358_v49 }
 0x726   :  { %v3094_v1 = vadd.f32 %v3093_v43, %v3092_v20 }
 0x727   :  { %7118 = vmatpush3.bf16.msra.mxu0 %v7358_v49 }
 0x728   :  { %v3095_v18 = vrot.slane %v3094_v1, 4 }
 0x72a   :  { %v3096_v37 = vadd.f32 %v3095_v18, %v3094_v1 }
 0x72c   :  { %v3097_v42 = vrot.slane %v3096_v37, 2 }
 0x72e   :  { %v3098_v62 = vadd.f32 %v3097_v42, %v3096_v37 }
 0x730   :  { %v3099_v38 = vrot.slane %v3098_v62, 1 }
 0x732   :  { %v3100_v50 = vadd.f32 %v3099_v38, %v3098_v62 }
 0x734   :  { %v9563_v55 = vmul.f32 0.00390625, %v3100_v50 }
 0x736   :  { %v9567_v60 = vsub.f32 %v9398_v13, %v9563_v55  ;;  %v9571_v57 = vsub.f32 %v9395_v63, %v9563_v55  ;;  %v9575_v30 = vsub.f32 %v9403_v10, %v9563_v55  ;;  %v9579_v34 = vsub.f32 %v9410_v41, %v9563_v55 }
 0x737   :  { %v9587_v13 = vsub.f32 %v9413_v52, %v9563_v55  ;;  %v9593_v10 = vsub.f32 %v9415_v22, %v9563_v55  ;;  %v9601_v18 = vsub.f32 %v9424_v35, %v9563_v55  ;;  %v9608_v22 = vsub.f32 %v9429_v17, %v9563_v55 }
 0x738   :  { %v3134_v21 = vmul.f32 %v9567_v60, %v9567_v60  ;;  %v3135_v43 = vmul.f32 %v9571_v57, %v9571_v57  ;;  %v3136_v63 = vmul.f32 %v9575_v30, %v9575_v30  ;;  %v3137_v41 = vmul.f32 %v9579_v34, %v9579_v34 }
 0x739   :  { %v3138_v52 = vmul.f32 %v9587_v13, %v9587_v13  ;;  %v3139_v62 = vmul.f32 %v9593_v10, %v9593_v10  ;;  %v9615_v35 = vsub.f32 %v9431_v44, %v9563_v55  ;;  %v3140_v38 = vmul.f32 %v9601_v18, %v9601_v18 }
 0x73a   :  { %v3166_v20 = vsel %vm1533_vm1, %v3134_v21, 0.0  ;;  %v3167_v58 = vsel %vm1533_vm1, %v3135_v43, 0.0  ;;  %v3169_v37 = vsel %vm1533_vm1, %v3136_v63, 0.0  ;;  %v3171_v45 = vsel %vm1533_vm1, %v3137_v41, 0.0 }
 0x73b   :  { %v3168_v1 = vadd.f32 %v3167_v58, %v3166_v20  ;;  %v3173_v49 = vsel %vm1533_vm1, %v3138_v52, 0.0  ;;  %v9622_v17 = vsub.f32 %v9433_v54, %v9563_v55  ;;  %v3141_v21 = vmul.f32 %v9608_v22, %v9608_v22 }
 0x73c   :  { %v3175_v43 = vsel %vm1533_vm1, %v3139_v62, 0.0  ;;  %v9629_v44 = vsub.f32 %v9442_v29, %v9563_v55  ;;  %v3142_v41 = vmul.f32 %v9615_v35, %v9615_v35  ;;  %v3177_v20 = vsel %vm1533_vm1, %v3140_v38, 0.0 }
 0x73d   :  { %v3170_v42 = vadd.f32 %v3169_v37, %v3168_v1  ;;  %v9636_v54 = vsub.f32 %v9447_v61, %v9563_v55  ;;  %v3143_v1 = vmul.f32 %v9622_v17, %v9622_v17  ;;  %v3179_v52 = vsel %vm1533_vm1, %v3141_v21, 0.0 }
 0x73e   :  { %v9643_v29 = vsub.f32 %v9450_v28, %v9563_v55  ;;  %v3181_v62 = vsel %vm1533_vm1, %v3142_v41, 0.0  ;;  %v9650_v61 = vsub.f32 %v9453_v23, %v9563_v55  ;;  %v9657_v28 = vsub.f32 %v9462_v4, %v9563_v55 }
 0x73f   :  { %v3172_v33 = vadd.f32 %v3171_v45, %v3170_v42  ;;  %v3144_v42 = vmul.f32 %v9629_v44, %v9629_v44  ;;  %v3183_v38 = vsel %vm1533_vm1, %v3143_v1, 0.0  ;;  %v9664_v23 = vsub.f32 %v9467_v56, %v9563_v55 }
 0x740   :  { %v9671_v4 = vsub.f32 %v9470_v2, %v9563_v55  ;;  %v9678_v56 = vsub.f32 %v9473_v15, %v9563_v55  ;;  %v9685_v2 = vsub.f32 %v9482_v8, %v9563_v55  ;;  %v9692_v15 = vsub.f32 %v9487_v59, %v9563_v55 }
 0x741   :  { %v3174_v50 = vadd.f32 %v3173_v49, %v3172_v33  ;;  %v3145_v33 = vmul.f32 %v9636_v54, %v9636_v54  ;;  %v3185_v21 = vsel %vm1533_vm1, %v3144_v42, 0.0  ;;  %v9699_v8 = vsub.f32 %v9490_v27, %v9563_v55 }
 0x742   :  { %v9706_v59 = vsub.f32 %v9493_v26, %v9563_v55  ;;  %v9713_v27 = vsub.f32 %v9502_v3, %v9563_v55  ;;  %v9720_v26 = vsub.f32 %v9507_v6, %v9563_v55  ;;  %v9727_v3 = vsub.f32 %v9510_v12, %v9563_v55 }
 0x743   :  { %v3176_v63 = vadd.f32 %v3175_v43, %v3174_v50  ;;  %v3146_v50 = vmul.f32 %v9643_v29, %v9643_v29  ;;  %v3187_v41 = vsel %vm1533_vm1, %v3145_v33, 0.0  ;;  %v9734_v6 = vsub.f32 %v9513_v46, %v9563_v55 }
 0x744   :  { %v9741_v12 = vsub.f32 %v9522_v19, %v9563_v55  ;;  %v9748_v46 = vsub.f32 %v9527_v25, %v9563_v55  ;;  %v9755_v19 = vsub.f32 %v9530_v24, %v9563_v55  ;;  %v3131_v25 = vsub.f32 %v9540_v0, %v9563_v55 }
 0x745   :  { %v3178_v58 = vadd.f32 %v3177_v20, %v3176_v63  ;;  %v3147_v63 = vmul.f32 %v9650_v61, %v9650_v61  ;;  %v3189_v1 = vsel %vm1533_vm1, %v3146_v50, 0.0 }
 0x746   :  { %v3162_v24 = vmul.f32 %v9755_v19, %v9755_v19 }
 0x747   :  { %v3180_v37 = vadd.f32 %v3179_v52, %v3178_v58  ;;  %v3148_v58 = vmul.f32 %v9657_v28, %v9657_v28  ;;  %v3191_v42 = vsel %vm1533_vm1, %v3147_v63, 0.0 }
 0x749   :  { %v3182_v45 = vadd.f32 %v3181_v62, %v3180_v37  ;;  %v3149_v37 = vmul.f32 %v9664_v23, %v9664_v23  ;;  %v3193_v33 = vsel %vm1533_vm1, %v3148_v58, 0.0 }
 0x74b   :  { %v3184_v49 = vadd.f32 %v3183_v38, %v3182_v45  ;;  %v3150_v45 = vmul.f32 %v9671_v4, %v9671_v4  ;;  %v3195_v50 = vsel %vm1533_vm1, %v3149_v37, 0.0 }
 0x74d   :  { %v3186_v43 = vadd.f32 %v3185_v21, %v3184_v49  ;;  %v3151_v49 = vmul.f32 %v9678_v56, %v9678_v56  ;;  %v3197_v63 = vsel %vm1533_vm1, %v3150_v45, 0.0 }
 0x74f   :  { %v3188_v20 = vadd.f32 %v3187_v41, %v3186_v43  ;;  %v3152_v43 = vmul.f32 %v9685_v2, %v9685_v2  ;;  %v3199_v58 = vsel %vm1533_vm1, %v3151_v49, 0.0 }
 0x751   :  { %v3190_v52 = vadd.f32 %v3189_v1, %v3188_v20  ;;  %v3153_v20 = vmul.f32 %v9692_v15, %v9692_v15  ;;  %v3201_v37 = vsel %vm1533_vm1, %v3152_v43, 0.0 }
 0x753   :  { %v3192_v62 = vadd.f32 %v3191_v42, %v3190_v52  ;;  %v3154_v52 = vmul.f32 %v9699_v8, %v9699_v8  ;;  %v3203_v45 = vsel %vm1533_vm1, %v3153_v20, 0.0 }
 0x755   :  { %v3194_v38 = vadd.f32 %v3193_v33, %v3192_v62  ;;  %v3155_v62 = vmul.f32 %v9706_v59, %v9706_v59  ;;  %v3205_v49 = vsel %vm1533_vm1, %v3154_v52, 0.0 }
 0x757   :  { %v3196_v21 = vadd.f32 %v3195_v50, %v3194_v38  ;;  %v3156_v38 = vmul.f32 %v9713_v27, %v9713_v27  ;;  %v3207_v43 = vsel %vm1533_vm1, %v3155_v62, 0.0 }
 0x759   :  { %v3198_v41 = vadd.f32 %v3197_v63, %v3196_v21  ;;  %v3157_v21 = vmul.f32 %v9720_v26, %v9720_v26  ;;  %v3209_v20 = vsel %vm1533_vm1, %v3156_v38, 0.0 }
 0x75b   :  { %v3200_v1 = vadd.f32 %v3199_v58, %v3198_v41  ;;  %v3158_v41 = vmul.f32 %v9727_v3, %v9727_v3  ;;  %v3211_v52 = vsel %vm1533_vm1, %v3157_v21, 0.0 }
 0x75d   :  { %v3202_v42 = vadd.f32 %v3201_v37, %v3200_v1  ;;  %v3159_v1 = vmul.f32 %v9734_v6, %v9734_v6  ;;  %v3213_v62 = vsel %vm1533_vm1, %v3158_v41, 0.0  ;;  %v3163_v41 = vmul.f32 %v3131_v25, %v3131_v25 }
 0x75f   :  { %v3204_v33 = vadd.f32 %v3203_v45, %v3202_v42  ;;  %v3160_v42 = vmul.f32 %v9741_v12, %v9741_v12  ;;  %v3215_v38 = vsel %vm1533_vm1, %v3159_v1, 0.0  ;;  %v3221_v1 = vsel %vm1533_vm1, %v3162_v24, 0.0  ;;  %v6045_v24 = vld [vmem:[%s11668_s9] ss:$0 sm:$0xff] }
 0x761   :  { %v3206_v50 = vadd.f32 %v3205_v49, %v3204_v33  ;;  %v3161_v33 = vmul.f32 %v9748_v46, %v9748_v46  ;;  %v3217_v21 = vsel %vm1533_vm1, %v3160_v42, 0.0 }
 0x763   :  { %v3208_v63 = vadd.f32 %v3207_v43, %v3206_v50  ;;  %v3132_v50 = vsub.f32 %v9537_v48, %v9563_v55  ;;  %v3219_v0 = vsel %vm1533_vm1, %v3161_v33, 0.0  ;;  %v3223_v48 = vsel %vm1533_vm1, %v3163_v41, 0.0 }
 0x764   :  { %v3272_v41 = vmul.f32 %v6045_v24, %v3131_v25  ;;  %v3252_v25 = vmul.f32 %v6045_v24, %v9622_v17  ;;  %v3262_v17 = vmul.f32 %v6045_v24, %v9692_v15 }
 0x765   :  { %v3210_v58 = vadd.f32 %v3209_v20, %v3208_v63  ;;  %v3133_v63 = vsub.f32 %v9543_v53, %v9563_v55  ;;  %v3273_v15 = vmul.f32 %v6045_v24, %v3132_v50 }
 0x767   :  { %v3212_v37 = vadd.f32 %v3211_v52, %v3210_v58  ;;  %v3164_v58 = vmul.f32 %v3132_v50, %v3132_v50 }
 0x769   :  { %v3214_v45 = vadd.f32 %v3213_v62, %v3212_v37  ;;  %v3165_v37 = vmul.f32 %v3133_v63, %v3133_v63 }
 0x76b   :  { %v3216_v49 = vadd.f32 %v3215_v38, %v3214_v45  ;;  %v3225_v45 = vsel %vm1533_vm1, %v3164_v58, 0.0  ;;  %v3227_v42 = vsel %vm1533_vm1, %v3165_v37, 0.0  ;;  %v3244_v58 = vmul.f32 %v6045_v24, %v9571_v57 }
 0x76c   :  { %v3247_v37 = vmul.f32 %v6045_v24, %v9587_v13  ;;  %v3254_v57 = vmul.f32 %v6045_v24, %v9636_v54  ;;  %v3257_v13 = vmul.f32 %v6045_v24, %v9657_v28  ;;  %v3264_v54 = vmul.f32 %v6045_v24, %v9706_v59 }
 0x76d   :  { %v3218_v43 = vadd.f32 %v3217_v21, %v3216_v49  ;;  %v3267_v28 = vmul.f32 %v6045_v24, %v9727_v3 }
 0x76f   :  { %v3220_v20 = vadd.f32 %v3219_v0, %v3218_v43 }
 0x771   :  { %v3222_v52 = vadd.f32 %v3221_v1, %v3220_v20  ;;  %v3243_v20 = vmul.f32 %v6045_v24, %v9567_v60  ;;  %v3245_v1 = vmul.f32 %v6045_v24, %v9575_v30  ;;  %v3253_v60 = vmul.f32 %v6045_v24, %v9629_v44 }
 0x772   :  { %v3255_v30 = vmul.f32 %v6045_v24, %v9643_v29  ;;  %v3263_v44 = vmul.f32 %v6045_v24, %v9699_v8  ;;  %v3265_v29 = vmul.f32 %v6045_v24, %v9713_v27 }
 0x773   :  { %v3224_v62 = vadd.f32 %v3223_v48, %v3222_v52  ;;  %v3246_v52 = vmul.f32 %v6045_v24, %v9579_v34  ;;  %v3249_v48 = vmul.f32 %v6045_v24, %v9601_v18  ;;  %v3256_v34 = vmul.f32 %v6045_v24, %v9650_v61 }
 0x774   :  { %v3259_v18 = vmul.f32 %v6045_v24, %v9671_v4  ;;  %v3266_v61 = vmul.f32 %v6045_v24, %v9720_v26  ;;  %v3269_v4 = vmul.f32 %v6045_v24, %v9741_v12 }
 0x775   :  { %v3226_v38 = vadd.f32 %v3225_v45, %v3224_v62  ;;  %v3251_v62 = vmul.f32 %v6045_v24, %v9615_v35  ;;  %v3261_v35 = vmul.f32 %v6045_v24, %v9685_v2  ;;  %v3271_v2 = vmul.f32 %v6045_v24, %v9755_v19 }
 0x777   :  { %v3228_v49 = vadd.f32 %v3227_v42, %v3226_v38  ;;  %v3274_v38 = vmul.f32 %v6045_v24, %v3133_v63 }
 0x779   :  { %v3229_v21 = vrot.slane %v3228_v49, 4 }
 0x77b   :  { %v3230_v53 = vadd.f32 %v3229_v21, %v3228_v49 }
 0x77d   :  { %v3231_v55 = vrot.slane %v3230_v53, 2 }
 0x77f   :  { %v3232_v14 = vadd.f32 %v3231_v55, %v3230_v53 }
 0x781   :  { %v3233_v33 = vrot.slane %v3232_v14, 1 }
 0x783   :  { %v3234_v43 = vadd.f32 %v3233_v33, %v3232_v14  ;;  %v3248_v14 = vmul.f32 %v6045_v24, %v9593_v10  ;;  %v3258_v10 = vmul.f32 %v6045_v24, %v9664_v23  ;;  %v3268_v23 = vmul.f32 %v6045_v24, %v9734_v6 }
 0x785   :  { %v3235_v0 = vmul.f32 0.00390625, %v3234_v43 }
 0x787   :  { %v3275_v7 = vadd.f32 1e-05, %v3235_v0 }
 0x789   :  { %7369 = vrsqrt.f32 %v3275_v7  ;;  %v3250_v7 = vmul.f32 %v6045_v24, %v9608_v22  ;;  %v3260_v22 = vmul.f32 %v6045_v24, %v9678_v56  ;;  %v3270_v56 = vmul.f32 %v6045_v24, %v9748_v46 }
 0x796   :  { %v7370_v45 = vpop.eup %7369 }
 0x797   :  { %v9809_v8 = vmul.f32 %v7370_v45, %v3272_v41  ;;  %v3277_v59 = vmul.f32 %v7370_v45, %v3243_v20  ;;  %v3278_v42 = vmul.f32 %v7370_v45, %v3244_v58  ;;  %v3279_v27 = vmul.f32 %v7370_v45, %v3245_v1  ;;  %v9820_v41 = vld [vmem:[%s11669_s10] ss:$0 sm:$0xff] }
 0x798   :  { %v3280_v49 = vmul.f32 %v7370_v45, %v3246_v52  ;;  %v3281_v26 = vmul.f32 %v7370_v45, %v3247_v37  ;;  %v3282_v21 = vmul.f32 %v7370_v45, %v3248_v14  ;;  %v3283_v3 = vmul.f32 %v7370_v45, %v3249_v48 }
 0x799   :  { %v3284_v53 = vmul.f32 %v7370_v45, %v3250_v7  ;;  %v3285_v6 = vmul.f32 %v7370_v45, %v3251_v62  ;;  %v3286_v55 = vmul.f32 %v7370_v45, %v3252_v25  ;;  %v3287_v12 = vmul.f32 %v7370_v45, %v3253_v60 }
 0x79a   :  { %v3288_v33 = vmul.f32 %v7370_v45, %v3254_v57  ;;  %v3289_v43 = vmul.f32 %v7370_v45, %v3255_v30  ;;  %v3290_v46 = vmul.f32 %v7370_v45, %v3256_v34  ;;  %v3291_v0 = vmul.f32 %v7370_v45, %v3257_v13 }
 0x79b   :  { %v3292_v19 = vmul.f32 %v7370_v45, %v3258_v10  ;;  %v9811_v50 = vmul.f32 %v7370_v45, %v3259_v18  ;;  %v9813_v63 = vmul.f32 %v7370_v45, %v3260_v22  ;;  %v9815_v24 = vmul.f32 %v7370_v45, %v3261_v35 }
 0x79c   :  { %v9822_v20 = vmul.f32 %v7370_v45, %v3262_v17  ;;  %v9824_v58 = vmul.f32 %v7370_v45, %v3263_v44  ;;  %v9826_v1 = vmul.f32 %v7370_v45, %v3264_v54  ;;  %v9828_v52 = vmul.f32 %v7370_v45, %v3265_v29 }
 0x79d   :  { %v9830_v37 = vmul.f32 %v7370_v45, %v3266_v61  ;;  %v9832_v14 = vmul.f32 %v7370_v45, %v3267_v28  ;;  %v9834_v48 = vmul.f32 %v7370_v45, %v3268_v23  ;;  %v9836_v7 = vmul.f32 %v7370_v45, %v3269_v4 }
 0x79e   :  { %v9838_v62 = vmul.f32 %v7370_v45, %v3270_v56  ;;  %v3305_v25 = vmul.f32 %v7370_v45, %v3271_v2  ;;  %v3307_v60 = vmul.f32 %v7370_v45, %v3273_v15  ;;  %v3308_v57 = vmul.f32 %v7370_v45, %v3274_v38  ;;  %v11901_v56 = vld [vmem:[#allocation39_spill] sm:$0xff]  ;;  %v11902_v15 = vld [vmem:[#allocation36_spill] sm:$0xff] }
 0x79f   :  { %v3316_v30 = vadd.f32 %v9820_v41, %v3277_v59  ;;  %v3317_v34 = vadd.f32 %v9820_v41, %v3278_v42  ;;  %v3318_v13 = vadd.f32 %v9820_v41, %v3279_v27  ;;  %v3319_v10 = vadd.f32 %v9820_v41, %v3280_v49  ;;  %v11903_v59 = vld [vmem:[#allocation43_spill] sm:$0xff]  ;;  %v11904_v27 = vld [vmem:[#allocation40_spill] sm:$0xff] }
 0x7a0   :  { %v3320_v18 = vadd.f32 %v9820_v41, %v3281_v26  ;;  %v3321_v22 = vadd.f32 %v9820_v41, %v3282_v21  ;;  %v3322_v35 = vadd.f32 %v9820_v41, %v3283_v3  ;;  %v3323_v17 = vadd.f32 %v9820_v41, %v3284_v53  ;;  %v11905_v3 = vld [vmem:[#allocation37_spill] sm:$0xff] }
 0x7a1   :  { %v9849_v44 = vadd.f32 %v9820_v41, %v3285_v6  ;;  %v9852_v54 = vadd.f32 %v9820_v41, %v3286_v55  ;;  %v3326_v29 = vadd.f32 %v9820_v41, %v3287_v12  ;;  %v3327_v61 = vadd.f32 %v9820_v41, %v3288_v33  ;;  %v11906_v6 = vld [vmem:[#allocation38_spill] sm:$0xff] }
 0x7a2   :  { %v3328_v28 = vadd.f32 %v9820_v41, %v3289_v43  ;;  %v3329_v23 = vadd.f32 %v9820_v41, %v3290_v46  ;;  %v3330_v4 = vadd.f32 %v9820_v41, %v3291_v0  ;;  %v3331_v45 = vadd.f32 %v9820_v41, %v3292_v19  ;;  %v11907_v0 = vld [vmem:[#allocation64_spill] sm:$0xff] }
 0x7a3   :  { %v3350_v2 = vadd.f32 %v3318_v13, %v11901_v56  ;;  %v3351_v38 = vadd.f32 %v3319_v10, %v11902_v15  ;;  %v3354_v42 = vadd.f32 %v3322_v35, %v11903_v59  ;;  %v3355_v49 = vadd.f32 %v3323_v17, %v11904_v27  ;;  %v11908_v13 = vld [vmem:[#allocation65_spill] sm:$0xff]  ;;  %v11909_v17 = vld [vmem:[#allocation51_spill] sm:$0xff]  ;;  %v11910_v59 = vld [vmem:[#allocation48_spill] sm:$0xff] }
 0x7a4   :  { %v3346_v26 = vadd.f32 %v9820_v41, %v3307_v60  ;;  %v3347_v21 = vadd.f32 %v9820_v41, %v3308_v57  ;;  %v3348_v53 = vadd.f32 %v3316_v30, %v11905_v3  ;;  %v3349_v55 = vadd.f32 %v3317_v34, %v11906_v6  ;;  %v11912_v3 = vld [vmem:[#allocation41_spill] sm:$0xff] }
 0x7a5   :  { %v3382_v12 = vmax.f32 %v3350_v2, 0.0  ;;  %v3383_v33 = vmax.f32 %v3351_v38, 0.0  ;;  %v3386_v43 = vmax.f32 %v3354_v42, 0.0  ;;  %v3387_v46 = vmax.f32 %v3355_v49, 0.0 }
 0x7a6   :  { %v3378_v19 = vadd.f32 %v3346_v26, %v11907_v0  ;;  %v3379_v10 = vadd.f32 %v3347_v21, %v11908_v13  ;;  %v3380_v56 = vmax.f32 %v3348_v53, 0.0  ;;  %v3381_v35 = vmax.f32 %v3349_v55, 0.0  ;;  %v11911_v26 = vld [vmem:[#allocation66_spill] sm:$0xff] }
 0x7a7   :  { %v9870_v15 = vpack.c.bf16 %v3383_v33, %v3382_v12  ;;  %v3362_v60 = vadd.f32 %v3330_v4, %v11909_v17  ;;  %v3363_v57 = vadd.f32 %v3331_v45, %v11910_v59  ;;  %v3344_v30 = vadd.f32 %v9820_v41, %v3305_v25  ;;  %v11913_v4 = vld [vmem:[#allocation67_spill] sm:$0xff]  ;;  %v11914_v45 = vld [vmem:[#allocation42_spill] sm:$0xff]  ;;  %v11915_v12 = vld [vmem:[#allocation49_spill] sm:$0xff] }
 0x7a8   :  { %v3410_v27 = vmax.f32 %v3378_v19, 0.0  ;;  %v3411_v34 = vmax.f32 %v3379_v10, 0.0  ;;  %v9875_v2 = vpack.c.bf16 %v3381_v35, %v3380_v56  ;;  %v3345_v38 = vadd.f32 %v9820_v41, %v9809_v8  ;;  %v11916_v13 = vld [vmem:[#allocation50_spill] sm:$0xff] }
 0x7a9   :  { %v3394_v42 = vmax.f32 %v3362_v60, 0.0  ;;  %v3395_v49 = vmax.f32 %v3363_v57, 0.0  ;;  %v3376_v21 = vadd.f32 %v3344_v30, %v11911_v26  ;;  %v3352_v53 = vadd.f32 %v3320_v18, %v11912_v3  ;;  %v11917_v60 = vld [vmem:[#allocation47_spill] sm:$0xff]  ;;  %v11918_v57 = vld [vmem:[#allocation44_spill] sm:$0xff] }
 0x7aa   :  { %v9881_v6 = vpack.c.bf16 %v3411_v34, %v3410_v27  ;;  %7119 = vmatprep.mubr.msk.bf16.mxu0 %vm1533_vm1, %v9875_v2  ;;  %v3377_v25 = vadd.f32 %v3345_v38, %v11913_v4  ;;  %v3353_v55 = vadd.f32 %v3321_v22, %v11914_v45  ;;  %v3360_v33 = vadd.f32 %v3328_v28, %v11915_v12  ;;  %v11919_v34 = vld [vmem:[#allocation63_spill] sm:$0xff]  ;;  %v11920_v26 = vld [vmem:[#allocation60_spill] sm:$0xff]  ;;  %v11923_v12 = vld [vmem:[#allocation61_spill] sm:$0xff] }
 0x7ab   :  { %v9888_v0 = vpack.c.bf16 %v3395_v49, %v3394_v42  ;;  %7120 = vmatmul.mubr.msk.bf16.vlgmr.msra.gmra.mxu0 %vm1533_vm1, %v9870_v15  ;;  %v3408_v8 = vmax.f32 %v3376_v21, 0.0  ;;  %v3384_v19 = vmax.f32 %v3352_v53, 0.0  ;;  %v3361_v18 = vadd.f32 %v3329_v23, %v11916_v13  ;;  %v11921_v53 = vld [vmem:[#allocation45_spill] sm:$0xff] }
 0x7ac   :  { %6579 = vmatprep.subr.bf16.mxu1 %v9881_v6  ;;  %v3409_v10 = vmax.f32 %v3377_v25, 0.0  ;;  %v3385_v56 = vmax.f32 %v3353_v55, 0.0  ;;  %v3392_v35 = vmax.f32 %v3360_v33, 0.0  ;;  %v3342_v17 = vadd.f32 %v9820_v41, %v9836_v7  ;;  %v11922_v25 = vld [vmem:[#allocation46_spill] sm:$0xff] }
 0x7ad   :  { %6580 = vmatpush3.bf16.msra.mxu1 %v9888_v0  ;;  %v3393_v22 = vmax.f32 %v3361_v18, 0.0  ;;  %v3343_v28 = vadd.f32 %v9820_v41, %v9838_v62  ;;  %v3358_v59 = vadd.f32 %v3326_v29, %v11917_v60  ;;  %v3359_v30 = vadd.f32 %v3327_v61, %v11918_v57  ;;  %v11925_v18 = vld [vmem:[#allocation59_spill] sm:$0xff] }
 0x7ae   :  { %v9901_v27 = vpack.c.bf16 %v3409_v10, %v3408_v8  ;;  %v9903_v23 = vpack.c.bf16 %v3385_v56, %v3384_v19  ;;  %v3374_v38 = vadd.f32 %v3342_v17, %v11919_v34  ;;  %v3415_v42 = vpack.c.bf16 %v3387_v46, %v3386_v43  ;;  %v11924_v8 = vld [vmem:[#allocation62_spill] sm:$0xff] }
 0x7af   :  { %v3418_v49 = vpack.c.bf16 %v3393_v22, %v3392_v35  ;;  %v3375_v7 = vadd.f32 %v3343_v28, %v11920_v26  ;;  %v3390_v21 = vmax.f32 %v3358_v59, 0.0  ;;  %v3391_v3 = vmax.f32 %v3359_v30, 0.0 }
 0x7b0   :  { %6581 = vmatprep.subr.bf16.mxu1 %v9901_v27  ;;  %7123 = vmatprep.mubr.msk.bf16.mxu0 %vm1533_vm1, %v9903_v23  ;;  %v3406_v62 = vmax.f32 %v3374_v38, 0.0  ;;  %v3340_v29 = vadd.f32 %v9820_v41, %v9832_v14  ;;  %v3341_v61 = vadd.f32 %v9820_v41, %v9834_v48  ;;  %v3356_v43 = vadd.f32 %v9849_v44, %v11921_v53  ;;  %v11928_v38 = vld [vmem:[#allocation58_spill] sm:$0xff] }
 0x7b1   :  { %6582 = vmatpush3.bf16.msra.mxu1 %v3418_v49  ;;  %v3407_v46 = vmax.f32 %v3375_v7, 0.0  ;;  %v3417_v4 = vpack.c.bf16 %v3391_v3, %v3390_v21  ;;  %v3357_v45 = vadd.f32 %v9852_v54, %v11922_v25  ;;  %v3338_v55 = vadd.f32 %v9820_v41, %v9828_v52  ;;  %v11926_v52 = vld [vmem:[#allocation56_spill] sm:$0xff] }
 0x7b2   :  { %v3372_v33 = vadd.f32 %v3340_v29, %v11923_v12  ;;  %v3373_v19 = vadd.f32 %v3341_v61, %v11924_v8  ;;  %v3388_v14 = vmax.f32 %v3356_v43, 0.0  ;;  %v3339_v48 = vadd.f32 %v9820_v41, %v9830_v37  ;;  %v11927_v37 = vld [vmem:[#allocation57_spill] sm:$0xff]  ;;  %v11930_v61 = vld [vmem:[#allocation52_spill] sm:$0xff]  ;;  %v7552_v8 = vld [vmem:[%s11779_s20 + $0x40] ss:$8 sps:$4 sm:$0xff]  }
 0x7b3   :  { %v3425_v13 = vpack.c.bf16 %v3407_v46, %v3406_v62  ;;  %7124 = vmatmul.mubr.msk.bf16.gmra.mxu0 %vm1533_vm1, %v3415_v42  ;;  %v3389_v44 = vmax.f32 %v3357_v45, 0.0  ;;  %v3370_v10 = vadd.f32 %v3338_v55, %v11925_v18  ;;  %v3336_v54 = vadd.f32 %v9820_v41, %v9824_v58  ;;  %v11931_v46 = vld [vmem:[#allocation53_spill] sm:$0xff]  ;;  %v7559_v18 = vld [vmem:[%s11779_s20 + $0x84] ss:$8 sps:$4 sm:$0xff]  }
 0x7b4   :  { %v3404_v56 = vmax.f32 %v3372_v33, 0.0  ;;  %v3405_v35 = vmax.f32 %v3373_v19, 0.0  ;;  %v3371_v17 = vadd.f32 %v3339_v48, %v11926_v52  ;;  %v3337_v22 = vadd.f32 %v9820_v41, %v9826_v1  ;;  %v11929_v1 = vld [vmem:[#allocation55_spill] sm:$0xff]  ;;  %v7553_v19 = vld [vmem:[%s11779_s20 + $0x54] ss:$8 sps:$4 sm:$0xff]  }
 0x7b5   :  { %6583 = vmatprep.subr.bf16.mxu1 %v3425_v13  ;;  %v3416_v28 = vpack.c.bf16 %v3389_v44, %v3388_v14  ;;  %v3402_v60 = vmax.f32 %v3370_v10, 0.0  ;;  %v3368_v59 = vadd.f32 %v3336_v54, %v11927_v37  ;;  %v3334_v57 = vadd.f32 %v9820_v41, %v9815_v24  ;;  %v7555_v14 = vld [vmem:[%s11779_s20 + $0x64] ss:$8 sps:$4 sm:$0xff]   ;;  %v7556_v48 = vld [vmem:[%s11779_s20 + $0x60] ss:$8 sps:$4 sm:$0xff]  }
 0x7b6   :  { %6584 = vmatpush3.bf16.msra.mxu1 %v3417_v4  ;;  %v3424_v30 = vpack.c.bf16 %v3405_v35, %v3404_v56  ;;  %v3403_v34 = vmax.f32 %v3371_v17, 0.0  ;;  %v3369_v58 = vadd.f32 %v3337_v22, %v11928_v38  ;;  %v3335_v26 = vadd.f32 %v9820_v41, %v9822_v20  ;;  %v11932_v20 = vld [vmem:[#allocation54_spill] sm:$0xff]  ;;  %v7558_v44 = vld [vmem:[%s11779_s20 + $0x70] ss:$8 sps:$4 sm:$0xff]   ;;  %v7561_v54 = vld [vmem:[%s11779_s20 + $0x94] ss:$8 sps:$4 sm:$0xff]  }
 0x7b7   :  { %7127 = vmatprep.mubr.msk.bf16.mxu0 %vm1533_vm1, %v3416_v28  ;;  %v3400_v7 = vmax.f32 %v3368_v59, 0.0  ;;  %v3366_v21 = vadd.f32 %v3334_v57, %v11929_v1  ;;  %v3332_v3 = vadd.f32 %v9820_v41, %v9811_v50  ;;  %v3333_v62 = vadd.f32 %v9820_v41, %v9813_v63  ;;  %v7560_v10 = vld [vmem:[%s11779_s20 + $0x80] ss:$8 sps:$4 sm:$0xff]   ;;  %v7359_v56 = vld [vmem:[%s11667_s11 + $0x18] sm:$0xff]   ;;  %v7563_v52 = vld [vmem:[%s11779_s20 + $0xa4] ss:$8 sps:$4 sm:$0xff]  }
 0x7b8   :  { %6585 = vmatprep.subr.bf16.mxu1 %v3424_v30  ;;  %v3423_v24 = vpack.c.bf16 %v3403_v34, %v3402_v60  ;;  %v3401_v29 = vmax.f32 %v3369_v58, 0.0  ;;  %v3367_v53 = vadd.f32 %v3335_v26, %v11930_v61  ;;  %7151 = vmatprep.subr.bf16.mxu0 %v7359_v56  ;;  %v7562_v35 = vld [vmem:[%s11779_s20 + $0x90] ss:$8 sps:$4 sm:$0xff]   ;;  %v7361_v22 = vld [vmem:[%s11667_s11 + $0x8] sm:$0xff]   ;;  %v7565_v60 = vld [vmem:[%s11779_s20 + $0xb4] ss:$8 sps:$4 sm:$0xff]  }
 0x7b9   :  { %v3398_v43 = vmax.f32 %v3366_v21, 0.0  ;;  %v3364_v25 = vadd.f32 %v3332_v3, %v11931_v46  ;;  %v3365_v45 = vadd.f32 %v3333_v62, %v11932_v20  ;;  %7152 = vmatpush3.bf16.msra.mxu0 %v7359_v56  ;;  %v7360_v17 = vld [vmem:[%s11667_s11 + $0x10] sm:$0xff]   ;;  %v7362_v37 = vld [vmem:[%s11667_s11] sm:$0xff]  }
 0x7ba   :  { %6586 = vmatpush3.bf16.msra.mxu1 %v3416_v28  ;;  %v3422_v55 = vpack.c.bf16 %v3401_v29, %v3400_v7  ;;  %v3399_v12 = vmax.f32 %v3367_v53, 0.0  ;;  %7153 = vmatprep.subr.bf16.mxu0 %v7360_v17  ;;  %v7564_v28 = vld [vmem:[%s11779_s20 + $0xa0] ss:$8 sps:$4 sm:$0xff]   ;;  %v7566_v59 = vld [vmem:[%s11779_s20 + $0xb0] ss:$8 sps:$4 sm:$0xff]  }
 0x7bb   :  { %6587 = vmatprep.subr.bf16.mxu1 %v3423_v24  ;;  %7128 = vmatmul.mubr.msk.bf16.gmra.mxu0 %vm1533_vm1, %v3417_v4  ;;  %v3396_v50 = vmax.f32 %v3364_v25, 0.0  ;;  %v3397_v33 = vmax.f32 %v3365_v45, 0.0  ;;  %v7550_v4 = vld [vmem:[%s11779_s20 + $0x30] ss:$8 sps:$4 sm:$0xff]   ;;  %v7567_v57 = vld [vmem:[%s11779_s20 + $0xc4] ss:$8 sps:$4 sm:$0xff]  }
 0x7bc   :  { %7131 = vmatprep.mubr.msk.bf16.mxu0 %vm1533_vm1, %v3418_v49  ;;  %v3421_v63 = vpack.c.bf16 %v3399_v12, %v3398_v43  ;;  %v7549_v49 = vld [vmem:[%s11779_s20 + $0x34] ss:$8 sps:$4 sm:$0xff]   ;;  %v7570_v38 = vld [vmem:[%s11779_s20 + $0xd0] ss:$8 sps:$4 sm:$0xff]   ;;  %v7571_v58 = vld [vmem:[%s11779_s20 + $0xe4] ss:$8 sps:$4 sm:$0xff]  }
 0x7bd   :  { %v3420_v41 = vpack.c.bf16 %v3397_v33, %v3396_v50  ;;  %7154 = vmatpush3.bf16.msra.mxu0 %v7360_v17  ;;  %v7569_v34 = vld [vmem:[%s11779_s20 + $0xd4] ss:$8 sps:$4 sm:$0xff]   ;;  %v7572_v26 = vld [vmem:[%s11779_s20 + $0xe0] ss:$8 sps:$4 sm:$0xff]   ;;  %v7574_v1 = vld [vmem:[%s11779_s20 + $0xf0] ss:$8 sps:$4 sm:$0xff]  }
 0x7be   :  { %6588 = vmatpush3.bf16.msra.mxu1 %v3415_v42  ;;  %v7544_v42 = vld [vmem:[%s11779_s20] ss:$8 sps:$4 sm:$0xff]   ;;  %7155 = vmatprep.subr.bf16.mxu0 %v7361_v22  ;;  %v7573_v7 = vld [vmem:[%s11779_s20 + $0xf4] ss:$8 sps:$4 sm:$0xff]   ;;  %v7575_v21 = vld [vmem:[%s11779_s20 + $0x4] ss:$8 sps:$4 sm:$0xff]  }
 0x7bf   :  { %6589 = vmatprep.subr.bf16.mxu1 %v3422_v55 }
 0x7c1   :  { %7156 = vmatpush3.bf16.msra.mxu0 %v7361_v22 }
 0x7c2   :  { %6590 = vmatpush3.bf16.msra.mxu1 %v9903_v23  ;;  %v7548_v23 = vld [vmem:[%s11779_s20 + $0x20] ss:$8 sps:$4 sm:$0xff]   ;;  %7157 = vmatprep.subr.bf16.mxu0 %v7362_v37 }
 0x7c3   :  { %6591 = vmatprep.subr.bf16.mxu1 %v3421_v63  ;;  %7132 = vmatmul.mubr.msk.bf16.gmra.mxu0 %vm1533_vm1, %v9888_v0  ;;  %v7545_v0 = vld [vmem:[%s11779_s20 + $0x14] ss:$8 sps:$4 sm:$0xff]  }
 0x7c4   :  { %7135 = vmatprep.mubr.msk.bf16.mxu0 %vm1533_vm1, %v3420_v41 }
 0x7c5   :  { %7158 = vmatpush3.bf16.msra.mxu0 %v7362_v37 }
 0x7c6   :  { %6592 = vmatpush3.bf16.msra.mxu1 %v9870_v15  ;;  %v7546_v15 = vld [vmem:[%s11779_s20 + $0x10] ss:$8 sps:$4 sm:$0xff]  }
 0x7c7   :  { %6593 = vmatprep.subr.bf16.mxu1 %v3420_v41 }
 0x7ca   :  { %6594 = vmatpush3.bf16.msra.mxu1 %v9875_v2  ;;  %v7547_v2 = vld [vmem:[%s11779_s20 + $0x24] ss:$8 sps:$4 sm:$0xff]  }
 0x7cb   :  { %7136 = vmatmul.mubr.msk.bf16.gmra.mxu0 %vm1533_vm1, %v3421_v63 }
 0x7cc   :  { %7139 = vmatprep.mubr.msk.bf16.mxu0 %vm1533_vm1, %v3422_v55 }
 0x7cd   :  { %3461 = vmatmul.mubr.bf16.vlgmr.msra.gmra.mxu1 %v7544_v42 }
 0x7ce   :  { %3468 = vmatprep.mubr.bf16.mxu1 %v7545_v0 }
 0x7d3   :  { %7140 = vmatmul.mubr.msk.bf16.gmra.mxu0 %vm1533_vm1, %v3423_v24 }
 0x7d4   :  { %7143 = vmatprep.mubr.msk.bf16.mxu0 %vm1533_vm1, %v3424_v30  ;;  %v7568_v30 = vld [vmem:[%s11779_s20 + $0xc0] ss:$8 sps:$4 sm:$0xff]  }
 0x7d5   :  { %3469 = vmatmul.mubr.bf16.gmra.mxu1 %v7546_v15 }
 0x7d6   :  { %3476 = vmatprep.mubr.bf16.mxu1 %v7547_v2 }
 0x7db   :  { %7144 = vmatmul.mubr.msk.bf16.gmra.mxu0 %vm1533_vm1, %v3425_v13  ;;  %v7557_v13 = vld [vmem:[%s11779_s20 + $0x74] ss:$8 sps:$4 sm:$0xff]  }
 0x7dc   :  { %7147 = vmatprep.mubr.msk.bf16.mxu0 %vm1533_vm1, %v9901_v27  ;;  %v7551_v27 = vld [vmem:[%s11779_s20 + $0x44] ss:$8 sps:$4 sm:$0xff]  }
 0x7dd   :  { %3477 = vmatmul.mubr.bf16.gmra.mxu1 %v7548_v23 }
 0x7de   :  { %3484 = vmatprep.mubr.bf16.mxu1 %v7549_v49 }
 0x7e3   :  { %7148 = vmatmul.mubr.msk.bf16.gmra.mxu0 %vm1533_vm1, %v9881_v6  ;;  %v7554_v6 = vld [vmem:[%s11779_s20 + $0x50] ss:$8 sps:$4 sm:$0xff]  }
 0x7e5   :  { %3485 = vmatmul.mubr.bf16.gmra.mxu1 %v7550_v4 }
 0x7e6   :  { %3492 = vmatprep.mubr.bf16.mxu1 %v7551_v27 }
 0x7ed   :  { %3493 = vmatmul.mubr.bf16.gmra.mxu1 %v7552_v8 }
 0x7ee   :  { %3500 = vmatprep.mubr.bf16.mxu1 %v7553_v19 }
 0x7f5   :  { %3501 = vmatmul.mubr.bf16.gmra.mxu1 %v7554_v6 }
 0x7f6   :  { %3508 = vmatprep.mubr.bf16.mxu1 %v7555_v14 }
 0x7fd   :  { %3509 = vmatmul.mubr.bf16.gmra.mxu1 %v7556_v48 }
 0x7fe   :  { %3516 = vmatprep.mubr.bf16.mxu1 %v7557_v13 }
 0x805   :  { %3517 = vmatmul.mubr.bf16.gmra.mxu1 %v7558_v44 }
 0x806   :  { %3524 = vmatprep.mubr.bf16.mxu1 %v7559_v18 }
 0x80d   :  { %3525 = vmatmul.mubr.bf16.gmra.mxu1 %v7560_v10 }
 0x80e   :  { %3532 = vmatprep.mubr.bf16.mxu1 %v7561_v54 }
 0x815   :  { %3533 = vmatmul.mubr.bf16.gmra.mxu1 %v7562_v35 }
 0x816   :  { %3540 = vmatprep.mubr.bf16.mxu1 %v7563_v52 }
 0x81d   :  { %3541 = vmatmul.mubr.bf16.gmra.mxu1 %v7564_v28 }
 0x81e   :  { %3548 = vmatprep.mubr.bf16.mxu1 %v7565_v60 }
 0x825   :  { %3549 = vmatmul.mubr.bf16.gmra.mxu1 %v7566_v59 }
 0x826   :  { %3556 = vmatprep.mubr.bf16.mxu1 %v7567_v57 }
 0x82d   :  { %3557 = vmatmul.mubr.bf16.gmra.mxu1 %v7568_v30 }
 0x82e   :  { %3564 = vmatprep.mubr.bf16.mxu1 %v7569_v34 }
 0x835   :  { %3565 = vmatmul.mubr.bf16.gmra.mxu1 %v7570_v38 }
 0x836   :  { %3572 = vmatprep.mubr.bf16.mxu1 %v7571_v58 }
 0x83d   :  { %3573 = vmatmul.mubr.bf16.gmra.mxu1 %v7572_v26 }
 0x83e   :  { %3580 = vmatprep.mubr.bf16.mxu1 %v7573_v7 }
 0x845   :  { %3581 = vmatmul.mubr.bf16.gmra.mxu1 %v7574_v1 }
 0x846   :  { %4515 = vmatprep.mubr.bf16.mxu1 %v7575_v21 }
 0x88d   :  { %v6595_v3 = vpop.f32.mrf.mxu1 }
 0x88f   :  { %v6596_v62 = vpop.f32.mrf.mxu1 }
 0x890   :  { %v6597_v29 = vadd.f32 %v6596_v62, %v6595_v3  ;;  %v11933_v3 = vld [vmem:[#allocation15_spill] sm:$0xff] }
 0x891   :  { %v6598_v24 = vpop.f32.mrf.mxu1 }
 0x892   :  { %v3589_v46 = vmul.f32 %v6597_v29, %v11848_v5 }
 0x893   :  { %v6599_v61 = vpop.f32.mrf.mxu1 }
 0x894   :  { %v6600_v53 = vadd.f32 %v6599_v61, %v6598_v24 }
 0x895   :  { %v6601_v43 = vpop.f32.mrf.mxu1 }
 0x896   :  { %v3590_v25 = vmul.f32 %v6600_v53, %v11849_v16 }
 0x897   :  { %v6602_v20 = vpop.f32.mrf.mxu1 }
 0x898   :  { %v3621_v45 = vpack.c.bf16 %v3590_v25, %v3589_v46  ;;  %v6603_v12 = vadd.f32 %v6602_v20, %v6601_v43  ;;  %v11934_v20 = vld [vmem:[#allocation16_spill] sm:$0xff] }
 0x899   :  { %v6604_v55 = vpop.f32.mrf.mxu1 }
 0x89a   :  { %7159 = vmatprep.mubr.msk.bf16.mxu0 %vm1533_vm1, %v3621_v45  ;;  %v3591_v41 = vmul.f32 %v6603_v12, %v11850_v32 }
 0x89b   :  { %v6605_v50 = vpop.f32.mrf.mxu1 }
 0x89c   :  { %v6606_v33 = vadd.f32 %v6605_v50, %v6604_v55  ;;  %v11935_v55 = vld [vmem:[#allocation17_spill] sm:$0xff] }
 0x89d   :  { %v6607_v63 = vpop.f32.mrf.mxu1 }
 0x89e   :  { %v3592_v42 = vmul.f32 %v6606_v33, %v11851_v39 }
 0x89f   :  { %v6608_v0 = vpop.f32.mrf.mxu1 }
 0x8a0   :  { %v3622_v15 = vpack.c.bf16 %v3592_v42, %v3591_v41  ;;  %v6609_v23 = vadd.f32 %v6608_v0, %v6607_v63 }
 0x8a1   :  { %v6610_v2 = vpop.f32.mrf.mxu1 }
 0x8a2   :  { %7160 = vmatmul.mubr.msk.bf16.vlgmr.msra.gmra.mxu0 %vm1533_vm1, %v3622_v15  ;;  %v3593_v8 = vmul.f32 %v6609_v23, %v11852_v31 }
 0x8a3   :  { %v6611_v49 = vpop.f32.mrf.mxu1 }
 0x8a4   :  { %v6612_v4 = vadd.f32 %v6611_v49, %v6610_v2  ;;  %v11936_v2 = vld [vmem:[#allocation18_spill] sm:$0xff]  ;;  %v11937_v49 = vld [vmem:[#allocation19_spill] sm:$0xff] }
 0x8a5   :  { %v6613_v27 = vpop.f32.mrf.mxu1 }
 0x8a6   :  { %v3594_v19 = vmul.f32 %v6612_v4, %v11853_v51 }
 0x8a7   :  { %v6614_v6 = vpop.f32.mrf.mxu1 }
 0x8a8   :  { %v3623_v14 = vpack.c.bf16 %v3594_v19, %v3593_v8  ;;  %v6615_v13 = vadd.f32 %v6614_v6, %v6613_v27 }
 0x8a9   :  { %v6616_v48 = vpop.f32.mrf.mxu1 }
 0x8aa   :  { %7163 = vmatprep.mubr.msk.bf16.mxu0 %vm1533_vm1, %v3623_v14  ;;  %v3595_v54 = vmul.f32 %v6615_v13, %v11854_v36 }
 0x8ab   :  { %v6617_v44 = vpop.f32.mrf.mxu1 }
 0x8ac   :  { %v6618_v18 = vadd.f32 %v6617_v44, %v6616_v48  ;;  %v11938_v44 = vld [vmem:[#allocation20_spill] sm:$0xff] }
 0x8ad   :  { %v6619_v10 = vpop.f32.mrf.mxu1 }
 0x8ae   :  { %v3596_v56 = vmul.f32 %v6618_v18, %v11855_v47 }
 0x8af   :  { %v6620_v35 = vpop.f32.mrf.mxu1 }
 0x8b0   :  { %v3624_v52 = vpack.c.bf16 %v3596_v56, %v3595_v54  ;;  %v6621_v22 = vadd.f32 %v6620_v35, %v6619_v10  ;;  %v11939_v10 = vld [vmem:[#allocation21_spill] sm:$0xff] }
 0x8b1   :  { %v6622_v17 = vpop.f32.mrf.mxu1 }
 0x8b2   :  { %7164 = vmatmul.mubr.msk.bf16.gmra.mxu0 %vm1533_vm1, %v3624_v52  ;;  %v3597_v59 = vmul.f32 %v6621_v22, %v11856_v11 }
 0x8b3   :  { %v6623_v28 = vpop.f32.mrf.mxu1 }
 0x8b4   :  { %v6624_v60 = vadd.f32 %v6623_v28, %v6622_v17 }
 0x8b5   :  { %v6625_v37 = vpop.f32.mrf.mxu1 }
 0x8b6   :  { %v3598_v57 = vmul.f32 %v6624_v60, %v11857_v9 }
 0x8b7   :  { %v6626_v30 = vpop.f32.mrf.mxu1 }
 0x8b8   :  { %v3625_v34 = vpack.c.bf16 %v3598_v57, %v3597_v59  ;;  %v6627_v58 = vadd.f32 %v6626_v30, %v6625_v37  ;;  %v11940_v37 = vld [vmem:[#allocation22_spill] sm:$0xff]  ;;  %v11941_v57 = vld [vmem:[#allocation23_spill] sm:$0xff] }
 0x8b9   :  { %v6628_v38 = vpop.f32.mrf.mxu1 }
 0x8ba   :  { %7167 = vmatprep.mubr.msk.bf16.mxu0 %vm1533_vm1, %v3625_v34  ;;  %v3599_v21 = vmul.f32 %v6627_v58, %v11858_v40 }
 0x8bb   :  { %v6629_v26 = vpop.f32.mrf.mxu1 }
 0x8bc   :  { %v6630_v7 = vadd.f32 %v6629_v26, %v6628_v38 }
 0x8bd   :  { %v6631_v1 = vpop.f32.mrf.mxu1 }
 0x8be   :  { %v3600_v62 = vmul.f32 %v6630_v7, %v11933_v3 }
 0x8bf   :  { %v6632_v24 = vpop.f32.mrf.mxu1 }
 0x8c0   :  { %v3626_v29 = vpack.c.bf16 %v3600_v62, %v3599_v21  ;;  %v6633_v53 = vadd.f32 %v6632_v24, %v6631_v1  ;;  %v11942_v62 = vld [vmem:[#allocation24_spill] sm:$0xff] }
 0x8c1   :  { %v6634_v61 = vpop.f32.mrf.mxu1 }
 0x8c2   :  { %7168 = vmatmul.mubr.msk.bf16.gmra.mxu0 %vm1533_vm1, %v3626_v29  ;;  %v3601_v45 = vmul.f32 %v6633_v53, %v11934_v20  ;;  %v11943_v29 = vld [vmem:[#allocation25_spill] sm:$0xff] }
 0x8c3   :  { %v6635_v43 = vpop.f32.mrf.mxu1 }
 0x8c4   :  { %v6636_v46 = vadd.f32 %v6635_v43, %v6634_v61 }
 0x8c5   :  { %v6637_v25 = vpop.f32.mrf.mxu1 }
 0x8c6   :  { %v3602_v12 = vmul.f32 %v6636_v46, %v11935_v55 }
 0x8c7   :  { %v6638_v50 = vpop.f32.mrf.mxu1 }
 0x8c8   :  { %v3627_v33 = vpack.c.bf16 %v3602_v12, %v3601_v45  ;;  %v6639_v41 = vadd.f32 %v6638_v50, %v6637_v25  ;;  %v10103_v25 = vpop.f32.mrf.mxu0 }
 0x8c9   :  { %v6640_v63 = vpop.f32.mrf.mxu1 }
 0x8ca   :  { %7171 = vmatprep.mubr.msk.bf16.mxu0 %vm1533_vm1, %v3627_v33  ;;  %v3603_v23 = vmul.f32 %v6639_v41, %v11936_v2  ;;  %v11944_v41 = vld [vmem:[#allocation26_spill] sm:$0xff] }
 0x8cb   :  { %v6641_v42 = vpop.f32.mrf.mxu1 }
 0x8cc   :  { %v6642_v0 = vadd.f32 %v6641_v42, %v6640_v63  ;;  %v10106_v63 = vpop.f32.mrf.mxu0 }
 0x8cd   :  { %v6643_v15 = vpop.f32.mrf.mxu1 }
 0x8ce   :  { %v3604_v4 = vmul.f32 %v6642_v0, %v11937_v49  ;;  %v11945_v0 = vld [vmem:[#allocation27_spill] sm:$0xff] }
 0x8cf   :  { %v6644_v27 = vpop.f32.mrf.mxu1 }
 0x8d0   :  { %v3628_v8 = vpack.c.bf16 %v3604_v4, %v3603_v23  ;;  %v6645_v6 = vadd.f32 %v6644_v27, %v6643_v15 }
 0x8d1   :  { %v6646_v19 = vpop.f32.mrf.mxu1 }
 0x8d2   :  { %7172 = vmatmul.mubr.msk.bf16.gmra.mxu0 %vm1533_vm1, %v3628_v8  ;;  %v3605_v18 = vmul.f32 %v6645_v6, %v11938_v44  ;;  %v10110_v8 = vpop.f32.mrf.mxu0 }
 0x8d3   :  { %v6647_v14 = vpop.f32.mrf.mxu1 }
 0x8d4   :  { %v6648_v48 = vadd.f32 %v6647_v14, %v6646_v19 }
 0x8d5   :  { %v6649_v13 = vpop.f32.mrf.mxu1 }
 0x8d6   :  { %v3606_v54 = vmul.f32 %v6648_v48, %v11939_v10 }
 0x8d7   :  { %v6650_v56 = vpop.f32.mrf.mxu1 }
 0x8d8   :  { %v3629_v35 = vpack.c.bf16 %v3606_v54, %v3605_v18  ;;  %v6651_v17 = vadd.f32 %v6650_v56, %v6649_v13  ;;  %v10113_v13 = vpop.f32.mrf.mxu0  ;;  %v11946_v18 = vld [vmem:[#allocation28_spill] sm:$0xff]  ;;  %v11947_v56 = vld [vmem:[#allocation29_spill] sm:$0xff] }
 0x8d9   :  { %v6652_v52 = vpop.f32.mrf.mxu1 }
 0x8da   :  { %7175 = vmatprep.mubr.msk.bf16.mxu0 %vm1533_vm1, %v3629_v35  ;;  %v3607_v59 = vmul.f32 %v6651_v17, %v11940_v37 }
 0x8db   :  { %v6653_v22 = vpop.f32.mrf.mxu1 }
 0x8dc   :  { %v6654_v28 = vadd.f32 %v6653_v22, %v6652_v52 }
 0x8dd   :  { %v6655_v60 = vpop.f32.mrf.mxu1 }
 0x8de   :  { %v3608_v30 = vmul.f32 %v6654_v28, %v11941_v57  ;;  %v10117_v28 = vpop.f32.mrf.mxu0 }
 0x8df   :  { %v6656_v34 = vpop.f32.mrf.mxu1 }
 0x8e0   :  { %v3630_v38 = vpack.c.bf16 %v3608_v30, %v3607_v59  ;;  %v6657_v26 = vadd.f32 %v6656_v34, %v6655_v60 }
 0x8e1   :  { %v6658_v58 = vpop.f32.mrf.mxu1 }
 0x8e2   :  { %7176 = vmatmul.mubr.msk.bf16.gmra.mxu0 %vm1533_vm1, %v3630_v38  ;;  %v3609_v24 = vmul.f32 %v6657_v26, %v11942_v62  ;;  %v10120_v38 = vpop.f32.mrf.mxu0 }
 0x8e3   :  { %v6659_v7 = vpop.f32.mrf.mxu1 }
 0x8e4   :  { %v6660_v1 = vadd.f32 %v6659_v7, %v6658_v58  ;;  %v11948_v58 = vld [vmem:[#allocation30_spill] sm:$0xff]  ;;  %v11949_v7 = vld [vmem:[#allocation31_spill] sm:$0xff] }
 0x8e5   :  { %v6661_v21 = vpop.f32.mrf.mxu1 }
 0x8e6   :  { %v3610_v61 = vmul.f32 %v6660_v1, %v11943_v29 }
 0x8e7   :  { %v6662_v53 = vpop.f32.mrf.mxu1 }
 0x8e8   :  { %v3631_v43 = vpack.c.bf16 %v3610_v61, %v3609_v24  ;;  %v6663_v45 = vadd.f32 %v6662_v53, %v6661_v21  ;;  %v10124_v53 = vpop.f32.mrf.mxu0 }
 0x8e9   :  { %v6664_v46 = vpop.f32.mrf.mxu1 }
 0x8ea   :  { %7179 = vmatprep.mubr.msk.bf16.mxu0 %vm1533_vm1, %v3631_v43  ;;  %v3611_v42 = vmul.f32 %v6663_v45, %v11944_v41 }
 0x8eb   :  { %v6665_v12 = vpop.f32.mrf.mxu1 }
 0x8ec   :  { %v6666_v50 = vadd.f32 %v6665_v12, %v6664_v46 }
 0x8ed   :  { %v6667_v33 = vpop.f32.mrf.mxu1 }
 0x8ee   :  { %v3612_v15 = vmul.f32 %v6666_v50, %v11945_v0  ;;  %v3778_v50 = vpop.f32.mrf.mxu0 }
 0x8ef   :  { %v6668_v23 = vpop.f32.mrf.mxu1 }
 0x8f0   :  { %v3632_v4 = vpack.c.bf16 %v3612_v15, %v3611_v42  ;;  %v6669_v19 = vadd.f32 %v6668_v23, %v6667_v33  ;;  %v11950_v33 = vld [vmem:[#allocation32_spill] sm:$0xff]  ;;  %v11951_v15 = vld [vmem:[#allocation33_spill] sm:$0xff] }
 0x8f1   :  { %v6670_v27 = vpop.f32.mrf.mxu1 }
 0x8f2   :  { %7180 = vmatmul.mubr.msk.bf16.gmra.mxu0 %vm1533_vm1, %v3632_v4  ;;  %v3613_v54 = vmul.f32 %v6669_v19, %v11946_v18 }
 0x8f3   :  { %v6671_v6 = vpop.f32.mrf.mxu1 }
 0x8f4   :  { %v6672_v14 = vadd.f32 %v6671_v6, %v6670_v27  ;;  %v10129_v6 = vpop.f32.mrf.mxu0 }
 0x8f5   :  { %v6673_v48 = vpop.f32.mrf.mxu1 }
 0x8f6   :  { %v3614_v35 = vmul.f32 %v6672_v14, %v11947_v56 }
 0x8f7   :  { %v6674_v52 = vpop.f32.mrf.mxu1 }
 0x8f8   :  { %v3633_v17 = vpack.c.bf16 %v3614_v35, %v3613_v54  ;;  %v6675_v60 = vadd.f32 %v6674_v52, %v6673_v48  ;;  %v3791_v35 = vpop.f32.mrf.mxu0  ;;  %v11952_v52 = vld [vmem:[#allocation34_spill] sm:$0xff] }
 0x8f9   :  { %v6676_v22 = vpop.f32.mrf.mxu1 }
 0x8fa   :  { %7183 = vmatprep.mubr.msk.bf16.mxu0 %vm1533_vm1, %v3633_v17  ;;  %v3615_v26 = vmul.f32 %v6675_v60, %v11948_v58 }
 0x8fb   :  { %v6677_v59 = vpop.f32.mrf.mxu1 }
 0x8fc   :  { %v6678_v30 = vadd.f32 %v6677_v59, %v6676_v22  ;;  %v11953_v22 = vld [vmem:[#allocation35_spill] sm:$0xff] }
 0x8fd   :  { %v6679_v34 = vpop.f32.mrf.mxu1 }
 0x8fe   :  { %v3616_v1 = vmul.f32 %v6678_v30, %v11949_v7  ;;  %v10134_v30 = vpop.f32.mrf.mxu0 }
 0x8ff   :  { %v6680_v21 = vpop.f32.mrf.mxu1 }
 0x900   :  { %v3634_v24 = vpack.c.bf16 %v3616_v1, %v3615_v26  ;;  %v6681_v43 = vadd.f32 %v6680_v21, %v6679_v34  ;;  %v3794_v34 = vpop.f32.mrf.mxu0 }
 0x901   :  { %v6682_v61 = vpop.f32.mrf.mxu1 }
 0x902   :  { %7184 = vmatmul.mubr.msk.bf16.gmra.mxu0 %vm1533_vm1, %v3634_v24  ;;  %v3617_v42 = vmul.f32 %v6681_v43, %v11950_v33  ;;  %v10137_v26 = vpop.f32.mrf.mxu0 }
 0x903   :  { %v6683_v46 = vpop.f32.mrf.mxu1 }
 0x904   :  { %v6684_v45 = vadd.f32 %v6683_v46, %v6682_v61  ;;  %v10139_v1 = vpop.f32.mrf.mxu0 }
 0x905   :  { %v6685_v12 = vpop.f32.mrf.mxu1 }
 0x906   :  { %v3618_v23 = vmul.f32 %v6684_v45, %v11951_v15  ;;  %v10141_v21 = vpop.f32.mrf.mxu0 }
 0x907   :  { %v6686_v4 = vpop.f32.mrf.mxu1 }
 0x908   :  { %v3635_v27 = vpack.c.bf16 %v3618_v23, %v3617_v42  ;;  %v6687_v14 = vadd.f32 %v6686_v4, %v6685_v12  ;;  %v10143_v24 = vpop.f32.mrf.mxu0 }
 0x909   :  { %v6688_v19 = vpop.f32.mrf.mxu1 }
 0x90a   :  { %7187 = vmatprep.mubr.msk.bf16.mxu0 %vm1533_vm1, %v3635_v27  ;;  %v3619_v17 = vmul.f32 %v6687_v14, %v11952_v52  ;;  %v10145_v61 = vpop.f32.mrf.mxu0 }
 0x90b   :  { %v6689_v48 = vpop.f32.mrf.mxu1 }
 0x90c   :  { %v6690_v54 = vadd.f32 %v6689_v48, %v6688_v19  ;;  %v10147_v43 = vpop.f32.mrf.mxu0 }
 0x90e   :  { %v3620_v60 = vmul.f32 %v6690_v54, %v11953_v22  ;;  %v10149_v46 = vpop.f32.mrf.mxu0 }
 0x910   :  { %v3636_v59 = vpack.c.bf16 %v3620_v60, %v3619_v17  ;;  %v10151_v45 = vpop.f32.mrf.mxu0 }
 0x912   :  { %7188 = vmatmul.mubr.msk.bf16.gmra.mxu0 %vm1533_vm1, %v3636_v59  ;;  %v10153_v12 = vpop.f32.mrf.mxu0 }
 0x914   :  { %v10155_v42 = vpop.f32.mrf.mxu0 }
 0x916   :  { %v10157_v23 = vpop.f32.mrf.mxu0 }
 0x918   :  { %v10159_v4 = vpop.f32.mrf.mxu0 }
 0x91a   :  { %v10161_v27 = vpop.f32.mrf.mxu0 }
 0x91c   :  { %v10163_v19 = vpop.f32.mrf.mxu0 }
 0x91e   :  { %v10165_v14 = vpop.f32.mrf.mxu0 }
 0x920   :  { %v10167_v48 = vpop.f32.mrf.mxu0 }
 0x922   :  { %v10169_v54 = vpop.f32.mrf.mxu0 }
 0x924   :  { %v10171_v17 = vpop.f32.mrf.mxu0 }
 0x926   :  { %v10173_v60 = vpop.f32.mrf.mxu0 }
 0x928   :  { %v10175_v59 = vpop.f32.mrf.mxu0 }
 0x962   :  { %v7161_v22 = vpop.f32.mrf.mxu0 }
 0x963   :  { %v10186_v62 = vadd.f32 %v7161_v22, %v10103_v25 }
 0x964   :  { %v3992_v52 = vpop.f32.mrf.mxu0 }
 0x965   :  { %v10181_v0 = vadd.f32 %v3992_v52, %v10106_v63 }
 0x966   :  { %v7162_v15 = vpop.f32.mrf.mxu0 }
 0x967   :  { %v4119_v57 = vsel %vm1533_vm1, %v10181_v0, 0.0 }
 0x968   :  { %v3995_v33 = vpop.f32.mrf.mxu0 }
 0x969   :  { %v10178_v56 = vadd.f32 %v3995_v33, %v10113_v13  ;;  %v4122_v13 = vsel %vm1533_vm1, %v10186_v62, 0.0  ;;  %v10193_v33 = vadd.f32 %v7162_v15, %v10110_v8 }
 0x96b   :  { %v4120_v41 = vsel %vm1533_vm1, %v10178_v56, 0.0  ;;  %v4124_v25 = vsel %vm1533_vm1, %v10193_v33, 0.0 }
 0x96c   :  { %v4121_v37 = vadd.f32 %v4120_v41, %v4119_v57 }
 0x96e   :  { %v4123_v52 = vadd.f32 %v4122_v13, %v4121_v37 }
 0x970   :  { %v4125_v41 = vadd.f32 %v4124_v25, %v4123_v52 }
 0x972   :  { %v7165_v7 = vpop.f32.mrf.mxu0 }
 0x973   :  { %v10207_v15 = vadd.f32 %v7165_v7, %v10117_v28 }
 0x974   :  { %v4008_v58 = vpop.f32.mrf.mxu0 }
 0x975   :  { %v10196_v63 = vadd.f32 %v4008_v58, %v10120_v38 }
 0x976   :  { %v7166_v18 = vpop.f32.mrf.mxu0 }
 0x977   :  { %v4126_v57 = vsel %vm1533_vm1, %v10196_v63, 0.0 }
 0x978   :  { %v4011_v29 = vpop.f32.mrf.mxu0  ;;  %v4127_v8 = vadd.f32 %v4126_v57, %v4125_v41 }
 0x979   :  { %v10198_v49 = vadd.f32 %v4011_v29, %v3778_v50  ;;  %v4130_v29 = vsel %vm1533_vm1, %v10207_v15, 0.0  ;;  %v10212_v50 = vadd.f32 %v7166_v18, %v10124_v53 }
 0x97b   :  { %v4128_v2 = vsel %vm1533_vm1, %v10198_v49, 0.0  ;;  %v4132_v57 = vsel %vm1533_vm1, %v10212_v50, 0.0 }
 0x97c   :  { %v4129_v38 = vadd.f32 %v4128_v2, %v4127_v8 }
 0x97e   :  { %v4131_v52 = vadd.f32 %v4130_v29, %v4129_v38 }
 0x980   :  { %v4133_v28 = vadd.f32 %v4132_v57, %v4131_v52 }
 0x982   :  { %v7169_v10 = vpop.f32.mrf.mxu0 }
 0x983   :  { %v10225_v18 = vadd.f32 %v7169_v10, %v10129_v6 }
 0x984   :  { %v4024_v44 = vpop.f32.mrf.mxu0 }
 0x985   :  { %v10214_v13 = vadd.f32 %v4024_v44, %v3791_v35  ;;  %v4138_v35 = vsel %vm1533_vm1, %v10225_v18, 0.0 }
 0x986   :  { %v7170_v22 = vpop.f32.mrf.mxu0 }
 0x987   :  { %v4134_v2 = vsel %vm1533_vm1, %v10214_v13, 0.0 }
 0x988   :  { %v4027_v37 = vpop.f32.mrf.mxu0  ;;  %v4135_v41 = vadd.f32 %v4134_v2, %v4133_v28 }
 0x989   :  { %v10216_v25 = vadd.f32 %v4027_v37, %v3794_v34  ;;  %v10230_v34 = vadd.f32 %v7170_v22, %v10134_v30 }
 0x98b   :  { %v4136_v7 = vsel %vm1533_vm1, %v10216_v25, 0.0  ;;  %v4140_v10 = vsel %vm1533_vm1, %v10230_v34, 0.0 }
 0x98c   :  { %v4137_v44 = vadd.f32 %v4136_v7, %v4135_v41 }
 0x98e   :  { %v4139_v37 = vadd.f32 %v4138_v35, %v4137_v44 }
 0x990   :  { %v4141_v57 = vadd.f32 %v4140_v10, %v4139_v37 }
 0x992   :  { %v7173_v58 = vpop.f32.mrf.mxu0 }
 0x994   :  { %v4040_v55 = vpop.f32.mrf.mxu0 }
 0x995   :  { %v10233_v38 = vadd.f32 %v4040_v55, %v10139_v1  ;;  %v10245_v55 = vadd.f32 %v7173_v58, %v10137_v26 }
 0x996   :  { %v7174_v8 = vpop.f32.mrf.mxu0 }
 0x997   :  { %v4142_v6 = vsel %vm1533_vm1, %v10233_v38, 0.0  ;;  %v4146_v7 = vsel %vm1533_vm1, %v10245_v55, 0.0  ;;  %v10250_v41 = vadd.f32 %v7174_v8, %v10141_v21 }
 0x998   :  { %v4043_v53 = vpop.f32.mrf.mxu0  ;;  %v4143_v22 = vadd.f32 %v4142_v6, %v4141_v57 }
 0x999   :  { %v10236_v29 = vadd.f32 %v4043_v53, %v10143_v24  ;;  %v4148_v37 = vsel %vm1533_vm1, %v10250_v41, 0.0 }
 0x99b   :  { %v4144_v30 = vsel %vm1533_vm1, %v10236_v29, 0.0 }
 0x99c   :  { %v4145_v1 = vadd.f32 %v4144_v30, %v4143_v22 }
 0x99e   :  { %v4147_v53 = vadd.f32 %v4146_v7, %v4145_v1 }
 0x9a0   :  { %v4149_v58 = vadd.f32 %v4148_v37, %v4147_v53 }
 0x9a2   :  { %v7177_v52 = vpop.f32.mrf.mxu0 }
 0x9a3   :  { %v10265_v8 = vadd.f32 %v7177_v52, %v10145_v61 }
 0x9a4   :  { %v4056_v2 = vpop.f32.mrf.mxu0 }
 0x9a5   :  { %v10253_v44 = vadd.f32 %v4056_v2, %v10147_v43 }
 0x9a6   :  { %v7178_v28 = vpop.f32.mrf.mxu0 }
 0x9a7   :  { %v4150_v26 = vsel %vm1533_vm1, %v10253_v44, 0.0  ;;  %v10270_v30 = vadd.f32 %v7178_v28, %v10149_v46 }
 0x9a8   :  { %v4059_v24 = vpop.f32.mrf.mxu0  ;;  %v4151_v6 = vadd.f32 %v4150_v26, %v4149_v58 }
 0x9a9   :  { %v10256_v35 = vadd.f32 %v4059_v24, %v10151_v45  ;;  %v4154_v45 = vsel %vm1533_vm1, %v10265_v8, 0.0  ;;  %v4156_v53 = vsel %vm1533_vm1, %v10270_v30, 0.0 }
 0x9ab   :  { %v4152_v10 = vsel %vm1533_vm1, %v10256_v35, 0.0 }
 0x9ac   :  { %v4153_v43 = vadd.f32 %v4152_v10, %v4151_v6 }
 0x9ae   :  { %v4155_v1 = vadd.f32 %v4154_v45, %v4153_v43 }
 0x9b0   :  { %v4157_v52 = vadd.f32 %v4156_v53, %v4155_v1 }
 0x9b2   :  { %v7181_v21 = vpop.f32.mrf.mxu0 }
 0x9b3   :  { %v4081_v58 = vadd.f32 %v7181_v21, %v10153_v12 }
 0x9b4   :  { %v4072_v57 = vpop.f32.mrf.mxu0 }
 0x9b5   :  { %v4073_v22 = vadd.f32 %v4072_v57, %v10155_v42  ;;  %v4162_v28 = vsel %vm1533_vm1, %v4081_v58, 0.0 }
 0x9b6   :  { %v7182_v2 = vpop.f32.mrf.mxu0 }
 0x9b7   :  { %v4158_v61 = vsel %vm1533_vm1, %v4073_v22, 0.0  ;;  %v4084_v42 = vadd.f32 %v7182_v2, %v10157_v23 }
 0x9b8   :  { %v4075_v24 = vpop.f32.mrf.mxu0  ;;  %v4159_v26 = vadd.f32 %v4158_v61, %v4157_v52 }
 0x9b9   :  { %v4076_v7 = vadd.f32 %v4075_v24, %v10159_v4  ;;  %v4164_v45 = vsel %vm1533_vm1, %v4084_v42, 0.0 }
 0x9bb   :  { %v4160_v37 = vsel %vm1533_vm1, %v4076_v7, 0.0 }
 0x9bc   :  { %v4161_v10 = vadd.f32 %v4160_v37, %v4159_v26 }
 0x9be   :  { %v4163_v6 = vadd.f32 %v4162_v28, %v4161_v10 }
 0x9c0   :  { %v4165_v24 = vadd.f32 %v4164_v45, %v4163_v6 }
 0x9c2   :  { %v7185_v46 = vpop.f32.mrf.mxu0 }
 0x9c3   :  { %v4097_v37 = vadd.f32 %v7185_v46, %v10161_v27 }
 0x9c4   :  { %v4088_v43 = vpop.f32.mrf.mxu0 }
 0x9c5   :  { %v4089_v4 = vadd.f32 %v4088_v43, %v10163_v19  ;;  %v4170_v2 = vsel %vm1533_vm1, %v4097_v37, 0.0 }
 0x9c6   :  { %v7186_v57 = vpop.f32.mrf.mxu0 }
 0x9c7   :  { %v4166_v1 = vsel %vm1533_vm1, %v4089_v4, 0.0  ;;  %v4100_v19 = vadd.f32 %v7186_v57, %v10165_v14 }
 0x9c8   :  { %v4091_v53 = vpop.f32.mrf.mxu0  ;;  %v4167_v12 = vadd.f32 %v4166_v1, %v4165_v24 }
 0x9c9   :  { %v4092_v61 = vadd.f32 %v4091_v53, %v10167_v48  ;;  %v4172_v6 = vsel %vm1533_vm1, %v4100_v19, 0.0 }
 0x9cb   :  { %v4168_v21 = vsel %vm1533_vm1, %v4092_v61, 0.0 }
 0x9cc   :  { %v4169_v52 = vadd.f32 %v4168_v21, %v4167_v12 }
 0x9ce   :  { %v4171_v26 = vadd.f32 %v4170_v2, %v4169_v52  ;;  %v10301_v52 = vld [vmem:[%s11670_s14 + $0x18] sm:$0xff]  }
 0x9cf   :  { %7191 = vmatprep.subr.bf16.mxu0 %v10301_v52 }
 0x9d0   :  { %v4173_v45 = vadd.f32 %v4172_v6, %v4171_v26  ;;  %7192 = vmatpush3.bf16.msra.mxu0 %v10301_v52 }
 0x9d2   :  { %v7189_v23 = vpop.f32.mrf.mxu0 }
 0x9d3   :  { %v4113_v24 = vadd.f32 %v7189_v23, %v10169_v54 }
 0x9d4   :  { %v4104_v10 = vpop.f32.mrf.mxu0 }
 0x9d5   :  { %v4105_v28 = vadd.f32 %v4104_v10, %v10171_v17  ;;  %v4178_v12 = vsel %vm1533_vm1, %v4113_v24, 0.0  ;;  %v10308_v10 = vld [vmem:[%s11670_s14 + $0x10] sm:$0xff]  }
 0x9d6   :  { %v7190_v43 = vpop.f32.mrf.mxu0  ;;  %7193 = vmatprep.subr.bf16.mxu0 %v10308_v10 }
 0x9d7   :  { %v4174_v48 = vsel %vm1533_vm1, %v4105_v28, 0.0  ;;  %v4116_v53 = vadd.f32 %v7190_v43, %v10173_v60  ;;  %7194 = vmatpush3.bf16.msra.mxu0 %v10308_v10 }
 0x9d8   :  { %v4107_v1 = vpop.f32.mrf.mxu0  ;;  %v4175_v46 = vadd.f32 %v4174_v48, %v4173_v45 }
 0x9d9   :  { %v4108_v27 = vadd.f32 %v4107_v1, %v10175_v59  ;;  %v4180_v17 = vsel %vm1533_vm1, %v4116_v53, 0.0 }
 0x9db   :  { %v4176_v14 = vsel %vm1533_vm1, %v4108_v27, 0.0 }
 0x9dc   :  { %v4177_v57 = vadd.f32 %v4176_v14, %v4175_v46 }
 0x9de   :  { %v4179_v21 = vadd.f32 %v4178_v12, %v4177_v57 }
 0x9e0   :  { %v4181_v2 = vadd.f32 %v4180_v17, %v4179_v21 }
 0x9e2   :  { %v4182_v54 = vrot.slane %v4181_v2, 4 }
 0x9e4   :  { %v4183_v60 = vadd.f32 %v4182_v54, %v4181_v2 }
 0x9e6   :  { %v4184_v59 = vrot.slane %v4183_v60, 2 }
 0x9e8   :  { %v4185_v23 = vadd.f32 %v4184_v59, %v4183_v60 }
 0x9ea   :  { %v4186_v26 = vrot.slane %v4185_v23, 1 }
 0x9ec   :  { %v4187_v43 = vadd.f32 %v4186_v26, %v4185_v23 }
 0x9ee   :  { %v10312_v6 = vmul.f32 0.00390625, %v4187_v43 }
 0x9f0   :  { %v10315_v48 = vsub.f32 %v4073_v22, %v10312_v6  ;;  %v10318_v45 = vsub.f32 %v4076_v7, %v10312_v6  ;;  %v10321_v1 = vsub.f32 %v4081_v58, %v10312_v6  ;;  %v10324_v46 = vsub.f32 %v4084_v42, %v10312_v6 }
 0x9f1   :  { %v10327_v14 = vsub.f32 %v4089_v4, %v10312_v6  ;;  %v10330_v57 = vsub.f32 %v4092_v61, %v10312_v6  ;;  %v10333_v12 = vsub.f32 %v4097_v37, %v10312_v6  ;;  %v10336_v22 = vsub.f32 %v4100_v19, %v10312_v6 }
 0x9f2   :  { %v10339_v7 = vsub.f32 %v4105_v28, %v10312_v6  ;;  %v10342_v58 = vsub.f32 %v4108_v27, %v10312_v6  ;;  %v10345_v42 = vsub.f32 %v4113_v24, %v10312_v6  ;;  %v10348_v4 = vsub.f32 %v4116_v53, %v10312_v6 }
 0x9f3   :  { %v10352_v61 = vsub.f32 %v10181_v0, %v10312_v6  ;;  %v10356_v37 = vsub.f32 %v10178_v56, %v10312_v6  ;;  %v10360_v19 = vsub.f32 %v10186_v62, %v10312_v6  ;;  %v10364_v28 = vsub.f32 %v10193_v33, %v10312_v6 }
 0x9f4   :  { %v10372_v0 = vsub.f32 %v10196_v63, %v10312_v6  ;;  %v10378_v62 = vsub.f32 %v10198_v49, %v10312_v6  ;;  %v10386_v2 = vsub.f32 %v10207_v15, %v10312_v6  ;;  %v10393_v49 = vsub.f32 %v10212_v50, %v10312_v6 }
 0x9f5   :  { %v4221_v24 = vmul.f32 %v10352_v61, %v10352_v61  ;;  %v4222_v27 = vmul.f32 %v10356_v37, %v10356_v37  ;;  %v4223_v56 = vmul.f32 %v10360_v19, %v10360_v19  ;;  %v4224_v33 = vmul.f32 %v10364_v28, %v10364_v28 }
 0x9f6   :  { %v4225_v63 = vmul.f32 %v10372_v0, %v10372_v0  ;;  %v4226_v59 = vmul.f32 %v10378_v62, %v10378_v62  ;;  %v10400_v15 = vsub.f32 %v10214_v13, %v10312_v6  ;;  %v4227_v43 = vmul.f32 %v10386_v2, %v10386_v2 }
 0x9f7   :  { %v4253_v53 = vsel %vm1533_vm1, %v4221_v24, 0.0  ;;  %v4254_v17 = vsel %vm1533_vm1, %v4222_v27, 0.0  ;;  %v4256_v54 = vsel %vm1533_vm1, %v4223_v56, 0.0  ;;  %v4258_v23 = vsel %vm1533_vm1, %v4224_v33, 0.0 }
 0x9f8   :  { %v4255_v21 = vadd.f32 %v4254_v17, %v4253_v53  ;;  %v4260_v24 = vsel %vm1533_vm1, %v4225_v63, 0.0  ;;  %v10407_v50 = vsub.f32 %v10216_v25, %v10312_v6  ;;  %v4228_v56 = vmul.f32 %v10393_v49, %v10393_v49 }
 0x9f9   :  { %v4262_v33 = vsel %vm1533_vm1, %v4226_v59, 0.0  ;;  %v10414_v13 = vsub.f32 %v10225_v18, %v10312_v6  ;;  %v4229_v17 = vmul.f32 %v10400_v15, %v10400_v15  ;;  %v10421_v25 = vsub.f32 %v10230_v34, %v10312_v6 }
 0x9fa   :  { %v4257_v60 = vadd.f32 %v4256_v54, %v4255_v21  ;;  %v4264_v21 = vsel %vm1533_vm1, %v4227_v43, 0.0  ;;  %v4230_v54 = vmul.f32 %v10407_v50, %v10407_v50  ;;  %v10428_v18 = vsub.f32 %v10233_v38, %v10312_v6 }
 0x9fb   :  { %v10435_v34 = vsub.f32 %v10236_v29, %v10312_v6  ;;  %v10442_v38 = vsub.f32 %v10245_v55, %v10312_v6  ;;  %v10449_v29 = vsub.f32 %v10250_v41, %v10312_v6  ;;  %v10456_v55 = vsub.f32 %v10253_v44, %v10312_v6 }
 0x9fc   :  { %v4259_v26 = vadd.f32 %v4258_v23, %v4257_v60  ;;  %v4266_v60 = vsel %vm1533_vm1, %v4228_v56, 0.0  ;;  %v4231_v23 = vmul.f32 %v10414_v13, %v10414_v13  ;;  %v10463_v41 = vsub.f32 %v10256_v35, %v10312_v6 }
 0x9fd   :  { %v10470_v44 = vsub.f32 %v10265_v8, %v10312_v6  ;;  %v10477_v35 = vsub.f32 %v10270_v30, %v10312_v6  ;;  %v4241_v30 = vmul.f32 %v10315_v48, %v10315_v48 }
 0x9fe   :  { %v4261_v27 = vadd.f32 %v4260_v24, %v4259_v26  ;;  %v4268_v26 = vsel %vm1533_vm1, %v4229_v17, 0.0  ;;  %v4232_v24 = vmul.f32 %v10421_v25, %v10421_v25 }
 0x9ff   :  { %v4239_v8 = vmul.f32 %v10470_v44, %v10470_v44 }
 0xa00   :  { %v4263_v53 = vadd.f32 %v4262_v33, %v4261_v27  ;;  %v4270_v27 = vsel %vm1533_vm1, %v4230_v54, 0.0  ;;  %v4233_v33 = vmul.f32 %v10428_v18, %v10428_v18 }
 0xa01   :  { %v4288_v6 = vsel %vm1533_vm1, %v4239_v8, 0.0  ;;  %v4245_v8 = vmul.f32 %v10327_v14, %v10327_v14 }
 0xa02   :  { %v4265_v63 = vadd.f32 %v4264_v21, %v4263_v53  ;;  %v4272_v53 = vsel %vm1533_vm1, %v4231_v23, 0.0  ;;  %v4234_v21 = vmul.f32 %v10435_v34, %v10435_v34 }
 0xa04   :  { %v4267_v59 = vadd.f32 %v4266_v60, %v4265_v63  ;;  %v4274_v63 = vsel %vm1533_vm1, %v4232_v24, 0.0  ;;  %v4235_v60 = vmul.f32 %v10442_v38, %v10442_v38 }
 0xa06   :  { %v4269_v43 = vadd.f32 %v4268_v26, %v4267_v59  ;;  %v4276_v59 = vsel %vm1533_vm1, %v4233_v33, 0.0  ;;  %v4236_v26 = vmul.f32 %v10449_v29, %v10449_v29 }
 0xa08   :  { %v4271_v56 = vadd.f32 %v4270_v27, %v4269_v43  ;;  %v4278_v43 = vsel %vm1533_vm1, %v4234_v21, 0.0  ;;  %v4237_v27 = vmul.f32 %v10456_v55, %v10456_v55 }
 0xa0a   :  { %v4273_v17 = vadd.f32 %v4272_v53, %v4271_v56  ;;  %v4280_v56 = vsel %vm1533_vm1, %v4235_v60, 0.0  ;;  %v4238_v53 = vmul.f32 %v10463_v41, %v10463_v41  ;;  %v4240_v60 = vmul.f32 %v10477_v35, %v10477_v35 }
 0xa0c   :  { %v4275_v54 = vadd.f32 %v4274_v63, %v4273_v17  ;;  %v4282_v17 = vsel %vm1533_vm1, %v4236_v26, 0.0  ;;  %v4284_v63 = vsel %vm1533_vm1, %v4237_v27, 0.0  ;;  %v4242_v26 = vmul.f32 %v10318_v45, %v10318_v45 }
 0xa0d   :  { %v4243_v27 = vmul.f32 %v10321_v1, %v10321_v1 }
 0xa0e   :  { %v4277_v23 = vadd.f32 %v4276_v59, %v4275_v54  ;;  %v4286_v59 = vsel %vm1533_vm1, %v4238_v53, 0.0  ;;  %v4244_v53 = vmul.f32 %v10324_v46, %v10324_v46 }
 0xa10   :  { %v4279_v24 = vadd.f32 %v4278_v43, %v4277_v23 }
 0xa12   :  { %v4281_v33 = vadd.f32 %v4280_v56, %v4279_v24  ;;  %v4290_v24 = vsel %vm1533_vm1, %v4240_v60, 0.0  ;;  %v4246_v60 = vmul.f32 %v10330_v57, %v10330_v57 }
 0xa14   :  { %v4283_v21 = vadd.f32 %v4282_v17, %v4281_v33  ;;  %v4292_v33 = vsel %vm1533_vm1, %v4241_v30, 0.0  ;;  %v4247_v30 = vmul.f32 %v10333_v12, %v10333_v12 }
 0xa16   :  { %v4285_v54 = vadd.f32 %v4284_v63, %v4283_v21  ;;  %v4294_v21 = vsel %vm1533_vm1, %v4242_v26, 0.0  ;;  %v4248_v26 = vmul.f32 %v10336_v22, %v10336_v22 }
 0xa18   :  { %v4287_v23 = vadd.f32 %v4286_v59, %v4285_v54  ;;  %v4296_v54 = vsel %vm1533_vm1, %v4243_v27, 0.0  ;;  %v4249_v27 = vmul.f32 %v10339_v7, %v10339_v7 }
 0xa1a   :  { %v4289_v43 = vadd.f32 %v4288_v6, %v4287_v23  ;;  %v4298_v23 = vsel %vm1533_vm1, %v4244_v53, 0.0  ;;  %v4250_v53 = vmul.f32 %v10342_v58, %v10342_v58 }
 0xa1c   :  { %v4291_v56 = vadd.f32 %v4290_v24, %v4289_v43  ;;  %v4300_v43 = vsel %vm1533_vm1, %v4245_v8, 0.0  ;;  %v4251_v8 = vmul.f32 %v10345_v42, %v10345_v42 }
 0xa1e   :  { %v4293_v17 = vadd.f32 %v4292_v33, %v4291_v56  ;;  %v4302_v56 = vsel %vm1533_vm1, %v4246_v60, 0.0  ;;  %v4252_v60 = vmul.f32 %v10348_v4, %v10348_v4 }
 0xa20   :  { %v4295_v63 = vadd.f32 %v4294_v21, %v4293_v17  ;;  %v4304_v17 = vsel %vm1533_vm1, %v4247_v30, 0.0  ;;  %v4312_v30 = vsel %vm1533_vm1, %v4251_v8, 0.0 }
 0xa22   :  { %v4297_v59 = vadd.f32 %v4296_v54, %v4295_v63  ;;  %v4306_v63 = vsel %vm1533_vm1, %v4248_v26, 0.0 }
 0xa24   :  { %v4299_v6 = vadd.f32 %v4298_v23, %v4297_v59  ;;  %v4308_v59 = vsel %vm1533_vm1, %v4249_v27, 0.0 }
 0xa26   :  { %v4301_v24 = vadd.f32 %v4300_v43, %v4299_v6  ;;  %v4310_v6 = vsel %vm1533_vm1, %v4250_v53, 0.0  ;;  %v6087_v53 = vld [vmem:[%s11671_s12] ss:$0 sm:$0xff] }
 0xa27   :  { %v10531_v8 = vmul.f32 %v6087_v53, %v10352_v61  ;;  %v4338_v61 = vmul.f32 %v6087_v53, %v10400_v15  ;;  %v4348_v15 = vmul.f32 %v6087_v53, %v10470_v44  ;;  %v4358_v44 = vmul.f32 %v6087_v53, %v10339_v7 }
 0xa28   :  { %v4303_v33 = vadd.f32 %v4302_v56, %v4301_v24  ;;  %v4314_v56 = vsel %vm1533_vm1, %v4252_v60, 0.0  ;;  %v10537_v60 = vmul.f32 %v6087_v53, %v10360_v19  ;;  %v4340_v19 = vmul.f32 %v6087_v53, %v10414_v13 }
 0xa29   :  { %v4350_v13 = vmul.f32 %v6087_v53, %v10315_v48  ;;  %v4360_v48 = vmul.f32 %v6087_v53, %v10345_v42 }
 0xa2a   :  { %v4305_v21 = vadd.f32 %v4304_v17, %v4303_v33 }
 0xa2c   :  { %v4307_v54 = vadd.f32 %v4306_v63, %v4305_v21 }
 0xa2e   :  { %v4309_v23 = vadd.f32 %v4308_v59, %v4307_v54  ;;  %v4359_v59 = vmul.f32 %v6087_v53, %v10342_v58  ;;  %v10548_v58 = vmul.f32 %v6087_v53, %v10393_v49  ;;  %v4347_v49 = vmul.f32 %v6087_v53, %v10463_v41 }
 0xa2f   :  { %v4357_v41 = vmul.f32 %v6087_v53, %v10336_v22 }
 0xa30   :  { %v4311_v43 = vadd.f32 %v4310_v6, %v4309_v23  ;;  %v10534_v23 = vmul.f32 %v6087_v53, %v10356_v37  ;;  %v4335_v6 = vmul.f32 %v6087_v53, %v10378_v62  ;;  %v4339_v37 = vmul.f32 %v6087_v53, %v10407_v50 }
 0xa31   :  { %v4344_v62 = vmul.f32 %v6087_v53, %v10442_v38  ;;  %v4349_v50 = vmul.f32 %v6087_v53, %v10477_v35  ;;  %v4354_v38 = vmul.f32 %v6087_v53, %v10327_v14 }
 0xa32   :  { %v4313_v24 = vadd.f32 %v4312_v30, %v4311_v43  ;;  %v10545_v43 = vmul.f32 %v6087_v53, %v10386_v2  ;;  %v4341_v30 = vmul.f32 %v6087_v53, %v10421_v25  ;;  %v4345_v2 = vmul.f32 %v6087_v53, %v10449_v29 }
 0xa33   :  { %v4351_v25 = vmul.f32 %v6087_v53, %v10318_v45  ;;  %v4355_v29 = vmul.f32 %v6087_v53, %v10330_v57  ;;  %v4361_v45 = vmul.f32 %v6087_v53, %v10348_v4 }
 0xa34   :  { %v4315_v33 = vadd.f32 %v4314_v56, %v4313_v24  ;;  %v4346_v24 = vmul.f32 %v6087_v53, %v10456_v55  ;;  %v4356_v55 = vmul.f32 %v6087_v53, %v10333_v12 }
 0xa36   :  { %v4316_v26 = vrot.slane %v4315_v33, 4 }
 0xa38   :  { %v4317_v17 = vadd.f32 %v4316_v26, %v4315_v33 }
 0xa3a   :  { %v4318_v21 = vrot.slane %v4317_v17, 2 }
 0xa3c   :  { %v4319_v63 = vadd.f32 %v4318_v21, %v4317_v17  ;;  %v10592_v17 = vld [vmem:[%s11672_s13] ss:$0 sm:$0xff]  ;;  %s7608_s13 = smov 96  }
 0xa3e   :  { %v4320_v20 = vrot.slane %v4319_v63, 1 }
 0xa40   :  { %v4321_v3 = vadd.f32 %v4320_v20, %v4319_v63  ;;  %v10540_v20 = vmul.f32 %v6087_v53, %v10364_v28  ;;  %v4342_v28 = vmul.f32 %v6087_v53, %v10428_v18  ;;  %v4352_v18 = vmul.f32 %v6087_v53, %v10321_v1 }
 0xa42   :  { %v4322_v27 = vmul.f32 0.00390625, %v4321_v3  ;;  %v4334_v3 = vmul.f32 %v6087_v53, %v10372_v0  ;;  %v4343_v0 = vmul.f32 %v6087_v53, %v10435_v34  ;;  %v4353_v34 = vmul.f32 %v6087_v53, %v10324_v46 }
 0xa44   :  { %v4362_v54 = vadd.f32 1e-05, %v4322_v27 }
 0xa46   :  { %7371 = vrsqrt.f32 %v4362_v54 }
 0xa53   :  { %v10569_v56 = vpop.eup %7371 }
 0xa54   :  { %v4393_v1 = vmul.f32 %v10569_v56, %v4359_v59  ;;  %v4368_v46 = vmul.f32 %v10569_v56, %v4334_v3  ;;  %v4369_v14 = vmul.f32 %v10569_v56, %v4335_v6  ;;  %v4372_v57 = vmul.f32 %v10569_v56, %v4338_v61 }
 0xa55   :  { %v4373_v12 = vmul.f32 %v10569_v56, %v4339_v37  ;;  %v4374_v35 = vmul.f32 %v10569_v56, %v4340_v19  ;;  %v4375_v22 = vmul.f32 %v10569_v56, %v4341_v30  ;;  %v4376_v7 = vmul.f32 %v10569_v56, %v4342_v28 }
 0xa56   :  { %v4377_v42 = vmul.f32 %v10569_v56, %v4343_v0  ;;  %v4378_v4 = vmul.f32 %v10569_v56, %v4344_v62  ;;  %v4379_v33 = vmul.f32 %v10569_v56, %v4345_v2  ;;  %v10587_v26 = vmul.f32 %v10569_v56, %v4346_v24 }
 0xa57   :  { %v10595_v21 = vmul.f32 %v10569_v56, %v4347_v49  ;;  %v10598_v63 = vmul.f32 %v10569_v56, %v4348_v15  ;;  %v10601_v27 = vmul.f32 %v10569_v56, %v4349_v50  ;;  %v10604_v54 = vmul.f32 %v10569_v56, %v4350_v13 }
 0xa58   :  { %v10607_v53 = vmul.f32 %v10569_v56, %v4351_v25  ;;  %v10610_v59 = vmul.f32 %v10569_v56, %v4352_v18  ;;  %v10613_v3 = vmul.f32 %v10569_v56, %v4353_v34  ;;  %v10616_v6 = vmul.f32 %v10569_v56, %v4354_v38 }
 0xa59   :  { %v10619_v61 = vmul.f32 %v10569_v56, %v4355_v29  ;;  %v4390_v37 = vmul.f32 %v10569_v56, %v4356_v55  ;;  %v4391_v19 = vmul.f32 %v10569_v56, %v4357_v41  ;;  %v4392_v30 = vmul.f32 %v10569_v56, %v4358_v44 }
 0xa5a   :  { %v4394_v28 = vmul.f32 %v10569_v56, %v4360_v48  ;;  %v4395_v0 = vmul.f32 %v10569_v56, %v4361_v45  ;;  %v10627_v62 = vadd.f32 %v10592_v17, %v4368_v46  ;;  %v10630_v2 = vadd.f32 %v10592_v17, %v4369_v14 }
 0xa5b   :  { %v10633_v24 = vadd.f32 %v10592_v17, %v4372_v57  ;;  %v10636_v49 = vadd.f32 %v10592_v17, %v4373_v12  ;;  %v10639_v15 = vadd.f32 %v10592_v17, %v4374_v35  ;;  %v10642_v50 = vadd.f32 %v10592_v17, %v4375_v22 }
 0xa5c   :  { %v10645_v13 = vadd.f32 %v10592_v17, %v4376_v7  ;;  %v10648_v25 = vadd.f32 %v10592_v17, %v4377_v42  ;;  %v10651_v18 = vadd.f32 %v10592_v17, %v4378_v4  ;;  %v10654_v34 = vadd.f32 %v10592_v17, %v4379_v33 }
 0xa5d   :  { %v4365_v38 = vmul.f32 %v10569_v56, %v10534_v23  ;;  %v4364_v29 = vmul.f32 %v10569_v56, %v10531_v8  ;;  %v10661_v55 = vadd.f32 %v10592_v17, %v4394_v28  ;;  %v10664_v41 = vadd.f32 %v10592_v17, %v4395_v0 }
 0xa5e   :  { %v4367_v44 = vmul.f32 %v10569_v56, %v10540_v20  ;;  %v4366_v48 = vmul.f32 %v10569_v56, %v10537_v60  ;;  %v4449_v45 = vmax.f32 %v10651_v18, 0.0  ;;  %v4450_v46 = vmax.f32 %v10654_v34, 0.0 }
 0xa5f   :  { %v4404_v23 = vadd.f32 %v10592_v17, %v4365_v38  ;;  %v4403_v8 = vadd.f32 %v10592_v17, %v4364_v29  ;;  %v4465_v14 = vmax.f32 %v10661_v55, 0.0  ;;  %v4466_v57 = vmax.f32 %v10664_v41, 0.0 }
 0xa60   :  { %v4406_v12 = vadd.f32 %v10592_v17, %v4367_v44  ;;  %v4405_v35 = vadd.f32 %v10592_v17, %v4366_v48  ;;  %v10678_v20 = vpack.c.bf16 %v4450_v46, %v4449_v45  ;;  %v10681_v60 = vadd.f32 %v10592_v17, %v4392_v30 }
 0xa61   :  { %5492 = vrot.lane.b32.xlu1 %v4404_v23, %s7608_s13  ;;  %v4436_v22 = vmax.f32 %v4404_v23, 0.0  ;;  %5490 = vrot.lane.b32.xlu0 %v4403_v8, %s7608_s13  ;;  %v4435_v7 = vmax.f32 %v4403_v8, 0.0  ;;  %v10685_v42 = vpack.c.bf16 %v4466_v57, %v4465_v14  ;;  %v10688_v4 = vadd.f32 %v10592_v17, %v4393_v1 }
 0xa62   :  { %v4438_v33 = vmax.f32 %v4406_v12, 0.0  ;;  %v4437_v28 = vmax.f32 %v4405_v35, 0.0  ;;  %v4463_v0 = vmax.f32 %v10681_v60, 0.0  ;;  %v4439_v38 = vmax.f32 %v10627_v62, 0.0 }
 0xa63   :  { %6731 = vmatprep.subr.bf16.mxu1 %v10685_v42  ;;  %v10693_v30 = vpack.c.bf16 %v4436_v22, %v4435_v7  ;;  %v4464_v29 = vmax.f32 %v10688_v4, 0.0  ;;  %v4440_v44 = vmax.f32 %v10630_v2, 0.0  ;;  %v4447_v48 = vmax.f32 %v10645_v13, 0.0 }
 0xa64   :  { %v10698_v45 = vpack.c.bf16 %v4438_v33, %v4437_v28  ;;  %6732 = vmatpush3.bf16.msra.mxu1 %v10678_v20  ;;  %v4448_v1 = vmax.f32 %v10648_v25, 0.0  ;;  %v10703_v46 = vadd.f32 %v10592_v17, %v4390_v37  ;;  %v10706_v23 = vadd.f32 %v10592_v17, %v4391_v19 }
 0xa65   :  { %5496 = vrot.lane.b32.xlu1 %v4406_v12, %s7608_s13  ;;  %5494 = vrot.lane.b32.xlu0 %v4405_v35, %s7608_s13  ;;  %v10710_v8 = vpack.c.bf16 %v4464_v29, %v4463_v0  ;;  %v10712_v14 = vpack.c.bf16 %v4440_v44, %v4439_v38  ;;  %v4371_v57 = vmul.f32 %v10569_v56, %v10548_v58  ;;  %v4445_v22 = vmax.f32 %v10639_v15, 0.0 }
 0xa66   :  { %7195 = vmatprep.mubr.msk.bf16.mxu0 %vm798_vm0, %v10693_v30  ;;  %v4473_v37 = vpack.c.bf16 %v4448_v1, %v4447_v48  ;;  %v4461_v19 = vmax.f32 %v10703_v46, 0.0  ;;  %v4462_v7 = vmax.f32 %v10706_v23, 0.0  ;;  %v4370_v12 = vmul.f32 %v10569_v56, %v10545_v43 }
 0xa67   :  { %7196 = vmatmul.mubr.msk.bf16.vlgmr.msra.gmra.mxu0 %vm798_vm0, %v10698_v45  ;;  %6733 = vmatprep.subr.bf16.mxu1 %v10710_v8  ;;  %v4410_v58 = vadd.f32 %v10592_v17, %v4371_v57  ;;  %v4446_v35 = vmax.f32 %v10642_v50, 0.0  ;;  %v10730_v33 = vadd.f32 %v10592_v17, %v10616_v6  ;;  %v10734_v28 = vadd.f32 %v10592_v17, %v10619_v61 }
 0xa68   :  { %7199 = vmatprep.mubr.msk.bf16.mxu0 %vm798_vm0, %v10712_v14  ;;  %6734 = vmatpush3.bf16.msra.mxu1 %v4473_v37  ;;  %v10738_v43 = vpack.c.bf16 %v4462_v7, %v4461_v19  ;;  %v4409_v56 = vadd.f32 %v10592_v17, %v4370_v12  ;;  %v4443_v0 = vmax.f32 %v10633_v24, 0.0  ;;  %v4444_v38 = vmax.f32 %v10636_v49, 0.0 }
 0xa69   :  { %5500 = vrot.lane.b32.xlu1 %v10630_v2, %s7608_s13  ;;  %5498 = vrot.lane.b32.xlu0 %v10627_v62, %s7608_s13  ;;  %v4442_v6 = vmax.f32 %v4410_v58, 0.0  ;;  %v4472_v61 = vpack.c.bf16 %v4446_v35, %v4445_v22  ;;  %v4459_v29 = vmax.f32 %v10730_v33, 0.0  ;;  %v4460_v44 = vmax.f32 %v10734_v28, 0.0 }
 0xa6a   :  { %6735 = vmatprep.subr.bf16.mxu1 %v10738_v43  ;;  %v4441_v48 = vmax.f32 %v4409_v56, 0.0  ;;  %v4471_v1 = vpack.c.bf16 %v4444_v38, %v4443_v0  ;;  %v10752_v57 = vadd.f32 %v10592_v17, %v10610_v59  ;;  %v10756_v2 = vadd.f32 %v10592_v17, %v10613_v3 }
 0xa6b   :  { %v10758_v19 = vpack.c.bf16 %v4460_v44, %v4459_v29  ;;  %v4423_v62 = vadd.f32 %v10592_v17, %v10604_v54  ;;  %v4424_v22 = vadd.f32 %v10592_v17, %v10607_v53  ;;  %v4421_v7 = vadd.f32 %v10592_v17, %v10598_v63 }
 0xa6c   :  { %v4470_v12 = vpack.c.bf16 %v4442_v6, %v4441_v48  ;;  %6736 = vmatpush3.bf16.msra.mxu1 %v4472_v61  ;;  %v4457_v59 = vmax.f32 %v10752_v57, 0.0  ;;  %v4458_v35 = vmax.f32 %v10756_v2, 0.0  ;;  %v4422_v3 = vadd.f32 %v10592_v17, %v10601_v27  ;;  %v7601_v48 = vld [vmem:[%s11779_s20 + $0xd4] ss:$8 sps:$4 sm:$0xff]  }
 0xa6d   :  { %5504 = vrot.lane.b32.xlu1 %v4410_v58, %s7608_s13  ;;  %5502 = vrot.lane.b32.xlu0 %v4409_v56, %s7608_s13  ;;  %v4455_v54 = vmax.f32 %v4423_v62, 0.0  ;;  %v4456_v0 = vmax.f32 %v4424_v22, 0.0  ;;  %v4453_v38 = vmax.f32 %v4421_v7, 0.0  ;;  %v4419_v53 = vadd.f32 %v10592_v17, %v10587_v26 }
 0xa6e   :  { %6737 = vmatprep.subr.bf16.mxu1 %v10758_v19  ;;  %v4478_v63 = vpack.c.bf16 %v4458_v35, %v4457_v59  ;;  %v4454_v6 = vmax.f32 %v4422_v3, 0.0  ;;  %v4420_v29 = vadd.f32 %v10592_v17, %v10595_v21  ;;  %v7576_v17 = vld [vmem:[%s11779_s20] ss:$8 sps:$4 sm:$0xff]   ;;  %v7577_v21 = vld [vmem:[%s11779_s20 + $0x14] ss:$8 sps:$4 sm:$0xff]  }
 0xa6f   :  { %7200 = vmatmul.mubr.msk.bf16.gmra.mxu0 %vm798_vm0, %v4470_v12  ;;  %v4477_v27 = vpack.c.bf16 %v4456_v0, %v4455_v54  ;;  %v4451_v44 = vmax.f32 %v4419_v53, 0.0 }
 0xa70   :  { %7203 = vmatprep.mubr.msk.bf16.mxu0 %vm798_vm0, %v4471_v1  ;;  %6738 = vmatpush3.bf16.msra.mxu1 %v4471_v1  ;;  %v4476_v58 = vpack.c.bf16 %v4454_v6, %v4453_v38  ;;  %v4452_v56 = vmax.f32 %v4420_v29, 0.0  ;;  %v7602_v1 = vld [vmem:[%s11779_s20 + $0xd0] ss:$8 sps:$4 sm:$0xff]  }
 0xa71   :  { %5508 = vrot.lane.b32.xlu1 %v10636_v49, %s7608_s13  ;;  %5506 = vrot.lane.b32.xlu0 %v10633_v24, %s7608_s13  ;;  %v7579_v24 = vld [vmem:[%s11779_s20 + $0x24] ss:$8 sps:$4 sm:$0xff]   ;;  %v7581_v49 = vld [vmem:[%s11779_s20 + $0x34] ss:$8 sps:$4 sm:$0xff]  }
 0xa72   :  { %6739 = vmatprep.subr.bf16.mxu1 %v4478_v63  ;;  %v4475_v26 = vpack.c.bf16 %v4452_v56, %v4451_v44 }
 0xa74   :  { %6740 = vmatpush3.bf16.msra.mxu1 %v4470_v12 }
 0xa75   :  { %5512 = vrot.lane.b32.xlu1 %v10642_v50, %s7608_s13  ;;  %5510 = vrot.lane.b32.xlu0 %v10639_v15, %s7608_s13  ;;  %v7582_v15 = vld [vmem:[%s11779_s20 + $0x30] ss:$8 sps:$4 sm:$0xff]   ;;  %v7583_v50 = vld [vmem:[%s11779_s20 + $0x44] ss:$8 sps:$4 sm:$0xff]  }
 0xa76   :  { %6741 = vmatprep.subr.bf16.mxu1 %v4477_v27 }
 0xa77   :  { %7204 = vmatmul.mubr.msk.bf16.gmra.mxu0 %vm798_vm0, %v4472_v61  ;;  %v7600_v61 = vld [vmem:[%s11779_s20 + $0xc0] ss:$8 sps:$4 sm:$0xff]  }
 0xa78   :  { %7207 = vmatprep.mubr.msk.bf16.mxu0 %vm798_vm0, %v4473_v37  ;;  %6742 = vmatpush3.bf16.msra.mxu1 %v10712_v14  ;;  %v7365_v14 = vld [vmem:[%s11670_s14 + $0x8] sm:$0xff]   ;;  %v7597_v37 = vld [vmem:[%s11779_s20 + $0xb4] ss:$8 sps:$4 sm:$0xff]  }
 0xa79   :  { %5516 = vrot.lane.b32.xlu1 %v10648_v25, %s7608_s13  ;;  %5514 = vrot.lane.b32.xlu0 %v10645_v13, %s7608_s13  ;;  %v7584_v13 = vld [vmem:[%s11779_s20 + $0x40] ss:$8 sps:$4 sm:$0xff]   ;;  %v7585_v25 = vld [vmem:[%s11779_s20 + $0x54] ss:$8 sps:$4 sm:$0xff]  }
 0xa7a   :  { %6743 = vmatprep.subr.bf16.mxu1 %v4476_v58  ;;  %7227 = vmatprep.subr.bf16.mxu0 %v7365_v14 }
 0xa7b   :  { %7228 = vmatpush3.bf16.msra.mxu0 %v7365_v14 }
 0xa7c   :  { %6744 = vmatpush3.bf16.msra.mxu1 %v10698_v45  ;;  %v7594_v45 = vld [vmem:[%s11779_s20 + $0x90] ss:$8 sps:$4 sm:$0xff]  }
 0xa7d   :  { %5520 = vrot.lane.b32.xlu1 %v10654_v34, %s7608_s13  ;;  %5518 = vrot.lane.b32.xlu0 %v10651_v18, %s7608_s13  ;;  %v7586_v18 = vld [vmem:[%s11779_s20 + $0x50] ss:$8 sps:$4 sm:$0xff]   ;;  %v7587_v34 = vld [vmem:[%s11779_s20 + $0x64] ss:$8 sps:$4 sm:$0xff]  }
 0xa7e   :  { %6745 = vmatprep.subr.bf16.mxu1 %v4475_v26 }
 0xa7f   :  { %7208 = vmatmul.mubr.msk.bf16.gmra.mxu0 %vm798_vm0, %v10678_v20  ;;  %v7590_v20 = vld [vmem:[%s11779_s20 + $0x70] ss:$8 sps:$4 sm:$0xff]  }
 0xa80   :  { %7211 = vmatprep.mubr.msk.bf16.mxu0 %vm798_vm0, %v4475_v26  ;;  %6746 = vmatpush3.bf16.msra.mxu1 %v10693_v30  ;;  %v7593_v30 = vld [vmem:[%s11779_s20 + $0x94] ss:$8 sps:$4 sm:$0xff]  }
 0xa81   :  { %5524 = vrot.lane.b32.xlu1 %v4420_v29, %s7608_s13  ;;  %5522 = vrot.lane.b32.xlu0 %v4419_v53, %s7608_s13 }
 0xa82   :  { %7263 = vmatprep.subr.bf16.mxu1 %v10301_v52 }
 0xa83   :  { %4516 = vmatmul.mubr.bf16.vlgmr.msra.gmra.mxu1 %v7576_v17 }
 0xa84   :  { %4523 = vmatprep.mubr.bf16.mxu1 %v7577_v21  ;;  %7265 = vmatpush3.bf16.msra.mxu1 %v10301_v52  ;;  %v7578_v52 = vld [vmem:[%s11779_s20 + $0x10] ss:$8 sps:$4 sm:$0xff]  }
 0xa85   :  { %5528 = vrot.lane.b32.xlu1 %v4422_v3, %s7608_s13  ;;  %5526 = vrot.lane.b32.xlu0 %v4421_v7, %s7608_s13 }
 0xa86   :  { %7264 = vmatprep.subr.bf16.mxu1 %v10308_v10 }
 0xa87   :  { %7212 = vmatmul.mubr.msk.bf16.gmra.mxu0 %vm798_vm0, %v4476_v58 }
 0xa88   :  { %7215 = vmatprep.mubr.msk.bf16.mxu0 %vm798_vm0, %v4477_v27  ;;  %7266 = vmatpush3.bf16.msra.mxu1 %v10308_v10  ;;  %v7580_v10 = vld [vmem:[%s11779_s20 + $0x20] ss:$8 sps:$4 sm:$0xff]  }
 0xa89   :  { %5532 = vrot.lane.b32.xlu1 %v4424_v22, %s7608_s13  ;;  %5530 = vrot.lane.b32.xlu0 %v4423_v62, %s7608_s13  ;;  %v7606_v62 = vld [vmem:[%s11779_s20 + $0xf0] ss:$8 sps:$4 sm:$0xff]  }
 0xa8b   :  { %4524 = vmatmul.mubr.bf16.gmra.mxu1 %v7578_v52 }
 0xa8c   :  { %4531 = vmatprep.mubr.bf16.mxu1 %v7579_v24 }
 0xa8d   :  { %5536 = vrot.lane.b32.xlu1 %v10756_v2, %s7608_s13  ;;  %5534 = vrot.lane.b32.xlu0 %v10752_v57, %s7608_s13  ;;  %v7603_v57 = vld [vmem:[%s11779_s20 + $0xe4] ss:$8 sps:$4 sm:$0xff]   ;;  %v7604_v2 = vld [vmem:[%s11779_s20 + $0xe0] ss:$8 sps:$4 sm:$0xff]  }
 0xa8f   :  { %7216 = vmatmul.mubr.msk.bf16.gmra.mxu0 %vm798_vm0, %v4478_v63 }
 0xa90   :  { %7219 = vmatprep.mubr.msk.bf16.mxu0 %vm798_vm0, %v10758_v19  ;;  %v7605_v19 = vld [vmem:[%s11779_s20 + $0xf4] ss:$8 sps:$4 sm:$0xff]  }
 0xa91   :  { %5540 = vrot.lane.b32.xlu1 %v10734_v28, %s7608_s13  ;;  %5538 = vrot.lane.b32.xlu0 %v10730_v33, %s7608_s13  ;;  %v7366_v33 = vld [vmem:[%s11670_s14] sm:$0xff]   ;;  %v7598_v28 = vld [vmem:[%s11779_s20 + $0xb0] ss:$8 sps:$4 sm:$0xff]  }
 0xa92   :  { %7229 = vmatprep.subr.bf16.mxu0 %v7366_v33 }
 0xa93   :  { %4532 = vmatmul.mubr.bf16.gmra.mxu1 %v7580_v10  ;;  %7230 = vmatpush3.bf16.msra.mxu0 %v7366_v33 }
 0xa94   :  { %4539 = vmatprep.mubr.bf16.mxu1 %v7581_v49 }
 0xa95   :  { %5544 = vrot.lane.b32.xlu1 %v10706_v23, %s7608_s13  ;;  %5542 = vrot.lane.b32.xlu0 %v10703_v46, %s7608_s13  ;;  %v7595_v46 = vld [vmem:[%s11779_s20 + $0xa4] ss:$8 sps:$4 sm:$0xff]   ;;  %v7596_v23 = vld [vmem:[%s11779_s20 + $0xa0] ss:$8 sps:$4 sm:$0xff]  }
 0xa97   :  { %7220 = vmatmul.mubr.msk.bf16.gmra.mxu0 %vm798_vm0, %v10738_v43  ;;  %v7599_v43 = vld [vmem:[%s11779_s20 + $0xc4] ss:$8 sps:$4 sm:$0xff]  }
 0xa99   :  { %5548 = vrot.lane.b32.xlu1 %v10688_v4, %s7608_s13  ;;  %5546 = vrot.lane.b32.xlu0 %v10681_v60, %s7608_s13  ;;  %v7591_v60 = vld [vmem:[%s11779_s20 + $0x84] ss:$8 sps:$4 sm:$0xff]   ;;  %v7592_v4 = vld [vmem:[%s11779_s20 + $0x80] ss:$8 sps:$4 sm:$0xff]  }
 0xa9b   :  { %4540 = vmatmul.mubr.bf16.gmra.mxu1 %v7582_v15 }
 0xa9c   :  { %4547 = vmatprep.mubr.bf16.mxu1 %v7583_v50 }
 0xa9d   :  { %5552 = vrot.lane.b32.xlu1 %v10664_v41, %s7608_s13  ;;  %5550 = vrot.lane.b32.xlu0 %v10661_v55, %s7608_s13  ;;  %v7588_v55 = vld [vmem:[%s11779_s20 + $0x60] ss:$8 sps:$4 sm:$0xff]   ;;  %v7589_v41 = vld [vmem:[%s11779_s20 + $0x74] ss:$8 sps:$4 sm:$0xff]  }
 0xaa3   :  { %4548 = vmatmul.mubr.bf16.gmra.mxu1 %v7584_v13 }
 0xaa4   :  { %4555 = vmatprep.mubr.bf16.mxu1 %v7585_v25 }
 0xaab   :  { %4556 = vmatmul.mubr.bf16.gmra.mxu1 %v7586_v18 }
 0xaac   :  { %4563 = vmatprep.mubr.bf16.mxu1 %v7587_v34 }
 0xab3   :  { %4564 = vmatmul.mubr.bf16.gmra.mxu1 %v7588_v55 }
 0xab4   :  { %4571 = vmatprep.mubr.bf16.mxu1 %v7589_v41 }
 0xabb   :  { %4572 = vmatmul.mubr.bf16.gmra.mxu1 %v7590_v20 }
 0xabc   :  { %4579 = vmatprep.mubr.bf16.mxu1 %v7591_v60 }
 0xac3   :  { %4580 = vmatmul.mubr.bf16.gmra.mxu1 %v7592_v4 }
 0xac4   :  { %4587 = vmatprep.mubr.bf16.mxu1 %v7593_v30 }
 0xacb   :  { %4588 = vmatmul.mubr.bf16.gmra.mxu1 %v7594_v45 }
 0xacc   :  { %4595 = vmatprep.mubr.bf16.mxu1 %v7595_v46 }
 0xad3   :  { %4596 = vmatmul.mubr.bf16.gmra.mxu1 %v7596_v23 }
 0xad4   :  { %4603 = vmatprep.mubr.bf16.mxu1 %v7597_v37 }
 0xadb   :  { %4604 = vmatmul.mubr.bf16.gmra.mxu1 %v7598_v28 }
 0xadc   :  { %4611 = vmatprep.mubr.bf16.mxu1 %v7599_v43  ;;  %v11954_v43 = vld [vmem:[#allocation15_spill] sm:$0xff] }
 0xae3   :  { %4612 = vmatmul.mubr.bf16.gmra.mxu1 %v7600_v61 }
 0xae4   :  { %4619 = vmatprep.mubr.bf16.mxu1 %v7601_v48 }
 0xaeb   :  { %4620 = vmatmul.mubr.bf16.gmra.mxu1 %v7602_v1 }
 0xaec   :  { %4627 = vmatprep.mubr.bf16.mxu1 %v7603_v57 }
 0xaf3   :  { %4628 = vmatmul.mubr.bf16.gmra.mxu1 %v7604_v2 }
 0xaf4   :  { %4635 = vmatprep.mubr.bf16.mxu1 %v7605_v19 }
 0xafb   :  { %4636 = vmatmul.mubr.bf16.gmra.mxu1 %v7606_v62  ;;  %v11955_v62 = vld [vmem:[#allocation16_spill] sm:$0xff] }
 0xafc   :  { %7223 = vmatprep.mubr.msk.bf16.mxu1 %vm798_vm0, %v10710_v8 }
 0xb03   :  { %7224 = vmatmul.mubr.msk.bf16.vlgmr.msra.gmra.mxu1 %vm798_vm0, %v10685_v42 }
 0xb43   :  { %v6747_v22 = vpop.f32.mrf.mxu1 }
 0xb45   :  { %v6748_v7 = vpop.f32.mrf.mxu1 }
 0xb46   :  { %v6749_v59 = vadd.f32 %v6748_v7, %v6747_v22  ;;  %v11956_v7 = vld [vmem:[#allocation17_spill] sm:$0xff] }
 0xb47   :  { %v6750_v12 = vpop.f32.mrf.mxu1 }
 0xb48   :  { %v4644_v0 = vmul.f32 %v6749_v59, %v11848_v5 }
 0xb49   :  { %v6751_v35 = vpop.f32.mrf.mxu1 }
 0xb4a   :  { %v6752_v3 = vadd.f32 %v6751_v35, %v6750_v12 }
 0xb4b   :  { %v6753_v54 = vpop.f32.mrf.mxu1 }
 0xb4c   :  { %v4645_v38 = vmul.f32 %v6752_v3, %v11849_v16 }
 0xb4d   :  { %v6754_v53 = vpop.f32.mrf.mxu1 }
 0xb4e   :  { %v4676_v63 = vpack.c.bf16 %v4645_v38, %v4644_v0  ;;  %v6755_v29 = vadd.f32 %v6754_v53, %v6753_v54  ;;  %v11957_v53 = vld [vmem:[#allocation18_spill] sm:$0xff] }
 0xb4f   :  { %v6756_v6 = vpop.f32.mrf.mxu1 }
 0xb50   :  { %7231 = vmatprep.mubr.msk.bf16.mxu0 %vm798_vm0, %v4676_v63  ;;  %v4646_v44 = vmul.f32 %v6755_v29, %v11850_v32 }
 0xb51   :  { %v6757_v8 = vpop.f32.mrf.mxu1 }
 0xb52   :  { %v6758_v27 = vadd.f32 %v6757_v8, %v6756_v6  ;;  %v11958_v6 = vld [vmem:[#allocation19_spill] sm:$0xff] }
 0xb53   :  { %v6759_v42 = vpop.f32.mrf.mxu1 }
 0xb54   :  { %v4647_v58 = vmul.f32 %v6758_v27, %v11851_v39 }
 0xb55   :  { %v6760_v56 = vpop.f32.mrf.mxu1 }
 0xb56   :  { %v4677_v26 = vpack.c.bf16 %v4647_v58, %v4646_v44  ;;  %v6761_v21 = vadd.f32 %v6760_v56, %v6759_v42 }
 0xb57   :  { %v6762_v17 = vpop.f32.mrf.mxu1 }
 0xb58   :  { %7232 = vmatmul.mubr.msk.bf16.vlgmr.msra.gmra.mxu0 %vm798_vm0, %v4677_v26  ;;  %v4648_v24 = vmul.f32 %v6761_v21, %v11852_v31 }
 0xb59   :  { %v6763_v5 = vpop.f32.mrf.mxu1 }
 0xb5a   :  { %v6764_v16 = vadd.f32 %v6763_v5, %v6762_v17  ;;  %v11959_v17 = vld [vmem:[#allocation20_spill] sm:$0xff]  ;;  %v11960_v5 = vld [vmem:[#allocation21_spill] sm:$0xff] }
 0xb5b   :  { %v6765_v52 = vpop.f32.mrf.mxu1 }
 0xb5c   :  { %v4649_v10 = vmul.f32 %v6764_v16, %v11853_v51 }
 0xb5d   :  { %v6766_v49 = vpop.f32.mrf.mxu1 }
 0xb5e   :  { %v4678_v15 = vpack.c.bf16 %v4649_v10, %v4648_v24  ;;  %v6767_v13 = vadd.f32 %v6766_v49, %v6765_v52 }
 0xb5f   :  { %v6768_v50 = vpop.f32.mrf.mxu1 }
 0xb60   :  { %7235 = vmatprep.mubr.msk.bf16.mxu0 %vm798_vm0, %v4678_v15  ;;  %v4650_v18 = vmul.f32 %v6767_v13, %v11854_v36 }
 0xb61   :  { %v6769_v32 = vpop.f32.mrf.mxu1 }
 0xb62   :  { %v6770_v39 = vadd.f32 %v6769_v32, %v6768_v50  ;;  %v11961_v32 = vld [vmem:[#allocation22_spill] sm:$0xff] }
 0xb63   :  { %v6771_v25 = vpop.f32.mrf.mxu1 }
 0xb64   :  { %v4651_v34 = vmul.f32 %v6770_v39, %v11855_v47 }
 0xb65   :  { %v6772_v55 = vpop.f32.mrf.mxu1 }
 0xb66   :  { %v4679_v41 = vpack.c.bf16 %v4651_v34, %v4650_v18  ;;  %v6773_v60 = vadd.f32 %v6772_v55, %v6771_v25  ;;  %v11962_v25 = vld [vmem:[#allocation23_spill] sm:$0xff] }
 0xb67   :  { %v6774_v20 = vpop.f32.mrf.mxu1 }
 0xb68   :  { %7236 = vmatmul.mubr.msk.bf16.gmra.mxu0 %vm798_vm0, %v4679_v41  ;;  %v4652_v30 = vmul.f32 %v6773_v60, %v11856_v11 }
 0xb69   :  { %v6775_v31 = vpop.f32.mrf.mxu1 }
 0xb6a   :  { %v6776_v51 = vadd.f32 %v6775_v31, %v6774_v20 }
 0xb6b   :  { %v6777_v4 = vpop.f32.mrf.mxu1 }
 0xb6c   :  { %v4653_v45 = vmul.f32 %v6776_v51, %v11857_v9 }
 0xb6d   :  { %v6778_v46 = vpop.f32.mrf.mxu1 }
 0xb6e   :  { %v4680_v23 = vpack.c.bf16 %v4653_v45, %v4652_v30  ;;  %v6779_v37 = vadd.f32 %v6778_v46, %v6777_v4  ;;  %v11963_v4 = vld [vmem:[#allocation24_spill] sm:$0xff]  ;;  %v11964_v45 = vld [vmem:[#allocation25_spill] sm:$0xff] }
 0xb6f   :  { %v6780_v14 = vpop.f32.mrf.mxu1 }
 0xb70   :  { %7239 = vmatprep.mubr.msk.bf16.mxu0 %vm798_vm0, %v4680_v23  ;;  %v4654_v28 = vmul.f32 %v6779_v37, %v11858_v40 }
 0xb71   :  { %v6781_v36 = vpop.f32.mrf.mxu1 }
 0xb72   :  { %v6782_v47 = vadd.f32 %v6781_v36, %v6780_v14 }
 0xb73   :  { %v6783_v33 = vpop.f32.mrf.mxu1 }
 0xb74   :  { %v4655_v61 = vmul.f32 %v6782_v47, %v11954_v43  ;;  %v11965_v43 = vld [vmem:[#allocation26_spill] sm:$0xff] }
 0xb75   :  { %v6784_v48 = vpop.f32.mrf.mxu1 }
 0xb76   :  { %v4681_v1 = vpack.c.bf16 %v4655_v61, %v4654_v28  ;;  %v6785_v2 = vadd.f32 %v6784_v48, %v6783_v33  ;;  %v11966_v48 = vld [vmem:[#allocation27_spill] sm:$0xff] }
 0xb77   :  { %v6786_v57 = vpop.f32.mrf.mxu1 }
 0xb78   :  { %7240 = vmatmul.mubr.msk.bf16.gmra.mxu0 %vm798_vm0, %v4681_v1  ;;  %v4656_v22 = vmul.f32 %v6785_v2, %v11955_v62 }
 0xb79   :  { %v6787_v11 = vpop.f32.mrf.mxu1 }
 0xb7a   :  { %v6788_v9 = vadd.f32 %v6787_v11, %v6786_v57 }
 0xb7b   :  { %v6789_v19 = vpop.f32.mrf.mxu1 }
 0xb7c   :  { %v4657_v12 = vmul.f32 %v6788_v9, %v11956_v7  ;;  %v11967_v7 = vld [vmem:[#allocation28_spill] sm:$0xff] }
 0xb7d   :  { %v6790_v59 = vpop.f32.mrf.mxu1 }
 0xb7e   :  { %v4682_v35 = vpack.c.bf16 %v4657_v12, %v4656_v22  ;;  %v6791_v54 = vadd.f32 %v6790_v59, %v6789_v19  ;;  %v11968_v59 = vld [vmem:[#allocation29_spill] sm:$0xff] }
 0xb7f   :  { %v6792_v3 = vpop.f32.mrf.mxu1 }
 0xb80   :  { %7243 = vmatprep.mubr.msk.bf16.mxu0 %vm798_vm0, %v4682_v35  ;;  %v4658_v63 = vmul.f32 %v6791_v54, %v11957_v53 }
 0xb81   :  { %v6793_v40 = vpop.f32.mrf.mxu1 }
 0xb82   :  { %v6794_v0 = vadd.f32 %v6793_v40, %v6792_v3 }
 0xb83   :  { %v6795_v38 = vpop.f32.mrf.mxu1 }
 0xb84   :  { %v4659_v29 = vmul.f32 %v6794_v0, %v11958_v6  ;;  %v10981_v0 = vpop.f32.mrf.mxu0 }
 0xb85   :  { %v6796_v8 = vpop.f32.mrf.mxu1 }
 0xb86   :  { %v4683_v27 = vpack.c.bf16 %v4659_v29, %v4658_v63  ;;  %v6797_v44 = vadd.f32 %v6796_v8, %v6795_v38  ;;  %v4794_v29 = vpop.f32.mrf.mxu0  ;;  %v11969_v8 = vld [vmem:[#allocation30_spill] sm:$0xff] }
 0xb87   :  { %v6798_v42 = vpop.f32.mrf.mxu1 }
 0xb88   :  { %7244 = vmatmul.mubr.msk.bf16.gmra.mxu0 %vm798_vm0, %v4683_v27  ;;  %v4660_v21 = vmul.f32 %v6797_v44, %v11959_v17  ;;  %v7198_v17 = vpop.f32.mrf.mxu0 }
 0xb89   :  { %v6799_v58 = vpop.f32.mrf.mxu1 }
 0xb8a   :  { %v6800_v56 = vadd.f32 %v6799_v58, %v6798_v42  ;;  %v11970_v42 = vld [vmem:[#allocation31_spill] sm:$0xff] }
 0xb8b   :  { %v6801_v26 = vpop.f32.mrf.mxu1 }
 0xb8c   :  { %v4661_v16 = vmul.f32 %v6800_v56, %v11960_v5 }
 0xb8d   :  { %v6802_v52 = vpop.f32.mrf.mxu1 }
 0xb8e   :  { %v4684_v24 = vpack.c.bf16 %v4661_v16, %v4660_v21  ;;  %v6803_v49 = vadd.f32 %v6802_v52, %v6801_v26 }
 0xb8f   :  { %v6804_v10 = vpop.f32.mrf.mxu1 }
 0xb90   :  { %7247 = vmatprep.mubr.msk.bf16.mxu0 %vm798_vm0, %v4684_v24  ;;  %v4662_v39 = vmul.f32 %v6803_v49, %v11961_v32  ;;  %v4797_v24 = vpop.f32.mrf.mxu0 }
 0xb91   :  { %v6805_v15 = vpop.f32.mrf.mxu1 }
 0xb92   :  { %v6806_v50 = vadd.f32 %v6805_v15, %v6804_v10  ;;  %v11971_v10 = vld [vmem:[#allocation32_spill] sm:$0xff]  ;;  %v11972_v15 = vld [vmem:[#allocation33_spill] sm:$0xff] }
 0xb93   :  { %v6807_v13 = vpop.f32.mrf.mxu1 }
 0xb94   :  { %v4663_v18 = vmul.f32 %v6806_v50, %v11962_v25  ;;  %v7201_v25 = vpop.f32.mrf.mxu0 }
 0xb95   :  { %v6808_v34 = vpop.f32.mrf.mxu1 }
 0xb96   :  { %v4685_v55 = vpack.c.bf16 %v4663_v18, %v4662_v39  ;;  %v6809_v20 = vadd.f32 %v6808_v34, %v6807_v13 }
 0xb97   :  { %v6810_v41 = vpop.f32.mrf.mxu1 }
 0xb98   :  { %7248 = vmatmul.mubr.msk.bf16.gmra.mxu0 %vm798_vm0, %v4685_v55  ;;  %v4664_v30 = vmul.f32 %v6809_v20, %v11963_v4  ;;  %v11973_v20 = vld [vmem:[#allocation34_spill] sm:$0xff] }
 0xb99   :  { %v6811_v60 = vpop.f32.mrf.mxu1 }
 0xb9a   :  { %v6812_v31 = vadd.f32 %v6811_v60, %v6810_v41  ;;  %v4810_v41 = vpop.f32.mrf.mxu0 }
 0xb9b   :  { %v6813_v51 = vpop.f32.mrf.mxu1 }
 0xb9c   :  { %v4665_v46 = vmul.f32 %v6812_v31, %v11964_v45  ;;  %v11974_v31 = vld [vmem:[#allocation35_spill] sm:$0xff] }
 0xb9d   :  { %v6814_v23 = vpop.f32.mrf.mxu1 }
 0xb9e   :  { %v4686_v14 = vpack.c.bf16 %v4665_v46, %v4664_v30  ;;  %v6815_v36 = vadd.f32 %v6814_v23, %v6813_v51  ;;  %v7202_v30 = vpop.f32.mrf.mxu0 }
 0xb9f   :  { %v6816_v37 = vpop.f32.mrf.mxu1 }
 0xba0   :  { %7251 = vmatprep.mubr.msk.bf16.mxu0 %vm798_vm0, %v4686_v14  ;;  %v4666_v61 = vmul.f32 %v6815_v36, %v11965_v43  ;;  %v4813_v45 = vpop.f32.mrf.mxu0 }
 0xba1   :  { %v6817_v47 = vpop.f32.mrf.mxu1 }
 0xba2   :  { %v6818_v33 = vadd.f32 %v6817_v47, %v6816_v37  ;;  %v10993_v46 = vpop.f32.mrf.mxu0 }
 0xba3   :  { %v6819_v28 = vpop.f32.mrf.mxu1 }
 0xba4   :  { %v4667_v1 = vmul.f32 %v6818_v33, %v11966_v48  ;;  %v4826_v23 = vpop.f32.mrf.mxu0 }
 0xba5   :  { %v6820_v57 = vpop.f32.mrf.mxu1 }
 0xba6   :  { %v4687_v2 = vpack.c.bf16 %v4667_v1, %v4666_v61  ;;  %v6821_v9 = vadd.f32 %v6820_v57, %v6819_v28  ;;  %v10995_v14 = vpop.f32.mrf.mxu0 }
 0xba7   :  { %v6822_v11 = vpop.f32.mrf.mxu1 }
 0xba8   :  { %7252 = vmatmul.mubr.msk.bf16.gmra.mxu0 %vm798_vm0, %v4687_v2  ;;  %v4668_v12 = vmul.f32 %v6821_v9, %v11967_v7  ;;  %v4829_v37 = vpop.f32.mrf.mxu0 }
 0xba9   :  { %v6823_v19 = vpop.f32.mrf.mxu1 }
 0xbaa   :  { %v6824_v62 = vadd.f32 %v6823_v19, %v6822_v11  ;;  %v10997_v36 = vpop.f32.mrf.mxu0 }
 0xbab   :  { %v6825_v22 = vpop.f32.mrf.mxu1 }
 0xbac   :  { %v4669_v35 = vmul.f32 %v6824_v62, %v11968_v59  ;;  %v10999_v47 = vpop.f32.mrf.mxu0 }
 0xbad   :  { %v6826_v3 = vpop.f32.mrf.mxu1 }
 0xbae   :  { %v4688_v54 = vpack.c.bf16 %v4669_v35, %v4668_v12  ;;  %v6827_v38 = vadd.f32 %v6826_v3, %v6825_v22  ;;  %v11001_v33 = vpop.f32.mrf.mxu0 }
 0xbaf   :  { %v6828_v40 = vpop.f32.mrf.mxu1 }
 0xbb0   :  { %7255 = vmatprep.mubr.msk.bf16.mxu0 %vm798_vm0, %v4688_v54  ;;  %v4670_v27 = vmul.f32 %v6827_v38, %v11969_v8  ;;  %v11003_v28 = vpop.f32.mrf.mxu0 }
 0xbb1   :  { %v6829_v53 = vpop.f32.mrf.mxu1 }
 0xbb2   :  { %v6830_v63 = vadd.f32 %v6829_v53, %v6828_v40  ;;  %v11005_v43 = vpop.f32.mrf.mxu0 }
 0xbb3   :  { %v6831_v6 = vpop.f32.mrf.mxu1 }
 0xbb4   :  { %v4671_v44 = vmul.f32 %v6830_v63, %v11970_v42  ;;  %v11007_v61 = vpop.f32.mrf.mxu0 }
 0xbb5   :  { %v6832_v58 = vpop.f32.mrf.mxu1 }
 0xbb6   :  { %v4689_v56 = vpack.c.bf16 %v4671_v44, %v4670_v27  ;;  %v6833_v21 = vadd.f32 %v6832_v58, %v6831_v6  ;;  %v11009_v48 = vpop.f32.mrf.mxu0 }
 0xbb7   :  { %v6834_v26 = vpop.f32.mrf.mxu1 }
 0xbb8   :  { %7256 = vmatmul.mubr.msk.bf16.gmra.mxu0 %vm798_vm0, %v4689_v56  ;;  %v4672_v49 = vmul.f32 %v6833_v21, %v11971_v10  ;;  %v11011_v1 = vpop.f32.mrf.mxu0 }
 0xbb9   :  { %v6835_v5 = vpop.f32.mrf.mxu1 }
 0xbba   :  { %v6836_v16 = vadd.f32 %v6835_v5, %v6834_v26  ;;  %v11013_v57 = vpop.f32.mrf.mxu0 }
 0xbbb   :  { %v6837_v52 = vpop.f32.mrf.mxu1 }
 0xbbc   :  { %v4673_v50 = vmul.f32 %v6836_v16, %v11972_v15  ;;  %v11015_v2 = vpop.f32.mrf.mxu0 }
 0xbbd   :  { %v6838_v13 = vpop.f32.mrf.mxu1 }
 0xbbe   :  { %v4690_v32 = vpack.c.bf16 %v4673_v50, %v4672_v49  ;;  %v6839_v18 = vadd.f32 %v6838_v13, %v6837_v52  ;;  %v11017_v11 = vpop.f32.mrf.mxu0 }
 0xbbf   :  { %v6840_v39 = vpop.f32.mrf.mxu1 }
 0xbc0   :  { %7259 = vmatprep.mubr.msk.bf16.mxu0 %vm798_vm0, %v4690_v32  ;;  %v4674_v60 = vmul.f32 %v6839_v18, %v11973_v20  ;;  %v11019_v9 = vpop.f32.mrf.mxu0 }
 0xbc1   :  { %v6841_v34 = vpop.f32.mrf.mxu1 }
 0xbc2   :  { %v6842_v55 = vadd.f32 %v6841_v34, %v6840_v39  ;;  %v11021_v19 = vpop.f32.mrf.mxu0 }
 0xbc4   :  { %v4675_v51 = vmul.f32 %v6842_v55, %v11974_v31  ;;  %v11023_v62 = vpop.f32.mrf.mxu0 }
 0xbc6   :  { %v4691_v4 = vpack.c.bf16 %v4675_v51, %v4674_v60  ;;  %v11025_v22 = vpop.f32.mrf.mxu0 }
 0xbc8   :  { %7260 = vmatmul.mubr.msk.bf16.gmra.mxu0 %vm798_vm0, %v4691_v4  ;;  %v11027_v7 = vpop.f32.mrf.mxu0 }
 0xc18   :  { %v7233_v12 = vpop.f32.mrf.mxu0 }
 0xc19   :  { %v11036_v27 = vadd.f32 %v7233_v12, %v10981_v0 }
 0xc1a   :  { %v5015_v59 = vpop.f32.mrf.mxu0 }
 0xc1b   :  { %v11031_v63 = vadd.f32 %v5015_v59, %v4794_v29  ;;  %v5145_v56 = vsel %vm798_vm0, %v11036_v27, 0.0 }
 0xc1c   :  { %v7234_v35 = vpop.f32.mrf.mxu0 }
 0xc1d   :  { %v5142_v42 = vsel %vm798_vm0, %v11031_v63, 0.0  ;;  %v11042_v26 = vadd.f32 %v7234_v35, %v7198_v17 }
 0xc1e   :  { %v5018_v3 = vpop.f32.mrf.mxu0 }
 0xc1f   :  { %v11029_v38 = vadd.f32 %v5018_v3, %v4797_v24  ;;  %v5147_v0 = vsel %vm798_vm0, %v11042_v26, 0.0 }
 0xc21   :  { %v5143_v6 = vsel %vm798_vm0, %v11029_v38, 0.0 }
 0xc22   :  { %v5144_v44 = vadd.f32 %v5143_v6, %v5142_v42 }
 0xc24   :  { %v5146_v29 = vadd.f32 %v5145_v56, %v5144_v44 }
 0xc26   :  { %v5148_v24 = vadd.f32 %v5147_v0, %v5146_v29 }
 0xc28   :  { %v7237_v54 = vpop.f32.mrf.mxu0 }
 0xc29   :  { %v11054_v17 = vadd.f32 %v7237_v54, %v7201_v25 }
 0xc2a   :  { %v5031_v40 = vpop.f32.mrf.mxu0 }
 0xc2b   :  { %v11044_v21 = vadd.f32 %v5031_v40, %v4810_v41  ;;  %v5153_v39 = vsel %vm798_vm0, %v11054_v17, 0.0 }
 0xc2c   :  { %v7238_v53 = vpop.f32.mrf.mxu0 }
 0xc2d   :  { %v5149_v52 = vsel %vm798_vm0, %v11044_v21, 0.0  ;;  %v11058_v18 = vadd.f32 %v7238_v53, %v7202_v30 }
 0xc2e   :  { %v5034_v8 = vpop.f32.mrf.mxu0  ;;  %v5150_v15 = vadd.f32 %v5149_v52, %v5148_v24 }
 0xc2f   :  { %v11046_v16 = vadd.f32 %v5034_v8, %v4813_v45  ;;  %v5155_v60 = vsel %vm798_vm0, %v11058_v18, 0.0 }
 0xc31   :  { %v5151_v49 = vsel %vm798_vm0, %v11046_v16, 0.0 }
 0xc32   :  { %v5152_v50 = vadd.f32 %v5151_v49, %v5150_v15 }
 0xc34   :  { %v5154_v55 = vadd.f32 %v5153_v39, %v5152_v50 }
 0xc36   :  { %v5156_v31 = vadd.f32 %v5155_v60, %v5154_v55 }
 0xc38   :  { %v7241_v58 = vpop.f32.mrf.mxu0 }
 0xc39   :  { %v11071_v30 = vadd.f32 %v7241_v58, %v10993_v46 }
 0xc3a   :  { %v5047_v5 = vpop.f32.mrf.mxu0 }
 0xc3b   :  { %v11060_v34 = vadd.f32 %v5047_v5, %v4826_v23 }
 0xc3c   :  { %v7242_v10 = vpop.f32.mrf.mxu0 }
 0xc3d   :  { %v5157_v25 = vsel %vm798_vm0, %v11060_v34, 0.0  ;;  %v11076_v59 = vadd.f32 %v7242_v10, %v10995_v14 }
 0xc3e   :  { %v5050_v13 = vpop.f32.mrf.mxu0  ;;  %v5158_v4 = vadd.f32 %v5157_v25, %v5156_v31 }
 0xc3f   :  { %v11062_v41 = vadd.f32 %v5050_v13, %v4829_v37  ;;  %v5161_v37 = vsel %vm798_vm0, %v11071_v30, 0.0  ;;  %v5163_v46 = vsel %vm798_vm0, %v11076_v59, 0.0 }
 0xc41   :  { %v5159_v51 = vsel %vm798_vm0, %v11062_v41, 0.0 }
 0xc42   :  { %v5160_v23 = vadd.f32 %v5159_v51, %v5158_v4 }
 0xc44   :  { %v5162_v3 = vadd.f32 %v5161_v37, %v5160_v23 }
 0xc46   :  { %v5164_v6 = vadd.f32 %v5163_v46, %v5162_v3 }
 0xc48   :  { %v7245_v32 = vpop.f32.mrf.mxu0 }
 0xc4a   :  { %v5063_v20 = vpop.f32.mrf.mxu0 }
 0xc4b   :  { %v11079_v35 = vadd.f32 %v5063_v20, %v10999_v47  ;;  %v11091_v47 = vadd.f32 %v7245_v32, %v10997_v36 }
 0xc4c   :  { %v7246_v45 = vpop.f32.mrf.mxu0 }
 0xc4d   :  { %v5165_v53 = vsel %vm798_vm0, %v11079_v35, 0.0  ;;  %v5169_v56 = vsel %vm798_vm0, %v11091_v47, 0.0  ;;  %v11096_v29 = vadd.f32 %v7246_v45, %v11001_v33 }
 0xc4e   :  { %v5066_v12 = vpop.f32.mrf.mxu0  ;;  %v5166_v42 = vadd.f32 %v5165_v53, %v5164_v6 }
 0xc4f   :  { %v11082_v54 = vadd.f32 %v5066_v12, %v11003_v28  ;;  %v5171_v24 = vsel %vm798_vm0, %v11096_v29, 0.0 }
 0xc51   :  { %v5167_v14 = vsel %vm798_vm0, %v11082_v54, 0.0 }
 0xc52   :  { %v5168_v58 = vadd.f32 %v5167_v14, %v5166_v42 }
 0xc54   :  { %v5170_v0 = vadd.f32 %v5169_v56, %v5168_v58 }
 0xc56   :  { %v5172_v10 = vadd.f32 %v5171_v24, %v5170_v0 }
 0xc58   :  { %v7249_v40 = vpop.f32.mrf.mxu0 }
 0xc59   :  { %v11111_v50 = vadd.f32 %v7249_v40, %v11005_v43 }
 0xc5a   :  { %v5079_v8 = vpop.f32.mrf.mxu0 }
 0xc5b   :  { %v11099_v5 = vadd.f32 %v5079_v8, %v11007_v61 }
 0xc5c   :  { %v7250_v44 = vpop.f32.mrf.mxu0 }
 0xc5d   :  { %v5173_v36 = vsel %vm798_vm0, %v11099_v5, 0.0  ;;  %v11116_v39 = vadd.f32 %v7250_v44, %v11009_v48 }
 0xc5e   :  { %v5082_v28 = vpop.f32.mrf.mxu0  ;;  %v5174_v15 = vadd.f32 %v5173_v36, %v5172_v10 }
 0xc5f   :  { %v11102_v52 = vadd.f32 %v5082_v28, %v11011_v1  ;;  %v5177_v1 = vsel %vm798_vm0, %v11111_v50, 0.0  ;;  %v5179_v31 = vsel %vm798_vm0, %v11116_v39, 0.0  ;;  %v7225_v28 = vpop.f32.mrf.mxu1 }
 0xc61   :  { %v5175_v49 = vsel %vm798_vm0, %v11102_v52, 0.0 }
 0xc62   :  { %v5176_v61 = vadd.f32 %v5175_v49, %v5174_v15 }
 0xc64   :  { %v5178_v20 = vadd.f32 %v5177_v1, %v5176_v61 }
 0xc66   :  { %v5180_v51 = vadd.f32 %v5179_v31, %v5178_v20 }
 0xc68   :  { %v7253_v33 = vpop.f32.mrf.mxu0 }
 0xc69   :  { %v5104_v23 = vadd.f32 %v7253_v33, %v11013_v57 }
 0xc6a   :  { %v5095_v13 = vpop.f32.mrf.mxu0 }
 0xc6b   :  { %v5096_v55 = vadd.f32 %v5095_v13, %v11015_v2  ;;  %v5185_v37 = vsel %vm798_vm0, %v5104_v23, 0.0 }
 0xc6c   :  { %v7254_v32 = vpop.f32.mrf.mxu0 }
 0xc6d   :  { %v5181_v43 = vsel %vm798_vm0, %v5096_v55, 0.0  ;;  %v5107_v2 = vadd.f32 %v7254_v32, %v11017_v11 }
 0xc6e   :  { %v5098_v60 = vpop.f32.mrf.mxu0  ;;  %v5182_v45 = vadd.f32 %v5181_v43, %v5180_v51 }
 0xc6f   :  { %v5099_v25 = vadd.f32 %v5098_v60, %v11019_v9  ;;  %v5187_v53 = vsel %vm798_vm0, %v5107_v2, 0.0 }
 0xc71   :  { %v5183_v4 = vsel %vm798_vm0, %v5099_v25, 0.0 }
 0xc72   :  { %v5184_v12 = vadd.f32 %v5183_v4, %v5182_v45 }
 0xc74   :  { %v5186_v3 = vadd.f32 %v5185_v37, %v5184_v12 }
 0xc76   :  { %v5188_v8 = vadd.f32 %v5187_v53, %v5186_v3 }
 0xc78   :  { %v7257_v48 = vpop.f32.mrf.mxu0 }
 0xc79   :  { %v5120_v42 = vadd.f32 %v7257_v48, %v11021_v19 }
 0xc7a   :  { %v5111_v40 = vpop.f32.mrf.mxu0 }
 0xc7b   :  { %v5112_v9 = vadd.f32 %v5111_v40, %v11023_v62  ;;  %v5193_v56 = vsel %vm798_vm0, %v5120_v42, 0.0  ;;  %v4906_v62 = vpop.f32.mrf.mxu1 }
 0xc7c   :  { %v7258_v46 = vpop.f32.mrf.mxu0 }
 0xc7d   :  { %v5189_v6 = vsel %vm798_vm0, %v5112_v9, 0.0  ;;  %v5123_v36 = vadd.f32 %v7258_v46, %v11025_v22  ;;  %v7226_v10 = vpop.f32.mrf.mxu1 }
 0xc7e   :  { %v5114_v14 = vpop.f32.mrf.mxu0  ;;  %v5190_v44 = vadd.f32 %v5189_v6, %v5188_v8 }
 0xc7f   :  { %v5115_v57 = vadd.f32 %v5114_v14, %v11027_v7  ;;  %v5195_v19 = vsel %vm798_vm0, %v5123_v36, 0.0  ;;  %v4909_v61 = vpop.f32.mrf.mxu1 }
 0xc81   :  { %v5191_v58 = vsel %vm798_vm0, %v5115_v57, 0.0 }
 0xc82   :  { %v5192_v11 = vadd.f32 %v5191_v58, %v5190_v44 }
 0xc84   :  { %v5194_v0 = vadd.f32 %v5193_v56, %v5192_v11 }
 0xc86   :  { %v5196_v13 = vadd.f32 %v5195_v19, %v5194_v0 }
 0xc88   :  { %v7261_v24 = vpop.f32.mrf.mxu0 }
 0xc89   :  { %v5136_v1 = vadd.f32 %v7261_v24, %v7225_v28 }
 0xc8a   :  { %v5127_v49 = vpop.f32.mrf.mxu0 }
 0xc8b   :  { %v5128_v15 = vadd.f32 %v5127_v49, %v4906_v62  ;;  %v5201_v22 = vsel %vm798_vm0, %v5136_v1, 0.0 }
 0xc8c   :  { %v7262_v33 = vpop.f32.mrf.mxu0 }
 0xc8d   :  { %v5197_v7 = vsel %vm798_vm0, %v5128_v15, 0.0  ;;  %v5139_v31 = vadd.f32 %v7262_v33, %v7226_v10 }
 0xc8e   :  { %v5130_v32 = vpop.f32.mrf.mxu0  ;;  %v5198_v60 = vadd.f32 %v5197_v7, %v5196_v13 }
 0xc8f   :  { %v5131_v20 = vadd.f32 %v5130_v32, %v4909_v61  ;;  %v5203_v45 = vsel %vm798_vm0, %v5139_v31, 0.0 }
 0xc91   :  { %v5199_v43 = vsel %vm798_vm0, %v5131_v20, 0.0 }
 0xc92   :  { %v5200_v51 = vadd.f32 %v5199_v43, %v5198_v60 }
 0xc94   :  { %v5202_v4 = vadd.f32 %v5201_v22, %v5200_v51 }
 0xc96   :  { %v5204_v12 = vadd.f32 %v5203_v45, %v5202_v4 }
 0xc98   :  { %v5205_v48 = vrot.slane %v5204_v12, 4 }
 0xc9a   :  { %v5206_v37 = vadd.f32 %v5205_v48, %v5204_v12 }
 0xc9c   :  { %v5207_v3 = vrot.slane %v5206_v37, 2 }
 0xc9e   :  { %v5208_v40 = vadd.f32 %v5207_v3, %v5206_v37 }
 0xca0   :  { %v5209_v46 = vrot.slane %v5208_v40, 1 }
 0xca2   :  { %v5210_v53 = vadd.f32 %v5209_v46, %v5208_v40 }
 0xca4   :  { %v11140_v6 = vmul.f32 0.00390625, %v5210_v53 }
 0xca6   :  { %v11143_v8 = vsub.f32 %v5096_v55, %v11140_v6  ;;  %v11146_v14 = vsub.f32 %v5099_v25, %v11140_v6  ;;  %v11149_v44 = vsub.f32 %v5104_v23, %v11140_v6  ;;  %v11152_v58 = vsub.f32 %v5107_v2, %v11140_v6 }
 0xca7   :  { %v11155_v28 = vsub.f32 %v5112_v9, %v11140_v6  ;;  %v11158_v11 = vsub.f32 %v5115_v57, %v11140_v6  ;;  %v11161_v56 = vsub.f32 %v5120_v42, %v11140_v6  ;;  %v11164_v55 = vsub.f32 %v5123_v36, %v11140_v6 }
 0xca8   :  { %v11167_v25 = vsub.f32 %v5128_v15, %v11140_v6  ;;  %v11170_v23 = vsub.f32 %v5131_v20, %v11140_v6  ;;  %v11173_v2 = vsub.f32 %v5136_v1, %v11140_v6  ;;  %v11176_v9 = vsub.f32 %v5139_v31, %v11140_v6 }
 0xca9   :  { %v11180_v57 = vsub.f32 %v11031_v63, %v11140_v6  ;;  %v11184_v42 = vsub.f32 %v11029_v38, %v11140_v6  ;;  %v11188_v0 = vsub.f32 %v11036_v27, %v11140_v6  ;;  %v11192_v62 = vsub.f32 %v11042_v26, %v11140_v6 }
 0xcaa   :  { %v11200_v63 = vsub.f32 %v11044_v21, %v11140_v6  ;;  %v11206_v27 = vsub.f32 %v11046_v16, %v11140_v6  ;;  %v11214_v33 = vsub.f32 %v11054_v17, %v11140_v6  ;;  %v11221_v16 = vsub.f32 %v11058_v18, %v11140_v6 }
 0xcab   :  { %v5244_v24 = vmul.f32 %v11180_v57, %v11180_v57  ;;  %v5245_v36 = vmul.f32 %v11184_v42, %v11184_v42  ;;  %v5246_v38 = vmul.f32 %v11188_v0, %v11188_v0  ;;  %v5247_v26 = vmul.f32 %v11192_v62, %v11192_v62 }
 0xcac   :  { %v5248_v21 = vmul.f32 %v11200_v63, %v11200_v63  ;;  %v5249_v61 = vmul.f32 %v11206_v27, %v11206_v27  ;;  %v11228_v17 = vsub.f32 %v11060_v34, %v11140_v6  ;;  %v5250_v1 = vmul.f32 %v11214_v33, %v11214_v33 }
 0xcad   :  { %v5276_v10 = vsel %vm798_vm0, %v5244_v24, 0.0  ;;  %v5277_v49 = vsel %vm798_vm0, %v5245_v36, 0.0  ;;  %v5279_v19 = vsel %vm798_vm0, %v5246_v38, 0.0  ;;  %v5281_v13 = vsel %vm798_vm0, %v5247_v26, 0.0 }
 0xcae   :  { %v5278_v15 = vadd.f32 %v5277_v49, %v5276_v10  ;;  %v5283_v20 = vsel %vm798_vm0, %v5248_v21, 0.0  ;;  %v11235_v18 = vsub.f32 %v11062_v41, %v11140_v6  ;;  %v5251_v31 = vmul.f32 %v11221_v16, %v11221_v16 }
 0xcaf   :  { %v5285_v43 = vsel %vm798_vm0, %v5249_v61, 0.0  ;;  %v11242_v34 = vsub.f32 %v11071_v30, %v11140_v6  ;;  %v5252_v22 = vmul.f32 %v11228_v17, %v11228_v17  ;;  %v5287_v4 = vsel %vm798_vm0, %v5250_v1, 0.0 }
 0xcb0   :  { %v5280_v7 = vadd.f32 %v5279_v19, %v5278_v15  ;;  %v11249_v41 = vsub.f32 %v11076_v59, %v11140_v6  ;;  %v5253_v12 = vmul.f32 %v11235_v18, %v11235_v18  ;;  %v5289_v48 = vsel %vm798_vm0, %v5251_v31, 0.0 }
 0xcb1   :  { %v11256_v30 = vsub.f32 %v11079_v35, %v11140_v6  ;;  %v5254_v3 = vmul.f32 %v11242_v34, %v11242_v34  ;;  %v5291_v40 = vsel %vm798_vm0, %v5252_v22, 0.0  ;;  %v11263_v59 = vsub.f32 %v11082_v54, %v11140_v6 }
 0xcb2   :  { %v5282_v32 = vadd.f32 %v5281_v13, %v5280_v7  ;;  %v5255_v53 = vmul.f32 %v11249_v41, %v11249_v41  ;;  %v5293_v24 = vsel %vm798_vm0, %v5253_v12, 0.0  ;;  %v11270_v35 = vsub.f32 %v11091_v47, %v11140_v6 }
 0xcb3   :  { %v5256_v38 = vmul.f32 %v11256_v30, %v11256_v30  ;;  %v5295_v26 = vsel %vm798_vm0, %v5254_v3, 0.0  ;;  %v11277_v54 = vsub.f32 %v11096_v29, %v11140_v6  ;;  %v5257_v49 = vmul.f32 %v11263_v59, %v11263_v59 }
 0xcb4   :  { %v5284_v60 = vadd.f32 %v5283_v20, %v5282_v32  ;;  %v5297_v15 = vsel %vm798_vm0, %v5255_v53, 0.0  ;;  %v11284_v47 = vsub.f32 %v11099_v5, %v11140_v6  ;;  %v5258_v19 = vmul.f32 %v11270_v35, %v11270_v35 }
 0xcb5   :  { %v5299_v7 = vsel %vm798_vm0, %v5256_v38, 0.0  ;;  %v11291_v29 = vsub.f32 %v11102_v52, %v11140_v6  ;;  %v5259_v13 = vmul.f32 %v11277_v54, %v11277_v54  ;;  %v5301_v32 = vsel %vm798_vm0, %v5257_v49, 0.0 }
 0xcb6   :  { %v5286_v51 = vadd.f32 %v5285_v43, %v5284_v60  ;;  %v11298_v5 = vsub.f32 %v11111_v50, %v11140_v6  ;;  %v5260_v20 = vmul.f32 %v11284_v47, %v11284_v47  ;;  %v5303_v60 = vsel %vm798_vm0, %v5258_v19, 0.0 }
 0xcb7   :  { %v11305_v52 = vsub.f32 %v11116_v39, %v11140_v6  ;;  %v5261_v43 = vmul.f32 %v11291_v29, %v11291_v29  ;;  %v5264_v39 = vmul.f32 %v11143_v8, %v11143_v8 }
 0xcb8   :  { %v5288_v45 = vadd.f32 %v5287_v4, %v5286_v51  ;;  %v5305_v51 = vsel %vm798_vm0, %v5259_v13, 0.0  ;;  %v5262_v50 = vmul.f32 %v11298_v5, %v11298_v5  ;;  %v5307_v4 = vsel %vm798_vm0, %v5260_v20, 0.0 }
 0xcb9   :  { %v5263_v12 = vmul.f32 %v11305_v52, %v11305_v52  ;;  %v5269_v13 = vmul.f32 %v11158_v11, %v11158_v11  ;;  %v5270_v20 = vmul.f32 %v11161_v56, %v11161_v56 }
 0xcba   :  { %v5290_v37 = vadd.f32 %v5289_v48, %v5288_v45  ;;  %v5309_v48 = vsel %vm798_vm0, %v5261_v43, 0.0  ;;  %v5311_v6 = vsel %vm798_vm0, %v5262_v50, 0.0 }
 0xcbc   :  { %v5292_v46 = vadd.f32 %v5291_v40, %v5290_v37  ;;  %v5265_v40 = vmul.f32 %v11146_v14, %v11146_v14 }
 0xcbe   :  { %v5294_v36 = vadd.f32 %v5293_v24, %v5292_v46  ;;  %v5313_v46 = vsel %vm798_vm0, %v5263_v12, 0.0  ;;  %v5266_v24 = vmul.f32 %v11149_v44, %v11149_v44  ;;  %v5327_v12 = vsel %vm798_vm0, %v5270_v20, 0.0 }
 0xcc0   :  { %v5296_v10 = vadd.f32 %v5295_v26, %v5294_v36  ;;  %v5315_v36 = vsel %vm798_vm0, %v5264_v39, 0.0  ;;  %v5267_v26 = vmul.f32 %v11152_v58, %v11152_v58  ;;  %v5319_v19 = vsel %vm798_vm0, %v5266_v24, 0.0 }
 0xcc2   :  { %v5298_v21 = vadd.f32 %v5297_v15, %v5296_v10  ;;  %v5317_v10 = vsel %vm798_vm0, %v5265_v40, 0.0  ;;  %v11328_v15 = vpop.permute.xlu0 %5490  ;;  %v5274_v40 = vmul.f32 %v11173_v2, %v11173_v2 }
 0xcc4   :  { %v5300_v61 = vadd.f32 %v5299_v7, %v5298_v21  ;;  %v5268_v21 = vmul.f32 %v11155_v28, %v11155_v28  ;;  %v11333_v7 = vpop.permute.xlu1 %5492 }
 0xcc6   :  { %v5302_v1 = vadd.f32 %v5301_v32, %v5300_v61  ;;  %v5321_v32 = vsel %vm798_vm0, %v5267_v26, 0.0  ;;  %v11341_v43 = vpop.permute.xlu0 %5494 }
 0xcc8   :  { %v5304_v31 = vadd.f32 %v5303_v60, %v5302_v1  ;;  %v5323_v60 = vsel %vm798_vm0, %v5268_v21, 0.0  ;;  %v11346_v50 = vpop.permute.xlu1 %5496 }
 0xcca   :  { %v5306_v22 = vadd.f32 %v5305_v51, %v5304_v31  ;;  %v5271_v51 = vmul.f32 %v11164_v55, %v11164_v55 }
 0xccc   :  { %v5308_v45 = vadd.f32 %v5307_v4, %v5306_v22  ;;  %v5325_v22 = vsel %vm798_vm0, %v5269_v13, 0.0  ;;  %v5329_v39 = vsel %vm798_vm0, %v5271_v51, 0.0 }
 0xcce   :  { %v5310_v37 = vadd.f32 %v5309_v48, %v5308_v45  ;;  %v5272_v45 = vmul.f32 %v11167_v25, %v11167_v25 }
 0xcd0   :  { %v5312_v3 = vadd.f32 %v5311_v6, %v5310_v37  ;;  %v5273_v37 = vmul.f32 %v11170_v23, %v11170_v23 }
 0xcd2   :  { %v5314_v53 = vadd.f32 %v5313_v46, %v5312_v3  ;;  %v11354_v3 = vpop.permute.xlu0 %5498  ;;  %v5331_v46 = vsel %vm798_vm0, %v5272_v45, 0.0 }
 0xcd4   :  { %v5316_v38 = vadd.f32 %v5315_v36, %v5314_v53  ;;  %v11359_v53 = vpop.permute.xlu1 %5500  ;;  %v5275_v36 = vmul.f32 %v11176_v9, %v11176_v9 }
 0xcd6   :  { %v5318_v49 = vadd.f32 %v5317_v10, %v5316_v38  ;;  %v5333_v38 = vsel %vm798_vm0, %v5273_v37, 0.0  ;;  %v5335_v10 = vsel %vm798_vm0, %v5274_v40, 0.0  ;;  %v11365_v21 = vpop.permute.xlu0 %5502  ;;  %v6125_v40 = vld [vmem:[%s11673_s15] ss:$0 sm:$0xff] }
 0xcd8   :  { %v5320_v61 = vadd.f32 %v5319_v19, %v5318_v49  ;;  %v5337_v19 = vsel %vm798_vm0, %v5275_v36, 0.0  ;;  %v5353_v36 = vmul.f32 %v6125_v40, %v11180_v57  ;;  %v5363_v57 = vmul.f32 %v6125_v40, %v11242_v34 }
 0xcd9   :  { %v5373_v34 = vmul.f32 %v6125_v40, %v11143_v8  ;;  %v5382_v8 = vmul.f32 %v6125_v40, %v11170_v23 }
 0xcda   :  { %v5322_v1 = vadd.f32 %v5321_v32, %v5320_v61  ;;  %v11368_v61 = vpop.permute.xlu1 %5504  ;;  %v11370_v20 = vpop.permute.xlu0 %5506 }
 0xcdc   :  { %v5324_v31 = vadd.f32 %v5323_v60, %v5322_v1 }
 0xcde   :  { %v5326_v4 = vadd.f32 %v5325_v22, %v5324_v31  ;;  %v11372_v60 = vpop.permute.xlu1 %5508 }
 0xce0   :  { %v5328_v48 = vadd.f32 %v5327_v12, %v5326_v4  ;;  %v11374_v4 = vpop.permute.xlu0 %5510 }
 0xce1   :  { %11975 = vst [vmem:[#allocation2_spill] sm:$0xff] %v11374_v4 }
 0xce2   :  { %v5330_v6 = vadd.f32 %v5329_v39, %v5328_v48  ;;  %v11376_v45 = vpop.permute.xlu1 %5512 }
 0xce3   :  { %11976 = vst [vmem:[#allocation3_spill] sm:$0xff] %v11376_v45 }
 0xce4   :  { %v5332_v24 = vadd.f32 %v5331_v46, %v5330_v6  ;;  %v11378_v39 = vpop.permute.xlu0 %5514 }
 0xce5   :  { %11977 = vst [vmem:[#allocation4_spill] sm:$0xff] %v11378_v39 }
 0xce6   :  { %v5334_v26 = vadd.f32 %v5333_v38, %v5332_v24  ;;  %v11380_v6 = vpop.permute.xlu1 %5516  ;;  %v5354_v38 = vmul.f32 %v6125_v40, %v11184_v42  ;;  %v5364_v42 = vmul.f32 %v6125_v40, %v11249_v41  ;;  %v5374_v41 = vmul.f32 %v6125_v40, %v11146_v14 }
 0xce7   :  { %11978 = vst [vmem:[#allocation5_spill] sm:$0xff] %v11380_v6  ;;  %v5383_v14 = vmul.f32 %v6125_v40, %v11173_v2 }
 0xce8   :  { %v5336_v49 = vadd.f32 %v5335_v10, %v5334_v26  ;;  %v11385_v46 = vpop.permute.xlu0 %5518  ;;  %v5355_v26 = vmul.f32 %v6125_v40, %v11188_v0  ;;  %v5356_v10 = vmul.f32 %v6125_v40, %v11192_v62  ;;  %v5365_v0 = vmul.f32 %v6125_v40, %v11256_v30 }
 0xce9   :  { %11979 = vst [vmem:[#allocation6_spill] sm:$0xff] %v11385_v46  ;;  %v5366_v62 = vmul.f32 %v6125_v40, %v11263_v59  ;;  %v5375_v30 = vmul.f32 %v6125_v40, %v11149_v44  ;;  %v5376_v59 = vmul.f32 %v6125_v40, %v11152_v58  ;;  %v5384_v44 = vmul.f32 %v6125_v40, %v11176_v9 }
 0xcea   :  { %v5338_v13 = vadd.f32 %v5337_v19, %v5336_v49  ;;  %v11387_v24 = vpop.permute.xlu1 %5520  ;;  %v5357_v49 = vmul.f32 %v6125_v40, %v11200_v63  ;;  %v5358_v19 = vmul.f32 %v6125_v40, %v11206_v27  ;;  %v5367_v63 = vmul.f32 %v6125_v40, %v11270_v35 }
 0xceb   :  { %11980 = vst [vmem:[#allocation7_spill] sm:$0xff] %v11387_v24  ;;  %v5368_v27 = vmul.f32 %v6125_v40, %v11277_v54  ;;  %v5377_v54 = vmul.f32 %v6125_v40, %v11155_v28 }
 0xcec   :  { %v5339_v32 = vrot.slane %v5338_v13, 4 }
 0xcee   :  { %v5340_v1 = vadd.f32 %v5339_v32, %v5338_v13  ;;  %v5359_v13 = vmul.f32 %v6125_v40, %v11214_v33  ;;  %v5360_v32 = vmul.f32 %v6125_v40, %v11221_v16  ;;  %v5369_v33 = vmul.f32 %v6125_v40, %v11284_v47  ;;  %v11415_v35 = vpop.permute.xlu1 %5524 }
 0xcef   :  { %v5370_v16 = vmul.f32 %v6125_v40, %v11291_v29  ;;  %11982 = vst [vmem:[#allocation9_spill] sm:$0xff] %v11415_v35  ;;  %v5378_v47 = vmul.f32 %v6125_v40, %v11158_v11  ;;  %v5379_v29 = vmul.f32 %v6125_v40, %v11161_v56 }
 0xcf0   :  { %v5341_v31 = vrot.slane %v5340_v1, 2 }
 0xcf2   :  { %v5342_v51 = vadd.f32 %v5341_v31, %v5340_v1  ;;  %v5361_v1 = vmul.f32 %v6125_v40, %v11228_v17  ;;  %v5362_v31 = vmul.f32 %v6125_v40, %v11235_v18  ;;  %v5371_v17 = vmul.f32 %v6125_v40, %v11298_v5  ;;  %v11427_v45 = vpop.permute.xlu1 %5528 }
 0xcf3   :  { %v5372_v18 = vmul.f32 %v6125_v40, %v11305_v52  ;;  %v5380_v5 = vmul.f32 %v6125_v40, %v11164_v55  ;;  %11984 = vst [vmem:[#allocation11_spill] sm:$0xff] %v11427_v45 }
 0xcf4   :  { %v5343_v22 = vrot.slane %v5342_v51, 1 }
 0xcf6   :  { %v5344_v12 = vadd.f32 %v5343_v22, %v5342_v51  ;;  %v11409_v51 = vpop.permute.xlu0 %5522  ;;  %v5381_v22 = vmul.f32 %v6125_v40, %v11167_v25 }
 0xcf7   :  { %11981 = vst [vmem:[#allocation8_spill] sm:$0xff] %v11409_v51 }
 0xcf8   :  { %v5345_v48 = vmul.f32 0.00390625, %v5344_v12 }
 0xcfa   :  { %v5385_v37 = vadd.f32 1e-05, %v5345_v48  ;;  %v11425_v6 = vpop.permute.xlu0 %5526 }
 0xcfb   :  { %11983 = vst [vmem:[#allocation10_spill] sm:$0xff] %v11425_v6 }
 0xcfc   :  { %7373 = vrsqrt.f32 %v5385_v37 }
 0xd09   :  { %v7374_v52 = vpop.eup %7373 }
 0xd0a   :  { %v5387_v58 = vmul.f32 %v7374_v52, %v5353_v36  ;;  %v5388_v12 = vmul.f32 %v7374_v52, %v5354_v38  ;;  %v5389_v48 = vmul.f32 %v7374_v52, %v5355_v26  ;;  %v5390_v37 = vmul.f32 %v7374_v52, %v5356_v10 }
 0xd0b   :  { %v5391_v28 = vmul.f32 %v7374_v52, %v5357_v49  ;;  %v5392_v35 = vmul.f32 %v7374_v52, %v5358_v19  ;;  %v5393_v11 = vmul.f32 %v7374_v52, %v5359_v13  ;;  %v5394_v51 = vmul.f32 %v7374_v52, %v5360_v32 }
 0xd0c   :  { %v5395_v56 = vmul.f32 %v7374_v52, %v5361_v1  ;;  %v5396_v24 = vmul.f32 %v7374_v52, %v5362_v31  ;;  %v5397_v55 = vmul.f32 %v7374_v52, %v5363_v57  ;;  %v5398_v46 = vmul.f32 %v7374_v52, %v5364_v42 }
 0xd0d   :  { %v5399_v25 = vmul.f32 %v7374_v52, %v5365_v0  ;;  %v5400_v23 = vmul.f32 %v7374_v52, %v5366_v62  ;;  %v5401_v39 = vmul.f32 %v7374_v52, %v5367_v63  ;;  %v5402_v2 = vmul.f32 %v7374_v52, %v5368_v27  ;;  %v11429_v63 = vpop.permute.xlu0 %5530  ;;  %v11431_v27 = vpop.permute.xlu1 %5532 }
 0xd0e   :  { %v5403_v9 = vmul.f32 %v7374_v52, %v5369_v33  ;;  %v5404_v40 = vmul.f32 %v7374_v52, %v5370_v16  ;;  %v5405_v36 = vmul.f32 %v7374_v52, %v5371_v17  ;;  %v5406_v38 = vmul.f32 %v7374_v52, %v5372_v18  ;;  %11985 = vst [vmem:[#allocation12_spill] sm:$0xff] %v11429_v63  ;;  %v6126_v17 = vld [vmem:[%s11674_s16] ss:$0 sm:$0xff] }
 0xd0f   :  { %v5407_v26 = vmul.f32 %v7374_v52, %v5373_v34  ;;  %v5408_v10 = vmul.f32 %v7374_v52, %v5374_v41  ;;  %v5409_v49 = vmul.f32 %v7374_v52, %v5375_v30  ;;  %v5410_v19 = vmul.f32 %v7374_v52, %v5376_v59  ;;  %11986 = vst [vmem:[#allocation13_spill] sm:$0xff] %v11431_v27 }
 0xd10   :  { %v5411_v13 = vmul.f32 %v7374_v52, %v5377_v54  ;;  %v5412_v32 = vmul.f32 %v7374_v52, %v5378_v47  ;;  %v5413_v1 = vmul.f32 %v7374_v52, %v5379_v29  ;;  %v5414_v31 = vmul.f32 %v7374_v52, %v5380_v5 }
 0xd11   :  { %v5415_v57 = vmul.f32 %v7374_v52, %v5381_v22  ;;  %v5416_v42 = vmul.f32 %v7374_v52, %v5382_v8  ;;  %v5417_v0 = vmul.f32 %v7374_v52, %v5383_v14  ;;  %v5418_v62 = vmul.f32 %v7374_v52, %v5384_v44  ;;  %v11433_v33 = vpop.permute.xlu0 %5534  ;;  %v11435_v16 = vpop.permute.xlu1 %5536 }
 0xd12   :  { %11987 = vst [vmem:[#allocation14_spill] sm:$0xff] %v11433_v33  ;;  %11988 = vst [vmem:[#allocation39_spill] sm:$0xff] %v11435_v16  ;;  %v5426_v18 = vadd.f32 %v6126_v17, %v5387_v58  ;;  %v5427_v34 = vadd.f32 %v6126_v17, %v5388_v12  ;;  %v5428_v41 = vadd.f32 %v6126_v17, %v5389_v48 }
 0xd13   :  { %v5429_v30 = vadd.f32 %v6126_v17, %v5390_v37  ;;  %v5430_v54 = vadd.f32 %v6126_v17, %v5391_v28  ;;  %v5431_v47 = vadd.f32 %v6126_v17, %v5392_v35  ;;  %v5432_v29 = vadd.f32 %v6126_v17, %v5393_v11 }
 0xd14   :  { %v5433_v5 = vadd.f32 %v6126_v17, %v5394_v51  ;;  %v5434_v22 = vadd.f32 %v6126_v17, %v5395_v56  ;;  %v5435_v8 = vadd.f32 %v6126_v17, %v5396_v24  ;;  %v5436_v14 = vadd.f32 %v6126_v17, %v5397_v55 }
 0xd15   :  { %v11440_v59 = vpop.permute.xlu0 %5538  ;;  %v5541_v52 = vpop.permute.xlu1 %5540  ;;  %v5437_v44 = vadd.f32 %v6126_v17, %v5398_v46  ;;  %v5438_v16 = vadd.f32 %v6126_v17, %v5399_v25  ;;  %v5439_v33 = vadd.f32 %v6126_v17, %v5400_v23  ;;  %v5440_v27 = vadd.f32 %v6126_v17, %v5401_v39 }
 0xd16   :  { %11989 = vst [vmem:[#allocation36_spill] sm:$0xff] %v11440_v59  ;;  %v5441_v63 = vadd.f32 %v6126_v17, %v5402_v2  ;;  %v5442_v45 = vadd.f32 %v6126_v17, %v5403_v9  ;;  %v5443_v58 = vadd.f32 %v6126_v17, %v5404_v40  ;;  %v5444_v12 = vadd.f32 %v6126_v17, %v5405_v36 }
 0xd17   :  { %v5445_v48 = vadd.f32 %v6126_v17, %v5406_v38  ;;  %v5446_v37 = vadd.f32 %v6126_v17, %v5407_v26  ;;  %v5447_v6 = vadd.f32 %v6126_v17, %v5408_v10  ;;  %v5448_v59 = vadd.f32 %v6126_v17, %v5409_v49 }
 0xd18   :  { %v5449_v28 = vadd.f32 %v6126_v17, %v5410_v19  ;;  %v5450_v35 = vadd.f32 %v6126_v17, %v5411_v13  ;;  %v5451_v11 = vadd.f32 %v6126_v17, %v5412_v32  ;;  %v5452_v51 = vadd.f32 %v6126_v17, %v5413_v1  ;;  %v11990_v13 = vld [vmem:[#allocation2_spill] sm:$0xff]  ;;  %v11991_v32 = vld [vmem:[#allocation3_spill] sm:$0xff]  ;;  %v11992_v1 = vld [vmem:[#allocation4_spill] sm:$0xff] }
 0xd19   :  { %v5453_v4 = vadd.f32 %v6126_v17, %v5414_v31  ;;  %v5543_v56 = vpop.permute.xlu0 %5542  ;;  %v5454_v24 = vadd.f32 %v6126_v17, %v5415_v57  ;;  %v5455_v55 = vadd.f32 %v6126_v17, %v5416_v42  ;;  %v5456_v46 = vadd.f32 %v6126_v17, %v5417_v0  ;;  %v5545_v23 = vpop.permute.xlu1 %5544 }
 0xd1a   :  { %v5457_v25 = vadd.f32 %v6126_v17, %v5418_v62  ;;  %v5586_v39 = vadd.f32 %v11328_v15, %v5426_v18  ;;  %v5587_v2 = vadd.f32 %v11333_v7, %v5427_v34  ;;  %v5588_v9 = vadd.f32 %v11341_v43, %v5428_v41  ;;  %v11997_v17 = vld [vmem:[#allocation9_spill] sm:$0xff] }
 0xd1b   :  { %v5589_v40 = vadd.f32 %v11346_v50, %v5429_v30  ;;  %v5590_v36 = vadd.f32 %v11354_v3, %v5430_v54  ;;  %v5591_v38 = vadd.f32 %v11359_v53, %v5431_v47  ;;  %v5592_v26 = vadd.f32 %v11365_v21, %v5432_v29  ;;  %v11993_v50 = vld [vmem:[#allocation5_spill] sm:$0xff]  ;;  %v11994_v3 = vld [vmem:[#allocation6_spill] sm:$0xff]  ;;  %v11995_v21 = vld [vmem:[#allocation7_spill] sm:$0xff] }
 0xd1c   :  { %v5593_v10 = vadd.f32 %v11368_v61, %v5433_v5  ;;  %v5594_v49 = vadd.f32 %v11370_v20, %v5434_v22  ;;  %v5595_v19 = vadd.f32 %v11372_v60, %v5435_v8  ;;  %v5596_v15 = vadd.f32 %v11990_v13, %v5436_v14  ;;  %v11996_v61 = vld [vmem:[#allocation8_spill] sm:$0xff]  ;;  %v12002_v29 = vld [vmem:[#allocation14_spill] sm:$0xff]  ;;  %v12003_v8 = vld [vmem:[#allocation39_spill] sm:$0xff] }
 0xd1d   :  { %v5597_v7 = vadd.f32 %v11991_v32, %v5437_v44  ;;  %v11455_v43 = vadd.f32 %v11992_v1, %v5438_v16  ;;  %v11458_v31 = vadd.f32 %v11993_v50, %v5439_v33  ;;  %v11461_v53 = vadd.f32 %v11994_v3, %v5440_v27  ;;  %v5547_v62 = vpop.permute.xlu0 %5546  ;;  %v11998_v16 = vld [vmem:[#allocation10_spill] sm:$0xff]  ;;  %v11999_v33 = vld [vmem:[#allocation11_spill] sm:$0xff]  ;;  %v5549_v30 = vpop.permute.xlu1 %5548  ;;  %v12004_v44 = vld [vmem:[#allocation36_spill] sm:$0xff] }
 0xd1e   :  { %v11464_v57 = vadd.f32 %v11995_v21, %v5441_v63  ;;  %v11467_v20 = vadd.f32 %v11996_v61, %v5442_v45  ;;  %v5618_v60 = vmax.f32 %v5586_v39, 0.0  ;;  %v5619_v42 = vmax.f32 %v5587_v2, 0.0  ;;  %v12000_v63 = vld [vmem:[#allocation12_spill] sm:$0xff]  ;;  %v12001_v45 = vld [vmem:[#allocation13_spill] sm:$0xff] }
 0xd1f   :  { %v5620_v0 = vmax.f32 %v5588_v9, 0.0  ;;  %v11470_v18 = vadd.f32 %v11997_v17, %v5443_v58  ;;  %v11473_v34 = vadd.f32 %v11998_v16, %v5444_v12  ;;  %v11476_v41 = vadd.f32 %v11999_v33, %v5445_v48 }
 0xd20   :  { %v5621_v27 = vmax.f32 %v5589_v40, 0.0  ;;  %v11479_v54 = vadd.f32 %v12000_v63, %v5446_v37  ;;  %v11482_v47 = vadd.f32 %v12001_v45, %v5447_v6  ;;  %v11485_v5 = vadd.f32 %v12002_v29, %v5448_v59 }
 0xd21   :  { %v5622_v22 = vmax.f32 %v5590_v36, 0.0  ;;  %v11488_v14 = vadd.f32 %v12003_v8, %v5449_v28  ;;  %v11491_v58 = vadd.f32 %v12004_v44, %v5450_v35  ;;  %v5623_v12 = vmax.f32 %v5591_v38, 0.0  ;;  %v5551_v1 = vpop.permute.xlu0 %5550  ;;  %v5553_v50 = vpop.permute.xlu1 %5552 }
 0xd22   :  { %v5624_v48 = vmax.f32 %v5592_v26, 0.0  ;;  %v11493_v39 = vadd.f32 %v5541_v52, %v5451_v11  ;;  %v5650_v2 = vsub.f32 0.0, %v5618_v60  ;;  %v5651_v37 = vsub.f32 0.0, %v5619_v42 }
 0xd23   :  { %v5652_v9 = vsub.f32 0.0, %v5620_v0  ;;  %v11495_v40 = vadd.f32 %v5543_v56, %v5452_v51  ;;  %v11497_v6 = vadd.f32 %v5545_v23, %v5453_v4  ;;  %v5625_v59 = vmax.f32 %v5593_v10, 0.0 }
 0xd24   :  { %v5653_v13 = vsub.f32 0.0, %v5621_v27  ;;  %v11499_v36 = vadd.f32 %v5547_v62, %v5454_v24  ;;  %v11501_v28 = vadd.f32 %v5549_v30, %v5455_v55  ;;  %v5626_v32 = vmax.f32 %v5594_v49, 0.0 }
 0xd25   :  { %v5654_v35 = vsub.f32 0.0, %v5622_v22  ;;  %v5627_v38 = vmax.f32 %v5595_v19, 0.0  ;;  %v5628_v26 = vmax.f32 %v5596_v15, 0.0  ;;  %v5655_v52 = vsub.f32 0.0, %v5623_v12 }
 0xd26   :  { %v5656_v11 = vsub.f32 0.0, %v5624_v48  ;;  %v11503_v3 = vadd.f32 %v5551_v1, %v5456_v46  ;;  %v5682_v51 = vmul.f32 1.442695, %v5650_v2  ;;  %v5684_v56 = vmul.f32 1.442695, %v5651_v37 }
 0xd27   :  { %v5686_v4 = vmul.f32 1.442695, %v5652_v9  ;;  %v11505_v23 = vadd.f32 %v5553_v50, %v5457_v25  ;;  %v5629_v10 = vmax.f32 %v5597_v7, 0.0  ;;  %v5657_v24 = vsub.f32 0.0, %v5625_v59 }
 0xd28   :  { %v5688_v21 = vmul.f32 1.442695, %v5653_v13  ;;  %v5630_v55 = vmax.f32 %v11455_v43, 0.0  ;;  %v5658_v49 = vsub.f32 0.0, %v5626_v32  ;;  %7375 = vpow2.f32 %v5682_v51 }
 0xd29   :  { %v5690_v61 = vmul.f32 1.442695, %v5654_v35  ;;  %v5631_v19 = vmax.f32 %v11458_v31, 0.0  ;;  %v5659_v15 = vsub.f32 0.0, %v5627_v38  ;;  %7377 = vpow2.f32 %v5684_v56 }
 0xd2a   :  { %v5692_v60 = vmul.f32 1.442695, %v5655_v52  ;;  %v5632_v46 = vmax.f32 %v11461_v53, 0.0  ;;  %v5660_v42 = vsub.f32 0.0, %v5628_v26  ;;  %7379 = vpow2.f32 %v5686_v4 }
 0xd2b   :  { %v5694_v0 = vmul.f32 1.442695, %v5656_v11  ;;  %v5633_v25 = vmax.f32 %v11464_v57, 0.0  ;;  %v5661_v7 = vsub.f32 0.0, %v5629_v10  ;;  %7381 = vpow2.f32 %v5688_v21 }
 0xd2c   :  { %v5696_v62 = vmul.f32 1.442695, %v5657_v24  ;;  %v5634_v43 = vmax.f32 %v11467_v20, 0.0  ;;  %v5662_v17 = vsub.f32 0.0, %v5630_v55  ;;  %7383 = vpow2.f32 %v5690_v61 }
 0xd2d   :  { %v5698_v16 = vmul.f32 1.442695, %v5658_v49  ;;  %v5635_v31 = vmax.f32 %v11470_v18, 0.0  ;;  %v5663_v33 = vsub.f32 0.0, %v5631_v19  ;;  %7385 = vpow2.f32 %v5692_v60 }
 0xd2e   :  { %v5700_v27 = vmul.f32 1.442695, %v5659_v15  ;;  %v5636_v53 = vmax.f32 %v11473_v34, 0.0  ;;  %v5664_v30 = vsub.f32 0.0, %v5632_v46  ;;  %7387 = vpow2.f32 %v5694_v0 }
 0xd2f   :  { %v5702_v63 = vmul.f32 1.442695, %v5660_v42  ;;  %v5637_v57 = vmax.f32 %v11476_v41, 0.0  ;;  %v5665_v45 = vsub.f32 0.0, %v5633_v25  ;;  %7389 = vpow2.f32 %v5696_v62 }
 0xd30   :  { %v5704_v29 = vmul.f32 1.442695, %v5661_v7  ;;  %v5638_v20 = vmax.f32 %v11479_v54, 0.0  ;;  %v5666_v22 = vsub.f32 0.0, %v5634_v43  ;;  %7391 = vpow2.f32 %v5698_v16 }
 0xd31   :  { %v5706_v8 = vmul.f32 1.442695, %v5662_v17  ;;  %v5639_v18 = vmax.f32 %v11482_v47, 0.0  ;;  %v5667_v44 = vsub.f32 0.0, %v5635_v31  ;;  %7393 = vpow2.f32 %v5700_v27 }
 0xd32   :  { %v5708_v12 = vmul.f32 1.442695, %v5663_v33  ;;  %v5640_v34 = vmax.f32 %v11485_v5, 0.0  ;;  %v5668_v48 = vsub.f32 0.0, %v5636_v53  ;;  %7395 = vpow2.f32 %v5702_v63 }
 0xd33   :  { %v5710_v2 = vmul.f32 1.442695, %v5664_v30  ;;  %v5641_v41 = vmax.f32 %v11488_v14, 0.0  ;;  %v5669_v37 = vsub.f32 0.0, %v5637_v57  ;;  %7397 = vpow2.f32 %v5704_v29 }
 0xd34   :  { %v5712_v9 = vmul.f32 1.442695, %v5665_v45  ;;  %v5642_v54 = vmax.f32 %v11491_v58, 0.0  ;;  %v5670_v59 = vsub.f32 0.0, %v5638_v20  ;;  %7399 = vpow2.f32 %v5706_v8 }
 0xd35   :  { %v5714_v13 = vmul.f32 1.442695, %v5666_v22  ;;  %v11520_v32 = vpop.eup %7375  ;;  %v5643_v47 = vmax.f32 %v11493_v39, 0.0  ;;  %v5671_v35 = vsub.f32 0.0, %v5639_v18  ;;  %7401 = vpow2.f32 %v5708_v12 }
 0xd36   :  { %v5716_v5 = vmul.f32 1.442695, %v5667_v44  ;;  %v7378_v1 = vpop.eup %7377  ;;  %v5644_v38 = vmax.f32 %v11495_v40, 0.0  ;;  %v5672_v26 = vsub.f32 0.0, %v5640_v34  ;;  %7403 = vpow2.f32 %v5710_v2 }
 0xd37   :  { %v5718_v14 = vmul.f32 1.442695, %v5668_v48  ;;  %v7380_v52 = vpop.eup %7379  ;;  %v5645_v11 = vmax.f32 %v11497_v6, 0.0  ;;  %v5673_v58 = vsub.f32 0.0, %v5641_v41  ;;  %7405 = vpow2.f32 %v5712_v9 }
 0xd38   :  { %v5720_v50 = vmul.f32 1.442695, %v5669_v37  ;;  %v7382_v51 = vpop.eup %7381  ;;  %v5646_v56 = vmax.f32 %v11499_v36, 0.0  ;;  %v5674_v4 = vsub.f32 0.0, %v5642_v54  ;;  %7407 = vpow2.f32 %v5714_v13 }
 0xd39   :  { %v5722_v39 = vmul.f32 1.442695, %v5670_v59  ;;  %v7384_v10 = vpop.eup %7383  ;;  %v5647_v24 = vmax.f32 %v11501_v28, 0.0  ;;  %v5675_v21 = vsub.f32 0.0, %v5643_v47  ;;  %7409 = vpow2.f32 %v5716_v5 }
 0xd3a   :  { %v5724_v40 = vmul.f32 1.442695, %v5671_v35  ;;  %v7386_v55 = vpop.eup %7385  ;;  %v5648_v49 = vmax.f32 %v11503_v3, 0.0  ;;  %v5676_v61 = vsub.f32 0.0, %v5644_v38  ;;  %7411 = vpow2.f32 %v5718_v14 }
 0xd3b   :  { %v5726_v6 = vmul.f32 1.442695, %v5672_v26  ;;  %v7388_v19 = vpop.eup %7387  ;;  %v5649_v15 = vmax.f32 %v11505_v23, 0.0  ;;  %v5677_v60 = vsub.f32 0.0, %v5645_v11  ;;  %7413 = vpow2.f32 %v5720_v50 }
 0xd3c   :  { %v5728_v36 = vmul.f32 1.442695, %v5673_v58  ;;  %v7390_v46 = vpop.eup %7389  ;;  %v5678_v42 = vsub.f32 0.0, %v5646_v56  ;;  %7415 = vpow2.f32 %v5722_v39  ;;  %v5730_v0 = vmul.f32 1.442695, %v5674_v4 }
 0xd3d   :  { %v7392_v28 = vpop.eup %7391  ;;  %v5679_v25 = vsub.f32 0.0, %v5647_v24  ;;  %7417 = vpow2.f32 %v5724_v40  ;;  %v5732_v7 = vmul.f32 1.442695, %v5675_v21  ;;  %v5680_v43 = vsub.f32 0.0, %v5648_v49 }
 0xd3e   :  { %v7394_v62 = vpop.eup %7393  ;;  %7419 = vpow2.f32 %v5726_v6  ;;  %v5734_v3 = vmul.f32 1.442695, %v5676_v61  ;;  %v5681_v16 = vsub.f32 0.0, %v5649_v15  ;;  %v5736_v31 = vmul.f32 1.442695, %v5677_v60 }
 0xd3f   :  { %v7396_v17 = vpop.eup %7395  ;;  %7421 = vpow2.f32 %v5728_v36  ;;  %v5738_v33 = vmul.f32 1.442695, %v5678_v42  ;;  %v5740_v53 = vmul.f32 1.442695, %v5679_v25  ;;  %v5742_v63 = vmul.f32 1.442695, %v5680_v43 }
 0xd40   :  { %v7398_v23 = vpop.eup %7397  ;;  %7423 = vpow2.f32 %v5730_v0  ;;  %v5744_v45 = vmul.f32 1.442695, %v5681_v16  ;;  %v5746_v20 = vadd.f32 1.0, %v11520_v32  ;;  %v5747_v8 = vadd.f32 1.0, %v7378_v1 }
 0xd41   :  { %v7400_v27 = vpop.eup %7399  ;;  %7425 = vpow2.f32 %v5732_v7  ;;  %v5748_v44 = vadd.f32 1.0, %v7380_v52  ;;  %v5749_v34 = vadd.f32 1.0, %v7382_v51  ;;  %v5750_v2 = vadd.f32 1.0, %v7384_v10 }
 0xd42   :  { %v7402_v30 = vpop.eup %7401  ;;  %7427 = vpow2.f32 %v5734_v3  ;;  %v5751_v37 = vadd.f32 1.0, %v7386_v55  ;;  %v5752_v54 = vadd.f32 1.0, %v7388_v19  ;;  %v5753_v13 = vadd.f32 1.0, %v7390_v46 }
 0xd43   :  { %v7404_v57 = vpop.eup %7403  ;;  %7429 = vpow2.f32 %v5736_v31  ;;  %v5754_v47 = vadd.f32 1.0, %v7392_v28  ;;  %v5755_v5 = vadd.f32 1.0, %v7394_v62  ;;  %v5756_v38 = vadd.f32 1.0, %v7396_v17 }
 0xd44   :  { %v7406_v29 = vpop.eup %7405  ;;  %7431 = vpow2.f32 %v5738_v33  ;;  %v5757_v14 = vadd.f32 1.0, %v7398_v23  ;;  %v5758_v11 = vadd.f32 1.0, %v7400_v27  ;;  %v5759_v50 = vadd.f32 1.0, %v7402_v30 }
 0xd45   :  { %v7408_v22 = vpop.eup %7407  ;;  %7433 = vpow2.f32 %v5740_v53  ;;  %v5760_v56 = vadd.f32 1.0, %v7404_v57  ;;  %v5761_v39 = vadd.f32 1.0, %v7406_v29 }
 0xd46   :  { %v7410_v18 = vpop.eup %7409  ;;  %7435 = vpow2.f32 %v5742_v63  ;;  %v5762_v24 = vadd.f32 1.0, %v7408_v22 }
 0xd47   :  { %v7412_v12 = vpop.eup %7411  ;;  %7437 = vpow2.f32 %v5744_v45  ;;  %v5763_v40 = vadd.f32 1.0, %v7410_v18 }
 0xd48   :  { %v7414_v48 = vpop.eup %7413  ;;  %7439 = vrcp.f32 %v5746_v20  ;;  %v5764_v49 = vadd.f32 1.0, %v7412_v12 }
 0xd49   :  { %v7416_v41 = vpop.eup %7415  ;;  %7441 = vrcp.f32 %v5747_v8  ;;  %v5765_v6 = vadd.f32 1.0, %v7414_v48 }
 0xd4a   :  { %v7418_v9 = vpop.eup %7417  ;;  %7443 = vrcp.f32 %v5748_v44  ;;  %v5766_v15 = vadd.f32 1.0, %v7416_v41 }
 0xd4b   :  { %v7420_v59 = vpop.eup %7419  ;;  %7445 = vrcp.f32 %v5749_v34  ;;  %v5767_v36 = vadd.f32 1.0, %v7418_v9 }
 0xd4c   :  { %v7422_v32 = vpop.eup %7421  ;;  %7447 = vrcp.f32 %v5750_v2  ;;  %v5768_v42 = vadd.f32 1.0, %v7420_v59 }
 0xd4d   :  { %v7424_v35 = vpop.eup %7423  ;;  %7449 = vrcp.f32 %v5751_v37  ;;  %v5769_v28 = vadd.f32 1.0, %v7422_v32 }
 0xd4e   :  { %v7426_v1 = vpop.eup %7425  ;;  %7451 = vrcp.f32 %v5752_v54  ;;  %v5770_v7 = vadd.f32 1.0, %v7424_v35 }
 0xd4f   :  { %v7428_v26 = vpop.eup %7427  ;;  %7453 = vrcp.f32 %v5753_v13  ;;  %v5771_v43 = vadd.f32 1.0, %v7426_v1 }
 0xd50   :  { %v7430_v52 = vpop.eup %7429  ;;  %7455 = vrcp.f32 %v5754_v47  ;;  %v5772_v17 = vadd.f32 1.0, %v7428_v26 }
 0xd51   :  { %v7432_v58 = vpop.eup %7431  ;;  %7457 = vrcp.f32 %v5755_v5  ;;  %v5773_v31 = vadd.f32 1.0, %v7430_v52 }
 0xd52   :  { %v7434_v51 = vpop.eup %7433  ;;  %7459 = vrcp.f32 %v5756_v38  ;;  %v5774_v33 = vadd.f32 1.0, %v7432_v58 }
 0xd53   :  { %v7436_v4 = vpop.eup %7435  ;;  %7461 = vrcp.f32 %v5757_v14  ;;  %v5775_v53 = vadd.f32 1.0, %v7434_v51 }
 0xd54   :  { %v7438_v10 = vpop.eup %7437  ;;  %7463 = vrcp.f32 %v5758_v11  ;;  %v5776_v63 = vadd.f32 1.0, %v7436_v4 }
 0xd55   :  { %v7440_v21 = vpop.eup %7439  ;;  %7465 = vrcp.f32 %v5759_v50  ;;  %v5777_v45 = vadd.f32 1.0, %v7438_v10 }
 0xd56   :  { %v7442_v55 = vpop.eup %7441  ;;  %7467 = vrcp.f32 %v5760_v56  ;;  %5842 = vst.msk [vmem:[%s11675_s17] sm:$0xff] %vm798_vm0, %v7440_v21 }
 0xd57   :  { %v7444_v61 = vpop.eup %7443  ;;  %7469 = vrcp.f32 %v5761_v39  ;;  %5843 = vst.msk [vmem:[%s11675_s17 + $0x8] sm:$0xff] %vm798_vm0, %v7442_v55 }
 0xd58   :  { %v7446_v19 = vpop.eup %7445  ;;  %7471 = vrcp.f32 %v5762_v24  ;;  %5844 = vst.msk [vmem:[%s11675_s17 + $0x10] sm:$0xff] %vm798_vm0, %v7444_v61 }
 0xd59   :  { %v7448_v60 = vpop.eup %7447  ;;  %7473 = vrcp.f32 %v5763_v40  ;;  %5845 = vst.msk [vmem:[%s11675_s17 + $0x18] sm:$0xff] %vm798_vm0, %v7446_v19 }
 0xd5a   :  { %v7450_v46 = vpop.eup %7449  ;;  %7475 = vrcp.f32 %v5764_v49  ;;  %5846 = vst.msk [vmem:[%s11675_s17 + $0x20] sm:$0xff] %vm798_vm0, %v7448_v60 }
 0xd5b   :  { %v7452_v0 = vpop.eup %7451  ;;  %7477 = vrcp.f32 %v5765_v6  ;;  %5847 = vst.msk [vmem:[%s11675_s17 + $0x28] sm:$0xff] %vm798_vm0, %v7450_v46 }
 0xd5c   :  { %v7454_v25 = vpop.eup %7453  ;;  %7479 = vrcp.f32 %v5766_v15  ;;  %5848 = vst.msk [vmem:[%s11675_s17 + $0x30] sm:$0xff] %vm798_vm0, %v7452_v0 }
 0xd5d   :  { %v7456_v62 = vpop.eup %7455  ;;  %7481 = vrcp.f32 %v5767_v36  ;;  %5849 = vst.msk [vmem:[%s11675_s17 + $0x38] sm:$0xff] %vm798_vm0, %v7454_v25 }
 0xd5e   :  { %v7458_v3 = vpop.eup %7457  ;;  %7483 = vrcp.f32 %v5768_v42  ;;  %5850 = vst.msk [vmem:[%s11675_s17 + $0x40] sm:$0xff] %vm798_vm0, %v7456_v62 }
 0xd5f   :  { %v7460_v16 = vpop.eup %7459  ;;  %7485 = vrcp.f32 %v5769_v28  ;;  %5851 = vst.msk [vmem:[%s11675_s17 + $0x48] sm:$0xff] %vm798_vm0, %v7458_v3 }
 0xd60   :  { %v7462_v23 = vpop.eup %7461  ;;  %7487 = vrcp.f32 %v5770_v7  ;;  %5852 = vst.msk [vmem:[%s11675_s17 + $0x50] sm:$0xff] %vm798_vm0, %v7460_v16 }
 0xd61   :  { %v7464_v27 = vpop.eup %7463  ;;  %7489 = vrcp.f32 %v5771_v43  ;;  %5853 = vst.msk [vmem:[%s11675_s17 + $0x58] sm:$0xff] %vm798_vm0, %v7462_v23 }
 0xd62   :  { %v7466_v30 = vpop.eup %7465  ;;  %7491 = vrcp.f32 %v5772_v17  ;;  %5854 = vst.msk [vmem:[%s11675_s17 + $0x60] sm:$0xff] %vm798_vm0, %v7464_v27 }
 0xd63   :  { %v7468_v57 = vpop.eup %7467  ;;  %7493 = vrcp.f32 %v5773_v31  ;;  %5855 = vst.msk [vmem:[%s11675_s17 + $0x68] sm:$0xff] %vm798_vm0, %v7466_v30 }
 0xd64   :  { %v7470_v29 = vpop.eup %7469  ;;  %7495 = vrcp.f32 %v5774_v33  ;;  %5856 = vst.msk [vmem:[%s11675_s17 + $0x70] sm:$0xff] %vm798_vm0, %v7468_v57 }
 0xd65   :  { %v7472_v20 = vpop.eup %7471  ;;  %7497 = vrcp.f32 %v5775_v53  ;;  %5857 = vst.msk [vmem:[%s11675_s17 + $0x78] sm:$0xff] %vm798_vm0, %v7470_v29 }
 0xd66   :  { %v7474_v22 = vpop.eup %7473  ;;  %7499 = vrcp.f32 %v5776_v63  ;;  %5858 = vst.msk [vmem:[%s11675_s17 + $0x80] sm:$0xff] %vm798_vm0, %v7472_v20 }
 0xd67   :  { %v7476_v8 = vpop.eup %7475  ;;  %7501 = vrcp.f32 %v5777_v45  ;;  %5859 = vst.msk [vmem:[%s11675_s17 + $0x88] sm:$0xff] %vm798_vm0, %v7474_v22 }
 0xd68   :  { %v7478_v18 = vpop.eup %7477  ;;  %5860 = vst.msk [vmem:[%s11675_s17 + $0x90] sm:$0xff] %vm798_vm0, %v7476_v8 }
 0xd69   :  { %v7480_v44 = vpop.eup %7479  ;;  %5861 = vst.msk [vmem:[%s11675_s17 + $0x98] sm:$0xff] %vm798_vm0, %v7478_v18 }
 0xd6a   :  { %v7482_v12 = vpop.eup %7481  ;;  %5862 = vst.msk [vmem:[%s11675_s17 + $0xa0] sm:$0xff] %vm798_vm0, %v7480_v44 }
 0xd6b   :  { %v7484_v34 = vpop.eup %7483  ;;  %5863 = vst.msk [vmem:[%s11675_s17 + $0xa8] sm:$0xff] %vm798_vm0, %v7482_v12 }
 0xd6c   :  { %v7486_v48 = vpop.eup %7485  ;;  %5864 = vst.msk [vmem:[%s11675_s17 + $0xb0] sm:$0xff] %vm798_vm0, %v7484_v34 }
 0xd6d   :  { %v7488_v2 = vpop.eup %7487  ;;  %5865 = vst.msk [vmem:[%s11675_s17 + $0xb8] sm:$0xff] %vm798_vm0, %v7486_v48 }
 0xd6e   :  { %v7490_v41 = vpop.eup %7489  ;;  %5866 = vst.msk [vmem:[%s11675_s17 + $0xc0] sm:$0xff] %vm798_vm0, %v7488_v2 }
 0xd6f   :  { %v7492_v37 = vpop.eup %7491  ;;  %5867 = vst.msk [vmem:[%s11675_s17 + $0xc8] sm:$0xff] %vm798_vm0, %v7490_v41 }
 0xd70   :  { %v7494_v9 = vpop.eup %7493  ;;  %5868 = vst.msk [vmem:[%s11675_s17 + $0xd0] sm:$0xff] %vm798_vm0, %v7492_v37 }
 0xd71   :  { %v7496_v54 = vpop.eup %7495  ;;  %5869 = vst.msk [vmem:[%s11675_s17 + $0xd8] sm:$0xff] %vm798_vm0, %v7494_v9 }
 0xd72   :  { %v7498_v59 = vpop.eup %7497  ;;  %5870 = vst.msk [vmem:[%s11675_s17 + $0xe0] sm:$0xff] %vm798_vm0, %v7496_v54 }
 0xd73   :  { %v7500_v13 = vpop.eup %7499  ;;  %5871 = vst.msk [vmem:[%s11675_s17 + $0xe8] sm:$0xff] %vm798_vm0, %v7498_v59 }
 0xd74   :  { %v7502_v32 = vpop.eup %7501  ;;  %5872 = vst.msk [vmem:[%s11675_s17 + $0xf0] sm:$0xff] %vm798_vm0, %v7500_v13 }
 0xd75   :  { %5873 = vst.msk [vmem:[%s11675_s17 + $0xf8] sm:$0xff] %vm798_vm0, %v7502_v32 }

</bundles_post_ra>
